<compile_context>
chip_gen: v7x
topology: tpu7x:2x2x1
jax: 0.10.0
libtpu: 0.0.40
codegen_flags: <defaults>
</compile_context>

<pallas_src>
import jax
import jax.numpy as jnp
from jax import lax
from jax.experimental import pallas as pl
from jax.experimental.pallas import tpu as pltpu


def _make_conv2d_kernel(B, Cin, Cout, H, W, KH, KW):
    Ho, Wo = H - KH + 1, W - KW + 1
    HoWo = Ho * Wo

    def kernel(w_ref, b_ref, x_ref, o_ref):
        # w_ref: (Cout*Cin*KH*KW,) f32 SMEM  (scalar-prefetch, flat OIHW)
        # b_ref: (Cout,)           f32 SMEM  (scalar-prefetch)
        # x_ref: (B, Cin, H, W)    f32 VMEM  (B images, native NCHW)
        # o_ref: (B, Cout*Ho*Wo)   f32 VMEM  (lane-dense, contiguous-NCHW)
        x = x_ref[...]                                    # one small full-block load

        # One (B, Ho, Wo) f32 accumulator per output channel (lives in vregs).
        accs = [jnp.zeros((B, Ho, Wo), jnp.float32) for _ in range(Cout)]

        # Direct conv: Cin*KH*KW = 27 shifted windows, each reused for all
        # Cout channels with an SMEM scalar weight (VPU broadcast-MAC).
        for ci in range(Cin):
            plane = x[:, ci]                              # (B, H, W)
            for kh in range(KH):
                for kw in range(KW):
                    patch = plane[:, kh:kh + Ho, kw:kw + Wo]   # (B, Ho, Wo)
                    for co in range(Cout):
                        widx = ((co * Cin + ci) * KH + kh) * KW + kw
                        accs[co] = accs[co] + patch * w_ref[widx]

        # Bias + flatten each channel to a 196-lane row; store into the
        # contiguous (B, Cout*Ho*Wo) output block (lane-dense writeback).
        for co in range(Cout):
            row = (accs[co] + b_ref[co]).reshape(B, HoWo)
            o_ref[:, pl.ds(co * HoWo, HoWo)] = row.astype(o_ref.dtype)

    return kernel


def conv2d_pallas(x_nchw, w_oihw, bias, *, stride=1, padding=0):
    """Matches torch.nn.Conv2d(3, 6, 3, stride=1, padding=0).forward semantics."""
    assert stride == 1 and padding == 0
    N, Cin, H, W = x_nchw.shape
    Cout, Cin_w, KH, KW = w_oihw.shape
    assert Cin == Cin_w
    Ho, Wo = H - KH + 1, W - KW + 1
    HoWo = Ho * Wo

    # Batch B images per grid step (whole batch for small N); amortizes the
    # ~0.35 us per-step overhead that dominated the one-image-per-step version.
    B = N if N <= 8 else 8
    assert N % B == 0, "batch must divide evenly into image blocks"
    grid = (N // B,)

    # BlockSpec (8,128) rule: last-two dims of each block equal full extents
    # (or are multiples of 8 on the sublane axis) — keep it that way.
    assert B == N or B % 8 == 0

    # Flatten params for SMEM scalar access (contiguous reshape: no relayout).
    w_flat = w_oihw.reshape(-1).astype(jnp.float32)       # (Cout*Cin*KH*KW,)
    b_flat = bias.astype(jnp.float32)                     # (Cout,)

    kernel = _make_conv2d_kernel(B, Cin, Cout, H, W, KH, KW)

    out_flat = pl.pallas_call(
        kernel,
        out_shape=jax.ShapeDtypeStruct((N, Cout * HoWo), jnp.float32),
        grid_spec=pltpu.PrefetchScalarGridSpec(
            # Weights + biases prefetched to SMEM once, before the grid.
            num_scalar_prefetch=2,
            grid=grid,
            in_specs=[
                # B whole images per grid step, native NCHW block.
                pl.BlockSpec((B, Cin, H, W), lambda i, w, b: (i, 0, 0, 0)),
            ],
            # Lane-dense output block: minor dim = Cout*Ho*Wo = 1176.
            out_specs=pl.BlockSpec((B, Cout * HoWo), lambda i, w, b: (i, 0)),
        ),
        compiler_params=pltpu.CompilerParams(
            dimension_semantics=("parallel",)),   # only matters on v7x, grid>1
    )(w_flat, b_flat, x_nchw)

    # Free contiguous reshape back to the module's NCHW output contract.
    return out_flat.reshape(N, Cout, Ho, Wo)


if __name__ == "__main__":
    key = jax.random.PRNGKey(0)
    k_x, k_w, k_b = jax.random.split(key, 3)

    # Small deterministic example consistent with Conv2d(3, 6, 3).
    N, Cin, H, W = 2, 3, 16, 16
    Cout, KH, KW = 6, 3, 3

    x = jax.random.normal(k_x, (N, Cin, H, W), dtype=jnp.float32)
    fan_in = Cin * KH * KW
    bound = 1.0 / (fan_in ** 0.5)
    weight = jax.random.uniform(k_w, (Cout, Cin, KH, KW),
                                minval=-bound, maxval=bound, dtype=jnp.float32)
    bias = jax.random.uniform(k_b, (Cout,),
                              minval=-bound, maxval=bound, dtype=jnp.float32)

    out = conv2d_pallas(x, weight, bias)
    out = jax.block_until_ready(out)

    # Sanity check against XLA's native convolution (same NCHW / OIHW semantics).
    ref = lax.conv_general_dilated(
        x, weight, window_strides=(1, 1), padding="VALID",
        dimension_numbers=("NCHW", "OIHW", "NCHW"),
    ) + bias.reshape(1, Cout, 1, 1)
    assert out.shape == (N, Cout, H - 2, W - 2)
    assert jnp.allclose(out, ref, atol=1e-4, rtol=1e-4)

    print("KERNEL_OK")
</pallas_src>

<mosaic_0001>
module attributes {stable_mosaic.version = 11 : i64} {
  func.func @kernel(%arg0: i32, %arg1: memref<162xf32, #tpu.memory_space<smem>>, %arg2: memref<6xf32, #tpu.memory_space<smem>>, %arg3: memref<2x3x16x16xf32, #tpu.memory_space<vmem>>, %arg4: memref<2x1176xf32, #tpu.memory_space<vmem>>) attributes {dimension_semantics = [#tpu.dimension_semantics<parallel>], iteration_bounds = array<i64: 1>, scalar_prefetch = 2 : i64, scratch_operands = 0 : i64, tpu.core_type = #tpu.core_type<tc>, window_params = [{transform_indices = @transform_0, window_bounds = array<i64: 2, 3, 16, 16>}, {transform_indices = @transform_1, window_bounds = array<i64: 2, 1176>}]} {
    %c0 = arith.constant 0 : index
    %c0_0 = arith.constant 0 : index
    %c0_1 = arith.constant 0 : index
    %c0_2 = arith.constant 0 : index
    %0 = vector.load %arg3[%c0, %c0_0, %c0_1, %c0_2] : memref<2x3x16x16xf32, #tpu.memory_space<vmem>>, vector<2x3x16x16xf32>
    %cst = arith.constant 0.000000e+00 : f32
    %1 = vector.broadcast %cst : f32 to vector<2x14x14xf32>
    %cst_3 = arith.constant 0.000000e+00 : f32
    %2 = vector.broadcast %cst_3 : f32 to vector<2x14x14xf32>
    %cst_4 = arith.constant 0.000000e+00 : f32
    %3 = vector.broadcast %cst_4 : f32 to vector<2x14x14xf32>
    %cst_5 = arith.constant 0.000000e+00 : f32
    %4 = vector.broadcast %cst_5 : f32 to vector<2x14x14xf32>
    %cst_6 = arith.constant 0.000000e+00 : f32
    %5 = vector.broadcast %cst_6 : f32 to vector<2x14x14xf32>
    %cst_7 = arith.constant 0.000000e+00 : f32
    %6 = vector.broadcast %cst_7 : f32 to vector<2x14x14xf32>
    %7 = vector.extract_strided_slice %0 {offsets = [0, 0, 0, 0], sizes = [2, 1, 16, 16], strides = [1, 1, 1, 1]} : vector<2x3x16x16xf32> to vector<2x1x16x16xf32>
    %8 = vector.shape_cast %7 : vector<2x1x16x16xf32> to vector<2x16x16xf32>
    %9 = vector.extract_strided_slice %8 {offsets = [0, 0, 0], sizes = [2, 14, 14], strides = [1, 1, 1]} : vector<2x16x16xf32> to vector<2x14x14xf32>
    %c0_8 = arith.constant 0 : index
    %10 = memref.load %arg1[%c0_8] : memref<162xf32, #tpu.memory_space<smem>>
    %11 = vector.broadcast %10 : f32 to vector<2x14x14xf32>
    %12 = arith.mulf %9, %11 : vector<2x14x14xf32>
    %13 = arith.addf %1, %12 : vector<2x14x14xf32>
    %c27 = arith.constant 27 : index
    %14 = memref.load %arg1[%c27] : memref<162xf32, #tpu.memory_space<smem>>
    %15 = vector.broadcast %14 : f32 to vector<2x14x14xf32>
    %16 = arith.mulf %9, %15 : vector<2x14x14xf32>
    %17 = arith.addf %2, %16 : vector<2x14x14xf32>
    %c54 = arith.constant 54 : index
    %18 = memref.load %arg1[%c54] : memref<162xf32, #tpu.memory_space<smem>>
    %19 = vector.broadcast %18 : f32 to vector<2x14x14xf32>
    %20 = arith.mulf %9, %19 : vector<2x14x14xf32>
    %21 = arith.addf %3, %20 : vector<2x14x14xf32>
    %c81 = arith.constant 81 : index
    %22 = memref.load %arg1[%c81] : memref<162xf32, #tpu.memory_space<smem>>
    %23 = vector.broadcast %22 : f32 to vector<2x14x14xf32>
    %24 = arith.mulf %9, %23 : vector<2x14x14xf32>
    %25 = arith.addf %4, %24 : vector<2x14x14xf32>
    %c108 = arith.constant 108 : index
    %26 = memref.load %arg1[%c108] : memref<162xf32, #tpu.memory_space<smem>>
    %27 = vector.broadcast %26 : f32 to vector<2x14x14xf32>
    %28 = arith.mulf %9, %27 : vector<2x14x14xf32>
    %29 = arith.addf %5, %28 : vector<2x14x14xf32>
    %c135 = arith.constant 135 : index
    %30 = memref.load %arg1[%c135] : memref<162xf32, #tpu.memory_space<smem>>
    %31 = vector.broadcast %30 : f32 to vector<2x14x14xf32>
    %32 = arith.mulf %9, %31 : vector<2x14x14xf32>
    %33 = arith.addf %6, %32 : vector<2x14x14xf32>
    %34 = vector.extract_strided_slice %8 {offsets = [0, 0, 1], sizes = [2, 14, 14], strides = [1, 1, 1]} : vector<2x16x16xf32> to vector<2x14x14xf32>
    %c1 = arith.constant 1 : index
    %35 = memref.load %arg1[%c1] : memref<162xf32, #tpu.memory_space<smem>>
    %36 = vector.broadcast %35 : f32 to vector<2x14x14xf32>
    %37 = arith.mulf %34, %36 : vector<2x14x14xf32>
    %38 = arith.addf %13, %37 : vector<2x14x14xf32>
    %c28 = arith.constant 28 : index
    %39 = memref.load %arg1[%c28] : memref<162xf32, #tpu.memory_space<smem>>
    %40 = vector.broadcast %39 : f32 to vector<2x14x14xf32>
    %41 = arith.mulf %34, %40 : vector<2x14x14xf32>
    %42 = arith.addf %17, %41 : vector<2x14x14xf32>
    %c55 = arith.constant 55 : index
    %43 = memref.load %arg1[%c55] : memref<162xf32, #tpu.memory_space<smem>>
    %44 = vector.broadcast %43 : f32 to vector<2x14x14xf32>
    %45 = arith.mulf %34, %44 : vector<2x14x14xf32>
    %46 = arith.addf %21, %45 : vector<2x14x14xf32>
    %c82 = arith.constant 82 : index
    %47 = memref.load %arg1[%c82] : memref<162xf32, #tpu.memory_space<smem>>
    %48 = vector.broadcast %47 : f32 to vector<2x14x14xf32>
    %49 = arith.mulf %34, %48 : vector<2x14x14xf32>
    %50 = arith.addf %25, %49 : vector<2x14x14xf32>
    %c109 = arith.constant 109 : index
    %51 = memref.load %arg1[%c109] : memref<162xf32, #tpu.memory_space<smem>>
    %52 = vector.broadcast %51 : f32 to vector<2x14x14xf32>
    %53 = arith.mulf %34, %52 : vector<2x14x14xf32>
    %54 = arith.addf %29, %53 : vector<2x14x14xf32>
    %c136 = arith.constant 136 : index
    %55 = memref.load %arg1[%c136] : memref<162xf32, #tpu.memory_space<smem>>
    %56 = vector.broadcast %55 : f32 to vector<2x14x14xf32>
    %57 = arith.mulf %34, %56 : vector<2x14x14xf32>
    %58 = arith.addf %33, %57 : vector<2x14x14xf32>
    %59 = vector.extract_strided_slice %8 {offsets = [0, 0, 2], sizes = [2, 14, 14], strides = [1, 1, 1]} : vector<2x16x16xf32> to vector<2x14x14xf32>
    %c2 = arith.constant 2 : index
    %60 = memref.load %arg1[%c2] : memref<162xf32, #tpu.memory_space<smem>>
    %61 = vector.broadcast %60 : f32 to vector<2x14x14xf32>
    %62 = arith.mulf %59, %61 : vector<2x14x14xf32>
    %63 = arith.addf %38, %62 : vector<2x14x14xf32>
    %c29 = arith.constant 29 : index
    %64 = memref.load %arg1[%c29] : memref<162xf32, #tpu.memory_space<smem>>
    %65 = vector.broadcast %64 : f32 to vector<2x14x14xf32>
    %66 = arith.mulf %59, %65 : vector<2x14x14xf32>
    %67 = arith.addf %42, %66 : vector<2x14x14xf32>
    %c56 = arith.constant 56 : index
    %68 = memref.load %arg1[%c56] : memref<162xf32, #tpu.memory_space<smem>>
    %69 = vector.broadcast %68 : f32 to vector<2x14x14xf32>
    %70 = arith.mulf %59, %69 : vector<2x14x14xf32>
    %71 = arith.addf %46, %70 : vector<2x14x14xf32>
    %c83 = arith.constant 83 : index
    %72 = memref.load %arg1[%c83] : memref<162xf32, #tpu.memory_space<smem>>
    %73 = vector.broadcast %72 : f32 to vector<2x14x14xf32>
    %74 = arith.mulf %59, %73 : vector<2x14x14xf32>
    %75 = arith.addf %50, %74 : vector<2x14x14xf32>
    %c110 = arith.constant 110 : index
    %76 = memref.load %arg1[%c110] : memref<162xf32, #tpu.memory_space<smem>>
    %77 = vector.broadcast %76 : f32 to vector<2x14x14xf32>
    %78 = arith.mulf %59, %77 : vector<2x14x14xf32>
    %79 = arith.addf %54, %78 : vector<2x14x14xf32>
    %c137 = arith.constant 137 : index
    %80 = memref.load %arg1[%c137] : memref<162xf32, #tpu.memory_space<smem>>
    %81 = vector.broadcast %80 : f32 to vector<2x14x14xf32>
    %82 = arith.mulf %59, %81 : vector<2x14x14xf32>
    %83 = arith.addf %58, %82 : vector<2x14x14xf32>
    %84 = vector.extract_strided_slice %8 {offsets = [0, 1, 0], sizes = [2, 14, 14], strides = [1, 1, 1]} : vector<2x16x16xf32> to vector<2x14x14xf32>
    %c3 = arith.constant 3 : index
    %85 = memref.load %arg1[%c3] : memref<162xf32, #tpu.memory_space<smem>>
    %86 = vector.broadcast %85 : f32 to vector<2x14x14xf32>
    %87 = arith.mulf %84, %86 : vector<2x14x14xf32>
    %88 = arith.addf %63, %87 : vector<2x14x14xf32>
    %c30 = arith.constant 30 : index
    %89 = memref.load %arg1[%c30] : memref<162xf32, #tpu.memory_space<smem>>
    %90 = vector.broadcast %89 : f32 to vector<2x14x14xf32>
    %91 = arith.mulf %84, %90 : vector<2x14x14xf32>
    %92 = arith.addf %67, %91 : vector<2x14x14xf32>
    %c57 = arith.constant 57 : index
    %93 = memref.load %arg1[%c57] : memref<162xf32, #tpu.memory_space<smem>>
    %94 = vector.broadcast %93 : f32 to vector<2x14x14xf32>
    %95 = arith.mulf %84, %94 : vector<2x14x14xf32>
    %96 = arith.addf %71, %95 : vector<2x14x14xf32>
    %c84 = arith.constant 84 : index
    %97 = memref.load %arg1[%c84] : memref<162xf32, #tpu.memory_space<smem>>
    %98 = vector.broadcast %97 : f32 to vector<2x14x14xf32>
    %99 = arith.mulf %84, %98 : vector<2x14x14xf32>
    %100 = arith.addf %75, %99 : vector<2x14x14xf32>
    %c111 = arith.constant 111 : index
    %101 = memref.load %arg1[%c111] : memref<162xf32, #tpu.memory_space<smem>>
    %102 = vector.broadcast %101 : f32 to vector<2x14x14xf32>
    %103 = arith.mulf %84, %102 : vector<2x14x14xf32>
    %104 = arith.addf %79, %103 : vector<2x14x14xf32>
    %c138 = arith.constant 138 : index
    %105 = memref.load %arg1[%c138] : memref<162xf32, #tpu.memory_space<smem>>
    %106 = vector.broadcast %105 : f32 to vector<2x14x14xf32>
    %107 = arith.mulf %84, %106 : vector<2x14x14xf32>
    %108 = arith.addf %83, %107 : vector<2x14x14xf32>
    %109 = vector.extract_strided_slice %8 {offsets = [0, 1, 1], sizes = [2, 14, 14], strides = [1, 1, 1]} : vector<2x16x16xf32> to vector<2x14x14xf32>
    %c4 = arith.constant 4 : index
    %110 = memref.load %arg1[%c4] : memref<162xf32, #tpu.memory_space<smem>>
    %111 = vector.broadcast %110 : f32 to vector<2x14x14xf32>
    %112 = arith.mulf %109, %111 : vector<2x14x14xf32>
    %113 = arith.addf %88, %112 : vector<2x14x14xf32>
    %c31 = arith.constant 31 : index
    %114 = memref.load %arg1[%c31] : memref<162xf32, #tpu.memory_space<smem>>
    %115 = vector.broadcast %114 : f32 to vector<2x14x14xf32>
    %116 = arith.mulf %109, %115 : vector<2x14x14xf32>
    %117 = arith.addf %92, %116 : vector<2x14x14xf32>
    %c58 = arith.constant 58 : index
    %118 = memref.load %arg1[%c58] : memref<162xf32, #tpu.memory_space<smem>>
    %119 = vector.broadcast %118 : f32 to vector<2x14x14xf32>
    %120 = arith.mulf %109, %119 : vector<2x14x14xf32>
    %121 = arith.addf %96, %120 : vector<2x14x14xf32>
    %c85 = arith.constant 85 : index
    %122 = memref.load %arg1[%c85] : memref<162xf32, #tpu.memory_space<smem>>
    %123 = vector.broadcast %122 : f32 to vector<2x14x14xf32>
    %124 = arith.mulf %109, %123 : vector<2x14x14xf32>
    %125 = arith.addf %100, %124 : vector<2x14x14xf32>
    %c112 = arith.constant 112 : index
    %126 = memref.load %arg1[%c112] : memref<162xf32, #tpu.memory_space<smem>>
    %127 = vector.broadcast %126 : f32 to vector<2x14x14xf32>
    %128 = arith.mulf %109, %127 : vector<2x14x14xf32>
    %129 = arith.addf %104, %128 : vector<2x14x14xf32>
    %c139 = arith.constant 139 : index
    %130 = memref.load %arg1[%c139] : memref<162xf32, #tpu.memory_space<smem>>
    %131 = vector.broadcast %130 : f32 to vector<2x14x14xf32>
    %132 = arith.mulf %109, %131 : vector<2x14x14xf32>
    %133 = arith.addf %108, %132 : vector<2x14x14xf32>
    %134 = vector.extract_strided_slice %8 {offsets = [0, 1, 2], sizes = [2, 14, 14], strides = [1, 1, 1]} : vector<2x16x16xf32> to vector<2x14x14xf32>
    %c5 = arith.constant 5 : index
    %135 = memref.load %arg1[%c5] : memref<162xf32, #tpu.memory_space<smem>>
    %136 = vector.broadcast %135 : f32 to vector<2x14x14xf32>
    %137 = arith.mulf %134, %136 : vector<2x14x14xf32>
    %138 = arith.addf %113, %137 : vector<2x14x14xf32>
    %c32 = arith.constant 32 : index
    %139 = memref.load %arg1[%c32] : memref<162xf32, #tpu.memory_space<smem>>
    %140 = vector.broadcast %139 : f32 to vector<2x14x14xf32>
    %141 = arith.mulf %134, %140 : vector<2x14x14xf32>
    %142 = arith.addf %117, %141 : vector<2x14x14xf32>
    %c59 = arith.constant 59 : index
    %143 = memref.load %arg1[%c59] : memref<162xf32, #tpu.memory_space<smem>>
    %144 = vector.broadcast %143 : f32 to vector<2x14x14xf32>
    %145 = arith.mulf %134, %144 : vector<2x14x14xf32>
    %146 = arith.addf %121, %145 : vector<2x14x14xf32>
    %c86 = arith.constant 86 : index
    %147 = memref.load %arg1[%c86] : memref<162xf32, #tpu.memory_space<smem>>
    %148 = vector.broadcast %147 : f32 to vector<2x14x14xf32>
    %149 = arith.mulf %134, %148 : vector<2x14x14xf32>
    %150 = arith.addf %125, %149 : vector<2x14x14xf32>
    %c113 = arith.constant 113 : index
    %151 = memref.load %arg1[%c113] : memref<162xf32, #tpu.memory_space<smem>>
    %152 = vector.broadcast %151 : f32 to vector<2x14x14xf32>
    %153 = arith.mulf %134, %152 : vector<2x14x14xf32>
    %154 = arith.addf %129, %153 : vector<2x14x14xf32>
    %c140 = arith.constant 140 : index
    %155 = memref.load %arg1[%c140] : memref<162xf32, #tpu.memory_space<smem>>
    %156 = vector.broadcast %155 : f32 to vector<2x14x14xf32>
    %157 = arith.mulf %134, %156 : vector<2x14x14xf32>
    %158 = arith.addf %133, %157 : vector<2x14x14xf32>
    %159 = vector.extract_strided_slice %8 {offsets = [0, 2, 0], sizes = [2, 14, 14], strides = [1, 1, 1]} : vector<2x16x16xf32> to vector<2x14x14xf32>
    %c6 = arith.constant 6 : index
    %160 = memref.load %arg1[%c6] : memref<162xf32, #tpu.memory_space<smem>>
    %161 = vector.broadcast %160 : f32 to vector<2x14x14xf32>
    %162 = arith.mulf %159, %161 : vector<2x14x14xf32>
    %163 = arith.addf %138, %162 : vector<2x14x14xf32>
    %c33 = arith.constant 33 : index
    %164 = memref.load %arg1[%c33] : memref<162xf32, #tpu.memory_space<smem>>
    %165 = vector.broadcast %164 : f32 to vector<2x14x14xf32>
    %166 = arith.mulf %159, %165 : vector<2x14x14xf32>
    %167 = arith.addf %142, %166 : vector<2x14x14xf32>
    %c60 = arith.constant 60 : index
    %168 = memref.load %arg1[%c60] : memref<162xf32, #tpu.memory_space<smem>>
    %169 = vector.broadcast %168 : f32 to vector<2x14x14xf32>
    %170 = arith.mulf %159, %169 : vector<2x14x14xf32>
    %171 = arith.addf %146, %170 : vector<2x14x14xf32>
    %c87 = arith.constant 87 : index
    %172 = memref.load %arg1[%c87] : memref<162xf32, #tpu.memory_space<smem>>
    %173 = vector.broadcast %172 : f32 to vector<2x14x14xf32>
    %174 = arith.mulf %159, %173 : vector<2x14x14xf32>
    %175 = arith.addf %150, %174 : vector<2x14x14xf32>
    %c114 = arith.constant 114 : index
    %176 = memref.load %arg1[%c114] : memref<162xf32, #tpu.memory_space<smem>>
    %177 = vector.broadcast %176 : f32 to vector<2x14x14xf32>
    %178 = arith.mulf %159, %177 : vector<2x14x14xf32>
    %179 = arith.addf %154, %178 : vector<2x14x14xf32>
    %c141 = arith.constant 141 : index
    %180 = memref.load %arg1[%c141] : memref<162xf32, #tpu.memory_space<smem>>
    %181 = vector.broadcast %180 : f32 to vector<2x14x14xf32>
    %182 = arith.mulf %159, %181 : vector<2x14x14xf32>
    %183 = arith.addf %158, %182 : vector<2x14x14xf32>
    %184 = vector.extract_strided_slice %8 {offsets = [0, 2, 1], sizes = [2, 14, 14], strides = [1, 1, 1]} : vector<2x16x16xf32> to vector<2x14x14xf32>
    %c7 = arith.constant 7 : index
    %185 = memref.load %arg1[%c7] : memref<162xf32, #tpu.memory_space<smem>>
    %186 = vector.broadcast %185 : f32 to vector<2x14x14xf32>
    %187 = arith.mulf %184, %186 : vector<2x14x14xf32>
    %188 = arith.addf %163, %187 : vector<2x14x14xf32>
    %c34 = arith.constant 34 : index
    %189 = memref.load %arg1[%c34] : memref<162xf32, #tpu.memory_space<smem>>
    %190 = vector.broadcast %189 : f32 to vector<2x14x14xf32>
    %191 = arith.mulf %184, %190 : vector<2x14x14xf32>
    %192 = arith.addf %167, %191 : vector<2x14x14xf32>
    %c61 = arith.constant 61 : index
    %193 = memref.load %arg1[%c61] : memref<162xf32, #tpu.memory_space<smem>>
    %194 = vector.broadcast %193 : f32 to vector<2x14x14xf32>
    %195 = arith.mulf %184, %194 : vector<2x14x14xf32>
    %196 = arith.addf %171, %195 : vector<2x14x14xf32>
    %c88 = arith.constant 88 : index
    %197 = memref.load %arg1[%c88] : memref<162xf32, #tpu.memory_space<smem>>
    %198 = vector.broadcast %197 : f32 to vector<2x14x14xf32>
    %199 = arith.mulf %184, %198 : vector<2x14x14xf32>
    %200 = arith.addf %175, %199 : vector<2x14x14xf32>
    %c115 = arith.constant 115 : index
    %201 = memref.load %arg1[%c115] : memref<162xf32, #tpu.memory_space<smem>>
    %202 = vector.broadcast %201 : f32 to vector<2x14x14xf32>
    %203 = arith.mulf %184, %202 : vector<2x14x14xf32>
    %204 = arith.addf %179, %203 : vector<2x14x14xf32>
    %c142 = arith.constant 142 : index
    %205 = memref.load %arg1[%c142] : memref<162xf32, #tpu.memory_space<smem>>
    %206 = vector.broadcast %205 : f32 to vector<2x14x14xf32>
    %207 = arith.mulf %184, %206 : vector<2x14x14xf32>
    %208 = arith.addf %183, %207 : vector<2x14x14xf32>
    %209 = vector.extract_strided_slice %8 {offsets = [0, 2, 2], sizes = [2, 14, 14], strides = [1, 1, 1]} : vector<2x16x16xf32> to vector<2x14x14xf32>
    %c8 = arith.constant 8 : index
    %210 = memref.load %arg1[%c8] : memref<162xf32, #tpu.memory_space<smem>>
    %211 = vector.broadcast %210 : f32 to vector<2x14x14xf32>
    %212 = arith.mulf %209, %211 : vector<2x14x14xf32>
    %213 = arith.addf %188, %212 : vector<2x14x14xf32>
    %c35 = arith.constant 35 : index
    %214 = memref.load %arg1[%c35] : memref<162xf32, #tpu.memory_space<smem>>
    %215 = vector.broadcast %214 : f32 to vector<2x14x14xf32>
    %216 = arith.mulf %209, %215 : vector<2x14x14xf32>
    %217 = arith.addf %192, %216 : vector<2x14x14xf32>
    %c62 = arith.constant 62 : index
    %218 = memref.load %arg1[%c62] : memref<162xf32, #tpu.memory_space<smem>>
    %219 = vector.broadcast %218 : f32 to vector<2x14x14xf32>
    %220 = arith.mulf %209, %219 : vector<2x14x14xf32>
    %221 = arith.addf %196, %220 : vector<2x14x14xf32>
    %c89 = arith.constant 89 : index
    %222 = memref.load %arg1[%c89] : memref<162xf32, #tpu.memory_space<smem>>
    %223 = vector.broadcast %222 : f32 to vector<2x14x14xf32>
    %224 = arith.mulf %209, %223 : vector<2x14x14xf32>
    %225 = arith.addf %200, %224 : vector<2x14x14xf32>
    %c116 = arith.constant 116 : index
    %226 = memref.load %arg1[%c116] : memref<162xf32, #tpu.memory_space<smem>>
    %227 = vector.broadcast %226 : f32 to vector<2x14x14xf32>
    %228 = arith.mulf %209, %227 : vector<2x14x14xf32>
    %229 = arith.addf %204, %228 : vector<2x14x14xf32>
    %c143 = arith.constant 143 : index
    %230 = memref.load %arg1[%c143] : memref<162xf32, #tpu.memory_space<smem>>
    %231 = vector.broadcast %230 : f32 to vector<2x14x14xf32>
    %232 = arith.mulf %209, %231 : vector<2x14x14xf32>
    %233 = arith.addf %208, %232 : vector<2x14x14xf32>
    %234 = vector.extract_strided_slice %0 {offsets = [0, 1, 0, 0], sizes = [2, 1, 16, 16], strides = [1, 1, 1, 1]} : vector<2x3x16x16xf32> to vector<2x1x16x16xf32>
    %235 = vector.shape_cast %234 : vector<2x1x16x16xf32> to vector<2x16x16xf32>
    %236 = vector.extract_strided_slice %235 {offsets = [0, 0, 0], sizes = [2, 14, 14], strides = [1, 1, 1]} : vector<2x16x16xf32> to vector<2x14x14xf32>
    %c9 = arith.constant 9 : index
    %237 = memref.load %arg1[%c9] : memref<162xf32, #tpu.memory_space<smem>>
    %238 = vector.broadcast %237 : f32 to vector<2x14x14xf32>
    %239 = arith.mulf %236, %238 : vector<2x14x14xf32>
    %240 = arith.addf %213, %239 : vector<2x14x14xf32>
    %c36 = arith.constant 36 : index
    %241 = memref.load %arg1[%c36] : memref<162xf32, #tpu.memory_space<smem>>
    %242 = vector.broadcast %241 : f32 to vector<2x14x14xf32>
    %243 = arith.mulf %236, %242 : vector<2x14x14xf32>
    %244 = arith.addf %217, %243 : vector<2x14x14xf32>
    %c63 = arith.constant 63 : index
    %245 = memref.load %arg1[%c63] : memref<162xf32, #tpu.memory_space<smem>>
    %246 = vector.broadcast %245 : f32 to vector<2x14x14xf32>
    %247 = arith.mulf %236, %246 : vector<2x14x14xf32>
    %248 = arith.addf %221, %247 : vector<2x14x14xf32>
    %c90 = arith.constant 90 : index
    %249 = memref.load %arg1[%c90] : memref<162xf32, #tpu.memory_space<smem>>
    %250 = vector.broadcast %249 : f32 to vector<2x14x14xf32>
    %251 = arith.mulf %236, %250 : vector<2x14x14xf32>
    %252 = arith.addf %225, %251 : vector<2x14x14xf32>
    %c117 = arith.constant 117 : index
    %253 = memref.load %arg1[%c117] : memref<162xf32, #tpu.memory_space<smem>>
    %254 = vector.broadcast %253 : f32 to vector<2x14x14xf32>
    %255 = arith.mulf %236, %254 : vector<2x14x14xf32>
    %256 = arith.addf %229, %255 : vector<2x14x14xf32>
    %c144 = arith.constant 144 : index
    %257 = memref.load %arg1[%c144] : memref<162xf32, #tpu.memory_space<smem>>
    %258 = vector.broadcast %257 : f32 to vector<2x14x14xf32>
    %259 = arith.mulf %236, %258 : vector<2x14x14xf32>
    %260 = arith.addf %233, %259 : vector<2x14x14xf32>
    %261 = vector.extract_strided_slice %235 {offsets = [0, 0, 1], sizes = [2, 14, 14], strides = [1, 1, 1]} : vector<2x16x16xf32> to vector<2x14x14xf32>
    %c10 = arith.constant 10 : index
    %262 = memref.load %arg1[%c10] : memref<162xf32, #tpu.memory_space<smem>>
    %263 = vector.broadcast %262 : f32 to vector<2x14x14xf32>
    %264 = arith.mulf %261, %263 : vector<2x14x14xf32>
    %265 = arith.addf %240, %264 : vector<2x14x14xf32>
    %c37 = arith.constant 37 : index
    %266 = memref.load %arg1[%c37] : memref<162xf32, #tpu.memory_space<smem>>
    %267 = vector.broadcast %266 : f32 to vector<2x14x14xf32>
    %268 = arith.mulf %261, %267 : vector<2x14x14xf32>
    %269 = arith.addf %244, %268 : vector<2x14x14xf32>
    %c64 = arith.constant 64 : index
    %270 = memref.load %arg1[%c64] : memref<162xf32, #tpu.memory_space<smem>>
    %271 = vector.broadcast %270 : f32 to vector<2x14x14xf32>
    %272 = arith.mulf %261, %271 : vector<2x14x14xf32>
    %273 = arith.addf %248, %272 : vector<2x14x14xf32>
    %c91 = arith.constant 91 : index
    %274 = memref.load %arg1[%c91] : memref<162xf32, #tpu.memory_space<smem>>
    %275 = vector.broadcast %274 : f32 to vector<2x14x14xf32>
    %276 = arith.mulf %261, %275 : vector<2x14x14xf32>
    %277 = arith.addf %252, %276 : vector<2x14x14xf32>
    %c118 = arith.constant 118 : index
    %278 = memref.load %arg1[%c118] : memref<162xf32, #tpu.memory_space<smem>>
    %279 = vector.broadcast %278 : f32 to vector<2x14x14xf32>
    %280 = arith.mulf %261, %279 : vector<2x14x14xf32>
    %281 = arith.addf %256, %280 : vector<2x14x14xf32>
    %c145 = arith.constant 145 : index
    %282 = memref.load %arg1[%c145] : memref<162xf32, #tpu.memory_space<smem>>
    %283 = vector.broadcast %282 : f32 to vector<2x14x14xf32>
    %284 = arith.mulf %261, %283 : vector<2x14x14xf32>
    %285 = arith.addf %260, %284 : vector<2x14x14xf32>
    %286 = vector.extract_strided_slice %235 {offsets = [0, 0, 2], sizes = [2, 14, 14], strides = [1, 1, 1]} : vector<2x16x16xf32> to vector<2x14x14xf32>
    %c11 = arith.constant 11 : index
    %287 = memref.load %arg1[%c11] : memref<162xf32, #tpu.memory_space<smem>>
    %288 = vector.broadcast %287 : f32 to vector<2x14x14xf32>
    %289 = arith.mulf %286, %288 : vector<2x14x14xf32>
    %290 = arith.addf %265, %289 : vector<2x14x14xf32>
    %c38 = arith.constant 38 : index
    %291 = memref.load %arg1[%c38] : memref<162xf32, #tpu.memory_space<smem>>
    %292 = vector.broadcast %291 : f32 to vector<2x14x14xf32>
    %293 = arith.mulf %286, %292 : vector<2x14x14xf32>
    %294 = arith.addf %269, %293 : vector<2x14x14xf32>
    %c65 = arith.constant 65 : index
    %295 = memref.load %arg1[%c65] : memref<162xf32, #tpu.memory_space<smem>>
    %296 = vector.broadcast %295 : f32 to vector<2x14x14xf32>
    %297 = arith.mulf %286, %296 : vector<2x14x14xf32>
    %298 = arith.addf %273, %297 : vector<2x14x14xf32>
    %c92 = arith.constant 92 : index
    %299 = memref.load %arg1[%c92] : memref<162xf32, #tpu.memory_space<smem>>
    %300 = vector.broadcast %299 : f32 to vector<2x14x14xf32>
    %301 = arith.mulf %286, %300 : vector<2x14x14xf32>
    %302 = arith.addf %277, %301 : vector<2x14x14xf32>
    %c119 = arith.constant 119 : index
    %303 = memref.load %arg1[%c119] : memref<162xf32, #tpu.memory_space<smem>>
    %304 = vector.broadcast %303 : f32 to vector<2x14x14xf32>
    %305 = arith.mulf %286, %304 : vector<2x14x14xf32>
    %306 = arith.addf %281, %305 : vector<2x14x14xf32>
    %c146 = arith.constant 146 : index
    %307 = memref.load %arg1[%c146] : memref<162xf32, #tpu.memory_space<smem>>
    %308 = vector.broadcast %307 : f32 to vector<2x14x14xf32>
    %309 = arith.mulf %286, %308 : vector<2x14x14xf32>
    %310 = arith.addf %285, %309 : vector<2x14x14xf32>
    %311 = vector.extract_strided_slice %235 {offsets = [0, 1, 0], sizes = [2, 14, 14], strides = [1, 1, 1]} : vector<2x16x16xf32> to vector<2x14x14xf32>
    %c12 = arith.constant 12 : index
    %312 = memref.load %arg1[%c12] : memref<162xf32, #tpu.memory_space<smem>>
    %313 = vector.broadcast %312 : f32 to vector<2x14x14xf32>
    %314 = arith.mulf %311, %313 : vector<2x14x14xf32>
    %315 = arith.addf %290, %314 : vector<2x14x14xf32>
    %c39 = arith.constant 39 : index
    %316 = memref.load %arg1[%c39] : memref<162xf32, #tpu.memory_space<smem>>
    %317 = vector.broadcast %316 : f32 to vector<2x14x14xf32>
    %318 = arith.mulf %311, %317 : vector<2x14x14xf32>
    %319 = arith.addf %294, %318 : vector<2x14x14xf32>
    %c66 = arith.constant 66 : index
    %320 = memref.load %arg1[%c66] : memref<162xf32, #tpu.memory_space<smem>>
    %321 = vector.broadcast %320 : f32 to vector<2x14x14xf32>
    %322 = arith.mulf %311, %321 : vector<2x14x14xf32>
    %323 = arith.addf %298, %322 : vector<2x14x14xf32>
    %c93 = arith.constant 93 : index
    %324 = memref.load %arg1[%c93] : memref<162xf32, #tpu.memory_space<smem>>
    %325 = vector.broadcast %324 : f32 to vector<2x14x14xf32>
    %326 = arith.mulf %311, %325 : vector<2x14x14xf32>
    %327 = arith.addf %302, %326 : vector<2x14x14xf32>
    %c120 = arith.constant 120 : index
    %328 = memref.load %arg1[%c120] : memref<162xf32, #tpu.memory_space<smem>>
    %329 = vector.broadcast %328 : f32 to vector<2x14x14xf32>
    %330 = arith.mulf %311, %329 : vector<2x14x14xf32>
    %331 = arith.addf %306, %330 : vector<2x14x14xf32>
    %c147 = arith.constant 147 : index
    %332 = memref.load %arg1[%c147] : memref<162xf32, #tpu.memory_space<smem>>
    %333 = vector.broadcast %332 : f32 to vector<2x14x14xf32>
    %334 = arith.mulf %311, %333 : vector<2x14x14xf32>
    %335 = arith.addf %310, %334 : vector<2x14x14xf32>
    %336 = vector.extract_strided_slice %235 {offsets = [0, 1, 1], sizes = [2, 14, 14], strides = [1, 1, 1]} : vector<2x16x16xf32> to vector<2x14x14xf32>
    %c13 = arith.constant 13 : index
    %337 = memref.load %arg1[%c13] : memref<162xf32, #tpu.memory_space<smem>>
    %338 = vector.broadcast %337 : f32 to vector<2x14x14xf32>
    %339 = arith.mulf %336, %338 : vector<2x14x14xf32>
    %340 = arith.addf %315, %339 : vector<2x14x14xf32>
    %c40 = arith.constant 40 : index
    %341 = memref.load %arg1[%c40] : memref<162xf32, #tpu.memory_space<smem>>
    %342 = vector.broadcast %341 : f32 to vector<2x14x14xf32>
    %343 = arith.mulf %336, %342 : vector<2x14x14xf32>
    %344 = arith.addf %319, %343 : vector<2x14x14xf32>
    %c67 = arith.constant 67 : index
    %345 = memref.load %arg1[%c67] : memref<162xf32, #tpu.memory_space<smem>>
    %346 = vector.broadcast %345 : f32 to vector<2x14x14xf32>
    %347 = arith.mulf %336, %346 : vector<2x14x14xf32>
    %348 = arith.addf %323, %347 : vector<2x14x14xf32>
    %c94 = arith.constant 94 : index
    %349 = memref.load %arg1[%c94] : memref<162xf32, #tpu.memory_space<smem>>
    %350 = vector.broadcast %349 : f32 to vector<2x14x14xf32>
    %351 = arith.mulf %336, %350 : vector<2x14x14xf32>
    %352 = arith.addf %327, %351 : vector<2x14x14xf32>
    %c121 = arith.constant 121 : index
    %353 = memref.load %arg1[%c121] : memref<162xf32, #tpu.memory_space<smem>>
    %354 = vector.broadcast %353 : f32 to vector<2x14x14xf32>
    %355 = arith.mulf %336, %354 : vector<2x14x14xf32>
    %356 = arith.addf %331, %355 : vector<2x14x14xf32>
    %c148 = arith.constant 148 : index
    %357 = memref.load %arg1[%c148] : memref<162xf32, #tpu.memory_space<smem>>
    %358 = vector.broadcast %357 : f32 to vector<2x14x14xf32>
    %359 = arith.mulf %336, %358 : vector<2x14x14xf32>
    %360 = arith.addf %335, %359 : vector<2x14x14xf32>
    %361 = vector.extract_strided_slice %235 {offsets = [0, 1, 2], sizes = [2, 14, 14], strides = [1, 1, 1]} : vector<2x16x16xf32> to vector<2x14x14xf32>
    %c14 = arith.constant 14 : index
    %362 = memref.load %arg1[%c14] : memref<162xf32, #tpu.memory_space<smem>>
    %363 = vector.broadcast %362 : f32 to vector<2x14x14xf32>
    %364 = arith.mulf %361, %363 : vector<2x14x14xf32>
    %365 = arith.addf %340, %364 : vector<2x14x14xf32>
    %c41 = arith.constant 41 : index
    %366 = memref.load %arg1[%c41] : memref<162xf32, #tpu.memory_space<smem>>
    %367 = vector.broadcast %366 : f32 to vector<2x14x14xf32>
    %368 = arith.mulf %361, %367 : vector<2x14x14xf32>
    %369 = arith.addf %344, %368 : vector<2x14x14xf32>
    %c68 = arith.constant 68 : index
    %370 = memref.load %arg1[%c68] : memref<162xf32, #tpu.memory_space<smem>>
    %371 = vector.broadcast %370 : f32 to vector<2x14x14xf32>
    %372 = arith.mulf %361, %371 : vector<2x14x14xf32>
    %373 = arith.addf %348, %372 : vector<2x14x14xf32>
    %c95 = arith.constant 95 : index
    %374 = memref.load %arg1[%c95] : memref<162xf32, #tpu.memory_space<smem>>
    %375 = vector.broadcast %374 : f32 to vector<2x14x14xf32>
    %376 = arith.mulf %361, %375 : vector<2x14x14xf32>
    %377 = arith.addf %352, %376 : vector<2x14x14xf32>
    %c122 = arith.constant 122 : index
    %378 = memref.load %arg1[%c122] : memref<162xf32, #tpu.memory_space<smem>>
    %379 = vector.broadcast %378 : f32 to vector<2x14x14xf32>
    %380 = arith.mulf %361, %379 : vector<2x14x14xf32>
    %381 = arith.addf %356, %380 : vector<2x14x14xf32>
    %c149 = arith.constant 149 : index
    %382 = memref.load %arg1[%c149] : memref<162xf32, #tpu.memory_space<smem>>
    %383 = vector.broadcast %382 : f32 to vector<2x14x14xf32>
    %384 = arith.mulf %361, %383 : vector<2x14x14xf32>
    %385 = arith.addf %360, %384 : vector<2x14x14xf32>
    %386 = vector.extract_strided_slice %235 {offsets = [0, 2, 0], sizes = [2, 14, 14], strides = [1, 1, 1]} : vector<2x16x16xf32> to vector<2x14x14xf32>
    %c15 = arith.constant 15 : index
    %387 = memref.load %arg1[%c15] : memref<162xf32, #tpu.memory_space<smem>>
    %388 = vector.broadcast %387 : f32 to vector<2x14x14xf32>
    %389 = arith.mulf %386, %388 : vector<2x14x14xf32>
    %390 = arith.addf %365, %389 : vector<2x14x14xf32>
    %c42 = arith.constant 42 : index
    %391 = memref.load %arg1[%c42] : memref<162xf32, #tpu.memory_space<smem>>
    %392 = vector.broadcast %391 : f32 to vector<2x14x14xf32>
    %393 = arith.mulf %386, %392 : vector<2x14x14xf32>
    %394 = arith.addf %369, %393 : vector<2x14x14xf32>
    %c69 = arith.constant 69 : index
    %395 = memref.load %arg1[%c69] : memref<162xf32, #tpu.memory_space<smem>>
    %396 = vector.broadcast %395 : f32 to vector<2x14x14xf32>
    %397 = arith.mulf %386, %396 : vector<2x14x14xf32>
    %398 = arith.addf %373, %397 : vector<2x14x14xf32>
    %c96 = arith.constant 96 : index
    %399 = memref.load %arg1[%c96] : memref<162xf32, #tpu.memory_space<smem>>
    %400 = vector.broadcast %399 : f32 to vector<2x14x14xf32>
    %401 = arith.mulf %386, %400 : vector<2x14x14xf32>
    %402 = arith.addf %377, %401 : vector<2x14x14xf32>
    %c123 = arith.constant 123 : index
    %403 = memref.load %arg1[%c123] : memref<162xf32, #tpu.memory_space<smem>>
    %404 = vector.broadcast %403 : f32 to vector<2x14x14xf32>
    %405 = arith.mulf %386, %404 : vector<2x14x14xf32>
    %406 = arith.addf %381, %405 : vector<2x14x14xf32>
    %c150 = arith.constant 150 : index
    %407 = memref.load %arg1[%c150] : memref<162xf32, #tpu.memory_space<smem>>
    %408 = vector.broadcast %407 : f32 to vector<2x14x14xf32>
    %409 = arith.mulf %386, %408 : vector<2x14x14xf32>
    %410 = arith.addf %385, %409 : vector<2x14x14xf32>
    %411 = vector.extract_strided_slice %235 {offsets = [0, 2, 1], sizes = [2, 14, 14], strides = [1, 1, 1]} : vector<2x16x16xf32> to vector<2x14x14xf32>
    %c16 = arith.constant 16 : index
    %412 = memref.load %arg1[%c16] : memref<162xf32, #tpu.memory_space<smem>>
    %413 = vector.broadcast %412 : f32 to vector<2x14x14xf32>
    %414 = arith.mulf %411, %413 : vector<2x14x14xf32>
    %415 = arith.addf %390, %414 : vector<2x14x14xf32>
    %c43 = arith.constant 43 : index
    %416 = memref.load %arg1[%c43] : memref<162xf32, #tpu.memory_space<smem>>
    %417 = vector.broadcast %416 : f32 to vector<2x14x14xf32>
    %418 = arith.mulf %411, %417 : vector<2x14x14xf32>
    %419 = arith.addf %394, %418 : vector<2x14x14xf32>
    %c70 = arith.constant 70 : index
    %420 = memref.load %arg1[%c70] : memref<162xf32, #tpu.memory_space<smem>>
    %421 = vector.broadcast %420 : f32 to vector<2x14x14xf32>
    %422 = arith.mulf %411, %421 : vector<2x14x14xf32>
    %423 = arith.addf %398, %422 : vector<2x14x14xf32>
    %c97 = arith.constant 97 : index
    %424 = memref.load %arg1[%c97] : memref<162xf32, #tpu.memory_space<smem>>
    %425 = vector.broadcast %424 : f32 to vector<2x14x14xf32>
    %426 = arith.mulf %411, %425 : vector<2x14x14xf32>
    %427 = arith.addf %402, %426 : vector<2x14x14xf32>
    %c124 = arith.constant 124 : index
    %428 = memref.load %arg1[%c124] : memref<162xf32, #tpu.memory_space<smem>>
    %429 = vector.broadcast %428 : f32 to vector<2x14x14xf32>
    %430 = arith.mulf %411, %429 : vector<2x14x14xf32>
    %431 = arith.addf %406, %430 : vector<2x14x14xf32>
    %c151 = arith.constant 151 : index
    %432 = memref.load %arg1[%c151] : memref<162xf32, #tpu.memory_space<smem>>
    %433 = vector.broadcast %432 : f32 to vector<2x14x14xf32>
    %434 = arith.mulf %411, %433 : vector<2x14x14xf32>
    %435 = arith.addf %410, %434 : vector<2x14x14xf32>
    %436 = vector.extract_strided_slice %235 {offsets = [0, 2, 2], sizes = [2, 14, 14], strides = [1, 1, 1]} : vector<2x16x16xf32> to vector<2x14x14xf32>
    %c17 = arith.constant 17 : index
    %437 = memref.load %arg1[%c17] : memref<162xf32, #tpu.memory_space<smem>>
    %438 = vector.broadcast %437 : f32 to vector<2x14x14xf32>
    %439 = arith.mulf %436, %438 : vector<2x14x14xf32>
    %440 = arith.addf %415, %439 : vector<2x14x14xf32>
    %c44 = arith.constant 44 : index
    %441 = memref.load %arg1[%c44] : memref<162xf32, #tpu.memory_space<smem>>
    %442 = vector.broadcast %441 : f32 to vector<2x14x14xf32>
    %443 = arith.mulf %436, %442 : vector<2x14x14xf32>
    %444 = arith.addf %419, %443 : vector<2x14x14xf32>
    %c71 = arith.constant 71 : index
    %445 = memref.load %arg1[%c71] : memref<162xf32, #tpu.memory_space<smem>>
    %446 = vector.broadcast %445 : f32 to vector<2x14x14xf32>
    %447 = arith.mulf %436, %446 : vector<2x14x14xf32>
    %448 = arith.addf %423, %447 : vector<2x14x14xf32>
    %c98 = arith.constant 98 : index
    %449 = memref.load %arg1[%c98] : memref<162xf32, #tpu.memory_space<smem>>
    %450 = vector.broadcast %449 : f32 to vector<2x14x14xf32>
    %451 = arith.mulf %436, %450 : vector<2x14x14xf32>
    %452 = arith.addf %427, %451 : vector<2x14x14xf32>
    %c125 = arith.constant 125 : index
    %453 = memref.load %arg1[%c125] : memref<162xf32, #tpu.memory_space<smem>>
    %454 = vector.broadcast %453 : f32 to vector<2x14x14xf32>
    %455 = arith.mulf %436, %454 : vector<2x14x14xf32>
    %456 = arith.addf %431, %455 : vector<2x14x14xf32>
    %c152 = arith.constant 152 : index
    %457 = memref.load %arg1[%c152] : memref<162xf32, #tpu.memory_space<smem>>
    %458 = vector.broadcast %457 : f32 to vector<2x14x14xf32>
    %459 = arith.mulf %436, %458 : vector<2x14x14xf32>
    %460 = arith.addf %435, %459 : vector<2x14x14xf32>
    %461 = vector.extract_strided_slice %0 {offsets = [0, 2, 0, 0], sizes = [2, 1, 16, 16], strides = [1, 1, 1, 1]} : vector<2x3x16x16xf32> to vector<2x1x16x16xf32>
    %462 = vector.shape_cast %461 : vector<2x1x16x16xf32> to vector<2x16x16xf32>
    %463 = vector.extract_strided_slice %462 {offsets = [0, 0, 0], sizes = [2, 14, 14], strides = [1, 1, 1]} : vector<2x16x16xf32> to vector<2x14x14xf32>
    %c18 = arith.constant 18 : index
    %464 = memref.load %arg1[%c18] : memref<162xf32, #tpu.memory_space<smem>>
    %465 = vector.broadcast %464 : f32 to vector<2x14x14xf32>
    %466 = arith.mulf %463, %465 : vector<2x14x14xf32>
    %467 = arith.addf %440, %466 : vector<2x14x14xf32>
    %c45 = arith.constant 45 : index
    %468 = memref.load %arg1[%c45] : memref<162xf32, #tpu.memory_space<smem>>
    %469 = vector.broadcast %468 : f32 to vector<2x14x14xf32>
    %470 = arith.mulf %463, %469 : vector<2x14x14xf32>
    %471 = arith.addf %444, %470 : vector<2x14x14xf32>
    %c72 = arith.constant 72 : index
    %472 = memref.load %arg1[%c72] : memref<162xf32, #tpu.memory_space<smem>>
    %473 = vector.broadcast %472 : f32 to vector<2x14x14xf32>
    %474 = arith.mulf %463, %473 : vector<2x14x14xf32>
    %475 = arith.addf %448, %474 : vector<2x14x14xf32>
    %c99 = arith.constant 99 : index
    %476 = memref.load %arg1[%c99] : memref<162xf32, #tpu.memory_space<smem>>
    %477 = vector.broadcast %476 : f32 to vector<2x14x14xf32>
    %478 = arith.mulf %463, %477 : vector<2x14x14xf32>
    %479 = arith.addf %452, %478 : vector<2x14x14xf32>
    %c126 = arith.constant 126 : index
    %480 = memref.load %arg1[%c126] : memref<162xf32, #tpu.memory_space<smem>>
    %481 = vector.broadcast %480 : f32 to vector<2x14x14xf32>
    %482 = arith.mulf %463, %481 : vector<2x14x14xf32>
    %483 = arith.addf %456, %482 : vector<2x14x14xf32>
    %c153 = arith.constant 153 : index
    %484 = memref.load %arg1[%c153] : memref<162xf32, #tpu.memory_space<smem>>
    %485 = vector.broadcast %484 : f32 to vector<2x14x14xf32>
    %486 = arith.mulf %463, %485 : vector<2x14x14xf32>
    %487 = arith.addf %460, %486 : vector<2x14x14xf32>
    %488 = vector.extract_strided_slice %462 {offsets = [0, 0, 1], sizes = [2, 14, 14], strides = [1, 1, 1]} : vector<2x16x16xf32> to vector<2x14x14xf32>
    %c19 = arith.constant 19 : index
    %489 = memref.load %arg1[%c19] : memref<162xf32, #tpu.memory_space<smem>>
    %490 = vector.broadcast %489 : f32 to vector<2x14x14xf32>
    %491 = arith.mulf %488, %490 : vector<2x14x14xf32>
    %492 = arith.addf %467, %491 : vector<2x14x14xf32>
    %c46 = arith.constant 46 : index
    %493 = memref.load %arg1[%c46] : memref<162xf32, #tpu.memory_space<smem>>
    %494 = vector.broadcast %493 : f32 to vector<2x14x14xf32>
    %495 = arith.mulf %488, %494 : vector<2x14x14xf32>
    %496 = arith.addf %471, %495 : vector<2x14x14xf32>
    %c73 = arith.constant 73 : index
    %497 = memref.load %arg1[%c73] : memref<162xf32, #tpu.memory_space<smem>>
    %498 = vector.broadcast %497 : f32 to vector<2x14x14xf32>
    %499 = arith.mulf %488, %498 : vector<2x14x14xf32>
    %500 = arith.addf %475, %499 : vector<2x14x14xf32>
    %c100 = arith.constant 100 : index
    %501 = memref.load %arg1[%c100] : memref<162xf32, #tpu.memory_space<smem>>
    %502 = vector.broadcast %501 : f32 to vector<2x14x14xf32>
    %503 = arith.mulf %488, %502 : vector<2x14x14xf32>
    %504 = arith.addf %479, %503 : vector<2x14x14xf32>
    %c127 = arith.constant 127 : index
    %505 = memref.load %arg1[%c127] : memref<162xf32, #tpu.memory_space<smem>>
    %506 = vector.broadcast %505 : f32 to vector<2x14x14xf32>
    %507 = arith.mulf %488, %506 : vector<2x14x14xf32>
    %508 = arith.addf %483, %507 : vector<2x14x14xf32>
    %c154 = arith.constant 154 : index
    %509 = memref.load %arg1[%c154] : memref<162xf32, #tpu.memory_space<smem>>
    %510 = vector.broadcast %509 : f32 to vector<2x14x14xf32>
    %511 = arith.mulf %488, %510 : vector<2x14x14xf32>
    %512 = arith.addf %487, %511 : vector<2x14x14xf32>
    %513 = vector.extract_strided_slice %462 {offsets = [0, 0, 2], sizes = [2, 14, 14], strides = [1, 1, 1]} : vector<2x16x16xf32> to vector<2x14x14xf32>
    %c20 = arith.constant 20 : index
    %514 = memref.load %arg1[%c20] : memref<162xf32, #tpu.memory_space<smem>>
    %515 = vector.broadcast %514 : f32 to vector<2x14x14xf32>
    %516 = arith.mulf %513, %515 : vector<2x14x14xf32>
    %517 = arith.addf %492, %516 : vector<2x14x14xf32>
    %c47 = arith.constant 47 : index
    %518 = memref.load %arg1[%c47] : memref<162xf32, #tpu.memory_space<smem>>
    %519 = vector.broadcast %518 : f32 to vector<2x14x14xf32>
    %520 = arith.mulf %513, %519 : vector<2x14x14xf32>
    %521 = arith.addf %496, %520 : vector<2x14x14xf32>
    %c74 = arith.constant 74 : index
    %522 = memref.load %arg1[%c74] : memref<162xf32, #tpu.memory_space<smem>>
    %523 = vector.broadcast %522 : f32 to vector<2x14x14xf32>
    %524 = arith.mulf %513, %523 : vector<2x14x14xf32>
    %525 = arith.addf %500, %524 : vector<2x14x14xf32>
    %c101 = arith.constant 101 : index
    %526 = memref.load %arg1[%c101] : memref<162xf32, #tpu.memory_space<smem>>
    %527 = vector.broadcast %526 : f32 to vector<2x14x14xf32>
    %528 = arith.mulf %513, %527 : vector<2x14x14xf32>
    %529 = arith.addf %504, %528 : vector<2x14x14xf32>
    %c128 = arith.constant 128 : index
    %530 = memref.load %arg1[%c128] : memref<162xf32, #tpu.memory_space<smem>>
    %531 = vector.broadcast %530 : f32 to vector<2x14x14xf32>
    %532 = arith.mulf %513, %531 : vector<2x14x14xf32>
    %533 = arith.addf %508, %532 : vector<2x14x14xf32>
    %c155 = arith.constant 155 : index
    %534 = memref.load %arg1[%c155] : memref<162xf32, #tpu.memory_space<smem>>
    %535 = vector.broadcast %534 : f32 to vector<2x14x14xf32>
    %536 = arith.mulf %513, %535 : vector<2x14x14xf32>
    %537 = arith.addf %512, %536 : vector<2x14x14xf32>
    %538 = vector.extract_strided_slice %462 {offsets = [0, 1, 0], sizes = [2, 14, 14], strides = [1, 1, 1]} : vector<2x16x16xf32> to vector<2x14x14xf32>
    %c21 = arith.constant 21 : index
    %539 = memref.load %arg1[%c21] : memref<162xf32, #tpu.memory_space<smem>>
    %540 = vector.broadcast %539 : f32 to vector<2x14x14xf32>
    %541 = arith.mulf %538, %540 : vector<2x14x14xf32>
    %542 = arith.addf %517, %541 : vector<2x14x14xf32>
    %c48 = arith.constant 48 : index
    %543 = memref.load %arg1[%c48] : memref<162xf32, #tpu.memory_space<smem>>
    %544 = vector.broadcast %543 : f32 to vector<2x14x14xf32>
    %545 = arith.mulf %538, %544 : vector<2x14x14xf32>
    %546 = arith.addf %521, %545 : vector<2x14x14xf32>
    %c75 = arith.constant 75 : index
    %547 = memref.load %arg1[%c75] : memref<162xf32, #tpu.memory_space<smem>>
    %548 = vector.broadcast %547 : f32 to vector<2x14x14xf32>
    %549 = arith.mulf %538, %548 : vector<2x14x14xf32>
    %550 = arith.addf %525, %549 : vector<2x14x14xf32>
    %c102 = arith.constant 102 : index
    %551 = memref.load %arg1[%c102] : memref<162xf32, #tpu.memory_space<smem>>
    %552 = vector.broadcast %551 : f32 to vector<2x14x14xf32>
    %553 = arith.mulf %538, %552 : vector<2x14x14xf32>
    %554 = arith.addf %529, %553 : vector<2x14x14xf32>
    %c129 = arith.constant 129 : index
    %555 = memref.load %arg1[%c129] : memref<162xf32, #tpu.memory_space<smem>>
    %556 = vector.broadcast %555 : f32 to vector<2x14x14xf32>
    %557 = arith.mulf %538, %556 : vector<2x14x14xf32>
    %558 = arith.addf %533, %557 : vector<2x14x14xf32>
    %c156 = arith.constant 156 : index
    %559 = memref.load %arg1[%c156] : memref<162xf32, #tpu.memory_space<smem>>
    %560 = vector.broadcast %559 : f32 to vector<2x14x14xf32>
    %561 = arith.mulf %538, %560 : vector<2x14x14xf32>
    %562 = arith.addf %537, %561 : vector<2x14x14xf32>
    %563 = vector.extract_strided_slice %462 {offsets = [0, 1, 1], sizes = [2, 14, 14], strides = [1, 1, 1]} : vector<2x16x16xf32> to vector<2x14x14xf32>
    %c22 = arith.constant 22 : index
    %564 = memref.load %arg1[%c22] : memref<162xf32, #tpu.memory_space<smem>>
    %565 = vector.broadcast %564 : f32 to vector<2x14x14xf32>
    %566 = arith.mulf %563, %565 : vector<2x14x14xf32>
    %567 = arith.addf %542, %566 : vector<2x14x14xf32>
    %c49 = arith.constant 49 : index
    %568 = memref.load %arg1[%c49] : memref<162xf32, #tpu.memory_space<smem>>
    %569 = vector.broadcast %568 : f32 to vector<2x14x14xf32>
    %570 = arith.mulf %563, %569 : vector<2x14x14xf32>
    %571 = arith.addf %546, %570 : vector<2x14x14xf32>
    %c76 = arith.constant 76 : index
    %572 = memref.load %arg1[%c76] : memref<162xf32, #tpu.memory_space<smem>>
    %573 = vector.broadcast %572 : f32 to vector<2x14x14xf32>
    %574 = arith.mulf %563, %573 : vector<2x14x14xf32>
    %575 = arith.addf %550, %574 : vector<2x14x14xf32>
    %c103 = arith.constant 103 : index
    %576 = memref.load %arg1[%c103] : memref<162xf32, #tpu.memory_space<smem>>
    %577 = vector.broadcast %576 : f32 to vector<2x14x14xf32>
    %578 = arith.mulf %563, %577 : vector<2x14x14xf32>
    %579 = arith.addf %554, %578 : vector<2x14x14xf32>
    %c130 = arith.constant 130 : index
    %580 = memref.load %arg1[%c130] : memref<162xf32, #tpu.memory_space<smem>>
    %581 = vector.broadcast %580 : f32 to vector<2x14x14xf32>
    %582 = arith.mulf %563, %581 : vector<2x14x14xf32>
    %583 = arith.addf %558, %582 : vector<2x14x14xf32>
    %c157 = arith.constant 157 : index
    %584 = memref.load %arg1[%c157] : memref<162xf32, #tpu.memory_space<smem>>
    %585 = vector.broadcast %584 : f32 to vector<2x14x14xf32>
    %586 = arith.mulf %563, %585 : vector<2x14x14xf32>
    %587 = arith.addf %562, %586 : vector<2x14x14xf32>
    %588 = vector.extract_strided_slice %462 {offsets = [0, 1, 2], sizes = [2, 14, 14], strides = [1, 1, 1]} : vector<2x16x16xf32> to vector<2x14x14xf32>
    %c23 = arith.constant 23 : index
    %589 = memref.load %arg1[%c23] : memref<162xf32, #tpu.memory_space<smem>>
    %590 = vector.broadcast %589 : f32 to vector<2x14x14xf32>
    %591 = arith.mulf %588, %590 : vector<2x14x14xf32>
    %592 = arith.addf %567, %591 : vector<2x14x14xf32>
    %c50 = arith.constant 50 : index
    %593 = memref.load %arg1[%c50] : memref<162xf32, #tpu.memory_space<smem>>
    %594 = vector.broadcast %593 : f32 to vector<2x14x14xf32>
    %595 = arith.mulf %588, %594 : vector<2x14x14xf32>
    %596 = arith.addf %571, %595 : vector<2x14x14xf32>
    %c77 = arith.constant 77 : index
    %597 = memref.load %arg1[%c77] : memref<162xf32, #tpu.memory_space<smem>>
    %598 = vector.broadcast %597 : f32 to vector<2x14x14xf32>
    %599 = arith.mulf %588, %598 : vector<2x14x14xf32>
    %600 = arith.addf %575, %599 : vector<2x14x14xf32>
    %c104 = arith.constant 104 : index
    %601 = memref.load %arg1[%c104] : memref<162xf32, #tpu.memory_space<smem>>
    %602 = vector.broadcast %601 : f32 to vector<2x14x14xf32>
    %603 = arith.mulf %588, %602 : vector<2x14x14xf32>
    %604 = arith.addf %579, %603 : vector<2x14x14xf32>
    %c131 = arith.constant 131 : index
    %605 = memref.load %arg1[%c131] : memref<162xf32, #tpu.memory_space<smem>>
    %606 = vector.broadcast %605 : f32 to vector<2x14x14xf32>
    %607 = arith.mulf %588, %606 : vector<2x14x14xf32>
    %608 = arith.addf %583, %607 : vector<2x14x14xf32>
    %c158 = arith.constant 158 : index
    %609 = memref.load %arg1[%c158] : memref<162xf32, #tpu.memory_space<smem>>
    %610 = vector.broadcast %609 : f32 to vector<2x14x14xf32>
    %611 = arith.mulf %588, %610 : vector<2x14x14xf32>
    %612 = arith.addf %587, %611 : vector<2x14x14xf32>
    %613 = vector.extract_strided_slice %462 {offsets = [0, 2, 0], sizes = [2, 14, 14], strides = [1, 1, 1]} : vector<2x16x16xf32> to vector<2x14x14xf32>
    %c24 = arith.constant 24 : index
    %614 = memref.load %arg1[%c24] : memref<162xf32, #tpu.memory_space<smem>>
    %615 = vector.broadcast %614 : f32 to vector<2x14x14xf32>
    %616 = arith.mulf %613, %615 : vector<2x14x14xf32>
    %617 = arith.addf %592, %616 : vector<2x14x14xf32>
    %c51 = arith.constant 51 : index
    %618 = memref.load %arg1[%c51] : memref<162xf32, #tpu.memory_space<smem>>
    %619 = vector.broadcast %618 : f32 to vector<2x14x14xf32>
    %620 = arith.mulf %613, %619 : vector<2x14x14xf32>
    %621 = arith.addf %596, %620 : vector<2x14x14xf32>
    %c78 = arith.constant 78 : index
    %622 = memref.load %arg1[%c78] : memref<162xf32, #tpu.memory_space<smem>>
    %623 = vector.broadcast %622 : f32 to vector<2x14x14xf32>
    %624 = arith.mulf %613, %623 : vector<2x14x14xf32>
    %625 = arith.addf %600, %624 : vector<2x14x14xf32>
    %c105 = arith.constant 105 : index
    %626 = memref.load %arg1[%c105] : memref<162xf32, #tpu.memory_space<smem>>
    %627 = vector.broadcast %626 : f32 to vector<2x14x14xf32>
    %628 = arith.mulf %613, %627 : vector<2x14x14xf32>
    %629 = arith.addf %604, %628 : vector<2x14x14xf32>
    %c132 = arith.constant 132 : index
    %630 = memref.load %arg1[%c132] : memref<162xf32, #tpu.memory_space<smem>>
    %631 = vector.broadcast %630 : f32 to vector<2x14x14xf32>
    %632 = arith.mulf %613, %631 : vector<2x14x14xf32>
    %633 = arith.addf %608, %632 : vector<2x14x14xf32>
    %c159 = arith.constant 159 : index
    %634 = memref.load %arg1[%c159] : memref<162xf32, #tpu.memory_space<smem>>
    %635 = vector.broadcast %634 : f32 to vector<2x14x14xf32>
    %636 = arith.mulf %613, %635 : vector<2x14x14xf32>
    %637 = arith.addf %612, %636 : vector<2x14x14xf32>
    %638 = vector.extract_strided_slice %462 {offsets = [0, 2, 1], sizes = [2, 14, 14], strides = [1, 1, 1]} : vector<2x16x16xf32> to vector<2x14x14xf32>
    %c25 = arith.constant 25 : index
    %639 = memref.load %arg1[%c25] : memref<162xf32, #tpu.memory_space<smem>>
    %640 = vector.broadcast %639 : f32 to vector<2x14x14xf32>
    %641 = arith.mulf %638, %640 : vector<2x14x14xf32>
    %642 = arith.addf %617, %641 : vector<2x14x14xf32>
    %c52 = arith.constant 52 : index
    %643 = memref.load %arg1[%c52] : memref<162xf32, #tpu.memory_space<smem>>
    %644 = vector.broadcast %643 : f32 to vector<2x14x14xf32>
    %645 = arith.mulf %638, %644 : vector<2x14x14xf32>
    %646 = arith.addf %621, %645 : vector<2x14x14xf32>
    %c79 = arith.constant 79 : index
    %647 = memref.load %arg1[%c79] : memref<162xf32, #tpu.memory_space<smem>>
    %648 = vector.broadcast %647 : f32 to vector<2x14x14xf32>
    %649 = arith.mulf %638, %648 : vector<2x14x14xf32>
    %650 = arith.addf %625, %649 : vector<2x14x14xf32>
    %c106 = arith.constant 106 : index
    %651 = memref.load %arg1[%c106] : memref<162xf32, #tpu.memory_space<smem>>
    %652 = vector.broadcast %651 : f32 to vector<2x14x14xf32>
    %653 = arith.mulf %638, %652 : vector<2x14x14xf32>
    %654 = arith.addf %629, %653 : vector<2x14x14xf32>
    %c133 = arith.constant 133 : index
    %655 = memref.load %arg1[%c133] : memref<162xf32, #tpu.memory_space<smem>>
    %656 = vector.broadcast %655 : f32 to vector<2x14x14xf32>
    %657 = arith.mulf %638, %656 : vector<2x14x14xf32>
    %658 = arith.addf %633, %657 : vector<2x14x14xf32>
    %c160 = arith.constant 160 : index
    %659 = memref.load %arg1[%c160] : memref<162xf32, #tpu.memory_space<smem>>
    %660 = vector.broadcast %659 : f32 to vector<2x14x14xf32>
    %661 = arith.mulf %638, %660 : vector<2x14x14xf32>
    %662 = arith.addf %637, %661 : vector<2x14x14xf32>
    %663 = vector.extract_strided_slice %462 {offsets = [0, 2, 2], sizes = [2, 14, 14], strides = [1, 1, 1]} : vector<2x16x16xf32> to vector<2x14x14xf32>
    %c26 = arith.constant 26 : index
    %664 = memref.load %arg1[%c26] : memref<162xf32, #tpu.memory_space<smem>>
    %665 = vector.broadcast %664 : f32 to vector<2x14x14xf32>
    %666 = arith.mulf %663, %665 : vector<2x14x14xf32>
    %667 = arith.addf %642, %666 : vector<2x14x14xf32>
    %c53 = arith.constant 53 : index
    %668 = memref.load %arg1[%c53] : memref<162xf32, #tpu.memory_space<smem>>
    %669 = vector.broadcast %668 : f32 to vector<2x14x14xf32>
    %670 = arith.mulf %663, %669 : vector<2x14x14xf32>
    %671 = arith.addf %646, %670 : vector<2x14x14xf32>
    %c80 = arith.constant 80 : index
    %672 = memref.load %arg1[%c80] : memref<162xf32, #tpu.memory_space<smem>>
    %673 = vector.broadcast %672 : f32 to vector<2x14x14xf32>
    %674 = arith.mulf %663, %673 : vector<2x14x14xf32>
    %675 = arith.addf %650, %674 : vector<2x14x14xf32>
    %c107 = arith.constant 107 : index
    %676 = memref.load %arg1[%c107] : memref<162xf32, #tpu.memory_space<smem>>
    %677 = vector.broadcast %676 : f32 to vector<2x14x14xf32>
    %678 = arith.mulf %663, %677 : vector<2x14x14xf32>
    %679 = arith.addf %654, %678 : vector<2x14x14xf32>
    %c134 = arith.constant 134 : index
    %680 = memref.load %arg1[%c134] : memref<162xf32, #tpu.memory_space<smem>>
    %681 = vector.broadcast %680 : f32 to vector<2x14x14xf32>
    %682 = arith.mulf %663, %681 : vector<2x14x14xf32>
    %683 = arith.addf %658, %682 : vector<2x14x14xf32>
    %c161 = arith.constant 161 : index
    %684 = memref.load %arg1[%c161] : memref<162xf32, #tpu.memory_space<smem>>
    %685 = vector.broadcast %684 : f32 to vector<2x14x14xf32>
    %686 = arith.mulf %663, %685 : vector<2x14x14xf32>
    %687 = arith.addf %662, %686 : vector<2x14x14xf32>
    %c0_9 = arith.constant 0 : index
    %688 = memref.load %arg2[%c0_9] : memref<6xf32, #tpu.memory_space<smem>>
    %689 = vector.broadcast %688 : f32 to vector<2x14x14xf32>
    %690 = arith.addf %667, %689 : vector<2x14x14xf32>
    %691 = vector.shape_cast %690 : vector<2x14x14xf32> to vector<2x196xf32>
    %c0_10 = arith.constant 0 : index
    %c0_11 = arith.constant 0 : index
    %692 = vector.load %arg4[%c0_10, %c0_11] : memref<2x1176xf32, #tpu.memory_space<vmem>>, vector<2x196xf32>
    tpu.vector_store %arg4[%c0_10, %c0_11], %691 {strides = array<i32>} : memref<2x1176xf32, #tpu.memory_space<vmem>>, vector<2x196xf32>,
    %c1_12 = arith.constant 1 : index
    %693 = memref.load %arg2[%c1_12] : memref<6xf32, #tpu.memory_space<smem>>
    %694 = vector.broadcast %693 : f32 to vector<2x14x14xf32>
    %695 = arith.addf %671, %694 : vector<2x14x14xf32>
    %696 = vector.shape_cast %695 : vector<2x14x14xf32> to vector<2x196xf32>
    %c0_13 = arith.constant 0 : index
    %c196 = arith.constant 196 : index
    %697 = vector.load %arg4[%c0_13, %c196] : memref<2x1176xf32, #tpu.memory_space<vmem>>, vector<2x196xf32>
    tpu.vector_store %arg4[%c0_13, %c196], %696 {strides = array<i32>} : memref<2x1176xf32, #tpu.memory_space<vmem>>, vector<2x196xf32>,
    %c2_14 = arith.constant 2 : index
    %698 = memref.load %arg2[%c2_14] : memref<6xf32, #tpu.memory_space<smem>>
    %699 = vector.broadcast %698 : f32 to vector<2x14x14xf32>
    %700 = arith.addf %675, %699 : vector<2x14x14xf32>
    %701 = vector.shape_cast %700 : vector<2x14x14xf32> to vector<2x196xf32>
    %c0_15 = arith.constant 0 : index
    %c392 = arith.constant 392 : index
    %702 = vector.load %arg4[%c0_15, %c392] : memref<2x1176xf32, #tpu.memory_space<vmem>>, vector<2x196xf32>
    tpu.vector_store %arg4[%c0_15, %c392], %701 {strides = array<i32>} : memref<2x1176xf32, #tpu.memory_space<vmem>>, vector<2x196xf32>,
    %c3_16 = arith.constant 3 : index
    %703 = memref.load %arg2[%c3_16] : memref<6xf32, #tpu.memory_space<smem>>
    %704 = vector.broadcast %703 : f32 to vector<2x14x14xf32>
    %705 = arith.addf %679, %704 : vector<2x14x14xf32>
    %706 = vector.shape_cast %705 : vector<2x14x14xf32> to vector<2x196xf32>
    %c0_17 = arith.constant 0 : index
    %c588 = arith.constant 588 : index
    %707 = vector.load %arg4[%c0_17, %c588] : memref<2x1176xf32, #tpu.memory_space<vmem>>, vector<2x196xf32>
    tpu.vector_store %arg4[%c0_17, %c588], %706 {strides = array<i32>} : memref<2x1176xf32, #tpu.memory_space<vmem>>, vector<2x196xf32>,
    %c4_18 = arith.constant 4 : index
    %708 = memref.load %arg2[%c4_18] : memref<6xf32, #tpu.memory_space<smem>>
    %709 = vector.broadcast %708 : f32 to vector<2x14x14xf32>
    %710 = arith.addf %683, %709 : vector<2x14x14xf32>
    %711 = vector.shape_cast %710 : vector<2x14x14xf32> to vector<2x196xf32>
    %c0_19 = arith.constant 0 : index
    %c784 = arith.constant 784 : index
    %712 = vector.load %arg4[%c0_19, %c784] : memref<2x1176xf32, #tpu.memory_space<vmem>>, vector<2x196xf32>
    tpu.vector_store %arg4[%c0_19, %c784], %711 {strides = array<i32>} : memref<2x1176xf32, #tpu.memory_space<vmem>>, vector<2x196xf32>,
    %c5_20 = arith.constant 5 : index
    %713 = memref.load %arg2[%c5_20] : memref<6xf32, #tpu.memory_space<smem>>
    %714 = vector.broadcast %713 : f32 to vector<2x14x14xf32>
    %715 = arith.addf %687, %714 : vector<2x14x14xf32>
    %716 = vector.shape_cast %715 : vector<2x14x14xf32> to vector<2x196xf32>
    %c0_21 = arith.constant 0 : index
    %c980 = arith.constant 980 : index
    %717 = vector.load %arg4[%c0_21, %c980] : memref<2x1176xf32, #tpu.memory_space<vmem>>, vector<2x196xf32>
    tpu.vector_store %arg4[%c0_21, %c980], %716 {strides = array<i32>} : memref<2x1176xf32, #tpu.memory_space<vmem>>, vector<2x196xf32>,
    return
  }
  func.func @transform_0(%arg0: i32, %arg1: memref<162xf32, #tpu.memory_space<smem>>, %arg2: memref<6xf32, #tpu.memory_space<smem>>) -> (i32, i32, i32, i32) {
    %c0_i32 = arith.constant 0 : i32
    %c0_i32_0 = arith.constant 0 : i32
    %c0_i32_1 = arith.constant 0 : i32
    %c0_i32_2 = arith.constant 0 : i32
    return %arg0, %c0_i32, %c0_i32_0, %c0_i32_1 : i32, i32, i32, i32
  }
  func.func @transform_1(%arg0: i32, %arg1: memref<162xf32, #tpu.memory_space<smem>>, %arg2: memref<6xf32, #tpu.memory_space<smem>>) -> (i32, i32) {
    %c0_i32 = arith.constant 0 : i32
    %c0_i32_0 = arith.constant 0 : i32
    return %arg0, %c0_i32 : i32, i32
  }
}

</mosaic_0001>

<bundles_post_ra>
// kernel: tpu_custom_call.1
= control target key start
LH: loop header
LB: loop body
LE: loop exit
PB: predicated region body
PF: predicated region fallthrough
CT: control target
= control target key end

     0   :  { %s11231_s0 = inlined_call_operand.hbm [shape: f32[162], index: 0, kind: input, shape index: {}]   ;;  %s11232_s2 = inlined_call_operand.hbm [shape: f32[2,3,16,16], index: 2, kind: input, shape index: {}]   ;;  %s11233_s3 = inlined_call_operand.hbm [shape: f32[2,1176], index: 3, kind: output, shape index: {}]   ;;  %s11234_s1 = inlined_call_operand.vmem [shape: f32[6], index: 1, kind: input, shape index: {}]  }
   0x1   :  { %s5785_s14 = scalar_lea.hbm %s11231_s0, 32 }
   0x2   :  { %p5786_p0 = scmp.ne.s32.totalorder %s11231_s0, %s5785_s14  ;;  %p5789_p1 = scmp.lt.u32.totalorder %s5785_s14, %s11231_s0 }
   0x4   :  { %p5791_p2 = pnand %p5789_p1, %p5786_p0 }
   0x6   :  { %5794 = shalt.err (!%p5791_p2)  }
   0x7   :  { %s5857_s19 = smov [#allocation3]   ;;  %s10_s24 = sshll.u32 %s11234_s1, 4  ;;  %s11_s24 = int_to_ptr.vmem [resolvable:$true] %s10_s24 }
   0x8   :  { %9 = dma.hbm_to_smem %s11231_s0, 32, %s5857_s19, [#allocation2] }
   0x9   :  { %s5795_s25 = scalar_lea.vmem %s11_s24, 16  ;;  %p5800_p4 = scmp.lt.s32.totalorder %s11_s24, %s11_s24 }
   0xa   :  { %p5796_p3 = scmp.ne.s32.totalorder %s11_s24, %s5795_s25  ;;  %p5801_p5 = scmp.lt.s32.totalorder %s5795_s25, %s5795_s25 }
   0xc   :  { %p5802_p6 = por %p5801_p5, %p5800_p4 }
   0xe   :  { %p5803_p7 = pnand %p5802_p6, %p5796_p3 }
  0x10   :  { %5806 = shalt.err (!%p5803_p7)  }
  0x11   :  { %s5858_s26 = smov [#allocation4]  }
  0x12   :  { %13 = dma.vmem_to_smem %s11_s24, 16, %s5858_s26, [#allocation2] }
  0x13   :  { %5851 = dma.done.wait [#allocation2], 48 }
  0x14   :  { %5852 = vsyncadd [#allocation2], 4294967248 }
  0x15   :  { %15 = sfence }
  0x16   :  { %16 = vsyncpa [#allocation6], 0 }
  0x17   :  { %17 = vsyncpa [#allocation7], 0  ;;  %s5859_s0 = smov [#allocation5]   ;;  %s5807_s29 = scalar_lea.hbm %s11232_s2, 1536 }
  0x18   :  { %s23_s27 = sshll.u32 %s5859_s0, 4  ;;  %p5808_p8 = scmp.ne.s32.totalorder %s11232_s2, %s5807_s29  ;;  %s24_s27 = int_to_ptr.vmem [resolvable:$true] %s23_s27 }
  0x19   :  { %p5811_p9 = scmp.lt.u32.totalorder %s5807_s29, %s11232_s2 }
  0x1b   :  { %p5813_p10 = pnand %p5811_p9, %p5808_p8 }
  0x1d   :  { %5816 = shalt.err (!%p5813_p10)
}
  0x1e   :  { %s5817_s7 = scalar_lea.vmem %s24_s27, 1536  ;;  %p5822_p12 = scmp.lt.s32.totalorder %s24_s27, %s24_s27 }
  0x1f   :  { %p5818_p11 = scmp.ne.s32.totalorder %s24_s27, %s5817_s7  ;;  %p5823_p13 = scmp.lt.s32.totalorder %s5817_s7, %s5817_s7 }
  0x21   :  { %p5824_p0 = por %p5823_p13, %p5822_p12 }
  0x23   :  { %p5825_p1 = pnand %p5824_p0, %p5818_p11 }
  0x25   :  { %5828 = shalt.err (!%p5825_p1)
}
  0x26   :  { %s5860_s8 = smov 128   ;;  %s5861_s9 = smov 8  }
  0x27   :  { %29 = dma.hbm_to_vmem [thread:$0]  %s11232_s2, 1536, %s24_s27, [#allocation6], %s5860_s8, %s5860_s8, %s5861_s9  }
  0x28   :  { %5853 = dma.done.wait [#allocation6], 1536  }
  0x29   :  { %5854 = vsyncadd [#allocation6], 4294965760  ;;  %s5562_s12 = sld [smem:[#allocation3 + $0x1]]  ;;  %s5563_s13 = sld [smem:[#allocation3 + $0x1c]]  ;;  %v5931_v0 = vld [vmem:[#allocation5 + $0x30] sm:$0xff]  ;;  %v5933_v2 = vld [vmem:[#allocation5] sm:$0xff] }
  0x2a   :  { %v5935_v3 = vld [vmem:[#allocation5 + $0x38] sm:$0xff]  ;;  %v5939_v6 = vld [vmem:[#allocation5 + $0x8] sm:$0xff]  ;;  %s5862_s14 = smov 127   ;;  %s5564_s2 = sld [smem:[#allocation3 + $0x37]]  ;;  %vm427_vm0 = vcmask 1046528   ;;  %vm956_vm1 = vcmask 1045504  }
  0x2b   :  { %s5565_s15 = sld [smem:[#allocation3 + $0x52]]  ;;  %s5566_s16 = sld [smem:[#allocation3 + $0x6d]]  ;;  %vm4498_vm2 = vcmask 113664   ;;  %vm4500_vm3 = vcmask 228352   ;;  %vm4502_vm4 = vcmask 343040   ;;  %vm4504_vm5 = vcmask 457728  }
  0x2c   :  { %s5567_s17 = sld [smem:[#allocation3 + $0x88]]  ;;  %s5568_s18 = sld [smem:[#allocation3 + $0x2]]  ;;  %vm4506_vm6 = vcmask 572416   ;;  %vm4508_vm7 = vcmask 687104   ;;  %vm4516_vm8 = vcmask 97280   ;;  %vm4510_vm9 = vcmask 801792  }
  0x2d   :  { %s5569_s19 = sld [smem:[#allocation3 + $0x1d]]  ;;  %s5863_s20 = smov 126   ;;  %vm4518_vm10 = vcmask 211968   ;;  %vm4512_vm11 = vcmask 916480   ;;  %vm4520_vm12 = vcmask 326656   ;;  %vm4514_vm13 = vcmask 1031168  }
  0x2e   :  { %s5570_s21 = sld [smem:[#allocation3 + $0x38]]  ;;  %s5571_s22 = sld [smem:[#allocation3 + $0x53]]  ;;  %vm4522_vm14 = vcmask 441344   ;;  %vm4535_vm15 = vcmask 1041408  }
  0x2f   :  { %v106_v1 = vstv %s5562_s12  ;;  %v132_v9 = vstv %s5563_s13  ;;  %s5572_s23 = sld [smem:[#allocation3 + $0x6e]]  ;;  %s5573_s24 = sld [smem:[#allocation3 + $0x89]] }
  0x30   :  { %v109_v4 = vmul.f32 %v106_v1, %v5931_v0  ;;  %v107_v5 = vmul.f32 %v106_v1, %v5933_v2  ;;  %v110_v7 = vmul.f32 %v106_v1, %v5935_v3  ;;  %v108_v8 = vmul.f32 %v106_v1, %v5939_v6  ;;  %s5580_s25 = sld [smem:[#allocation3 + $0x4]]  ;;  %s5581_s26 = sld [smem:[#allocation3 + $0x1f]] }
  0x31   :  { %v134_v10 = vmul.f32 %v132_v9, %v5939_v6  ;;  %v133_v11 = vmul.f32 %v132_v9, %v5933_v2  ;;  %v136_v12 = vmul.f32 %v132_v9, %v5935_v3  ;;  %v135_v13 = vmul.f32 %v132_v9, %v5931_v0  ;;  %s5582_s0 = sld [smem:[#allocation3 + $0x3a]]  ;;  %s5583_s27 = sld [smem:[#allocation3 + $0x55]] }
  0x32   :  { %119 = vrot.lane.b32.xlu1 %v109_v4, %s5862_s14  ;;  %115 = vrot.lane.b32.xlu0 %v107_v5, %s5862_s14  ;;  %v158_v14 = vstv %s5564_s2  ;;  %v184_v19 = vstv %s5565_s15  ;;  %s5584_s28 = sld [smem:[#allocation3 + $0x70]]  ;;  %s5585_s1 = sld [smem:[#allocation3 + $0x8b]] }
  0x33   :  { %v160_v15 = vmul.f32 %v158_v14, %v5939_v6  ;;  %v159_v16 = vmul.f32 %v158_v14, %v5933_v2  ;;  %v162_v17 = vmul.f32 %v158_v14, %v5935_v3  ;;  %v161_v18 = vmul.f32 %v158_v14, %v5931_v0  ;;  %s5586_s29 = sld [smem:[#allocation3 + $0x5]]  ;;  %s5587_s30 = sld [smem:[#allocation3 + $0x20]] }
  0x34   :  { %v186_v20 = vmul.f32 %v184_v19, %v5939_v6  ;;  %v185_v21 = vmul.f32 %v184_v19, %v5933_v2  ;;  %v188_v22 = vmul.f32 %v184_v19, %v5935_v3  ;;  %v187_v23 = vmul.f32 %v184_v19, %v5931_v0  ;;  %s5588_s4 = sld [smem:[#allocation3 + $0x3b]]  ;;  %s5589_s5 = sld [smem:[#allocation3 + $0x56]] }
  0x35   :  { %v210_v24 = vstv %s5566_s16  ;;  %v236_v29 = vstv %s5567_s17  ;;  %v262_v34 = vstv %s5568_s18  ;;  %v288_v39 = vstv %s5569_s19  ;;  %s5590_s6 = sld [smem:[#allocation3 + $0x71]]  ;;  %s5591_s7 = sld [smem:[#allocation3 + $0x8c]] }
  0x36   :  { %121 = vrot.lane.b32.xlu1 %v110_v7, %s5862_s14  ;;  %117 = vrot.lane.b32.xlu0 %v108_v8, %s5862_s14  ;;  %v212_v25 = vmul.f32 %v210_v24, %v5939_v6  ;;  %v211_v26 = vmul.f32 %v210_v24, %v5933_v2  ;;  %v214_v27 = vmul.f32 %v210_v24, %v5935_v3  ;;  %v314_v44 = vstv %s5570_s21  ;;  %s5598_s8 = sld [smem:[#allocation3 + $0x7]]  ;;  %s5599_s10 = sld [smem:[#allocation3 + $0x22]] }
  0x37   :  { %v213_v28 = vmul.f32 %v210_v24, %v5931_v0  ;;  %v238_v30 = vmul.f32 %v236_v29, %v5939_v6  ;;  %v237_v31 = vmul.f32 %v236_v29, %v5933_v2  ;;  %v240_v32 = vmul.f32 %v236_v29, %v5935_v3  ;;  %s5600_s11 = sld [smem:[#allocation3 + $0x3d]]  ;;  %s5601_s12 = sld [smem:[#allocation3 + $0x58]] }
  0x38   :  { %v239_v33 = vmul.f32 %v236_v29, %v5931_v0  ;;  %v264_v35 = vmul.f32 %v262_v34, %v5939_v6  ;;  %v263_v36 = vmul.f32 %v262_v34, %v5933_v2  ;;  %v266_v37 = vmul.f32 %v262_v34, %v5935_v3  ;;  %s5602_s13 = sld [smem:[#allocation3 + $0x73]]  ;;  %s5603_s2 = sld [smem:[#allocation3 + $0x8e]] }
  0x39   :  { %v265_v38 = vmul.f32 %v262_v34, %v5931_v0  ;;  %v290_v40 = vmul.f32 %v288_v39, %v5939_v6  ;;  %v289_v41 = vmul.f32 %v288_v39, %v5933_v2  ;;  %v292_v42 = vmul.f32 %v288_v39, %v5935_v3  ;;  %s5604_s15 = sld [smem:[#allocation3 + $0x8]]  ;;  %s5605_s16 = sld [smem:[#allocation3 + $0x23]] }
  0x3a   :  { %143 = vrot.lane.b32.xlu1 %v134_v10, %s5862_s14  ;;  %141 = vrot.lane.b32.xlu0 %v133_v11, %s5862_s14  ;;  %v291_v43 = vmul.f32 %v288_v39, %v5931_v0  ;;  %v316_v45 = vmul.f32 %v314_v44, %v5939_v6  ;;  %v315_v46 = vmul.f32 %v314_v44, %v5933_v2  ;;  %v340_v49 = vstv %s5571_s22  ;;  %s5606_s17 = sld [smem:[#allocation3 + $0x3e]]  ;;  %s5607_s18 = sld [smem:[#allocation3 + $0x59]] }
  0x3b   :  { %v318_v47 = vmul.f32 %v314_v44, %v5935_v3  ;;  %v317_v48 = vmul.f32 %v314_v44, %v5931_v0  ;;  %v342_v50 = vmul.f32 %v340_v49, %v5939_v6  ;;  %v341_v51 = vmul.f32 %v340_v49, %v5933_v2  ;;  %s5608_s19 = sld [smem:[#allocation3 + $0x74]]  ;;  %s5609_s21 = sld [smem:[#allocation3 + $0x8f]] }
  0x3c   :  { %v344_v52 = vmul.f32 %v340_v49, %v5935_v3  ;;  %v343_v53 = vmul.f32 %v340_v49, %v5931_v0  ;;  %v366_v54 = vstv %s5572_s23  ;;  %v392_v59 = vstv %s5573_s24  ;;  %s5616_s22 = sld [smem:[#allocation3 + $0xa]]  ;;  %s5617_s23 = sld [smem:[#allocation3 + $0x25]] }
  0x3d   :  { %v368_v55 = vmul.f32 %v366_v54, %v5939_v6  ;;  %v367_v56 = vmul.f32 %v366_v54, %v5933_v2  ;;  %v370_v57 = vmul.f32 %v366_v54, %v5935_v3  ;;  %v369_v58 = vmul.f32 %v366_v54, %v5931_v0  ;;  %s5618_s24 = sld [smem:[#allocation3 + $0x40]] }
  0x3e   :  { %147 = vrot.lane.b32.xlu1 %v136_v12, %s5862_s14  ;;  %145 = vrot.lane.b32.xlu0 %v135_v13, %s5862_s14  ;;  %v563_v60 = vstv %s5580_s25  ;;  %v394_v61 = vmul.f32 %v392_v59, %v5939_v6  ;;  %v393_v62 = vmul.f32 %v392_v59, %v5933_v2  ;;  %v396_v4 = vmul.f32 %v392_v59, %v5935_v3  ;;  %s5619_s25 = sld [smem:[#allocation3 + $0x5b]] }
  0x3f   :  { %v565_v63 = vmul.f32 %v563_v60, %v5939_v6  ;;  %v564_v1 = vmul.f32 %v563_v60, %v5933_v2  ;;  %v395_v5 = vmul.f32 %v392_v59, %v5931_v0  ;;  %v567_v7 = vmul.f32 %v563_v60, %v5935_v3 }
  0x40   :  { %v566_v10 = vmul.f32 %v563_v60, %v5931_v0  ;;  %v595_v11 = vstv %s5581_s26  ;;  %s5620_s26 = sld [smem:[#allocation3 + $0x76]] }
  0x41   :  { %v573_v8 = vrot.slane %v565_v63, 1  ;;  %v572_v9 = vrot.slane %v564_v1, 1  ;;  %v576_v12 = vrot.slane %v567_v7, 1 }
  0x42   :  { %169 = vrot.lane.b32.xlu1 %v160_v15, %s5862_s14  ;;  %167 = vrot.lane.b32.xlu0 %v159_v16, %s5862_s14  ;;  %v575_v14 = vrot.slane %v566_v10, 1  ;;  %v597_v15 = vmul.f32 %v595_v11, %v5939_v6  ;;  %v596_v16 = vmul.f32 %v595_v11, %v5933_v2 }
  0x43   :  { %v574_v13 = vsel %vm427_vm0, %v572_v9, %v573_v8 }
  0x44   :  { %v577_v19 = vsel %vm427_vm0, %v575_v14, %v576_v12 }
  0x46   :  { %173 = vrot.lane.b32.xlu1 %v162_v17, %s5862_s14  ;;  %171 = vrot.lane.b32.xlu0 %v161_v18, %s5862_s14  ;;  %v599_v17 = vmul.f32 %v595_v11, %v5935_v3  ;;  %v627_v18 = vstv %s5582_s0  ;;  %s5621_s0 = sld [smem:[#allocation3 + $0x91]] }
  0x47   :  { %v628_v24 = vmul.f32 %v627_v18, %v5933_v2 }
  0x49   :  { %v636_v29 = vrot.slane %v628_v24, 1 }
  0x4a   :  { %195 = vrot.lane.b32.xlu1 %v186_v20, %s5862_s14  ;;  %193 = vrot.lane.b32.xlu0 %v185_v21, %s5862_s14  ;;  %v605_v20 = vrot.slane %v597_v15, 1  ;;  %v604_v21 = vrot.slane %v596_v16, 1  ;;  %v755_v16 = vstv %s5586_s29  ;;  %s5625_s29 = sld [smem:[#allocation3 + $0x5c]] }
  0x4b   :  { %v759_v24 = vmul.f32 %v755_v16, %v5935_v3 }
  0x4e   :  { %199 = vrot.lane.b32.xlu1 %v188_v22, %s5862_s14  ;;  %197 = vrot.lane.b32.xlu0 %v187_v23, %s5862_s14  ;;  %v598_v22 = vmul.f32 %v595_v11, %v5931_v0  ;;  %v629_v23 = vmul.f32 %v627_v18, %v5939_v6 }
  0x52   :  { %221 = vrot.lane.b32.xlu1 %v212_v25, %s5862_s14  ;;  %219 = vrot.lane.b32.xlu0 %v211_v26, %s5862_s14  ;;  %v606_v25 = vsel %vm427_vm0, %v604_v21, %v605_v20  ;;  %v608_v26 = vrot.slane %v599_v17, 1  ;;  %v756_v21 = vmul.f32 %v755_v16, %v5933_v2 }
  0x56   :  { %225 = vrot.lane.b32.xlu1 %v214_v27, %s5862_s14  ;;  %223 = vrot.lane.b32.xlu0 %v213_v28, %s5862_s14  ;;  %v607_v27 = vrot.slane %v598_v22, 1  ;;  %v637_v28 = vrot.slane %v629_v23, 1 }
  0x58   :  { %v638_v34 = vsel %vm427_vm0, %v636_v29, %v637_v28 }
  0x5a   :  { %247 = vrot.lane.b32.xlu1 %v238_v30, %s5862_s14  ;;  %245 = vrot.lane.b32.xlu0 %v237_v31, %s5862_s14  ;;  %v609_v30 = vsel %vm427_vm0, %v607_v27, %v608_v26  ;;  %v631_v31 = vmul.f32 %v627_v18, %v5935_v3  ;;  %v764_v27 = vrot.slane %v756_v21, 1 }
  0x5e   :  { %251 = vrot.lane.b32.xlu1 %v240_v32, %s5862_s14  ;;  %249 = vrot.lane.b32.xlu0 %v239_v33, %s5862_s14  ;;  %v630_v32 = vmul.f32 %v627_v18, %v5931_v0  ;;  %v659_v33 = vstv %s5583_s27  ;;  %s5622_s27 = sld [smem:[#allocation3 + $0xb]] }
  0x5f   :  { %v663_v39 = vmul.f32 %v659_v33, %v5935_v3 }
  0x62   :  { %273 = vrot.lane.b32.xlu1 %v264_v35, %s5863_s20  ;;  %271 = vrot.lane.b32.xlu0 %v263_v36, %s5863_s20  ;;  %v640_v35 = vrot.slane %v631_v31, 1  ;;  %v639_v36 = vrot.slane %v630_v32, 1  ;;  %v787_v31 = vstv %s5587_s30  ;;  %v768_v32 = vrot.slane %v759_v24, 1  ;;  %s5626_s30 = sld [smem:[#allocation3 + $0x77]] }
  0x66   :  { %277 = vrot.lane.b32.xlu1 %v266_v37, %s5863_s20  ;;  %275 = vrot.lane.b32.xlu0 %v265_v38, %s5863_s20  ;;  %v661_v37 = vmul.f32 %v659_v33, %v5939_v6  ;;  %v660_v38 = vmul.f32 %v659_v33, %v5933_v2 }
  0x6a   :  { %299 = vrot.lane.b32.xlu1 %v290_v40, %s5863_s20  ;;  %297 = vrot.lane.b32.xlu0 %v289_v41, %s5863_s20  ;;  %v641_v40 = vsel %vm427_vm0, %v639_v36, %v640_v35  ;;  %v669_v41 = vrot.slane %v661_v37, 1  ;;  %v788_v36 = vmul.f32 %v787_v31, %v5933_v2 }
  0x6e   :  { %303 = vrot.lane.b32.xlu1 %v292_v42, %s5863_s20  ;;  %301 = vrot.lane.b32.xlu0 %v291_v43, %s5863_s20  ;;  %v668_v42 = vrot.slane %v660_v38, 1  ;;  %v662_v43 = vmul.f32 %v659_v33, %v5931_v0 }
  0x70   :  { %v671_v49 = vrot.slane %v662_v43, 1  ;;  %v790_v43 = vmul.f32 %v787_v31, %v5931_v0 }
  0x72   :  { %325 = vrot.lane.b32.xlu1 %v316_v45, %s5863_s20  ;;  %323 = vrot.lane.b32.xlu0 %v315_v46, %s5863_s20  ;;  %v691_v46 = vstv %s5584_s28  ;;  %s5623_s28 = sld [smem:[#allocation3 + $0x26]] }
  0x73   :  { %v695_v54 = vmul.f32 %v691_v46, %v5935_v3 }
  0x76   :  { %329 = vrot.lane.b32.xlu1 %v318_v47, %s5863_s20  ;;  %327 = vrot.lane.b32.xlu0 %v317_v48, %s5863_s20  ;;  %v672_v47 = vrot.slane %v663_v39, 1  ;;  %v670_v48 = vsel %vm427_vm0, %v668_v42, %v669_v41  ;;  %v791_v39 = vmul.f32 %v787_v31, %v5935_v3  ;;  %v796_v42 = vrot.slane %v788_v36, 1 }
  0x7a   :  { %351 = vrot.lane.b32.xlu1 %v342_v50, %s5863_s20  ;;  %349 = vrot.lane.b32.xlu0 %v341_v51, %s5863_s20  ;;  %v693_v50 = vmul.f32 %v691_v46, %v5939_v6  ;;  %v692_v51 = vmul.f32 %v691_v46, %v5933_v2 }
  0x7e   :  { %355 = vrot.lane.b32.xlu1 %v344_v52, %s5863_s20  ;;  %353 = vrot.lane.b32.xlu0 %v343_v53, %s5863_s20 }
  0x82   :  { %377 = vrot.lane.b32.xlu1 %v368_v55, %s5863_s20  ;;  %375 = vrot.lane.b32.xlu0 %v367_v56, %s5863_s20  ;;  %v673_v55 = vsel %vm427_vm0, %v671_v49, %v672_v47  ;;  %v701_v56 = vrot.slane %v693_v50, 1  ;;  %v800_v49 = vrot.slane %v791_v39, 1 }
  0x86   :  { %381 = vrot.lane.b32.xlu1 %v370_v57, %s5863_s20  ;;  %379 = vrot.lane.b32.xlu0 %v369_v58, %s5863_s20  ;;  %v700_v57 = vrot.slane %v692_v51, 1  ;;  %v694_v58 = vmul.f32 %v691_v46, %v5931_v0  ;;  %v799_v51 = vrot.slane %v790_v43, 1 }
  0x88   :  { %v702_v63 = vsel %vm427_vm0, %v700_v57, %v701_v56  ;;  %v703_v1 = vrot.slane %v694_v58, 1 }
  0x8a   :  { %403 = vrot.lane.b32.xlu1 %v394_v61, %s5863_s20  ;;  %401 = vrot.lane.b32.xlu0 %v393_v62, %s5863_s20  ;;  %v723_v61 = vstv %s5585_s1  ;;  %v704_v62 = vrot.slane %v695_v54, 1  ;;  %s5624_s1 = sld [smem:[#allocation3 + $0x41]] }
  0x8b   :  { %v727_v9 = vmul.f32 %v723_v61, %v5935_v3 }
  0x8c   :  { %v705_v10 = vsel %vm427_vm0, %v703_v1, %v704_v62 }
  0x8d   :  { %v736_v17 = vrot.slane %v727_v9, 1 }
  0x8e   :  { %407 = vrot.lane.b32.xlu1 %v396_v4, %s5863_s20  ;;  %405 = vrot.lane.b32.xlu0 %v395_v5, %s5863_s20  ;;  %v725_v4 = vmul.f32 %v723_v61, %v5939_v6  ;;  %v724_v5 = vmul.f32 %v723_v61, %v5933_v2 }
  0x90   :  { %v733_v11 = vrot.slane %v725_v4, 1  ;;  %v851_v4 = vstv %s5589_s5  ;;  %s5578_s5 = sld [smem:[#allocation3 + $0x6f]] }
  0x92   :  { %580 = vrot.lane.b32.xlu1 %v573_v8, %s5862_s14  ;;  %578 = vrot.lane.b32.xlu0 %v574_v13, %s5862_s14  ;;  %v726_v13 = vmul.f32 %v723_v61, %v5931_v0 }
  0x96   :  { %584 = vrot.lane.b32.xlu1 %v576_v12, %s5862_s14  ;;  %582 = vrot.lane.b32.xlu0 %v577_v19, %s5862_s14  ;;  %v732_v12 = vrot.slane %v724_v5, 1  ;;  %v735_v19 = vrot.slane %v726_v13, 1 }
  0x98   :  { %v734_v18 = vsel %vm427_vm0, %v732_v12, %v733_v11 }
  0x9a   :  { %612 = vrot.lane.b32.xlu1 %v605_v20, %s5862_s14  ;;  %610 = vrot.lane.b32.xlu0 %v606_v25, %s5862_s14  ;;  %v757_v20 = vmul.f32 %v755_v16, %v5939_v6  ;;  %v737_v25 = vsel %vm427_vm0, %v735_v19, %v736_v17  ;;  %v855_v19 = vmul.f32 %v851_v4, %v5935_v3 }
  0x9e   :  { %616 = vrot.lane.b32.xlu1 %v608_v26, %s5862_s14  ;;  %614 = vrot.lane.b32.xlu0 %v609_v30, %s5862_s14  ;;  %v765_v26 = vrot.slane %v757_v20, 1  ;;  %v883_v20 = vstv %s5590_s6  ;;  %s5627_s6 = sld [smem:[#allocation3 + $0x92]] }
  0xa0   :  { %v766_v33 = vsel %vm427_vm0, %v764_v27, %v765_v26 }
  0xa2   :  { %644 = vrot.lane.b32.xlu1 %v637_v28, %s5862_s14  ;;  %642 = vrot.lane.b32.xlu0 %v638_v34, %s5862_s14  ;;  %v758_v28 = vmul.f32 %v755_v16, %v5931_v0  ;;  %v852_v16 = vmul.f32 %v851_v4, %v5933_v2 }
  0xa4   :  { %v6067_v44 = vpop.permute.xlu1 %119  ;;  %v6069_v45 = vpop.permute.xlu0 %115  ;;  %v767_v34 = vrot.slane %v758_v28, 1 }
  0xa6   :  { %648 = vrot.lane.b32.xlu1 %v640_v35, %s5862_s14  ;;  %646 = vrot.lane.b32.xlu0 %v641_v40, %s5862_s14  ;;  %v789_v35 = vmul.f32 %v787_v31, %v5939_v6  ;;  %v769_v40 = vsel %vm427_vm0, %v767_v34, %v768_v32  ;;  %v885_v31 = vmul.f32 %v883_v20, %v5939_v6 }
  0xa8   :  { %v6076_v52 = vpop.permute.xlu1 %121  ;;  %v6078_v53 = vpop.permute.xlu0 %117  ;;  %v893_v43 = vrot.slane %v885_v31, 1 }
  0xaa   :  { %676 = vrot.lane.b32.xlu1 %v669_v41, %s5862_s14  ;;  %674 = vrot.lane.b32.xlu0 %v670_v48, %s5862_s14  ;;  %v797_v41 = vrot.slane %v789_v35, 1  ;;  %v819_v48 = vstv %s5588_s4  ;;  %v884_v35 = vmul.f32 %v883_v20, %v5933_v2  ;;  %s5560_s4 = sld [smem:[#allocation3 + $0x6c]] }
  0xab   :  { %v821_v54 = vmul.f32 %v819_v48, %v5939_v6  ;;  %v823_v58 = vmul.f32 %v819_v48, %v5935_v3  ;;  %v822_v61 = vmul.f32 %v819_v48, %v5931_v0 }
  0xac   :  { %v6085_v59 = vpop.permute.xlu1 %143  ;;  %v6087_v60 = vpop.permute.xlu0 %141  ;;  %v798_v50 = vsel %vm427_vm0, %v796_v42, %v797_v41 }
  0xad   :  { %v832_v12 = vrot.slane %v823_v58, 1  ;;  %v831_v13 = vrot.slane %v822_v61, 1 }
  0xae   :  { %680 = vrot.lane.b32.xlu1 %v672_v47, %s5862_s14  ;;  %678 = vrot.lane.b32.xlu0 %v673_v55, %s5862_s14  ;;  %v820_v55 = vmul.f32 %v819_v48, %v5933_v2  ;;  %v892_v48 = vrot.slane %v884_v35, 1 }
  0xaf   :  { %v833_v21 = vsel %vm427_vm0, %v831_v13, %v832_v12 }
  0xb0   :  { %v6094_v7 = vpop.permute.xlu1 %147  ;;  %v6096_v8 = vpop.permute.xlu0 %145  ;;  %v828_v1 = vrot.slane %v820_v55, 1  ;;  %v894_v61 = vsel %vm427_vm0, %v892_v48, %v893_v43 }
  0xb2   :  { %708 = vrot.lane.b32.xlu1 %v701_v56, %s5862_s14  ;;  %706 = vrot.lane.b32.xlu0 %v702_v63, %s5862_s14  ;;  %v829_v63 = vrot.slane %v821_v54, 1 }
  0xb4   :  { %v6103_v14 = vpop.permute.xlu1 %169  ;;  %v6105_v15 = vpop.permute.xlu0 %167 }
  0xb5   :  { %11300 = vst [vmem:[#allocation12_spill] sm:$0xff] %v6103_v14  ;;  %11301 = vst [vmem:[#allocation13_spill] sm:$0xff] %v6105_v15 }
  0xb6   :  { %712 = vrot.lane.b32.xlu1 %v704_v62, %s5862_s14  ;;  %710 = vrot.lane.b32.xlu0 %v705_v10, %s5862_s14  ;;  %v801_v62 = vsel %vm427_vm0, %v799_v51, %v800_v49  ;;  %v853_v10 = vmul.f32 %v851_v4, %v5939_v6 }
  0xb8   :  { %v6112_v22 = vpop.permute.xlu1 %173  ;;  %v6114_v23 = vpop.permute.xlu0 %171  ;;  %v861_v24 = vrot.slane %v853_v10, 1 }
  0xb9   :  { %11302 = vst [vmem:[#allocation14_spill] sm:$0xff] %v6112_v22  ;;  %11303 = vst [vmem:[#allocation15_spill] sm:$0xff] %v6114_v23 }
  0xba   :  { %740 = vrot.lane.b32.xlu1 %v733_v11, %s5862_s14  ;;  %738 = vrot.lane.b32.xlu0 %v734_v18, %s5862_s14  ;;  %v830_v11 = vsel %vm427_vm0, %v828_v1, %v829_v63 }
  0xbc   :  { %v6121_v29 = vpop.permute.xlu1 %195  ;;  %v6123_v30 = vpop.permute.xlu0 %193 }
  0xbd   :  { %11304 = vst [vmem:[#allocation16_spill] sm:$0xff] %v6121_v29  ;;  %11305 = vst [vmem:[#allocation17_spill] sm:$0xff] %v6123_v30 }
  0xbe   :  { %744 = vrot.lane.b32.xlu1 %v736_v17, %s5862_s14  ;;  %742 = vrot.lane.b32.xlu0 %v737_v25, %s5862_s14  ;;  %v860_v25 = vrot.slane %v852_v16, 1  ;;  %v1092_v16 = vstv %s5598_s8  ;;  %s5561_s8 = sld [smem:[#allocation3 + $0x87]] }
  0xc0   :  { %v6130_v37 = vpop.permute.xlu1 %199  ;;  %v6132_v38 = vpop.permute.xlu0 %197 }
  0xc1   :  { %11306 = vst [vmem:[#allocation18_spill] sm:$0xff] %v6130_v37  ;;  %11307 = vst [vmem:[#allocation19_spill] sm:$0xff] %v6132_v38 }
  0xc2   :  { %772 = vrot.lane.b32.xlu1 %v765_v26, %s5863_s20  ;;  %770 = vrot.lane.b32.xlu0 %v766_v33, %s5863_s20  ;;  %v854_v26 = vmul.f32 %v851_v4, %v5931_v0  ;;  %v864_v33 = vrot.slane %v855_v19, 1 }
  0xc4   :  { %v6139_v46 = vpop.permute.xlu1 %221  ;;  %v6141_v47 = vpop.permute.xlu0 %219  ;;  %v863_v34 = vrot.slane %v854_v26, 1 }
  0xc5   :  { %11308 = vst [vmem:[#allocation20_spill] sm:$0xff] %v6141_v47 }
  0xc6   :  { %776 = vrot.lane.b32.xlu1 %v768_v32, %s5863_s20  ;;  %774 = vrot.lane.b32.xlu0 %v769_v40, %s5863_s20  ;;  %v862_v32 = vsel %vm427_vm0, %v860_v25, %v861_v24  ;;  %v887_v40 = vmul.f32 %v883_v20, %v5935_v3  ;;  %v865_v42 = vsel %vm427_vm0, %v863_v34, %v864_v33 }
  0xc8   :  { %v6148_v56 = vpop.permute.xlu1 %225  ;;  %v6150_v57 = vpop.permute.xlu0 %223  ;;  %v896_v54 = vrot.slane %v887_v40, 1 }
  0xc9   :  { %11309 = vst [vmem:[#allocation21_spill] sm:$0xff] %v6150_v57 }
  0xca   :  { %804 = vrot.lane.b32.xlu1 %v797_v41, %s5863_s20  ;;  %802 = vrot.lane.b32.xlu0 %v798_v50, %s5863_s20  ;;  %v886_v41 = vmul.f32 %v883_v20, %v5931_v0 }
  0xcc   :  { %v6157_v5 = vpop.permute.xlu1 %247  ;;  %v6159_v9 = vpop.permute.xlu0 %245  ;;  %v895_v55 = vrot.slane %v886_v41, 1  ;;  %v1096_v41 = vmul.f32 %v1092_v16, %v5935_v3 }
  0xcd   :  { %11310 = vst [vmem:[#allocation22_spill] sm:$0xff] %v6159_v9 }
  0xce   :  { %808 = vrot.lane.b32.xlu1 %v800_v49, %s5863_s20  ;;  %806 = vrot.lane.b32.xlu0 %v801_v62, %s5863_s20  ;;  %v915_v49 = vstv %s5591_s7  ;;  %v897_v4 = vsel %vm427_vm0, %v895_v55, %v896_v54  ;;  %v1105_v55 = vrot.slane %v1096_v41, 2  ;;  %s5634_s7 = sld [smem:[#allocation3 + $0xd]] }
  0xcf   :  { %v917_v58 = vmul.f32 %v915_v49, %v5939_v6  ;;  %v916_v62 = vmul.f32 %v915_v49, %v5933_v2  ;;  %v918_v13 = vmul.f32 %v915_v49, %v5931_v0 }
  0xd0   :  { %v6166_v17 = vpop.permute.xlu1 %251  ;;  %v6168_v18 = vpop.permute.xlu0 %249 }
  0xd1   :  { %11311 = vst [vmem:[#allocation23_spill] sm:$0xff] %v6168_v18  ;;  %v925_v10 = vrot.slane %v917_v58, 1  ;;  %v927_v31 = vrot.slane %v918_v13, 1 }
  0xd2   :  { %836 = vrot.lane.b32.xlu1 %v829_v63, %s5863_s20  ;;  %834 = vrot.lane.b32.xlu0 %v830_v11, %s5863_s20  ;;  %v924_v11 = vrot.slane %v916_v62, 1 }
  0xd4   :  { %v6175_v27 = vpop.permute.xlu1 %273  ;;  %v6177_v28 = vpop.permute.xlu0 %271  ;;  %v926_v25 = vsel %vm427_vm0, %v924_v11, %v925_v10 }
  0xd5   :  { %11312 = vst [vmem:[#allocation24_spill] sm:$0xff] %v6175_v27  ;;  %11313 = vst [vmem:[#allocation25_spill] sm:$0xff] %v6177_v28 }
  0xd6   :  { %840 = vrot.lane.b32.xlu1 %v832_v12, %s5863_s20  ;;  %838 = vrot.lane.b32.xlu0 %v833_v21, %s5863_s20  ;;  %v919_v12 = vmul.f32 %v915_v49, %v5935_v3  ;;  %v1094_v21 = vmul.f32 %v1092_v16, %v5939_v6  ;;  %v1124_v49 = vstv %s5599_s10  ;;  %s5579_s10 = sld [smem:[#allocation3 + $0x8a]] }
  0xd7   :  { %v1125_v62 = vmul.f32 %v1124_v49, %v5933_v2  ;;  %v1128_v11 = vmul.f32 %v1124_v49, %v5935_v3 }
  0xd8   :  { %v6184_v36 = vpop.permute.xlu1 %277  ;;  %v6186_v39 = vpop.permute.xlu0 %275  ;;  %v928_v26 = vrot.slane %v919_v12, 1  ;;  %v1102_v34 = vrot.slane %v1094_v21, 2  ;;  %v1127_v12 = vmul.f32 %v1124_v49, %v5931_v0 }
  0xd9   :  { %11314 = vst [vmem:[#allocation26_spill] sm:$0xff] %v6184_v36  ;;  %11315 = vst [vmem:[#allocation27_spill] sm:$0xff] %v6186_v39  ;;  %v1133_v21 = vrot.slane %v1125_v62, 2  ;;  %v1992_v39 = vstv %s5634_s7  ;;  %s5661_s7 = sld [smem:[#allocation3 + $0x62]] }
  0xda   :  { %868 = vrot.lane.b32.xlu1 %v861_v24, %s5863_s20  ;;  %866 = vrot.lane.b32.xlu0 %v862_v32, %s5863_s20  ;;  %v1093_v24 = vmul.f32 %v1092_v16, %v5933_v2  ;;  %v929_v40 = vsel %vm427_vm0, %v927_v31, %v928_v26  ;;  %v1137_v31 = vrot.slane %v1128_v11, 2  ;;  %v1188_v11 = vstv %s5601_s12  ;;  %s6635_s12 = sld [smem:[#allocation3 + $0x28]] }
  0xdc   :  { %v6193_v50 = vpop.permute.xlu1 %299  ;;  %v6195_v51 = vpop.permute.xlu0 %297  ;;  %v1101_v35 = vrot.slane %v1093_v24, 2  ;;  %v1156_v24 = vstv %s5600_s11  ;;  %s5596_s11 = sld [smem:[#allocation3 + $0x72]]  ;;  %v6651_v18 = vstv %s5579_s10  ;;  %s5663_s10 = sld [smem:[#allocation3 + $0x98]] }
  0xdd   :  { %11316 = vst [vmem:[#allocation28_spill] sm:$0xff] %v6193_v50  ;;  %11317 = vst [vmem:[#allocation29_spill] sm:$0xff] %v6195_v51  ;;  %v1157_v41 = vmul.f32 %v1156_v24, %v5933_v2  ;;  %v1159_v62 = vmul.f32 %v1156_v24, %v5931_v0  ;;  %v1822_v50 = vstv %s5627_s6  ;;  %s5660_s6 = sld [smem:[#allocation3 + $0x47]] }
  0xde   :  { %872 = vrot.lane.b32.xlu1 %v864_v33, %s5863_s20  ;;  %870 = vrot.lane.b32.xlu0 %v865_v42, %s5863_s20  ;;  %v1095_v42 = vmul.f32 %v1092_v16, %v5931_v0 }
  0xe0   :  { %v6202_v63 = vpop.permute.xlu1 %303  ;;  %v6204_v1 = vpop.permute.xlu0 %301  ;;  %v1104_v58 = vrot.slane %v1095_v42, 2 }
  0xe1   :  { %11318 = vst [vmem:[#allocation30_spill] sm:$0xff] %v6202_v63  ;;  %11319 = vst [vmem:[#allocation31_spill] sm:$0xff] %v6204_v1  ;;  %v6610_v1 = vstv %s5560_s4  ;;  %s5658_s4 = sld [smem:[#allocation3 + $0x11]] }
  0xe2   :  { %900 = vrot.lane.b32.xlu1 %v893_v43, %s5863_s20  ;;  %898 = vrot.lane.b32.xlu0 %v894_v61, %s5863_s20  ;;  %v1126_v61 = vmul.f32 %v1124_v49, %v5939_v6  ;;  %v1106_v13 = vsel %vm956_vm1, %v1104_v58, %v1105_v55  ;;  %v1165_v58 = vrot.slane %v1157_v41, 2  ;;  %v6653_v9 = vstv %s5596_s11  ;;  %s5670_s11 = sld [smem:[#allocation3 + $0x13]] }
  0xe3   :  { %11402 = vst [vmem:[#allocation114_spill] sm:$0xff] %v6653_v9 }
  0xe4   :  { %v6211_v19 = vpop.permute.xlu1 %325  ;;  %v6213_v20 = vpop.permute.xlu0 %323  ;;  %v1134_v16 = vrot.slane %v1126_v61, 2  ;;  %v1160_v61 = vmul.f32 %v1156_v24, %v5935_v3 }
  0xe5   :  { %11320 = vst [vmem:[#allocation32_spill] sm:$0xff] %v6211_v19  ;;  %11321 = vst [vmem:[#allocation33_spill] sm:$0xff] %v6213_v20  ;;  %v1770_v20 = vstv %s5625_s29  ;;  %s5656_s29 = sld [smem:[#allocation3 + $0x7c]] }
  0xe6   :  { %904 = vrot.lane.b32.xlu1 %v896_v54, %s5863_s20  ;;  %902 = vrot.lane.b32.xlu0 %v897_v4, %s5863_s20  ;;  %v1103_v54 = vsel %vm956_vm1, %v1101_v35, %v1102_v34  ;;  %v1158_v35 = vmul.f32 %v1156_v24, %v5939_v6 }
  0xe8   :  { %v6220_v32 = vpop.permute.xlu1 %329  ;;  %v6222_v33 = vpop.permute.xlu0 %327 }
  0xe9   :  { %11322 = vst [vmem:[#allocation34_spill] sm:$0xff] %v6220_v32  ;;  %11323 = vst [vmem:[#allocation35_spill] sm:$0xff] %v6222_v33 }
  0xea   :  { %932 = vrot.lane.b32.xlu1 %v925_v10, %s5863_s20  ;;  %930 = vrot.lane.b32.xlu0 %v926_v25, %s5863_s20 }
  0xec   :  { %v6229_v43 = vpop.permute.xlu1 %351  ;;  %v6231_v48 = vpop.permute.xlu0 %349 }
  0xed   :  { %11324 = vst [vmem:[#allocation36_spill] sm:$0xff] %v6229_v43  ;;  %11325 = vst [vmem:[#allocation37_spill] sm:$0xff] %v6231_v48 }
  0xee   :  { %936 = vrot.lane.b32.xlu1 %v928_v26, %s5863_s20  ;;  %934 = vrot.lane.b32.xlu0 %v929_v40, %s5863_s20  ;;  %v1135_v40 = vsel %vm956_vm1, %v1133_v21, %v1134_v16  ;;  %v1189_v21 = vmul.f32 %v1188_v11, %v5933_v2 }
  0xf0   :  { %v6238_v4 = vpop.permute.xlu1 %355  ;;  %v6240_v10 = vpop.permute.xlu0 %353 }
  0xf1   :  { %11326 = vst [vmem:[#allocation38_spill] sm:$0xff] %v6238_v4  ;;  %11327 = vst [vmem:[#allocation39_spill] sm:$0xff] %v6240_v10 }
  0xf2   :  { %1109 = vrot.lane.b32.xlu1 %v1102_v34, %s5862_s14  ;;  %1107 = vrot.lane.b32.xlu0 %v1103_v54, %s5862_s14  ;;  %v1136_v34 = vrot.slane %v1127_v12, 2 }
  0xf4   :  { %v6247_v25 = vpop.permute.xlu1 %377  ;;  %v6249_v26 = vpop.permute.xlu0 %375  ;;  %v1138_v54 = vsel %vm956_vm1, %v1136_v34, %v1137_v31 }
  0xf5   :  { %11328 = vst [vmem:[#allocation40_spill] sm:$0xff] %v6249_v26  ;;  %v1191_v26 = vmul.f32 %v1188_v11, %v5931_v0 }
  0xf6   :  { %1113 = vrot.lane.b32.xlu1 %v1105_v55, %s5862_s14  ;;  %1111 = vrot.lane.b32.xlu0 %v1106_v13, %s5862_s14  ;;  %v1166_v55 = vrot.slane %v1158_v35, 2  ;;  %v1169_v35 = vrot.slane %v1160_v61, 2 }
  0xf8   :  { %v6256_v42 = vpop.permute.xlu1 %381  ;;  %v6258_v49 = vpop.permute.xlu0 %379  ;;  %v1167_v34 = vsel %vm956_vm1, %v1165_v58, %v1166_v55 }
  0xf9   :  { %11329 = vst [vmem:[#allocation41_spill] sm:$0xff] %v6258_v49  ;;  %v1192_v49 = vmul.f32 %v1188_v11, %v5935_v3 }
  0xfa   :  { %1141 = vrot.lane.b32.xlu1 %v1134_v16, %s5862_s14  ;;  %1139 = vrot.lane.b32.xlu0 %v1135_v40, %s5862_s14  ;;  %v1190_v16 = vmul.f32 %v1188_v11, %v5939_v6  ;;  %v1168_v40 = vrot.slane %v1159_v62, 2  ;;  %v1220_v62 = vstv %s5602_s13  ;;  %s6655_s13 = sld [smem:[#allocation3 + $0x8d]] }
  0xfc   :  { %v6265_v12 = vpop.permute.xlu1 %403  ;;  %v6267_v13 = vpop.permute.xlu0 %401 }
  0xfd   :  { %11330 = vst [vmem:[#allocation42_spill] sm:$0xff] %v6267_v13  ;;  %v1198_v13 = vrot.slane %v1190_v16, 2  ;;  %v1201_v16 = vrot.slane %v1192_v49, 2 }
  0xfe   :  { %1145 = vrot.lane.b32.xlu1 %v1137_v31, %s5862_s14  ;;  %1143 = vrot.lane.b32.xlu0 %v1138_v54, %s5862_s14  ;;  %v1197_v31 = vrot.slane %v1189_v21, 2  ;;  %v1170_v54 = vsel %vm956_vm1, %v1168_v40, %v1169_v35  ;;  %v1200_v21 = vrot.slane %v1191_v26, 2  ;;  %v1221_v40 = vmul.f32 %v1220_v62, %v5933_v2 }
 0x100   :  { %v6274_v41 = vpop.permute.xlu1 %407  ;;  %v6276_v24 = vpop.permute.xlu0 %405  ;;  %v1229_v26 = vrot.slane %v1221_v40, 2  ;;  %v6714_v30 = vstv %s6655_s13  ;;  %s5672_s13 = sld [smem:[#allocation3 + $0x49]] }
 0x101   :  { %11331 = vst [vmem:[#allocation43_spill] sm:$0xff] %v6276_v24  ;;  %11411 = vst [vmem:[#allocation121_spill] sm:$0xff] %v6714_v30 }
 0x102   :  { %1173 = vrot.lane.b32.xlu1 %v1166_v55, %s5862_s14  ;;  %1171 = vrot.lane.b32.xlu0 %v1167_v34, %s5862_s14  ;;  %v1199_v55 = vsel %vm956_vm1, %v1197_v31, %v1198_v13  ;;  %v1222_v34 = vmul.f32 %v1220_v62, %v5939_v6  ;;  %v1202_v31 = vsel %vm956_vm1, %v1200_v21, %v1201_v16 }
 0x104   :  { %v6283_v58 = vpop.permute.xlu1 %580  ;;  %v6285_v61 = vpop.permute.xlu0 %578  ;;  %v1230_v49 = vrot.slane %v1222_v34, 2 }
 0x105   :  { %11332 = vst [vmem:[#allocation44_spill] sm:$0xff] %v6283_v58  ;;  %11333 = vst [vmem:[#allocation45_spill] sm:$0xff] %v6285_v61  ;;  %v1252_v61 = vstv %s5603_s2  ;;  %s6680_s2 = sld [smem:[#allocation3 + $0x75]] }
 0x106   :  { %1177 = vrot.lane.b32.xlu1 %v1169_v35, %s5862_s14  ;;  %1175 = vrot.lane.b32.xlu0 %v1170_v54, %s5862_s14  ;;  %v1224_v35 = vmul.f32 %v1220_v62, %v5935_v3  ;;  %v1223_v54 = vmul.f32 %v1220_v62, %v5931_v0  ;;  %v1231_v62 = vsel %vm956_vm1, %v1229_v26, %v1230_v49 }
 0x107   :  { %v1253_v21 = vmul.f32 %v1252_v61, %v5933_v2 }
 0x108   :  { %v6292_v24 = vpop.permute.xlu1 %584  ;;  %v6294_v11 = vpop.permute.xlu0 %582 }
 0x109   :  { %11334 = vst [vmem:[#allocation46_spill] sm:$0xff] %v6292_v24  ;;  %11335 = vst [vmem:[#allocation47_spill] sm:$0xff] %v6294_v11  ;;  %v1254_v11 = vmul.f32 %v1252_v61, %v5939_v6 }
 0x10a   :  { %1205 = vrot.lane.b32.xlu1 %v1198_v13, %s5862_s14  ;;  %1203 = vrot.lane.b32.xlu0 %v1199_v55, %s5862_s14  ;;  %v1233_v13 = vrot.slane %v1224_v35, 2  ;;  %v1232_v55 = vrot.slane %v1223_v54, 2  ;;  %v1256_v35 = vmul.f32 %v1252_v61, %v5935_v3  ;;  %v1255_v54 = vmul.f32 %v1252_v61, %v5931_v0 }
 0x10c   :  { %v6301_v58 = vpop.permute.xlu1 %612  ;;  %v6303_v10 = vpop.permute.xlu0 %610 }
 0x10d   :  { %11336 = vst [vmem:[#allocation48_spill] sm:$0xff] %v6301_v58  ;;  %11337 = vst [vmem:[#allocation49_spill] sm:$0xff] %v6303_v10  ;;  %v1262_v10 = vrot.slane %v1254_v11, 2  ;;  %v1284_v58 = vstv %s5604_s15  ;;  %s6689_s15 = sld [smem:[#allocation3 + $0x43]] }
 0x10e   :  { %1209 = vrot.lane.b32.xlu1 %v1201_v16, %s5862_s14  ;;  %1207 = vrot.lane.b32.xlu0 %v1202_v31, %s5862_s14  ;;  %v1234_v16 = vsel %vm956_vm1, %v1232_v55, %v1233_v13  ;;  %v1261_v31 = vrot.slane %v1253_v21, 2  ;;  %v1285_v55 = vmul.f32 %v1284_v58, %v5933_v2  ;;  %v1264_v21 = vrot.slane %v1255_v54, 2 }
 0x10f   :  { %v1316_v54 = vstv %s5605_s16  ;;  %s6724_s16 = sld [smem:[#allocation3 + $0x90]] }
 0x110   :  { %v6310_v34 = vpop.permute.xlu1 %616  ;;  %v6312_v40 = vpop.permute.xlu0 %614  ;;  %v1263_v11 = vsel %vm956_vm1, %v1261_v31, %v1262_v10 }
 0x111   :  { %11338 = vst [vmem:[#allocation50_spill] sm:$0xff] %v6310_v34  ;;  %11339 = vst [vmem:[#allocation51_spill] sm:$0xff] %v6312_v40  ;;  %v1287_v34 = vmul.f32 %v1284_v58, %v5931_v0 }
 0x112   :  { %1237 = vrot.lane.b32.xlu1 %v1230_v49, %s5862_s14  ;;  %1235 = vrot.lane.b32.xlu0 %v1231_v62, %s5862_s14  ;;  %v1286_v49 = vmul.f32 %v1284_v58, %v5939_v6  ;;  %v1265_v62 = vrot.slane %v1256_v35, 2 }
 0x114   :  { %v6319_v26 = vpop.permute.xlu1 %644  ;;  %v6321_v24 = vpop.permute.xlu0 %642 }
 0x115   :  { %11340 = vst [vmem:[#allocation52_spill] sm:$0xff] %v6319_v26  ;;  %11341 = vst [vmem:[#allocation53_spill] sm:$0xff] %v6321_v24  ;;  %v1294_v24 = vrot.slane %v1286_v49, 2  ;;  %v1288_v26 = vmul.f32 %v1284_v58, %v5935_v3 }
 0x116   :  { %1241 = vrot.lane.b32.xlu1 %v1233_v13, %s5862_s14  ;;  %1239 = vrot.lane.b32.xlu0 %v1234_v16, %s5862_s14  ;;  %v1293_v13 = vrot.slane %v1285_v55, 2  ;;  %v1266_v16 = vsel %vm956_vm1, %v1264_v21, %v1265_v62  ;;  %v1296_v55 = vrot.slane %v1287_v34, 2  ;;  %v1317_v21 = vmul.f32 %v1316_v54, %v5933_v2 }
 0x117   :  { %v1297_v49 = vrot.slane %v1288_v26, 2 }
 0x118   :  { %v6328_v40 = vpop.permute.xlu1 %648  ;;  %v6330_v61 = vpop.permute.xlu0 %646  ;;  %v1325_v34 = vrot.slane %v1317_v21, 2 }
 0x119   :  { %11342 = vst [vmem:[#allocation54_spill] sm:$0xff] %v6328_v40  ;;  %11343 = vst [vmem:[#allocation55_spill] sm:$0xff] %v6330_v61 }
 0x11a   :  { %1269 = vrot.lane.b32.xlu1 %v1262_v10, %s5862_s14  ;;  %1267 = vrot.lane.b32.xlu0 %v1263_v11, %s5862_s14  ;;  %v1295_v10 = vsel %vm956_vm1, %v1293_v13, %v1294_v24  ;;  %v1318_v11 = vmul.f32 %v1316_v54, %v5939_v6  ;;  %v1298_v13 = vsel %vm956_vm1, %v1296_v55, %v1297_v49 }
 0x11c   :  { %v6337_v31 = vpop.permute.xlu1 %676  ;;  %v6339_v35 = vpop.permute.xlu0 %674  ;;  %v1326_v26 = vrot.slane %v1318_v11, 2 }
 0x11d   :  { %11344 = vst [vmem:[#allocation56_spill] sm:$0xff] %v6337_v31  ;;  %11345 = vst [vmem:[#allocation57_spill] sm:$0xff] %v6339_v35  ;;  %v1348_v35 = vstv %s5606_s17  ;;  %s6752_s17 = sld [smem:[#allocation3 + $0x5e]] }
 0x11e   :  { %1273 = vrot.lane.b32.xlu1 %v1265_v62, %s5862_s14  ;;  %1271 = vrot.lane.b32.xlu0 %v1266_v16, %s5862_s14  ;;  %v1320_v62 = vmul.f32 %v1316_v54, %v5935_v3  ;;  %v1319_v16 = vmul.f32 %v1316_v54, %v5931_v0  ;;  %v1350_v3 = vmul.f32 %v1348_v35, %v5939_v6 }
 0x11f   :  { %v1327_v0 = vsel %vm956_vm1, %v1325_v34, %v1326_v26  ;;  %v1349_v54 = vmul.f32 %v1348_v35, %v5933_v2 }
 0x120   :  { %v6346_v61 = vpop.permute.xlu1 %680  ;;  %v6348_v58 = vpop.permute.xlu0 %678  ;;  %v1358_v21 = vrot.slane %v1350_v3, 2  ;;  %v5758_v3 = vld [vmem:[#allocation5] sm:$0xff] }
 0x121   :  { %11346 = vst [vmem:[#allocation58_spill] sm:$0xff] %v6346_v61  ;;  %11347 = vst [vmem:[#allocation59_spill] sm:$0xff] %v6348_v58 }
 0x122   :  { %1301 = vrot.lane.b32.xlu1 %v1294_v24, %s5863_s20  ;;  %1299 = vrot.lane.b32.xlu0 %v1295_v10, %s5863_s20  ;;  %v1329_v24 = vrot.slane %v1320_v62, 2  ;;  %v1328_v10 = vrot.slane %v1319_v16, 2  ;;  %v6371_v62 = vld [vmem:[#allocation5 + $0x38] sm:$0xff]  ;;  %v5756_v16 = vld [vmem:[#allocation5 + $0x30] sm:$0xff] }
 0x123   :  { %v1352_v6 = vmul.f32 %v6371_v62, %v1348_v35  ;;  %v1351_v34 = vmul.f32 %v5756_v16, %v1348_v35  ;;  %v90_v51 = vmul.f32 %v6371_v62, %v6610_v1 }
 0x124   :  { %v6355_v31 = vpop.permute.xlu1 %708  ;;  %v6357_v40 = vpop.permute.xlu0 %706 }
 0x125   :  { %11348 = vst [vmem:[#allocation60_spill] sm:$0xff] %v6357_v40  ;;  %v1380_v40 = vstv %s5607_s18  ;;  %v1360_v35 = vrot.slane %v1351_v34, 2  ;;  %s5638_s18 = sld [smem:[#allocation3 + $0x79]] }
 0x126   :  { %1305 = vrot.lane.b32.xlu1 %v1297_v49, %s5863_s20  ;;  %1303 = vrot.lane.b32.xlu0 %v1298_v13, %s5863_s20  ;;  %v1330_v49 = vsel %vm956_vm1, %v1328_v10, %v1329_v24  ;;  %v1357_v13 = vrot.slane %v1349_v54, 2  ;;  %v1384_v48 = vmul.f32 %v6371_v62, %v1380_v40  ;;  %v1383_v43 = vmul.f32 %v5756_v16, %v1380_v40 }
 0x128   :  { %v6364_v55 = vpop.permute.xlu1 %712  ;;  %v6366_v11 = vpop.permute.xlu0 %710  ;;  %v1359_v54 = vsel %vm956_vm1, %v1357_v13, %v1358_v21  ;;  %v1393_v34 = vrot.slane %v1384_v48, 2 }
 0x129   :  { %11349 = vst [vmem:[#allocation61_spill] sm:$0xff] %v6366_v11  ;;  %v1361_v11 = vrot.slane %v1352_v6, 2  ;;  %v1412_v6 = vstv %s5608_s19  ;;  %s5639_s19 = sld [smem:[#allocation3 + $0x94]] }
 0x12a   :  { %1333 = vrot.lane.b32.xlu1 %v1326_v26, %s5863_s20  ;;  %1331 = vrot.lane.b32.xlu0 %v1327_v0, %s5863_s20  ;;  %v6380_v26 = vld [vmem:[#allocation5 + $0x8] sm:$0xff]  ;;  %v1381_v0 = vmul.f32 %v5758_v3, %v1380_v40 }
 0x12b   :  { %v1382_v10 = vmul.f32 %v6380_v26, %v1380_v40 }
 0x12c   :  { %v6374_v2 = vpop.permute.xlu1 %740  ;;  %v6376_v58 = vpop.permute.xlu0 %738 }
 0x12d   :  { %11350 = vst [vmem:[#allocation62_spill] sm:$0xff] %v6376_v58  ;;  %v1362_v58 = vsel %vm956_vm1, %v1360_v35, %v1361_v11 }
 0x12e   :  { %1337 = vrot.lane.b32.xlu1 %v1329_v24, %s5863_s20  ;;  %1335 = vrot.lane.b32.xlu0 %v1330_v49, %s5863_s20  ;;  %v1390_v24 = vrot.slane %v1382_v10, 2  ;;  %v1389_v49 = vrot.slane %v1381_v0, 2  ;;  %v1392_v10 = vrot.slane %v1383_v43, 2  ;;  %v1414_v0 = vmul.f32 %v6380_v26, %v1412_v6 }
 0x130   :  { %v6384_v61 = vpop.permute.xlu1 %744  ;;  %v6386_v4 = vpop.permute.xlu0 %742 }
 0x131   :  { %11351 = vst [vmem:[#allocation63_spill] sm:$0xff] %v6386_v4  ;;  %v1422_v4 = vrot.slane %v1414_v0, 2 }
 0x132   :  { %1365 = vrot.lane.b32.xlu1 %v1358_v21, %s5863_s20  ;;  %1363 = vrot.lane.b32.xlu0 %v1359_v54, %s5863_s20  ;;  %v1391_v21 = vsel %vm956_vm1, %v1389_v49, %v1390_v24  ;;  %v1413_v54 = vmul.f32 %v5758_v3, %v1412_v6 }
 0x134   :  { %v6392_v33 = vpop.permute.xlu1 %772  ;;  %v6394_v13 = vpop.permute.xlu0 %770  ;;  %v1421_v49 = vrot.slane %v1413_v54, 2 }
 0x135   :  { %11352 = vst [vmem:[#allocation64_spill] sm:$0xff] %v6392_v33  ;;  %11353 = vst [vmem:[#allocation65_spill] sm:$0xff] %v6394_v13  ;;  %v1416_v13 = vmul.f32 %v6371_v62, %v1412_v6  ;;  %v1444_v33 = vstv %s5609_s21  ;;  %s5640_s21 = sld [smem:[#allocation3 + $0xe]] }
 0x136   :  { %1369 = vrot.lane.b32.xlu1 %v1361_v11, %s5863_s20  ;;  %1367 = vrot.lane.b32.xlu0 %v1362_v58, %s5863_s20  ;;  %v1415_v11 = vmul.f32 %v5756_v16, %v1412_v6  ;;  %v1394_v58 = vsel %vm956_vm1, %v1392_v10, %v1393_v34  ;;  %v1445_v6 = vmul.f32 %v5758_v3, %v1444_v33 }
 0x138   :  { %v6400_v35 = vpop.permute.xlu1 %776  ;;  %v6402_v40 = vpop.permute.xlu0 %774  ;;  %v1453_v54 = vrot.slane %v1445_v6, 2 }
 0x139   :  { %11354 = vst [vmem:[#allocation66_spill] sm:$0xff] %v6400_v35  ;;  %11355 = vst [vmem:[#allocation67_spill] sm:$0xff] %v6402_v40  ;;  %v1425_v40 = vrot.slane %v1416_v13, 2  ;;  %v1446_v35 = vmul.f32 %v6380_v26, %v1444_v33  ;;  %v1448_v13 = vmul.f32 %v6371_v62, %v1444_v33 }
 0x13a   :  { %1397 = vrot.lane.b32.xlu1 %v1390_v24, %s5863_s20  ;;  %1395 = vrot.lane.b32.xlu0 %v1391_v21, %s5863_s20  ;;  %v1424_v24 = vrot.slane %v1415_v11, 2  ;;  %v1423_v21 = vsel %vm956_vm1, %v1421_v49, %v1422_v4  ;;  %v1447_v11 = vmul.f32 %v5756_v16, %v1444_v33  ;;  %v6438_v16 = vld [vmem:[#allocation5 + $0x18] sm:$0xff] }
 0x13b   :  { %v1457_v3 = vrot.slane %v1448_v13, 2  ;;  %v6450_v13 = vld [vmem:[#allocation5 + $0x48] sm:$0xff] }
 0x13c   :  { %v6408_v48 = vpop.permute.xlu1 %804  ;;  %v6410_v43 = vpop.permute.xlu0 %802  ;;  %v1426_v0 = vsel %vm956_vm1, %v1424_v24, %v1425_v40  ;;  %v1536_v24 = vstv %s5616_s22  ;;  %s5641_s22 = sld [smem:[#allocation3 + $0x29]] }
 0x13d   :  { %11356 = vst [vmem:[#allocation68_spill] sm:$0xff] %v6408_v48  ;;  %11357 = vst [vmem:[#allocation69_spill] sm:$0xff] %v6410_v43  ;;  %v1744_v43 = vstv %s5624_s1  ;;  %s5655_s1 = sld [smem:[#allocation3 + $0x61]] }
 0x13e   :  { %1401 = vrot.lane.b32.xlu1 %v1393_v34, %s5863_s20  ;;  %1399 = vrot.lane.b32.xlu0 %v1394_v58, %s5863_s20  ;;  %v1454_v34 = vrot.slane %v1446_v35, 2 }
 0x140   :  { %v6416_v32 = vpop.permute.xlu1 %808  ;;  %v6418_v10 = vpop.permute.xlu0 %806 }
 0x141   :  { %11358 = vst [vmem:[#allocation70_spill] sm:$0xff] %v6416_v32  ;;  %11359 = vst [vmem:[#allocation71_spill] sm:$0xff] %v6418_v10 }
 0x142   :  { %1429 = vrot.lane.b32.xlu1 %v1422_v4, %s5863_s20  ;;  %1427 = vrot.lane.b32.xlu0 %v1423_v21, %s5863_s20  ;;  %v1455_v4 = vsel %vm956_vm1, %v1453_v54, %v1454_v34  ;;  %v1456_v21 = vrot.slane %v1447_v11, 2  ;;  %v6452_v11 = vld [vmem:[#allocation5 + $0x40] sm:$0xff] }
 0x144   :  { %v6424_v58 = vpop.permute.xlu1 %836  ;;  %v6426_v49 = vpop.permute.xlu0 %834  ;;  %v1458_v33 = vsel %vm956_vm1, %v1456_v21, %v1457_v3 }
 0x145   :  { %11360 = vst [vmem:[#allocation72_spill] sm:$0xff] %v6424_v58  ;;  %11361 = vst [vmem:[#allocation73_spill] sm:$0xff] %v6426_v49  ;;  %v1614_v58 = vstv %s5619_s25  ;;  %s5644_s25 = sld [smem:[#allocation3 + $0x7a]] }
 0x146   :  { %1433 = vrot.lane.b32.xlu1 %v1425_v40, %s5863_s20  ;;  %1431 = vrot.lane.b32.xlu0 %v1426_v0, %s5863_s20  ;;  %v6440_v40 = vld [vmem:[#allocation5 + $0x10] sm:$0xff] }
 0x147   :  { %v1537_v54 = vmul.f32 %v1536_v24, %v6440_v40 }
 0x148   :  { %v6431_v10 = vpop.permute.xlu1 %840  ;;  %v6433_v35 = vpop.permute.xlu0 %838 }
 0x149   :  { %11362 = vst [vmem:[#allocation74_spill] sm:$0xff] %v6431_v10  ;;  %11363 = vst [vmem:[#allocation75_spill] sm:$0xff] %v6433_v35  ;;  %v1588_v10 = vstv %s5618_s24  ;;  %s5643_s24 = sld [smem:[#allocation3 + $0x5f]] }
 0x14a   :  { %1461 = vrot.lane.b32.xlu1 %v1454_v34, %s5863_s20  ;;  %1459 = vrot.lane.b32.xlu0 %v1455_v4, %s5863_s20  ;;  %v1538_v34 = vmul.f32 %v1536_v24, %v6438_v16 }
 0x14c   :  { %v6442_v6 = vpop.permute.xlu1 %868  ;;  %v6444_v0 = vpop.permute.xlu0 %866 }
 0x14d   :  { %11364 = vst [vmem:[#allocation76_spill] sm:$0xff] %v6442_v6  ;;  %11365 = vst [vmem:[#allocation77_spill] sm:$0xff] %v6444_v0  ;;  %v1562_v0 = vstv %s5617_s23  ;;  %s5642_s23 = sld [smem:[#allocation3 + $0x44]] }
 0x14e   :  { %1465 = vrot.lane.b32.xlu1 %v1457_v3, %s5863_s20  ;;  %1463 = vrot.lane.b32.xlu0 %v1458_v33, %s5863_s20  ;;  %v1540_v3 = vmul.f32 %v1536_v24, %v6450_v13  ;;  %v1539_v33 = vmul.f32 %v1536_v24, %v6452_v11  ;;  %v1566_v24 = vmul.f32 %v1562_v0, %v6450_v13 }
 0x150   :  { %v6454_v4 = vpop.permute.xlu1 %872  ;;  %v6456_v21 = vpop.permute.xlu0 %870 }
 0x151   :  { %11366 = vst [vmem:[#allocation78_spill] sm:$0xff] %v6454_v4  ;;  %11367 = vst [vmem:[#allocation79_spill] sm:$0xff] %v6456_v21  ;;  %v1564_v21 = vmul.f32 %v1562_v0, %v6438_v16 }
 0x152   :  { %1547 = vrot.lane.b32.xlu1 %v1538_v34, %s5862_s14  ;;  %1545 = vrot.lane.b32.xlu0 %v1537_v54, %s5862_s14  ;;  %v1563_v34 = vmul.f32 %v1562_v0, %v6440_v40 }
 0x154   :  { %v6462_v6 = vpop.permute.xlu1 %900  ;;  %v6464_v35 = vpop.permute.xlu0 %898 }
 0x155   :  { %11368 = vst [vmem:[#allocation80_spill] sm:$0xff] %v6464_v35  ;;  %v1565_v35 = vmul.f32 %v1562_v0, %v6452_v11  ;;  %v1592_v0 = vmul.f32 %v1588_v10, %v6450_v13 }
 0x156   :  { %1551 = vrot.lane.b32.xlu1 %v1540_v3, %s5862_s14  ;;  %1549 = vrot.lane.b32.xlu0 %v1539_v33, %s5862_s14 }
 0x158   :  { %v6470_v4 = vpop.permute.xlu1 %904  ;;  %v6472_v54 = vpop.permute.xlu0 %902 }
 0x159   :  { %11369 = vst [vmem:[#allocation81_spill] sm:$0xff] %v6472_v54  ;;  %v1590_v54 = vmul.f32 %v1588_v10, %v6438_v16 }
 0x15a   :  { %1573 = vrot.lane.b32.xlu1 %v1564_v21, %s5862_s14  ;;  %1571 = vrot.lane.b32.xlu0 %v1563_v34, %s5862_s14  ;;  %v1589_v21 = vmul.f32 %v1588_v10, %v6440_v40 }
 0x15c   :  { %v6478_v3 = vpop.permute.xlu1 %932  ;;  %v6480_v33 = vpop.permute.xlu0 %930 }
 0x15d   :  { %11370 = vst [vmem:[#allocation82_spill] sm:$0xff] %v6480_v33  ;;  %v1591_v33 = vmul.f32 %v1588_v10, %v6452_v11  ;;  %v1618_v10 = vmul.f32 %v1614_v58, %v6450_v13 }
 0x15e   :  { %1577 = vrot.lane.b32.xlu1 %v1566_v24, %s5862_s14  ;;  %1575 = vrot.lane.b32.xlu0 %v1565_v35, %s5862_s14 }
 0x160   :  { %v6486_v49 = vpop.permute.xlu1 %936  ;;  %v6488_v34 = vpop.permute.xlu0 %934 }
 0x161   :  { %11371 = vst [vmem:[#allocation83_spill] sm:$0xff] %v6488_v34  ;;  %v1616_v34 = vmul.f32 %v1614_v58, %v6438_v16 }
 0x162   :  { %1599 = vrot.lane.b32.xlu1 %v1590_v54, %s5862_s14  ;;  %1597 = vrot.lane.b32.xlu0 %v1589_v21, %s5862_s14  ;;  %v1615_v54 = vmul.f32 %v1614_v58, %v6440_v40 }
 0x164   :  { %v6494_v24 = vpop.permute.xlu1 %1109  ;;  %v6496_v35 = vpop.permute.xlu0 %1107 }
 0x165   :  { %11372 = vst [vmem:[#allocation84_spill] sm:$0xff] %v6494_v24  ;;  %11373 = vst [vmem:[#allocation85_spill] sm:$0xff] %v6496_v35  ;;  %v1617_v35 = vmul.f32 %v1614_v58, %v6452_v11  ;;  %v1640_v24 = vstv %s5620_s26  ;;  %s5645_s26 = sld [smem:[#allocation3 + $0x95]] }
 0x166   :  { %1603 = vrot.lane.b32.xlu1 %v1592_v0, %s5862_s14  ;;  %1601 = vrot.lane.b32.xlu0 %v1591_v33, %s5862_s14  ;;  %v1644_v58 = vmul.f32 %v1640_v24, %v6450_v13 }
 0x168   :  { %v6502_v32 = vpop.permute.xlu1 %1113  ;;  %v6504_v21 = vpop.permute.xlu0 %1111 }
 0x169   :  { %11374 = vst [vmem:[#allocation86_spill] sm:$0xff] %v6502_v32  ;;  %11375 = vst [vmem:[#allocation87_spill] sm:$0xff] %v6504_v21  ;;  %v1642_v21 = vmul.f32 %v1640_v24, %v6438_v16 }
 0x16a   :  { %1625 = vrot.lane.b32.xlu1 %v1616_v34, %s5862_s14  ;;  %1623 = vrot.lane.b32.xlu0 %v1615_v54, %s5862_s14  ;;  %v1641_v34 = vmul.f32 %v1640_v24, %v6440_v40 }
 0x16c   :  { %v6510_v0 = vpop.permute.xlu1 %1141  ;;  %v6512_v33 = vpop.permute.xlu0 %1139 }
 0x16d   :  { %11376 = vst [vmem:[#allocation88_spill] sm:$0xff] %v6510_v0  ;;  %11377 = vst [vmem:[#allocation89_spill] sm:$0xff] %v6512_v33  ;;  %v1643_v33 = vmul.f32 %v1640_v24, %v6452_v11  ;;  %v1666_v0 = vstv %s5621_s0  ;;  %s5652_s0 = sld [smem:[#allocation3 + $0x10]] }
 0x16e   :  { %1629 = vrot.lane.b32.xlu1 %v1618_v10, %s5862_s14  ;;  %1627 = vrot.lane.b32.xlu0 %v1617_v35, %s5862_s14  ;;  %v1670_v24 = vmul.f32 %v1666_v0, %v6450_v13 }
 0x170   :  { %v6518_v32 = vpop.permute.xlu1 %1145  ;;  %v6520_v54 = vpop.permute.xlu0 %1143 }
 0x171   :  { %11378 = vst [vmem:[#allocation90_spill] sm:$0xff] %v6518_v32  ;;  %11379 = vst [vmem:[#allocation91_spill] sm:$0xff] %v6520_v54  ;;  %v1668_v54 = vmul.f32 %v1666_v0, %v6438_v16 }
 0x172   :  { %1651 = vrot.lane.b32.xlu1 %v1642_v21, %s5862_s14  ;;  %1649 = vrot.lane.b32.xlu0 %v1641_v34, %s5862_s14  ;;  %v1667_v21 = vmul.f32 %v1666_v0, %v6440_v40 }
 0x174   :  { %v6526_v10 = vpop.permute.xlu1 %1173  ;;  %v6528_v35 = vpop.permute.xlu0 %1171 }
 0x175   :  { %11380 = vst [vmem:[#allocation92_spill] sm:$0xff] %v6526_v10  ;;  %11381 = vst [vmem:[#allocation93_spill] sm:$0xff] %v6528_v35  ;;  %v1669_v35 = vmul.f32 %v1666_v0, %v6452_v11  ;;  %v1692_v10 = vstv %s5622_s27  ;;  %s5653_s27 = sld [smem:[#allocation3 + $0x2b]] }
 0x176   :  { %1655 = vrot.lane.b32.xlu1 %v1644_v58, %s5862_s14  ;;  %1653 = vrot.lane.b32.xlu0 %v1643_v33, %s5862_s14  ;;  %v1696_v0 = vmul.f32 %v1692_v10, %v6450_v13 }
 0x178   :  { %v6534_v32 = vpop.permute.xlu1 %1177  ;;  %v6536_v34 = vpop.permute.xlu0 %1175 }
 0x179   :  { %11382 = vst [vmem:[#allocation94_spill] sm:$0xff] %v6534_v32  ;;  %11383 = vst [vmem:[#allocation95_spill] sm:$0xff] %v6536_v34  ;;  %v1694_v34 = vmul.f32 %v1692_v10, %v6438_v16 }
 0x17a   :  { %1677 = vrot.lane.b32.xlu1 %v1668_v54, %s5862_s14  ;;  %1675 = vrot.lane.b32.xlu0 %v1667_v21, %s5862_s14  ;;  %v1693_v54 = vmul.f32 %v1692_v10, %v6440_v40 }
 0x17c   :  { %v6542_v58 = vpop.permute.xlu1 %1205  ;;  %v6544_v33 = vpop.permute.xlu0 %1203 }
 0x17d   :  { %11384 = vst [vmem:[#allocation96_spill] sm:$0xff] %v6542_v58  ;;  %11385 = vst [vmem:[#allocation97_spill] sm:$0xff] %v6544_v33  ;;  %v1695_v33 = vmul.f32 %v1692_v10, %v6452_v11  ;;  %v1718_v58 = vstv %s5623_s28  ;;  %s5654_s28 = sld [smem:[#allocation3 + $0x46]] }
 0x17e   :  { %1681 = vrot.lane.b32.xlu1 %v1670_v24, %s5862_s14  ;;  %1679 = vrot.lane.b32.xlu0 %v1669_v35, %s5862_s14  ;;  %v1722_v10 = vmul.f32 %v1718_v58, %v6450_v13 }
 0x180   :  { %v6550_v32 = vpop.permute.xlu1 %1209  ;;  %v6552_v21 = vpop.permute.xlu0 %1207 }
 0x181   :  { %11386 = vst [vmem:[#allocation98_spill] sm:$0xff] %v6550_v32  ;;  %11387 = vst [vmem:[#allocation99_spill] sm:$0xff] %v6552_v21  ;;  %v1720_v21 = vmul.f32 %v1718_v58, %v6438_v16 }
 0x182   :  { %1703 = vrot.lane.b32.xlu1 %v1694_v34, %s5863_s20  ;;  %1701 = vrot.lane.b32.xlu0 %v1693_v54, %s5863_s20  ;;  %v1719_v34 = vmul.f32 %v1718_v58, %v6440_v40 }
 0x184   :  { %v6558_v24 = vpop.permute.xlu1 %1237  ;;  %v6560_v35 = vpop.permute.xlu0 %1235 }
 0x185   :  { %11388 = vst [vmem:[#allocation100_spill] sm:$0xff] %v6560_v35  ;;  %v1721_v35 = vmul.f32 %v1718_v58, %v6452_v11  ;;  %v1748_v58 = vmul.f32 %v1744_v43, %v6450_v13 }
 0x186   :  { %1707 = vrot.lane.b32.xlu1 %v1696_v0, %s5863_s20  ;;  %1705 = vrot.lane.b32.xlu0 %v1695_v33, %s5863_s20 }
 0x188   :  { %v6566_v32 = vpop.permute.xlu1 %1241  ;;  %v6568_v54 = vpop.permute.xlu0 %1239 }
 0x189   :  { %11389 = vst [vmem:[#allocation101_spill] sm:$0xff] %v6568_v54  ;;  %v1746_v54 = vmul.f32 %v1744_v43, %v6438_v16 }
 0x18a   :  { %1729 = vrot.lane.b32.xlu1 %v1720_v21, %s5863_s20  ;;  %1727 = vrot.lane.b32.xlu0 %v1719_v34, %s5863_s20  ;;  %v1745_v21 = vmul.f32 %v1744_v43, %v6440_v40 }
 0x18c   :  { %v6574_v0 = vpop.permute.xlu1 %1269  ;;  %v6576_v33 = vpop.permute.xlu0 %1267 }
 0x18d   :  { %11390 = vst [vmem:[#allocation102_spill] sm:$0xff] %v6576_v33  ;;  %v1747_v33 = vmul.f32 %v1744_v43, %v6452_v11  ;;  %v1774_v43 = vmul.f32 %v1770_v20, %v6450_v13 }
 0x18e   :  { %1733 = vrot.lane.b32.xlu1 %v1722_v10, %s5863_s20  ;;  %1731 = vrot.lane.b32.xlu0 %v1721_v35, %s5863_s20 }
 0x190   :  { %v6582_v48 = vpop.permute.xlu1 %1273  ;;  %v6584_v34 = vpop.permute.xlu0 %1271 }
 0x191   :  { %11391 = vst [vmem:[#allocation103_spill] sm:$0xff] %v6584_v34 }
 0x192   :  { %1755 = vrot.lane.b32.xlu1 %v1746_v54, %s5863_s20  ;;  %1753 = vrot.lane.b32.xlu0 %v1745_v21, %s5863_s20  ;;  %v1772_v54 = vmul.f32 %v1770_v20, %v6438_v16  ;;  %v1771_v21 = vmul.f32 %v1770_v20, %v6440_v40 }
 0x194   :  { %v6590_v10 = vpop.permute.xlu1 %1301  ;;  %v6592_v35 = vpop.permute.xlu0 %1299 }
 0x195   :  { %11392 = vst [vmem:[#allocation104_spill] sm:$0xff] %v6590_v10  ;;  %11393 = vst [vmem:[#allocation105_spill] sm:$0xff] %v6592_v35  ;;  %v1773_v35 = vmul.f32 %v1770_v20, %v6452_v11  ;;  %v1796_v10 = vstv %s5626_s30  ;;  %s5657_s30 = sld [smem:[#allocation3 + $0x97]] }
 0x196   :  { %1759 = vrot.lane.b32.xlu1 %v1748_v58, %s5863_s20  ;;  %1757 = vrot.lane.b32.xlu0 %v1747_v33, %s5863_s20  ;;  %v1798_v20 = vmul.f32 %v1796_v10, %v6438_v16 }
 0x198   :  { %v6598_v34 = vpop.permute.xlu1 %1305  ;;  %v6600_v19 = vpop.permute.xlu0 %1303 }
 0x199   :  { %11394 = vst [vmem:[#allocation106_spill] sm:$0xff] %v6598_v34  ;;  %11395 = vst [vmem:[#allocation107_spill] sm:$0xff] %v6600_v19  ;;  %v6612_v34 = vstv %s5578_s5  ;;  %s5659_s5 = sld [smem:[#allocation3 + $0x2c]] }
 0x19a   :  { %1781 = vrot.lane.b32.xlu1 %v1772_v54, %s5863_s20  ;;  %1779 = vrot.lane.b32.xlu0 %v1771_v21, %s5863_s20  ;;  %v88_v54 = vmul.f32 %v6380_v26, %v6610_v1  ;;  %v1797_v21 = vmul.f32 %v1796_v10, %v6440_v40 }
 0x19c   :  { %v6606_v33 = vpop.permute.xlu1 %1333  ;;  %v6608_v58 = vpop.permute.xlu0 %1331  ;;  %v232_v63 = vadd.f32 %v6139_v46, %v88_v54  ;;  %v1994_v46 = vmul.f32 %v1992_v39, %v6438_v16 }
 0x19d   :  { %11396 = vst [vmem:[#allocation108_spill] sm:$0xff] %v6606_v33  ;;  %11397 = vst [vmem:[#allocation109_spill] sm:$0xff] %v6608_v58  ;;  %v6622_v58 = vmul.f32 %v6380_v26, %v6612_v34 }
 0x19e   :  { %1785 = vrot.lane.b32.xlu1 %v1774_v43, %s5863_s20  ;;  %1783 = vrot.lane.b32.xlu0 %v1773_v35, %s5863_s20  ;;  %v1800_v35 = vmul.f32 %v1796_v10, %v6450_v13  ;;  %v1799_v43 = vmul.f32 %v1796_v10, %v6452_v11 }
 0x19f   :  { %v11403_v57 = vrot.slane %v6622_v58, 1 }
 0x1a0   :  { %v6624_v33 = vpop.permute.xlu1 %1337  ;;  %v6626_v19 = vpop.permute.xlu0 %1335 }
 0x1a1   :  { %11398 = vst [vmem:[#allocation110_spill] sm:$0xff] %v6624_v33  ;;  %11399 = vst [vmem:[#allocation111_spill] sm:$0xff] %v6626_v19  ;;  %v6637_v33 = vstv %s5561_s8  ;;  %v388_v19 = vadd.f32 %v6247_v25, %v232_v63  ;;  %v1824_v63 = vmul.f32 %v1822_v50, %v6438_v16  ;;  %v1823_v25 = vmul.f32 %v1822_v50, %v6440_v40  ;;  %s5662_s8 = sld [smem:[#allocation3 + $0x7d]] }
 0x1a2   :  { %1807 = vrot.lane.b32.xlu1 %v1798_v20, %s5863_s20  ;;  %1805 = vrot.lane.b32.xlu0 %v1797_v21, %s5863_s20  ;;  %v98_v10 = vmul.f32 %v6380_v26, %v6637_v33  ;;  %v6649_v21 = vmul.f32 %v6371_v62, %v6612_v34  ;;  %v100_v36 = vmul.f32 %v6371_v62, %v6637_v33 }
 0x1a3   :  { %v535_v28 = vadd.f32 %v11403_v57, %v388_v19  ;;  %v6687_v19 = vmul.f32 %v6371_v62, %v6651_v18  ;;  %v1995_v57 = vmul.f32 %v1992_v39, %v6452_v11 }
 0x1a4   :  { %v6641_v54 = vpop.permute.xlu1 %1365  ;;  %v6643_v20 = vpop.permute.xlu0 %1363  ;;  %v260_v37 = vadd.f32 %v6166_v17, %v100_v36 }
 0x1a5   :  { %11400 = vst [vmem:[#allocation112_spill] sm:$0xff] %v6641_v54  ;;  %11401 = vst [vmem:[#allocation113_spill] sm:$0xff] %v6643_v20  ;;  %v234_v20 = vadd.f32 %v6148_v56, %v90_v51  ;;  %v1993_v54 = vmul.f32 %v1992_v39, %v6440_v40  ;;  %v258_v56 = vadd.f32 %v6157_v5, %v98_v10 }
 0x1a6   :  { %1811 = vrot.lane.b32.xlu1 %v1800_v35, %s5863_s20  ;;  %1809 = vrot.lane.b32.xlu0 %v1799_v43, %s5863_s20  ;;  %v6670_v35 = vmul.f32 %v6380_v26, %v6651_v18  ;;  %v6674_v43 = vmul.f32 %v6380_v26, %v6653_v9  ;;  %v719_v38 = vadd.f32 %v6355_v31, %v535_v28  ;;  %v6737_v28 = vstv %s6680_s2  ;;  %s5673_s2 = sld [smem:[#allocation3 + $0x64]] }
 0x1a7   :  { %v390_v51 = vadd.f32 %v6256_v42, %v234_v20  ;;  %v1825_v5 = vmul.f32 %v1822_v50, %v6452_v11  ;;  %v2002_v42 = vrot.slane %v1994_v46, 1  ;;  %v2001_v20 = vrot.slane %v1993_v54, 1  ;;  %11415 = vst [vmem:[#allocation125_spill] sm:$0xff] %v6737_v28 }
 0x1a8   :  { %11404 = vst [vmem:[#allocation115_spill] sm:$0xff] %v6674_v43  ;;  %v6676_v27 = vpop.permute.xlu1 %1369  ;;  %v6678_v47 = vpop.permute.xlu0 %1367  ;;  %v1996_v10 = vmul.f32 %v1992_v39, %v6450_v13  ;;  %v6703_v31 = vmul.f32 %v6371_v62, %v6653_v9  ;;  %v11410_v46 = vrot.slane %v6649_v21, 1  ;;  %v911_v39 = vadd.f32 %v6462_v6, %v719_v38 }
 0x1a9   :  { %11405 = vst [vmem:[#allocation116_spill] sm:$0xff] %v6676_v27  ;;  %11406 = vst [vmem:[#allocation117_spill] sm:$0xff] %v6678_v47  ;;  %v1826_v47 = vmul.f32 %v1822_v50, %v6450_v13  ;;  %v2024_v27 = vstv %s6635_s12  ;;  %v414_v50 = vadd.f32 %v6265_v12, %v258_v56  ;;  %v2003_v38 = vsel %vm427_vm0, %v2001_v20, %v2002_v42  ;;  %s5671_s12 = sld [smem:[#allocation3 + $0x2e]] }
 0x1aa   :  { %1833 = vrot.lane.b32.xlu1 %v1824_v63, %s5863_s20  ;;  %1831 = vrot.lane.b32.xlu0 %v1823_v25, %s5863_s20  ;;  %11407 = vst [vmem:[#allocation118_spill] sm:$0xff] %v6703_v31  ;;  %v537_v54 = vadd.f32 %v11410_v46, %v390_v51  ;;  %v2025_v12 = vmul.f32 %v2024_v27, %v6440_v40  ;;  %v2005_v6 = vrot.slane %v1996_v10, 1  ;;  %v2004_v51 = vrot.slane %v1995_v57, 1 }
 0x1ab   :  { %v416_v17 = vadd.f32 %v6274_v41, %v260_v37  ;;  %v11417_v10 = vrot.slane %v6674_v43, 2  ;;  %v2056_v41 = vstv %s6689_s15  ;;  %v2028_v36 = vmul.f32 %v2024_v27, %v6450_v13  ;;  %s45_s15 = sld [smem:[#allocation3]] }
 0x1ac   :  { %v6705_v63 = vpop.permute.xlu1 %1397  ;;  %v6707_v25 = vpop.permute.xlu0 %1395  ;;  %v721_v56 = vadd.f32 %v6364_v55, %v537_v54  ;;  %v11416_v55 = vrot.slane %v6670_v35, 1  ;;  %v2033_v54 = vrot.slane %v2025_v12, 1  ;;  %v6761_v12 = vmul.f32 %v6371_v62, %v6714_v30 }
 0x1ad   :  { %11408 = vst [vmem:[#allocation119_spill] sm:$0xff] %v6705_v63  ;;  %11409 = vst [vmem:[#allocation120_spill] sm:$0xff] %v6707_v25  ;;  %v2026_v25 = vmul.f32 %v2024_v27, %v6438_v16  ;;  %v1064_v37 = vadd.f32 %v11417_v10, %v911_v39  ;;  %v1518_v39 = vmul.f32 %v6737_v28, %v6438_v16 }
 0x1ae   :  { %1837 = vrot.lane.b32.xlu1 %v1826_v47, %s5863_s20  ;;  %1835 = vrot.lane.b32.xlu0 %v1825_v5, %s5863_s20  ;;  %v6730_v47 = vmul.f32 %v6380_v26, %v6714_v30  ;;  %v559_v20 = vadd.f32 %v11416_v55, %v414_v50  ;;  %v913_v57 = vadd.f32 %v6470_v4, %v721_v56 }
 0x1af   :  { %v2034_v26 = vrot.slane %v2026_v25, 1  ;;  %v1248_v50 = vadd.f32 %v6558_v24, %v1064_v37  ;;  %v2006_v4 = vsel %vm427_vm0, %v2004_v51, %v2005_v6  ;;  %11419 = vst [vmem:[#allocation126_spill] sm:$0xff] %v6761_v12  ;;  %v2058_v24 = vmul.f32 %v2056_v41, %v6438_v16 }
 0x1b0   :  { %11412 = vst [vmem:[#allocation122_spill] sm:$0xff] %v6730_v47  ;;  %v6732_v5 = vpop.permute.xlu1 %1401  ;;  %v6734_v46 = vpop.permute.xlu0 %1399  ;;  %v11421_v51 = vrot.slane %v6703_v31, 2  ;;  %v2037_v37 = vrot.slane %v2028_v36, 1  ;;  %v11425_v36 = vrot.slane %v6730_v47, 2 }
 0x1b1   :  { %11413 = vst [vmem:[#allocation123_spill] sm:$0xff] %v6732_v5  ;;  %11414 = vst [vmem:[#allocation124_spill] sm:$0xff] %v6734_v46  ;;  %v2027_v46 = vmul.f32 %v2024_v27, %v6452_v11  ;;  %v751_v5 = vadd.f32 %v6374_v2, %v559_v20  ;;  %v2035_v62 = vsel %vm427_vm0, %v2033_v54, %v2034_v26 }
 0x1b2   :  { %2009 = vrot.lane.b32.xlu1 %v2002_v42, %s5862_s14  ;;  %2007 = vrot.lane.b32.xlu0 %v2003_v38, %s5862_s14  ;;  %v11418_v42 = vrot.slane %v6687_v19, 1  ;;  %v1066_v55 = vadd.f32 %v11421_v51, %v913_v57  ;;  %v2088_v51 = vstv %s6752_s17  ;;  %s5558_s17 = sld [smem:[#allocation3 + $0x36]] }
 0x1b3   :  { %v943_v38 = vadd.f32 %v6478_v3, %v751_v5  ;;  %v1520_v3 = vmul.f32 %v6737_v28, %v6450_v13  ;;  %v6780_v5 = vstv %s6724_s16  ;;  %s5557_s16 = sld [smem:[#allocation3 + $0x1b]] }
 0x1b4   :  { %v561_v56 = vadd.f32 %v11418_v42, %v416_v17  ;;  %v1430_v27 = vpop.permute.xlu1 %1429  ;;  %v6763_v2 = vpop.permute.xlu0 %1427  ;;  %v2057_v17 = vmul.f32 %v2056_v41, %v6440_v40  ;;  %v2036_v42 = vrot.slane %v2027_v46, 1  ;;  %v1250_v25 = vadd.f32 %v6566_v32, %v1066_v55  ;;  %11423 = vst [vmem:[#allocation129_spill] sm:$0xff] %v6780_v5 }
 0x1b5   :  { %11420 = vst [vmem:[#allocation127_spill] sm:$0xff] %v6763_v2  ;;  %v1440_v20 = vadd.f32 %v1430_v27, %v1248_v50  ;;  %v2066_v50 = vrot.slane %v2058_v24, 1  ;;  %v1088_v46 = vadd.f32 %v11425_v36, %v943_v38  ;;  %v1528_v27 = vmul.f32 %v6780_v5, %v6438_v16 }
 0x1b6   :  { %v753_v10 = vadd.f32 %v6384_v61, %v561_v56  ;;  %2013 = vrot.lane.b32.xlu1 %v2005_v6, %s5862_s14  ;;  %2011 = vrot.lane.b32.xlu0 %v2006_v4, %s5862_s14  ;;  %v11235_v61 = vrot.slane %v6761_v12, 2  ;;  %v2065_v4 = vrot.slane %v2057_v17, 1  ;;  %v2060_v56 = vmul.f32 %v2056_v41, %v6450_v13 }
 0x1b7   :  { %v6775_v2 = vadd.f32 %v1518_v39, %v1440_v20  ;;  %v2038_v39 = vsel %vm427_vm0, %v2036_v42, %v2037_v37  ;;  %v1280_v24 = vadd.f32 %v6574_v0, %v1088_v46  ;;  %v2090_v0 = vmul.f32 %v2088_v51, %v6438_v16 }
 0x1b8   :  { %v1434_v57 = vpop.permute.xlu1 %1433  ;;  %v6783_v6 = vpop.permute.xlu0 %1431  ;;  %v945_v54 = vadd.f32 %v6486_v49, %v753_v10  ;;  %v2059_v49 = vmul.f32 %v2056_v41, %v6452_v11  ;;  %v2067_v17 = vsel %vm427_vm0, %v2065_v4, %v2066_v50  ;;  %v2089_v41 = vmul.f32 %v2088_v51, %v6440_v40 }
 0x1b9   :  { %11422 = vst [vmem:[#allocation128_spill] sm:$0xff] %v6775_v2  ;;  %11424 = vst [vmem:[#allocation130_spill] sm:$0xff] %v6783_v6  ;;  %v1442_v32 = vadd.f32 %v1434_v57, %v1250_v25  ;;  %v1530_v10 = vmul.f32 %v6780_v5, %v6450_v13  ;;  %v2069_v42 = vrot.slane %v2060_v56, 1 }
 0x1ba   :  { %2041 = vrot.lane.b32.xlu1 %v2034_v26, %s5862_s14  ;;  %2039 = vrot.lane.b32.xlu0 %v2035_v62, %s5862_s14  ;;  %v1090_v26 = vadd.f32 %v11235_v61, %v945_v54 }
 0x1bb   :  { %v6797_v55 = vadd.f32 %v1520_v3, %v1442_v32  ;;  %v2068_v3 = vrot.slane %v2059_v49, 1  ;;  %v2097_v32 = vrot.slane %v2089_v41, 1  ;;  %v2120_v49 = vstv %s5638_s18  ;;  %s5674_s18 = sld [smem:[#allocation3 + $0x7f]] }
 0x1bc   :  { %v1462_v25 = vpop.permute.xlu1 %1461  ;;  %v6799_v38 = vpop.permute.xlu0 %1459  ;;  %v1282_v62 = vadd.f32 %v6582_v48, %v1090_v26  ;;  %v2091_v48 = vmul.f32 %v2088_v51, %v6452_v11  ;;  %v2124_v41 = vmul.f32 %v2120_v49, %v6450_v13 }
 0x1bd   :  { %11426 = vst [vmem:[#allocation131_spill] sm:$0xff] %v6797_v55  ;;  %11427 = vst [vmem:[#allocation132_spill] sm:$0xff] %v6799_v38  ;;  %v1472_v20 = vadd.f32 %v1462_v25, %v1280_v24  ;;  %v2070_v4 = vsel %vm427_vm0, %v2068_v3, %v2069_v42 }
 0x1be   :  { %2045 = vrot.lane.b32.xlu1 %v2037_v37, %s5862_s14  ;;  %2043 = vrot.lane.b32.xlu0 %v2038_v39, %s5862_s14  ;;  %v2098_v37 = vrot.slane %v2090_v0, 1  ;;  %v2092_v39 = vmul.f32 %v2088_v51, %v6450_v13  ;;  %v2100_v26 = vrot.slane %v2091_v48, 1  ;;  %v2121_v51 = vmul.f32 %v2120_v49, %v6440_v40 }
 0x1bf   :  { %v6811_v57 = vadd.f32 %v1528_v27, %v1472_v20  ;;  %v2122_v20 = vmul.f32 %v2120_v49, %v6438_v16 }
 0x1c0   :  { %v1466_v54 = vpop.permute.xlu1 %1465  ;;  %v6813_v36 = vpop.permute.xlu0 %1463  ;;  %v2101_v25 = vrot.slane %v2092_v39, 1  ;;  %v2129_v3 = vrot.slane %v2121_v51, 1 }
 0x1c1   :  { %11428 = vst [vmem:[#allocation133_spill] sm:$0xff] %v6811_v57  ;;  %11429 = vst [vmem:[#allocation134_spill] sm:$0xff] %v6813_v36  ;;  %v1474_v46 = vadd.f32 %v1466_v54, %v1282_v62  ;;  %v2152_v54 = vstv %s5639_s19  ;;  %s7260_s19 = sld [smem:[#allocation3 + $0x51]] }
 0x1c2   :  { %2073 = vrot.lane.b32.xlu1 %v2066_v50, %s5862_s14  ;;  %2071 = vrot.lane.b32.xlu0 %v2067_v17, %s5862_s14  ;;  %v2099_v50 = vsel %vm427_vm0, %v2097_v32, %v2098_v37  ;;  %v2102_v62 = vsel %vm427_vm0, %v2100_v26, %v2101_v25  ;;  %v2154_v39 = vmul.f32 %v2152_v54, %v6438_v16 }
 0x1c3   :  { %v6820_v56 = vadd.f32 %v1530_v10, %v1474_v46  ;;  %v2123_v10 = vmul.f32 %v2120_v49, %v6452_v11  ;;  %v2153_v49 = vmul.f32 %v2152_v54, %v6440_v40 }
 0x1c4   :  { %v6822_v27 = vpop.permute.xlu1 %1547  ;;  %v6824_v24 = vpop.permute.xlu0 %1545 }
 0x1c5   :  { %11430 = vst [vmem:[#allocation135_spill] sm:$0xff] %v6820_v56  ;;  %11431 = vst [vmem:[#allocation136_spill] sm:$0xff] %v6822_v27  ;;  %v2161_v51 = vrot.slane %v2153_v49, 1 }
 0x1c6   :  { %11432 = vst [vmem:[#allocation137_spill] sm:$0xff] %v6824_v24  ;;  %2077 = vrot.lane.b32.xlu1 %v2069_v42, %s5862_s14  ;;  %2075 = vrot.lane.b32.xlu0 %v2070_v4, %s5862_s14  ;;  %v2130_v42 = vrot.slane %v2122_v20, 1  ;;  %v2132_v4 = vrot.slane %v2123_v10, 1  ;;  %v2162_v20 = vrot.slane %v2154_v39, 1  ;;  %v2155_v10 = vmul.f32 %v2152_v54, %v6452_v11 }
 0x1c8   :  { %v6831_v17 = vpop.permute.xlu1 %1551  ;;  %v6833_v0 = vpop.permute.xlu0 %1549  ;;  %v2131_v48 = vsel %vm427_vm0, %v2129_v3, %v2130_v42  ;;  %v2163_v39 = vsel %vm427_vm0, %v2161_v51, %v2162_v20  ;;  %v2164_v49 = vrot.slane %v2155_v10, 1  ;;  %v2216_v10 = vstv %s5641_s22  ;;  %s7268_s22 = sld [smem:[#allocation3 + $0x1e]] }
 0x1c9   :  { %11433 = vst [vmem:[#allocation138_spill] sm:$0xff] %v6831_v17  ;;  %11434 = vst [vmem:[#allocation139_spill] sm:$0xff] %v6833_v0 }
 0x1ca   :  { %2105 = vrot.lane.b32.xlu1 %v2098_v37, %s5862_s14  ;;  %2103 = vrot.lane.b32.xlu0 %v2099_v50, %s5862_s14  ;;  %v2133_v37 = vrot.slane %v2124_v41, 1  ;;  %v2156_v41 = vmul.f32 %v2152_v54, %v6450_v13 }
 0x1cc   :  { %v6840_v46 = vpop.permute.xlu1 %1573  ;;  %v6842_v32 = vpop.permute.xlu0 %1571 }
 0x1cd   :  { %11435 = vst [vmem:[#allocation140_spill] sm:$0xff] %v6840_v46  ;;  %11436 = vst [vmem:[#allocation141_spill] sm:$0xff] %v6842_v32 }
 0x1ce   :  { %2109 = vrot.lane.b32.xlu1 %v2101_v25, %s5862_s14  ;;  %2107 = vrot.lane.b32.xlu0 %v2102_v62, %s5862_s14  ;;  %v2134_v25 = vsel %vm427_vm0, %v2132_v4, %v2133_v37  ;;  %v2184_v62 = vstv %s5640_s21  ;;  %s7266_s21 = sld [smem:[#allocation3 + $0x3]] }
 0x1cf   :  { %v2185_v4 = vmul.f32 %v2184_v62, %v6440_v40 }
 0x1d0   :  { %v6849_v50 = vpop.permute.xlu1 %1577  ;;  %v6851_v26 = vpop.permute.xlu0 %1575 }
 0x1d1   :  { %11437 = vst [vmem:[#allocation142_spill] sm:$0xff] %v6849_v50  ;;  %11438 = vst [vmem:[#allocation143_spill] sm:$0xff] %v6851_v26  ;;  %v2187_v50 = vmul.f32 %v2184_v62, %v6452_v11 }
 0x1d2   :  { %2137 = vrot.lane.b32.xlu1 %v2130_v42, %s5862_s14  ;;  %2135 = vrot.lane.b32.xlu0 %v2131_v48, %s5862_s14  ;;  %v2186_v42 = vmul.f32 %v2184_v62, %v6438_v16  ;;  %v2165_v48 = vrot.slane %v2156_v41, 1 }
 0x1d4   :  { %v6858_v3 = vpop.permute.xlu1 %1599  ;;  %v6860_v61 = vpop.permute.xlu0 %1597 }
 0x1d5   :  { %11439 = vst [vmem:[#allocation144_spill] sm:$0xff] %v6858_v3  ;;  %11440 = vst [vmem:[#allocation145_spill] sm:$0xff] %v6860_v61  ;;  %v2194_v61 = vrot.slane %v2186_v42, 1  ;;  %v2188_v3 = vmul.f32 %v2184_v62, %v6450_v13 }
 0x1d6   :  { %2141 = vrot.lane.b32.xlu1 %v2133_v37, %s5862_s14  ;;  %2139 = vrot.lane.b32.xlu0 %v2134_v25, %s5862_s14  ;;  %v2193_v37 = vrot.slane %v2185_v4, 1  ;;  %v2166_v25 = vsel %vm427_vm0, %v2164_v49, %v2165_v48  ;;  %v2196_v4 = vrot.slane %v2187_v50, 1  ;;  %v2217_v49 = vmul.f32 %v2216_v10, %v6440_v40 }
 0x1d7   :  { %v2197_v42 = vrot.slane %v2188_v3, 1 }
 0x1d8   :  { %v6867_v26 = vpop.permute.xlu1 %1603  ;;  %v6869_v54 = vpop.permute.xlu0 %1601  ;;  %v2225_v50 = vrot.slane %v2217_v49, 1 }
 0x1d9   :  { %11441 = vst [vmem:[#allocation146_spill] sm:$0xff] %v6867_v26  ;;  %11442 = vst [vmem:[#allocation147_spill] sm:$0xff] %v6869_v54 }
 0x1da   :  { %2169 = vrot.lane.b32.xlu1 %v2162_v20, %s5862_s14  ;;  %2167 = vrot.lane.b32.xlu0 %v2163_v39, %s5862_s14  ;;  %v2195_v20 = vsel %vm427_vm0, %v2193_v37, %v2194_v61  ;;  %v2218_v39 = vmul.f32 %v2216_v10, %v6438_v16  ;;  %v2198_v37 = vsel %vm427_vm0, %v2196_v4, %v2197_v42 }
 0x1dc   :  { %v6876_v51 = vpop.permute.xlu1 %1625  ;;  %v6878_v41 = vpop.permute.xlu0 %1623  ;;  %v2226_v3 = vrot.slane %v2218_v39, 1 }
 0x1dd   :  { %11443 = vst [vmem:[#allocation148_spill] sm:$0xff] %v6876_v51  ;;  %11444 = vst [vmem:[#allocation149_spill] sm:$0xff] %v6878_v41  ;;  %v2248_v41 = vstv %s5642_s23  ;;  %s7283_s23 = sld [smem:[#allocation3 + $0x39]] }
 0x1de   :  { %2173 = vrot.lane.b32.xlu1 %v2165_v48, %s5862_s14  ;;  %2171 = vrot.lane.b32.xlu0 %v2166_v25, %s5862_s14  ;;  %v2220_v48 = vmul.f32 %v2216_v10, %v6450_v13  ;;  %v2219_v25 = vmul.f32 %v2216_v10, %v6452_v11  ;;  %v2227_v10 = vsel %vm427_vm0, %v2225_v50, %v2226_v3 }
 0x1df   :  { %v2249_v4 = vmul.f32 %v2248_v41, %v6440_v40 }
 0x1e0   :  { %v6885_v54 = vpop.permute.xlu1 %1629  ;;  %v6887_v62 = vpop.permute.xlu0 %1627 }
 0x1e1   :  { %11445 = vst [vmem:[#allocation150_spill] sm:$0xff] %v6885_v54  ;;  %11446 = vst [vmem:[#allocation151_spill] sm:$0xff] %v6887_v62  ;;  %v2250_v62 = vmul.f32 %v2248_v41, %v6438_v16  ;;  %v2280_v54 = vstv %s5643_s24  ;;  %s7299_s24 = sld [smem:[#allocation3 + $0x9a]] }
 0x1e2   :  { %2201 = vrot.lane.b32.xlu1 %v2194_v61, %s5863_s20  ;;  %2199 = vrot.lane.b32.xlu0 %v2195_v20, %s5863_s20  ;;  %v2229_v61 = vrot.slane %v2220_v48, 1  ;;  %v2228_v20 = vrot.slane %v2219_v25, 1  ;;  %v2252_v48 = vmul.f32 %v2248_v41, %v6450_v13  ;;  %v2251_v25 = vmul.f32 %v2248_v41, %v6452_v11 }
 0x1e3   :  { %v2284_v46 = vmul.f32 %v2280_v54, %v6450_v13  ;;  %v2283_v0 = vmul.f32 %v2280_v54, %v6452_v11 }
 0x1e4   :  { %v6894_v51 = vpop.permute.xlu1 %1651  ;;  %v6896_v26 = vpop.permute.xlu0 %1649 }
 0x1e5   :  { %11447 = vst [vmem:[#allocation152_spill] sm:$0xff] %v6894_v51  ;;  %11448 = vst [vmem:[#allocation153_spill] sm:$0xff] %v6896_v26  ;;  %v2258_v26 = vrot.slane %v2250_v62, 1 }
 0x1e6   :  { %2205 = vrot.lane.b32.xlu1 %v2197_v42, %s5863_s20  ;;  %2203 = vrot.lane.b32.xlu0 %v2198_v37, %s5863_s20  ;;  %v2230_v42 = vsel %vm427_vm0, %v2228_v20, %v2229_v61  ;;  %v2257_v37 = vrot.slane %v2249_v4, 1  ;;  %v2281_v20 = vmul.f32 %v2280_v54, %v6440_v40  ;;  %v2260_v4 = vrot.slane %v2251_v25, 1 }
 0x1e7   :  { %v2312_v25 = vstv %s5644_s25  ;;  %s7313_s25 = sld [smem:[#allocation3 + $0x54]]  ;;  %v3094_v30 = vstv %s7299_s24  ;;  %s8191_s24 = sld [smem:[#allocation3 + $0x9d]] }
 0x1e8   :  { %v6903_v39 = vpop.permute.xlu1 %1655  ;;  %v6905_v49 = vpop.permute.xlu0 %1653  ;;  %v2259_v62 = vsel %vm427_vm0, %v2257_v37, %v2258_v26 }
 0x1e9   :  { %11449 = vst [vmem:[#allocation154_spill] sm:$0xff] %v6903_v39  ;;  %11450 = vst [vmem:[#allocation155_spill] sm:$0xff] %v6905_v49 }
 0x1ea   :  { %2233 = vrot.lane.b32.xlu1 %v2226_v3, %s5863_s20  ;;  %2231 = vrot.lane.b32.xlu0 %v2227_v10, %s5863_s20  ;;  %v2282_v3 = vmul.f32 %v2280_v54, %v6438_v16  ;;  %v2261_v10 = vrot.slane %v2252_v48, 1 }
 0x1ec   :  { %v6912_v50 = vpop.permute.xlu1 %1677  ;;  %v6914_v32 = vpop.permute.xlu0 %1675 }
 0x1ed   :  { %11451 = vst [vmem:[#allocation156_spill] sm:$0xff] %v6912_v50  ;;  %11452 = vst [vmem:[#allocation157_spill] sm:$0xff] %v6914_v32  ;;  %v2290_v32 = vrot.slane %v2282_v3, 1  ;;  %v2293_v3 = vrot.slane %v2284_v46, 1 }
 0x1ee   :  { %2237 = vrot.lane.b32.xlu1 %v2229_v61, %s5863_s20  ;;  %2235 = vrot.lane.b32.xlu0 %v2230_v42, %s5863_s20  ;;  %v2289_v61 = vrot.slane %v2281_v20, 1  ;;  %v2262_v42 = vsel %vm427_vm0, %v2260_v4, %v2261_v10  ;;  %v2292_v20 = vrot.slane %v2283_v0, 1  ;;  %v2313_v4 = vmul.f32 %v2312_v25, %v6440_v40 }
 0x1f0   :  { %v6921_v49 = vpop.permute.xlu1 %1681  ;;  %v6923_v41 = vpop.permute.xlu0 %1679  ;;  %v2321_v0 = vrot.slane %v2313_v4, 1 }
 0x1f1   :  { %11453 = vst [vmem:[#allocation158_spill] sm:$0xff] %v6921_v49  ;;  %11454 = vst [vmem:[#allocation159_spill] sm:$0xff] %v6923_v41 }
 0x1f2   :  { %2265 = vrot.lane.b32.xlu1 %v2258_v26, %s5863_s20  ;;  %2263 = vrot.lane.b32.xlu0 %v2259_v62, %s5863_s20  ;;  %v2291_v26 = vsel %vm427_vm0, %v2289_v61, %v2290_v32  ;;  %v2314_v62 = vmul.f32 %v2312_v25, %v6438_v16  ;;  %v2294_v61 = vsel %vm427_vm0, %v2292_v20, %v2293_v3 }
 0x1f4   :  { %v6930_v37 = vpop.permute.xlu1 %1703  ;;  %v6932_v48 = vpop.permute.xlu0 %1701  ;;  %v2322_v46 = vrot.slane %v2314_v62, 1 }
 0x1f5   :  { %11455 = vst [vmem:[#allocation160_spill] sm:$0xff] %v6930_v37  ;;  %11456 = vst [vmem:[#allocation161_spill] sm:$0xff] %v6932_v48  ;;  %v2344_v48 = vstv %s5645_s26  ;;  %s7398_s26 = sld [smem:[#allocation3 + $0x14]] }
 0x1f6   :  { %2269 = vrot.lane.b32.xlu1 %v2261_v10, %s5863_s20  ;;  %2267 = vrot.lane.b32.xlu0 %v2262_v42, %s5863_s20  ;;  %v2316_v10 = vmul.f32 %v2312_v25, %v6450_v13  ;;  %v2315_v42 = vmul.f32 %v2312_v25, %v6452_v11  ;;  %v2323_v25 = vsel %vm427_vm0, %v2321_v0, %v2322_v46 }
 0x1f7   :  { %v2345_v20 = vmul.f32 %v2344_v48, %v6440_v40 }
 0x1f8   :  { %v6939_v41 = vpop.permute.xlu1 %1707  ;;  %v6941_v54 = vpop.permute.xlu0 %1705 }
 0x1f9   :  { %11457 = vst [vmem:[#allocation162_spill] sm:$0xff] %v6939_v41  ;;  %11458 = vst [vmem:[#allocation163_spill] sm:$0xff] %v6941_v54  ;;  %v2346_v54 = vmul.f32 %v2344_v48, %v6438_v16 }
 0x1fa   :  { %2297 = vrot.lane.b32.xlu1 %v2290_v32, %s5863_s20  ;;  %2295 = vrot.lane.b32.xlu0 %v2291_v26, %s5863_s20  ;;  %v2325_v32 = vrot.slane %v2316_v10, 1  ;;  %v2324_v26 = vrot.slane %v2315_v42, 1  ;;  %v2348_v10 = vmul.f32 %v2344_v48, %v6450_v13  ;;  %v2347_v42 = vmul.f32 %v2344_v48, %v6452_v11 }
 0x1fc   :  { %v6948_v37 = vpop.permute.xlu1 %1729  ;;  %v6950_v17 = vpop.permute.xlu0 %1727 }
 0x1fd   :  { %11459 = vst [vmem:[#allocation164_spill] sm:$0xff] %v6948_v37  ;;  %11460 = vst [vmem:[#allocation165_spill] sm:$0xff] %v6950_v17  ;;  %v2354_v17 = vrot.slane %v2346_v54, 1  ;;  %v2520_v37 = vstv %s5652_s0  ;;  %s7416_s0 = sld [smem:[#allocation3 + $0x6]] }
 0x1fe   :  { %2301 = vrot.lane.b32.xlu1 %v2293_v3, %s5863_s20  ;;  %2299 = vrot.lane.b32.xlu0 %v2294_v61, %s5863_s20  ;;  %v2326_v3 = vsel %vm427_vm0, %v2324_v26, %v2325_v32  ;;  %v2353_v61 = vrot.slane %v2345_v20, 1  ;;  %v2521_v26 = vmul.f32 %v2520_v37, %v6440_v40  ;;  %v2356_v20 = vrot.slane %v2347_v42, 1 }
 0x1ff   :  { %v2552_v42 = vstv %s5653_s27  ;;  %s7448_s27 = sld [smem:[#allocation3 + $0x21]] }
 0x200   :  { %v6957_v62 = vpop.permute.xlu1 %1733  ;;  %v6959_v4 = vpop.permute.xlu0 %1731  ;;  %v2355_v54 = vsel %vm427_vm0, %v2353_v61, %v2354_v17 }
 0x201   :  { %11461 = vst [vmem:[#allocation166_spill] sm:$0xff] %v6957_v62  ;;  %11462 = vst [vmem:[#allocation167_spill] sm:$0xff] %v6959_v4  ;;  %v2523_v62 = vmul.f32 %v2520_v37, %v6452_v11 }
 0x202   :  { %2329 = vrot.lane.b32.xlu1 %v2322_v46, %s5863_s20  ;;  %2327 = vrot.lane.b32.xlu0 %v2323_v25, %s5863_s20  ;;  %v2522_v46 = vmul.f32 %v2520_v37, %v6438_v16  ;;  %v2357_v25 = vrot.slane %v2348_v10, 1 }
 0x204   :  { %v6966_v0 = vpop.permute.xlu1 %1755  ;;  %v6968_v41 = vpop.permute.xlu0 %1753 }
 0x205   :  { %11463 = vst [vmem:[#allocation168_spill] sm:$0xff] %v6966_v0  ;;  %11464 = vst [vmem:[#allocation169_spill] sm:$0xff] %v6968_v41  ;;  %v2530_v41 = vrot.slane %v2522_v46, 2  ;;  %v2524_v0 = vmul.f32 %v2520_v37, %v6450_v13 }
 0x206   :  { %2333 = vrot.lane.b32.xlu1 %v2325_v32, %s5863_s20  ;;  %2331 = vrot.lane.b32.xlu0 %v2326_v3, %s5863_s20  ;;  %v2529_v32 = vrot.slane %v2521_v26, 2  ;;  %v2358_v3 = vsel %vm427_vm0, %v2356_v20, %v2357_v25  ;;  %v2532_v26 = vrot.slane %v2523_v62, 2  ;;  %v2553_v20 = vmul.f32 %v2552_v42, %v6440_v40 }
 0x207   :  { %v2533_v46 = vrot.slane %v2524_v0, 2 }
 0x208   :  { %v6975_v4 = vpop.permute.xlu1 %1759  ;;  %v6977_v48 = vpop.permute.xlu0 %1757  ;;  %v2561_v62 = vrot.slane %v2553_v20, 2 }
 0x209   :  { %11465 = vst [vmem:[#allocation170_spill] sm:$0xff] %v6975_v4  ;;  %11466 = vst [vmem:[#allocation171_spill] sm:$0xff] %v6977_v48 }
 0x20a   :  { %2361 = vrot.lane.b32.xlu1 %v2354_v17, %s5863_s20  ;;  %2359 = vrot.lane.b32.xlu0 %v2355_v54, %s5863_s20  ;;  %v2531_v17 = vsel %vm956_vm1, %v2529_v32, %v2530_v41  ;;  %v2554_v54 = vmul.f32 %v2552_v42, %v6438_v16  ;;  %v2534_v32 = vsel %vm956_vm1, %v2532_v26, %v2533_v46 }
 0x20c   :  { %v6984_v61 = vpop.permute.xlu1 %1781  ;;  %v6986_v10 = vpop.permute.xlu0 %1779  ;;  %v2562_v0 = vrot.slane %v2554_v54, 2 }
 0x20d   :  { %11467 = vst [vmem:[#allocation172_spill] sm:$0xff] %v6984_v61  ;;  %11468 = vst [vmem:[#allocation173_spill] sm:$0xff] %v6986_v10  ;;  %v2584_v10 = vstv %s5654_s28  ;;  %v2616_v61 = vstv %s5655_s1  ;;  %s7457_s28 = sld [smem:[#allocation3 + $0x2f]]  ;;  %s7474_s1 = sld [smem:[#allocation3 + $0x3c]] }
 0x20e   :  { %2365 = vrot.lane.b32.xlu1 %v2357_v25, %s5863_s20  ;;  %2363 = vrot.lane.b32.xlu0 %v2358_v3, %s5863_s20  ;;  %v2556_v25 = vmul.f32 %v2552_v42, %v6450_v13  ;;  %v2555_v3 = vmul.f32 %v2552_v42, %v6452_v11  ;;  %v2563_v11 = vsel %vm956_vm1, %v2561_v62, %v2562_v0  ;;  %v7012_v42 = vld [vmem:[#allocation5 + $0x10] sm:$0xff] }
 0x20f   :  { %v2585_v26 = vmul.f32 %v7012_v42, %v2584_v10 }
 0x210   :  { %v6993_v48 = vpop.permute.xlu1 %1785  ;;  %v6995_v37 = vpop.permute.xlu0 %1783 }
 0x211   :  { %11469 = vst [vmem:[#allocation174_spill] sm:$0xff] %v6993_v48  ;;  %11470 = vst [vmem:[#allocation175_spill] sm:$0xff] %v6995_v37  ;;  %v7008_v37 = vld [vmem:[#allocation5 + $0x18] sm:$0xff] }
 0x212   :  { %2537 = vrot.lane.b32.xlu1 %v2530_v41, %s5862_s14  ;;  %2535 = vrot.lane.b32.xlu0 %v2531_v17, %s5862_s14  ;;  %v2565_v41 = vrot.slane %v2556_v25, 2  ;;  %v2564_v17 = vrot.slane %v2555_v3, 2  ;;  %v2586_v13 = vmul.f32 %v7008_v37, %v2584_v10  ;;  %v2593_v3 = vrot.slane %v2585_v26, 2 }
 0x214   :  { %v7002_v16 = vpop.permute.xlu1 %1807  ;;  %v7004_v40 = vpop.permute.xlu0 %1805  ;;  %v2594_v25 = vrot.slane %v2586_v13, 2 }
 0x215   :  { %11471 = vst [vmem:[#allocation176_spill] sm:$0xff] %v7002_v16  ;;  %11472 = vst [vmem:[#allocation177_spill] sm:$0xff] %v7004_v40  ;;  %v7025_v40 = vld [vmem:[#allocation5 + $0x40] sm:$0xff] }
 0x216   :  { %2541 = vrot.lane.b32.xlu1 %v2533_v46, %s5862_s14  ;;  %2539 = vrot.lane.b32.xlu0 %v2534_v32, %s5862_s14  ;;  %v2566_v46 = vsel %vm956_vm1, %v2564_v17, %v2565_v41  ;;  %v7022_v32 = vld [vmem:[#allocation5 + $0x48] sm:$0xff]  ;;  %v2587_v48 = vmul.f32 %v7025_v40, %v2584_v10  ;;  %v2617_v17 = vmul.f32 %v7012_v42, %v2616_v61 }
 0x217   :  { %v2588_v62 = vmul.f32 %v7022_v32, %v2584_v10  ;;  %v2595_v13 = vsel %vm956_vm1, %v2593_v3, %v2594_v25  ;;  %v2620_v27 = vmul.f32 %v7022_v32, %v2616_v61  ;;  %v2619_v36 = vmul.f32 %v7025_v40, %v2616_v61 }
 0x218   :  { %v7015_v54 = vpop.permute.xlu1 %1811  ;;  %v7017_v20 = vpop.permute.xlu0 %1809  ;;  %v2596_v26 = vrot.slane %v2587_v48, 2 }
 0x219   :  { %11473 = vst [vmem:[#allocation178_spill] sm:$0xff] %v7015_v54  ;;  %11474 = vst [vmem:[#allocation179_spill] sm:$0xff] %v7017_v20  ;;  %v443_v54 = vstv %s7268_s22  ;;  %s8137_s22 = sld [smem:[#allocation3 + $0x3f]] }
 0x21a   :  { %2569 = vrot.lane.b32.xlu1 %v2562_v0, %s5862_s14  ;;  %2567 = vrot.lane.b32.xlu0 %v2563_v11, %s5862_s14  ;;  %v2618_v0 = vmul.f32 %v7008_v37, %v2616_v61  ;;  %v2597_v11 = vrot.slane %v2588_v62, 2  ;;  %v2648_v62 = vstv %s5656_s29  ;;  %s7557_s29 = sld [smem:[#allocation3 + $0x4a]] }
 0x21c   :  { %v7028_v4 = vpop.permute.xlu1 %1833  ;;  %v7030_v20 = vpop.permute.xlu0 %1831 }
 0x21d   :  { %11475 = vst [vmem:[#allocation180_spill] sm:$0xff] %v7028_v4  ;;  %11476 = vst [vmem:[#allocation181_spill] sm:$0xff] %v7030_v20  ;;  %v2626_v20 = vrot.slane %v2618_v0, 2  ;;  %v2629_v0 = vrot.slane %v2620_v27, 2  ;;  %v418_v4 = vstv %s7266_s21  ;;  %s8122_s21 = sld [smem:[#allocation3 + $0x24]] }
 0x21e   :  { %2573 = vrot.lane.b32.xlu1 %v2565_v41, %s5862_s14  ;;  %2571 = vrot.lane.b32.xlu0 %v2566_v46, %s5862_s14  ;;  %v2625_v41 = vrot.slane %v2617_v17, 2  ;;  %v2598_v46 = vsel %vm956_vm1, %v2596_v26, %v2597_v11  ;;  %v2628_v17 = vrot.slane %v2619_v36, 2  ;;  %v2649_v26 = vmul.f32 %v7012_v42, %v2648_v62 }
 0x220   :  { %v7037_v24 = vpop.permute.xlu1 %1837  ;;  %v7039_v10 = vpop.permute.xlu0 %1835  ;;  %v2657_v36 = vrot.slane %v2649_v26, 2 }
 0x221   :  { %11477 = vst [vmem:[#allocation182_spill] sm:$0xff] %v7037_v24  ;;  %11478 = vst [vmem:[#allocation183_spill] sm:$0xff] %v7039_v10 }
 0x222   :  { %2601 = vrot.lane.b32.xlu1 %v2594_v25, %s5862_s14  ;;  %2599 = vrot.lane.b32.xlu0 %v2595_v13, %s5862_s14  ;;  %v2627_v25 = vsel %vm956_vm1, %v2625_v41, %v2626_v20  ;;  %v2650_v13 = vmul.f32 %v7008_v37, %v2648_v62  ;;  %v2630_v41 = vsel %vm956_vm1, %v2628_v17, %v2629_v0 }
 0x224   :  { %v7046_v3 = vpop.permute.xlu1 %2009  ;;  %v7048_v48 = vpop.permute.xlu0 %2007  ;;  %v2658_v27 = vrot.slane %v2650_v13, 2 }
 0x225   :  { %11479 = vst [vmem:[#allocation184_spill] sm:$0xff] %v7046_v3  ;;  %11480 = vst [vmem:[#allocation185_spill] sm:$0xff] %v7048_v48  ;;  %v2680_v48 = vstv %s5657_s30  ;;  %s7575_s30 = sld [smem:[#allocation3 + $0x57]] }
 0x226   :  { %2605 = vrot.lane.b32.xlu1 %v2597_v11, %s5862_s14  ;;  %2603 = vrot.lane.b32.xlu0 %v2598_v46, %s5862_s14  ;;  %v2652_v11 = vmul.f32 %v7022_v32, %v2648_v62  ;;  %v2651_v46 = vmul.f32 %v7025_v40, %v2648_v62  ;;  %v2659_v62 = vsel %vm956_vm1, %v2657_v36, %v2658_v27 }
 0x227   :  { %v2681_v17 = vmul.f32 %v7012_v42, %v2680_v48 }
 0x228   :  { %v7055_v10 = vpop.permute.xlu1 %2013  ;;  %v7057_v61 = vpop.permute.xlu0 %2011 }
 0x229   :  { %11481 = vst [vmem:[#allocation186_spill] sm:$0xff] %v7055_v10  ;;  %11482 = vst [vmem:[#allocation187_spill] sm:$0xff] %v7057_v61  ;;  %v2682_v61 = vmul.f32 %v7008_v37, %v2680_v48 }
 0x22a   :  { %2633 = vrot.lane.b32.xlu1 %v2626_v20, %s5862_s14  ;;  %2631 = vrot.lane.b32.xlu0 %v2627_v25, %s5862_s14  ;;  %v2661_v20 = vrot.slane %v2652_v11, 2  ;;  %v2660_v25 = vrot.slane %v2651_v46, 2  ;;  %v2684_v11 = vmul.f32 %v7022_v32, %v2680_v48  ;;  %v2683_v46 = vmul.f32 %v7025_v40, %v2680_v48 }
 0x22c   :  { %v7064_v3 = vpop.permute.xlu1 %2041  ;;  %v7066_v38 = vpop.permute.xlu0 %2039 }
 0x22d   :  { %11483 = vst [vmem:[#allocation188_spill] sm:$0xff] %v7064_v3  ;;  %11484 = vst [vmem:[#allocation189_spill] sm:$0xff] %v7066_v38  ;;  %v2690_v38 = vrot.slane %v2682_v61, 2  ;;  %v2712_v3 = vstv %s5658_s4  ;;  %s7648_s4 = sld [smem:[#allocation3 + $0x65]] }
 0x22e   :  { %2637 = vrot.lane.b32.xlu1 %v2629_v0, %s5862_s14  ;;  %2635 = vrot.lane.b32.xlu0 %v2630_v41, %s5862_s14  ;;  %v2662_v0 = vsel %vm956_vm1, %v2660_v25, %v2661_v20  ;;  %v2689_v41 = vrot.slane %v2681_v17, 2  ;;  %v2713_v25 = vmul.f32 %v7012_v42, %v2712_v3  ;;  %v2692_v17 = vrot.slane %v2683_v46, 2 }
 0x22f   :  { %v2744_v46 = vstv %s5659_s5  ;;  %s7724_s5 = sld [smem:[#allocation3 + $0x80]] }
 0x230   :  { %v7073_v13 = vpop.permute.xlu1 %2045  ;;  %v7075_v26 = vpop.permute.xlu0 %2043  ;;  %v2691_v61 = vsel %vm956_vm1, %v2689_v41, %v2690_v38 }
 0x231   :  { %11485 = vst [vmem:[#allocation190_spill] sm:$0xff] %v7073_v13  ;;  %11486 = vst [vmem:[#allocation191_spill] sm:$0xff] %v7075_v26  ;;  %v2715_v13 = vmul.f32 %v7025_v40, %v2712_v3 }
 0x232   :  { %2665 = vrot.lane.b32.xlu1 %v2658_v27, %s5862_s14  ;;  %2663 = vrot.lane.b32.xlu0 %v2659_v62, %s5862_s14  ;;  %v2714_v27 = vmul.f32 %v7008_v37, %v2712_v3  ;;  %v2693_v62 = vrot.slane %v2684_v11, 2 }
 0x234   :  { %v7082_v36 = vpop.permute.xlu1 %2073  ;;  %v7084_v10 = vpop.permute.xlu0 %2071 }
 0x235   :  { %11487 = vst [vmem:[#allocation192_spill] sm:$0xff] %v7082_v36  ;;  %11488 = vst [vmem:[#allocation193_spill] sm:$0xff] %v7084_v10  ;;  %v2722_v10 = vrot.slane %v2714_v27, 2  ;;  %v2716_v36 = vmul.f32 %v7022_v32, %v2712_v3 }
 0x236   :  { %2669 = vrot.lane.b32.xlu1 %v2661_v20, %s5862_s14  ;;  %2667 = vrot.lane.b32.xlu0 %v2662_v0, %s5862_s14  ;;  %v2721_v20 = vrot.slane %v2713_v25, 2  ;;  %v2694_v0 = vsel %vm956_vm1, %v2692_v17, %v2693_v62  ;;  %v2724_v25 = vrot.slane %v2715_v13, 2  ;;  %v2745_v17 = vmul.f32 %v7012_v42, %v2744_v46 }
 0x237   :  { %v2725_v27 = vrot.slane %v2716_v36, 2 }
 0x238   :  { %v7091_v26 = vpop.permute.xlu1 %2077  ;;  %v7093_v48 = vpop.permute.xlu0 %2075  ;;  %v2753_v13 = vrot.slane %v2745_v17, 2 }
 0x239   :  { %11489 = vst [vmem:[#allocation194_spill] sm:$0xff] %v7091_v26  ;;  %11490 = vst [vmem:[#allocation195_spill] sm:$0xff] %v7093_v48 }
 0x23a   :  { %2697 = vrot.lane.b32.xlu1 %v2690_v38, %s5862_s14  ;;  %2695 = vrot.lane.b32.xlu0 %v2691_v61, %s5862_s14  ;;  %v2723_v38 = vsel %vm956_vm1, %v2721_v20, %v2722_v10  ;;  %v2746_v61 = vmul.f32 %v7008_v37, %v2744_v46  ;;  %v2726_v20 = vsel %vm956_vm1, %v2724_v25, %v2725_v27 }
 0x23c   :  { %v7100_v41 = vpop.permute.xlu1 %2105  ;;  %v7102_v11 = vpop.permute.xlu0 %2103  ;;  %v2754_v36 = vrot.slane %v2746_v61, 2 }
 0x23d   :  { %11491 = vst [vmem:[#allocation196_spill] sm:$0xff] %v7100_v41  ;;  %11492 = vst [vmem:[#allocation197_spill] sm:$0xff] %v7102_v11  ;;  %v2776_v11 = vstv %s5660_s6  ;;  %s7747_s6 = sld [smem:[#allocation3 + $0x78]] }
 0x23e   :  { %2701 = vrot.lane.b32.xlu1 %v2693_v62, %s5862_s14  ;;  %2699 = vrot.lane.b32.xlu0 %v2694_v0, %s5862_s14  ;;  %v2748_v62 = vmul.f32 %v7022_v32, %v2744_v46  ;;  %v2747_v0 = vmul.f32 %v7025_v40, %v2744_v46  ;;  %v2755_v46 = vsel %vm956_vm1, %v2753_v13, %v2754_v36 }
 0x23f   :  { %v2777_v25 = vmul.f32 %v7012_v42, %v2776_v11 }
 0x240   :  { %v7109_v48 = vpop.permute.xlu1 %2109  ;;  %v7111_v3 = vpop.permute.xlu0 %2107 }
 0x241   :  { %11493 = vst [vmem:[#allocation198_spill] sm:$0xff] %v7109_v48  ;;  %11494 = vst [vmem:[#allocation199_spill] sm:$0xff] %v7111_v3  ;;  %v2778_v3 = vmul.f32 %v7008_v37, %v2776_v11  ;;  %v2808_v48 = vstv %s5661_s7  ;;  %s7798_s7 = sld [smem:[#allocation3 + $0x93]] }
 0x242   :  { %2729 = vrot.lane.b32.xlu1 %v2722_v10, %s5863_s20  ;;  %2727 = vrot.lane.b32.xlu0 %v2723_v38, %s5863_s20  ;;  %v2757_v10 = vrot.slane %v2748_v62, 2  ;;  %v2756_v38 = vrot.slane %v2747_v0, 2  ;;  %v2780_v62 = vmul.f32 %v7022_v32, %v2776_v11  ;;  %v2779_v0 = vmul.f32 %v7025_v40, %v2776_v11 }
 0x243   :  { %v2812_v63 = vmul.f32 %v7022_v32, %v2808_v48  ;;  %v2811_v5 = vmul.f32 %v7025_v40, %v2808_v48 }
 0x244   :  { %v7118_v41 = vpop.permute.xlu1 %2137  ;;  %v7120_v26 = vpop.permute.xlu0 %2135 }
 0x245   :  { %11495 = vst [vmem:[#allocation200_spill] sm:$0xff] %v7118_v41  ;;  %11496 = vst [vmem:[#allocation201_spill] sm:$0xff] %v7120_v26  ;;  %v2786_v26 = vrot.slane %v2778_v3, 2 }
 0x246   :  { %2733 = vrot.lane.b32.xlu1 %v2725_v27, %s5863_s20  ;;  %2731 = vrot.lane.b32.xlu0 %v2726_v20, %s5863_s20  ;;  %v2758_v27 = vsel %vm956_vm1, %v2756_v38, %v2757_v10  ;;  %v2785_v20 = vrot.slane %v2777_v25, 2  ;;  %v2809_v38 = vmul.f32 %v7012_v42, %v2808_v48  ;;  %v2788_v25 = vrot.slane %v2779_v0, 2 }
 0x247   :  { %v2821_v0 = vrot.slane %v2812_v63, 2 }
 0x248   :  { %v7127_v61 = vpop.permute.xlu1 %2141  ;;  %v7129_v17 = vpop.permute.xlu0 %2139  ;;  %v2787_v3 = vsel %vm956_vm1, %v2785_v20, %v2786_v26 }
 0x249   :  { %11497 = vst [vmem:[#allocation202_spill] sm:$0xff] %v7127_v61  ;;  %11498 = vst [vmem:[#allocation203_spill] sm:$0xff] %v7129_v17 }
 0x24a   :  { %2761 = vrot.lane.b32.xlu1 %v2754_v36, %s5863_s20  ;;  %2759 = vrot.lane.b32.xlu0 %v2755_v46, %s5863_s20  ;;  %v2810_v36 = vmul.f32 %v7008_v37, %v2808_v48  ;;  %v2789_v46 = vrot.slane %v2780_v62, 2  ;;  %v2840_v62 = vstv %s5662_s8  ;;  %s7813_s8 = sld [smem:[#allocation3 + $0x9b]] }
 0x24c   :  { %v7136_v13 = vpop.permute.xlu1 %2169  ;;  %v7138_v6 = vpop.permute.xlu0 %2167 }
 0x24d   :  { %11499 = vst [vmem:[#allocation204_spill] sm:$0xff] %v7136_v13  ;;  %11500 = vst [vmem:[#allocation205_spill] sm:$0xff] %v7138_v6  ;;  %v2818_v6 = vrot.slane %v2810_v36, 2  ;;  %v2820_v36 = vrot.slane %v2811_v5, 2  ;;  %v76_v13 = vstv %s7260_s19  ;;  %s8105_s19 = sld [smem:[#allocation3 + $0x82]] }
 0x24e   :  { %2765 = vrot.lane.b32.xlu1 %v2757_v10, %s5863_s20  ;;  %2763 = vrot.lane.b32.xlu0 %v2758_v27, %s5863_s20  ;;  %v2817_v10 = vrot.slane %v2809_v38, 2  ;;  %v2790_v27 = vsel %vm956_vm1, %v2788_v25, %v2789_v46  ;;  %v2842_v38 = vmul.f32 %v7008_v37, %v2840_v62 }
 0x250   :  { %v7145_v17 = vpop.permute.xlu1 %2173  ;;  %v7147_v11 = vpop.permute.xlu0 %2171  ;;  %v2850_v63 = vrot.slane %v2842_v38, 2 }
 0x251   :  { %11501 = vst [vmem:[#allocation206_spill] sm:$0xff] %v7145_v17  ;;  %11502 = vst [vmem:[#allocation207_spill] sm:$0xff] %v7147_v11 }
 0x252   :  { %2793 = vrot.lane.b32.xlu1 %v2786_v26, %s5863_s20  ;;  %2791 = vrot.lane.b32.xlu0 %v2787_v3, %s5863_s20  ;;  %v2819_v26 = vsel %vm956_vm1, %v2817_v10, %v2818_v6  ;;  %v2841_v3 = vmul.f32 %v7012_v42, %v2840_v62  ;;  %v2822_v10 = vsel %vm956_vm1, %v2820_v36, %v2821_v0 }
 0x254   :  { %v7154_v28 = vpop.permute.xlu1 %2201  ;;  %v7156_v20 = vpop.permute.xlu0 %2199  ;;  %v2849_v5 = vrot.slane %v2841_v3, 2 }
 0x255   :  { %11503 = vst [vmem:[#allocation208_spill] sm:$0xff] %v7154_v28  ;;  %11504 = vst [vmem:[#allocation209_spill] sm:$0xff] %v7156_v20  ;;  %v2872_v28 = vstv %s5663_s10  ;;  %s7823_s10 = sld [smem:[#allocation3 + $0x7b]] }
 0x256   :  { %2797 = vrot.lane.b32.xlu1 %v2789_v46, %s5863_s20  ;;  %2795 = vrot.lane.b32.xlu0 %v2790_v27, %s5863_s20  ;;  %v2844_v46 = vmul.f32 %v7022_v32, %v2840_v62  ;;  %v2843_v27 = vmul.f32 %v7025_v40, %v2840_v62  ;;  %v2873_v62 = vmul.f32 %v7012_v42, %v2872_v28 }
 0x258   :  { %v7163_v25 = vpop.permute.xlu1 %2205  ;;  %v7165_v48 = vpop.permute.xlu0 %2203 }
 0x259   :  { %11505 = vst [vmem:[#allocation210_spill] sm:$0xff] %v7163_v25  ;;  %11506 = vst [vmem:[#allocation211_spill] sm:$0xff] %v7165_v48  ;;  %v2852_v48 = vrot.slane %v2843_v27, 2  ;;  %v2874_v25 = vmul.f32 %v7008_v37, %v2872_v28  ;;  %v2875_v27 = vmul.f32 %v7025_v40, %v2872_v28  ;;  %v7204_v40 = vld [vmem:[#allocation5 + $0x28] sm:$0xff] }
 0x25a   :  { %2825 = vrot.lane.b32.xlu1 %v2818_v6, %s5863_s20  ;;  %2823 = vrot.lane.b32.xlu0 %v2819_v26, %s5863_s20  ;;  %v2853_v6 = vrot.slane %v2844_v46, 2  ;;  %v2851_v26 = vsel %vm956_vm1, %v2849_v5, %v2850_v63  ;;  %v2876_v46 = vmul.f32 %v7022_v32, %v2872_v28  ;;  %v2964_v32 = vstv %s5670_s11  ;;  %s7829_s11 = sld [smem:[#allocation3 + $0x16]] }
 0x25b   :  { %v2882_v3 = vrot.slane %v2874_v25, 2 }
 0x25c   :  { %v7172_v11 = vpop.permute.xlu1 %2233  ;;  %v7174_v20 = vpop.permute.xlu0 %2231  ;;  %v2885_v5 = vrot.slane %v2876_v46, 2  ;;  %v7216_v46 = vld [vmem:[#allocation5 + $0x58] sm:$0xff] }
 0x25d   :  { %11507 = vst [vmem:[#allocation212_spill] sm:$0xff] %v7172_v11  ;;  %11508 = vst [vmem:[#allocation213_spill] sm:$0xff] %v7174_v20  ;;  %v7294_v20 = vld [vmem:[#allocation5 + $0x38] sm:$0xff] }
 0x25e   :  { %2829 = vrot.lane.b32.xlu1 %v2821_v0, %s5863_s20  ;;  %2827 = vrot.lane.b32.xlu0 %v2822_v10, %s5863_s20  ;;  %v2854_v0 = vsel %vm956_vm1, %v2852_v48, %v2853_v6  ;;  %v2881_v10 = vrot.slane %v2873_v62, 2  ;;  %v7359_v39 = vmul.f32 %v7294_v20, %v418_v4  ;;  %v7395_v43 = vmul.f32 %v7294_v20, %v443_v54 }
 0x260   :  { %v7181_v36 = vpop.permute.xlu1 %2237  ;;  %v7183_v38 = vpop.permute.xlu0 %2235 }
 0x261   :  { %11509 = vst [vmem:[#allocation214_spill] sm:$0xff] %v7181_v36  ;;  %11510 = vst [vmem:[#allocation215_spill] sm:$0xff] %v7183_v38  ;;  %v7278_v36 = vld [vmem:[#allocation5 + $0x30] sm:$0xff] }
 0x262   :  { %2857 = vrot.lane.b32.xlu1 %v2850_v63, %s5863_s20  ;;  %2855 = vrot.lane.b32.xlu0 %v2851_v26, %s5863_s20  ;;  %v2883_v63 = vsel %vm956_vm1, %v2881_v10, %v2882_v3  ;;  %v2884_v26 = vrot.slane %v2875_v27, 2  ;;  %v7218_v27 = vld [vmem:[#allocation5 + $0x50] sm:$0xff]  ;;  %v7366_v16 = vmul.f32 %v7278_v36, %v76_v13  ;;  %v7373_v2 = vmul.f32 %v7278_v36, %v418_v4 }
 0x263   :  { %v518_v23 = vmul.f32 %v7278_v36, %v6612_v34 }
 0x264   :  { %v7190_v37 = vpop.permute.xlu1 %2265  ;;  %v7192_v42 = vpop.permute.xlu0 %2263  ;;  %v2886_v28 = vsel %vm956_vm1, %v2884_v26, %v2885_v5  ;;  %11542 = vst [vmem:[#allocation247_spill] sm:$0xff] %v7366_v16  ;;  %v446_v16 = vmul.f32 %v7278_v36, %v443_v54 }
 0x265   :  { %11511 = vst [vmem:[#allocation216_spill] sm:$0xff] %v7190_v37  ;;  %11512 = vst [vmem:[#allocation217_spill] sm:$0xff] %v7192_v42 }
 0x266   :  { %2861 = vrot.lane.b32.xlu1 %v2853_v6, %s5863_s20  ;;  %2859 = vrot.lane.b32.xlu0 %v2854_v0, %s5863_s20  ;;  %v7206_v6 = vld [vmem:[#allocation5 + $0x20] sm:$0xff] }
 0x267   :  { %v2965_v10 = vmul.f32 %v2964_v32, %v7206_v6 }
 0x268   :  { %v7197_v48 = vpop.permute.xlu1 %2269  ;;  %v7199_v25 = vpop.permute.xlu0 %2267 }
 0x269   :  { %11513 = vst [vmem:[#allocation218_spill] sm:$0xff] %v7197_v48  ;;  %11514 = vst [vmem:[#allocation219_spill] sm:$0xff] %v7199_v25  ;;  %v3016_v48 = vstv %s5672_s13  ;;  %s7933_s13 = sld [smem:[#allocation3 + $0x96]] }
 0x26a   :  { %2889 = vrot.lane.b32.xlu1 %v2882_v3, %s5863_s20  ;;  %2887 = vrot.lane.b32.xlu0 %v2883_v63, %s5863_s20  ;;  %v2966_v3 = vmul.f32 %v2964_v32, %v7204_v40 }
 0x26c   :  { %v7208_v62 = vpop.permute.xlu1 %2297  ;;  %v7210_v0 = vpop.permute.xlu0 %2295 }
 0x26d   :  { %11515 = vst [vmem:[#allocation220_spill] sm:$0xff] %v7208_v62  ;;  %11516 = vst [vmem:[#allocation221_spill] sm:$0xff] %v7210_v0  ;;  %v2990_v0 = vstv %s5671_s12  ;;  %s7908_s12 = sld [smem:[#allocation3 + $0x31]] }
 0x26e   :  { %2893 = vrot.lane.b32.xlu1 %v2885_v5, %s5863_s20  ;;  %2891 = vrot.lane.b32.xlu0 %v2886_v28, %s5863_s20  ;;  %v2968_v5 = vmul.f32 %v2964_v32, %v7216_v46  ;;  %v2967_v28 = vmul.f32 %v2964_v32, %v7218_v27  ;;  %v2994_v32 = vmul.f32 %v2990_v0, %v7216_v46 }
 0x270   :  { %v7220_v63 = vpop.permute.xlu1 %2301  ;;  %v7222_v26 = vpop.permute.xlu0 %2299 }
 0x271   :  { %11517 = vst [vmem:[#allocation222_spill] sm:$0xff] %v7220_v63  ;;  %11518 = vst [vmem:[#allocation223_spill] sm:$0xff] %v7222_v26  ;;  %v2992_v26 = vmul.f32 %v2990_v0, %v7204_v40 }
 0x272   :  { %2975 = vrot.lane.b32.xlu1 %v2966_v3, %s5862_s14  ;;  %2973 = vrot.lane.b32.xlu0 %v2965_v10, %s5862_s14  ;;  %v2991_v3 = vmul.f32 %v2990_v0, %v7206_v6 }
 0x274   :  { %v7228_v62 = vpop.permute.xlu1 %2329  ;;  %v7230_v25 = vpop.permute.xlu0 %2327 }
 0x275   :  { %11519 = vst [vmem:[#allocation224_spill] sm:$0xff] %v7228_v62  ;;  %11520 = vst [vmem:[#allocation225_spill] sm:$0xff] %v7230_v25  ;;  %v2993_v25 = vmul.f32 %v2990_v0, %v7218_v27  ;;  %v3020_v0 = vmul.f32 %v3016_v48, %v7216_v46 }
 0x276   :  { %2979 = vrot.lane.b32.xlu1 %v2968_v5, %s5862_s14  ;;  %2977 = vrot.lane.b32.xlu0 %v2967_v28, %s5862_s14 }
 0x278   :  { %v7236_v63 = vpop.permute.xlu1 %2333  ;;  %v7238_v10 = vpop.permute.xlu0 %2331 }
 0x279   :  { %11521 = vst [vmem:[#allocation226_spill] sm:$0xff] %v7236_v63  ;;  %11522 = vst [vmem:[#allocation227_spill] sm:$0xff] %v7238_v10  ;;  %v3018_v10 = vmul.f32 %v3016_v48, %v7204_v40 }
 0x27a   :  { %3001 = vrot.lane.b32.xlu1 %v2992_v26, %s5862_s14  ;;  %2999 = vrot.lane.b32.xlu0 %v2991_v3, %s5862_s14  ;;  %v3017_v26 = vmul.f32 %v3016_v48, %v7206_v6 }
 0x27c   :  { %v7244_v5 = vpop.permute.xlu1 %2361  ;;  %v7246_v28 = vpop.permute.xlu0 %2359 }
 0x27d   :  { %11523 = vst [vmem:[#allocation228_spill] sm:$0xff] %v7244_v5  ;;  %11524 = vst [vmem:[#allocation229_spill] sm:$0xff] %v7246_v28 }
 0x27e   :  { %3005 = vrot.lane.b32.xlu1 %v2994_v32, %s5862_s14  ;;  %3003 = vrot.lane.b32.xlu0 %v2993_v25, %s5862_s14  ;;  %v3019_v32 = vmul.f32 %v3016_v48, %v7218_v27  ;;  %v3042_v25 = vstv %s5673_s2  ;;  %s7962_s2 = sld [smem:[#allocation3 + $0x7e]] }
 0x27f   :  { %v3043_v48 = vmul.f32 %v3042_v25, %v7206_v6 }
 0x280   :  { %v7252_v3 = vpop.permute.xlu1 %2365  ;;  %v7254_v42 = vpop.permute.xlu0 %2363 }
 0x281   :  { %11525 = vst [vmem:[#allocation230_spill] sm:$0xff] %v7252_v3  ;;  %11526 = vst [vmem:[#allocation231_spill] sm:$0xff] %v7254_v42  ;;  %v66_v3 = vstv %s5558_s17  ;;  %s8063_s17 = sld [smem:[#allocation3 + $0x67]] }
 0x282   :  { %3027 = vrot.lane.b32.xlu1 %v3018_v10, %s5862_s14  ;;  %3025 = vrot.lane.b32.xlu0 %v3017_v26, %s5862_s14  ;;  %v3044_v10 = vmul.f32 %v3042_v25, %v7204_v40  ;;  %v46_v26 = vstv %s45_s15  ;;  %v7341_v49 = vmul.f32 %v7278_v36, %v66_v3  ;;  %s7987_s15 = sld [smem:[#allocation3 + $0x4c]] }
 0x283   :  { %v7297_v11 = vmul.f32 %v7294_v20, %v46_v26 }
 0x284   :  { %v7262_v28 = vpop.permute.xlu1 %2537  ;;  %v7264_v37 = vpop.permute.xlu0 %2535  ;;  %11536 = vst [vmem:[#allocation241_spill] sm:$0xff] %v7341_v49 }
 0x285   :  { %11527 = vst [vmem:[#allocation232_spill] sm:$0xff] %v7262_v28  ;;  %11528 = vst [vmem:[#allocation233_spill] sm:$0xff] %v7264_v37  ;;  %v56_v28 = vstv %s5557_s16  ;;  %v7281_v37 = vmul.f32 %v7278_v36, %v46_v26  ;;  %s8037_s16 = sld [smem:[#allocation3 + $0x99]] }
 0x286   :  { %3031 = vrot.lane.b32.xlu1 %v3020_v0, %s5862_s14  ;;  %3029 = vrot.lane.b32.xlu0 %v3019_v32, %s5862_s14  ;;  %v3046_v0 = vmul.f32 %v3042_v25, %v7216_v46  ;;  %v3045_v32 = vmul.f32 %v3042_v25, %v7218_v27  ;;  %v7320_v62 = vmul.f32 %v7294_v20, %v56_v28 }
 0x287   :  { %v7323_v24 = vmul.f32 %v7278_v36, %v56_v28 }
 0x288   :  { %v7274_v42 = vpop.permute.xlu1 %2541  ;;  %v7276_v38 = vpop.permute.xlu0 %2539 }
 0x289   :  { %11529 = vst [vmem:[#allocation234_spill] sm:$0xff] %v7274_v42  ;;  %11530 = vst [vmem:[#allocation235_spill] sm:$0xff] %v7276_v38  ;;  %v7289_v42 = vld [vmem:[#allocation5] sm:$0xff] }
 0x28a   :  { %3053 = vrot.lane.b32.xlu1 %v3044_v10, %s5862_s14  ;;  %3051 = vrot.lane.b32.xlu0 %v3043_v48, %s5862_s14  ;;  %v7292_v38 = vmul.f32 %v7289_v42, %v46_v26  ;;  %v3068_v10 = vstv %s5674_s18  ;;  %v7301_v48 = vld [vmem:[#allocation5 + $0x8] sm:$0xff]  ;;  %v7310_v17 = vmul.f32 %v7289_v42, %v56_v28  ;;  %v7330_v41 = vmul.f32 %v7289_v42, %v66_v3  ;;  %s8091_s18 = sld [smem:[#allocation3 + $0x9]] }
 0x28b   :  { %v7304_v25 = vmul.f32 %v7301_v48, %v46_v26  ;;  %v7307_v5 = vmul.f32 %v7301_v48, %v56_v28  ;;  %v7326_v26 = vmul.f32 %v7301_v48, %v66_v3  ;;  %v7338_v28 = vmul.f32 %v7294_v20, %v66_v3 }
 0x28c   :  { %v7315_v63 = vpop.permute.xlu1 %2569  ;;  %v7317_v61 = vpop.permute.xlu0 %2567  ;;  %11534 = vst [vmem:[#allocation239_spill] sm:$0xff] %v7330_v41  ;;  %v7344_v56 = vmul.f32 %v7301_v48, %v76_v13  ;;  %v7347_v50 = vmul.f32 %v7289_v42, %v76_v13  ;;  %v7356_v57 = vmul.f32 %v7289_v42, %v418_v4  ;;  %v7370_v51 = vmul.f32 %v7289_v42, %v6610_v1 }
 0x28d   :  { %11531 = vst [vmem:[#allocation236_spill] sm:$0xff] %v7315_v63  ;;  %11532 = vst [vmem:[#allocation237_spill] sm:$0xff] %v7317_v61  ;;  %v3070_v61 = vmul.f32 %v3068_v10, %v7204_v40  ;;  %v3069_v63 = vmul.f32 %v3068_v10, %v7206_v6  ;;  %v7376_v12 = vmul.f32 %v7301_v48, %v443_v54 }
 0x28e   :  { %11533 = vst [vmem:[#allocation238_spill] sm:$0xff] %v7326_v26  ;;  %3057 = vrot.lane.b32.xlu1 %v3046_v0, %s5862_s14  ;;  %3055 = vrot.lane.b32.xlu0 %v3045_v32, %s5862_s14  ;;  %11535 = vst [vmem:[#allocation240_spill] sm:$0xff] %v7338_v28  ;;  %v7350_v0 = vmul.f32 %v7294_v20, %v76_v13  ;;  %v7353_v32 = vmul.f32 %v7301_v48, %v418_v4  ;;  %v947_v26 = vstv %s7416_s0  ;;  %s8398_s0 = sld [smem:[#allocation3 + $0xc]] }
 0x28f   :  { %11537 = vst [vmem:[#allocation242_spill] sm:$0xff] %v7344_v56  ;;  %11538 = vst [vmem:[#allocation243_spill] sm:$0xff] %v7347_v50  ;;  %v7379_v47 = vmul.f32 %v7289_v42, %v443_v54  ;;  %v3072_v13 = vmul.f32 %v3068_v10, %v7216_v46  ;;  %v7388_v4 = vmul.f32 %v7278_v36, %v6610_v1  ;;  %v455_v56 = vrot.slane %v446_v16, 1 }
 0x290   :  { %11539 = vst [vmem:[#allocation244_spill] sm:$0xff] %v7350_v0  ;;  %v7361_v3 = vpop.permute.xlu1 %2573  ;;  %v7363_v55 = vpop.permute.xlu0 %2571  ;;  %11543 = vst [vmem:[#allocation248_spill] sm:$0xff] %v7370_v51  ;;  %v7392_v31 = vmul.f32 %v7289_v42, %v6637_v33  ;;  %v491_v51 = vstv %s7313_s25  ;;  %v516_v50 = vmul.f32 %v7289_v42, %v6612_v34  ;;  %v540_v49 = vmul.f32 %v7289_v42, %v6651_v18  ;;  %s8304_s25 = sld [smem:[#allocation3 + $0x17]] }
 0x291   :  { %11540 = vst [vmem:[#allocation245_spill] sm:$0xff] %v7361_v3  ;;  %11541 = vst [vmem:[#allocation246_spill] sm:$0xff] %v7363_v55  ;;  %v467_v3 = vstv %s7283_s23  ;;  %v3071_v55 = vmul.f32 %v3068_v10, %v7218_v27  ;;  %v3096_v10 = vmul.f32 %v3094_v30, %v7204_v40  ;;  %v3098_v16 = vmul.f32 %v3094_v30, %v7216_v46  ;;  %s8177_s23 = sld [smem:[#allocation3 + $0x5a]] }
 0x292   :  { %3079 = vrot.lane.b32.xlu1 %v3070_v61, %s5862_s14  ;;  %3077 = vrot.lane.b32.xlu0 %v3069_v63, %s5862_s14  ;;  %11544 = vst [vmem:[#allocation249_spill] sm:$0xff] %v7388_v4  ;;  %11545 = vst [vmem:[#allocation250_spill] sm:$0xff] %v7392_v31  ;;  %v428_v63 = vrot.slane %v7356_v57, 1  ;;  %v431_v4 = vrot.slane %v7373_v2, 1  ;;  %v7412_v0 = vmul.f32 %v7301_v48, %v467_v3  ;;  %v452_v61 = vrot.slane %v7379_v47, 1 }
 0x293   :  { %v468_v57 = vmul.f32 %v7289_v42, %v467_v3  ;;  %v3095_v2 = vmul.f32 %v3094_v30, %v7206_v6  ;;  %v7424_v54 = vmul.f32 %v7294_v20, %v467_v3  ;;  %v7428_v47 = vmul.f32 %v7301_v48, %v491_v51 }
 0x294   :  { %v7404_v9 = vpop.permute.xlu1 %2601  ;;  %v7406_v1 = vpop.permute.xlu0 %2599  ;;  %v548_v14 = vrot.slane %v540_v49, 1 }
 0x295   :  { %11546 = vst [vmem:[#allocation251_spill] sm:$0xff] %v7404_v9  ;;  %11547 = vst [vmem:[#allocation252_spill] sm:$0xff] %v7406_v1  ;;  %v470_v1 = vmul.f32 %v7278_v36, %v467_v3  ;;  %v492_v9 = vmul.f32 %v7289_v42, %v491_v51  ;;  %v476_v22 = vrot.slane %v468_v57, 1  ;;  %v3097_v3 = vmul.f32 %v3094_v30, %v7218_v27 }
 0x296   :  { %3083 = vrot.lane.b32.xlu1 %v3072_v13, %s5862_s14  ;;  %3081 = vrot.lane.b32.xlu0 %v3071_v55, %s5862_s14  ;;  %v7432_v13 = vmul.f32 %v7294_v20, %v491_v51  ;;  %v494_v55 = vmul.f32 %v7278_v36, %v491_v51  ;;  %v542_v51 = vmul.f32 %v7278_v36, %v6651_v18  ;;  %v3120_v57 = vstv %s7398_s26  ;;  %s8369_s26 = sld [smem:[#allocation3 + $0x32]] }
 0x297   :  { %v479_v34 = vrot.slane %v470_v1, 1  ;;  %v500_v18 = vrot.slane %v492_v9, 1  ;;  %v7466_v30 = vmul.f32 %v7278_v36, %v6637_v33  ;;  %v11552_v1 = vrot.slane %v7353_v32, 1 }
 0x298   :  { %v7437_v29 = vpop.permute.xlu1 %2605  ;;  %v7439_v31 = vpop.permute.xlu0 %2603  ;;  %v503_v15 = vrot.slane %v494_v55, 1  ;;  %v551_v9 = vrot.slane %v542_v51, 1  ;;  %v3121_v33 = vmul.f32 %v3120_v57, %v7206_v6  ;;  %v11553_v55 = vrot.slane %v7359_v39, 1 }
 0x299   :  { %11548 = vst [vmem:[#allocation253_spill] sm:$0xff] %v7437_v29  ;;  %11549 = vst [vmem:[#allocation254_spill] sm:$0xff] %v7439_v31  ;;  %v7471_v29 = vsel %vm427_vm0, %v428_v63, %v11552_v1  ;;  %v527_v31 = vrot.slane %v518_v23, 1  ;;  %v11554_v23 = vrot.slane %v7376_v12, 1  ;;  %v11555_v51 = vrot.slane %v7395_v43, 1 }
 0x29a   :  { %3105 = vrot.lane.b32.xlu1 %v3096_v10, %s5862_s14  ;;  %3103 = vrot.lane.b32.xlu0 %v3095_v2, %s5862_s14  ;;  %v524_v10 = vrot.slane %v516_v50, 1  ;;  %v3122_v50 = vmul.f32 %v3120_v57, %v7204_v40  ;;  %v7483_v63 = vsel %vm427_vm0, %v431_v4, %v11553_v55  ;;  %v11557_v28 = vrot.slane %v7424_v54, 1 }
 0x29b   :  { %v7488_v49 = vsel %vm427_vm0, %v452_v61, %v11554_v23  ;;  %v11558_v55 = vrot.slane %v7428_v47, 1  ;;  %v11559_v23 = vrot.slane %v7432_v13, 1 }
 0x29c   :  { %v7460_v41 = vpop.permute.xlu1 %2633  ;;  %v7462_v2 = vpop.permute.xlu0 %2631  ;;  %v7503_v4 = vsel %vm427_vm0, %v479_v34, %v11557_v28  ;;  %v11565_v34 = vrot.slane %v6649_v21, 1  ;;  %v3124_v21 = vmul.f32 %v3120_v57, %v7216_v46 }
 0x29d   :  { %11550 = vst [vmem:[#allocation255_spill] sm:$0xff] %v7460_v41  ;;  %11551 = vst [vmem:[#allocation256_spill] sm:$0xff] %v7462_v2  ;;  %v7508_v61 = vsel %vm427_vm0, %v500_v18, %v11558_v55  ;;  %v11567_v55 = vrot.slane %v6670_v35, 1  ;;  %v7550_v35 = vadd.f32 %v6067_v44, %v7281_v37  ;;  %v7569_v44 = vadd.f32 %v6078_v53, %v7304_v25  ;;  %v11589_v2 = vld [vmem:[#allocation15_spill] sm:$0xff] }
 0x29e   :  { %3109 = vrot.lane.b32.xlu1 %v3098_v16, %s5862_s14  ;;  %3107 = vrot.lane.b32.xlu0 %v3097_v3, %s5862_s14  ;;  %v7493_v16 = vsel %vm427_vm0, %v455_v56, %v11555_v51  ;;  %v11556_v3 = vrot.slane %v7412_v0, 1  ;;  %v7513_v56 = vsel %vm427_vm0, %v503_v15, %v11559_v23  ;;  %v11561_v51 = vrot.slane %v6622_v58, 1 }
 0x29f   :  { %11560 = vst [vmem:[#allocation257_spill] sm:$0xff] %v7513_v56  ;;  %v7527_v18 = vsel %vm427_vm0, %v527_v31, %v11565_v34  ;;  %v7532_v15 = vsel %vm427_vm0, %v548_v14, %v11567_v55  ;;  %v7535_v58 = vmul.f32 %v7301_v48, %v947_v26  ;;  %v11570_v23 = vrot.slane %v6687_v19, 1 }
 0x2a0   :  { %v7498_v1 = vsel %vm427_vm0, %v476_v22, %v11556_v3  ;;  %v7518_v22 = vsel %vm427_vm0, %v524_v10, %v11561_v51  ;;  %v7520_v3 = vpop.permute.xlu1 %2637  ;;  %v7522_v28 = vpop.permute.xlu0 %2635  ;;  %11566 = vst [vmem:[#allocation261_spill] sm:$0xff] %v7527_v18  ;;  %11568 = vst [vmem:[#allocation262_spill] sm:$0xff] %v7532_v15  ;;  %v948_v10 = vmul.f32 %v7289_v42, %v947_v26 }
 0x2a1   :  { %11562 = vst [vmem:[#allocation258_spill] sm:$0xff] %v7518_v22  ;;  %11563 = vst [vmem:[#allocation259_spill] sm:$0xff] %v7520_v3  ;;  %v7541_v51 = vsel %vm427_vm0, %v551_v9, %v11570_v23  ;;  %v3123_v14 = vmul.f32 %v3120_v57, %v7218_v27  ;;  %v7553_v31 = vmul.f32 %v7294_v20, %v947_v26  ;;  %v3146_v9 = vstv %s7457_s28  ;;  %v11577_v23 = vld [vmem:[#allocation12_spill] sm:$0xff]  ;;  %s8445_s28 = sld [smem:[#allocation3 + $0x4d]] }
 0x2a2   :  { %11564 = vst [vmem:[#allocation260_spill] sm:$0xff] %v7522_v28  ;;  %11569 = vst [vmem:[#allocation263_spill] sm:$0xff] %v7535_v58  ;;  %v972_v28 = vstv %s7448_s27  ;;  %3131 = vrot.lane.b32.xlu1 %v3122_v50, %s5863_s20  ;;  %3129 = vrot.lane.b32.xlu0 %v3121_v33, %s5863_s20  ;;  %v950_v19 = vmul.f32 %v7278_v36, %v947_v26  ;;  %v7561_v50 = vadd.f32 %v6069_v45, %v7292_v38  ;;  %v11579_v45 = vld [vmem:[#allocation13_spill] sm:$0xff]  ;;  %s8437_s27 = sld [smem:[#allocation3 + $0x27]] }
 0x2a3   :  { %11571 = vst [vmem:[#allocation264_spill] sm:$0xff] %v7541_v51  ;;  %11572 = vst [vmem:[#allocation265_spill] sm:$0xff] %v7553_v31  ;;  %v7565_v57 = vadd.f32 %v6076_v52, %v7297_v11  ;;  %v7573_v37 = vadd.f32 %v6085_v59, %v7307_v5  ;;  %v957_v38 = vrot.slane %v948_v10, 2  ;;  %v7583_v52 = vmul.f32 %v7301_v48, %v972_v28  ;;  %v11576_v10 = vld [vmem:[#allocation238_spill] sm:$0xff] }
 0x2a4   :  { %v7577_v26 = vpop.permute.xlu1 %2665  ;;  %v7579_v33 = vpop.permute.xlu0 %2663  ;;  %v973_v11 = vmul.f32 %v7289_v42, %v972_v28  ;;  %v7588_v53 = vadd.f32 %v6087_v60, %v7310_v17  ;;  %v996_v59 = vstv %s7474_s1  ;;  %v3148_v5 = vmul.f32 %v3146_v9, %v7204_v40  ;;  %s8517_s1 = sld [smem:[#allocation3 + $0x42]] }
 0x2a5   :  { %11573 = vst [vmem:[#allocation266_spill] sm:$0xff] %v7577_v26  ;;  %11574 = vst [vmem:[#allocation267_spill] sm:$0xff] %v7579_v33  ;;  %v3147_v25 = vmul.f32 %v3146_v9, %v7206_v6  ;;  %v7597_v34 = vadd.f32 %v6094_v7, %v7320_v62  ;;  %v7601_v55 = vadd.f32 %v6096_v8, %v7323_v24  ;;  %v960_v17 = vrot.slane %v950_v19, 2  ;;  %v11610_v26 = vld [vmem:[#allocation20_spill] sm:$0xff] }
 0x2a6   :  { %11575 = vst [vmem:[#allocation268_spill] sm:$0xff] %v7583_v52  ;;  %3135 = vrot.lane.b32.xlu1 %v3124_v21, %s5863_s20  ;;  %3133 = vrot.lane.b32.xlu0 %v3123_v14, %s5863_s20  ;;  %v7606_v21 = vadd.f32 %v11577_v23, %v11576_v10  ;;  %v11578_v14 = vld [vmem:[#allocation239_spill] sm:$0xff]  ;;  %v7613_v3 = vmul.f32 %v7294_v20, %v972_v28  ;;  %v11583_v24 = vrot.slane %v7535_v58, 2  ;;  %v11588_v10 = vld [vmem:[#allocation241_spill] sm:$0xff]  ;;  %v11590_v41 = vrot.slane %v7553_v31, 2  ;;  %v11593_v58 = vld [vmem:[#allocation16_spill] sm:$0xff] }
 0x2a7   :  { %v7610_v33 = vadd.f32 %v11579_v45, %v11578_v14  ;;  %v975_v7 = vmul.f32 %v7278_v36, %v972_v28  ;;  %v981_v45 = vrot.slane %v973_v11, 2  ;;  %v7627_v23 = vmul.f32 %v7301_v48, %v996_v59  ;;  %v11597_v31 = vld [vmem:[#allocation17_spill] sm:$0xff] }
 0x2a8   :  { %11580 = vst [vmem:[#allocation238_spill] sm:$0xff] %v7613_v3  ;;  %v7616_v62 = vpop.permute.xlu1 %2669  ;;  %v7618_v8 = vpop.permute.xlu0 %2667  ;;  %v7623_v19 = vsel %vm956_vm1, %v957_v38, %v11583_v24  ;;  %v997_v14 = vmul.f32 %v7289_v42, %v996_v59  ;;  %v3150_v28 = vmul.f32 %v3146_v9, %v7216_v46  ;;  %v3149_v60 = vmul.f32 %v3146_v9, %v7218_v27  ;;  %v11587_v38 = vld [vmem:[#allocation14_spill] sm:$0xff] }
 0x2a9   :  { %11581 = vst [vmem:[#allocation12_spill] sm:$0xff] %v7616_v62  ;;  %11582 = vst [vmem:[#allocation239_spill] sm:$0xff] %v7618_v8  ;;  %v11586_v8 = vld [vmem:[#allocation240_spill] sm:$0xff]  ;;  %v7640_v11 = vadd.f32 %v11589_v2, %v11588_v10  ;;  %v11596_v10 = vld [vmem:[#allocation243_spill] sm:$0xff] }
 0x2aa   :  { %11584 = vst [vmem:[#allocation13_spill] sm:$0xff] %v7623_v19  ;;  %11585 = vst [vmem:[#allocation269_spill] sm:$0xff] %v7627_v23  ;;  %3157 = vrot.lane.b32.xlu1 %v3148_v5, %s5863_s20  ;;  %3155 = vrot.lane.b32.xlu0 %v3147_v25, %s5863_s20  ;;  %v7636_v24 = vadd.f32 %v11587_v38, %v11586_v8  ;;  %v7645_v19 = vsel %vm956_vm1, %v960_v17, %v11590_v41  ;;  %v3172_v5 = vstv %s7557_s29  ;;  %v11592_v25 = vld [vmem:[#allocation242_spill] sm:$0xff]  ;;  %s8538_s29 = sld [smem:[#allocation3 + $0x68]] }
 0x2ab   :  { %11591 = vst [vmem:[#allocation240_spill] sm:$0xff] %v7645_v19  ;;  %v7652_v51 = vadd.f32 %v11593_v58, %v11592_v25  ;;  %v984_v8 = vrot.slane %v975_v7, 2  ;;  %v1020_v38 = vstv %s7575_s30  ;;  %v7662_v18 = vadd.f32 %v11597_v31, %v11596_v10  ;;  %s8552_s30 = sld [smem:[#allocation3 + $0x5d]] }
 0x2ac   :  { %v7656_v15 = vpop.permute.xlu1 %2697  ;;  %v7658_v2 = vpop.permute.xlu0 %2695  ;;  %v11598_v41 = vrot.slane %v7583_v52, 2  ;;  %v7670_v58 = vmul.f32 %v7294_v20, %v996_v59  ;;  %v999_v25 = vmul.f32 %v7278_v36, %v996_v59  ;;  %v1005_v9 = vrot.slane %v997_v14, 2  ;;  %v11601_v52 = vld [vmem:[#allocation18_spill] sm:$0xff]  ;;  %v11602_v14 = vld [vmem:[#allocation247_spill] sm:$0xff] }
 0x2ad   :  { %11594 = vst [vmem:[#allocation14_spill] sm:$0xff] %v7656_v15  ;;  %11595 = vst [vmem:[#allocation241_spill] sm:$0xff] %v7658_v2  ;;  %v3174_v31 = vmul.f32 %v3172_v5, %v7204_v40  ;;  %v3173_v10 = vmul.f32 %v3172_v5, %v7206_v6  ;;  %v11600_v2 = vld [vmem:[#allocation244_spill] sm:$0xff]  ;;  %v1021_v59 = vmul.f32 %v7289_v42, %v1020_v38 }
 0x2ae   :  { %v7667_v17 = vsel %vm956_vm1, %v981_v45, %v11598_v41  ;;  %3161 = vrot.lane.b32.xlu1 %v3150_v28, %s5863_s20  ;;  %3159 = vrot.lane.b32.xlu0 %v3149_v60, %s5863_s20  ;;  %v7680_v45 = vadd.f32 %v11601_v52, %v11600_v2  ;;  %v7683_v41 = vmul.f32 %v7301_v48, %v1020_v38  ;;  %v11603_v28 = vld [vmem:[#allocation19_spill] sm:$0xff]  ;;  %v11604_v60 = vrot.slane %v7613_v3, 2  ;;  %v11606_v2 = vld [vmem:[#allocation114_spill] sm:$0xff] }
 0x2af   :  { %11599 = vst [vmem:[#allocation15_spill] sm:$0xff] %v7667_v17  ;;  %v7687_v7 = vmul.f32 %v7294_v20, %v1020_v38  ;;  %v7691_v17 = vadd.f32 %v11603_v28, %v11602_v14  ;;  %v1023_v52 = vmul.f32 %v7278_v36, %v1020_v38  ;;  %v1045_v48 = vmul.f32 %v7289_v42, %v11606_v2  ;;  %v11609_v20 = vld [vmem:[#allocation248_spill] sm:$0xff] }
 0x2b0   :  { %v7696_v19 = vsel %vm956_vm1, %v984_v8, %v11604_v60  ;;  %v7701_v15 = vpop.permute.xlu1 %2701  ;;  %v7703_v62 = vpop.permute.xlu0 %2699  ;;  %v7707_v22 = vadd.f32 %v11610_v26, %v11609_v20  ;;  %v1008_v28 = vrot.slane %v999_v25, 2  ;;  %v1047_v8 = vmul.f32 %v7278_v36, %v11606_v2  ;;  %v11613_v2 = vld [vmem:[#allocation24_spill] sm:$0xff]  ;;  %v11618_v20 = vld [vmem:[#allocation21_spill] sm:$0xff] }
 0x2b1   :  { %11605 = vst [vmem:[#allocation242_spill] sm:$0xff] %v7696_v19  ;;  %11607 = vst [vmem:[#allocation16_spill] sm:$0xff] %v7701_v15  ;;  %v11611_v38 = vrot.slane %v7627_v23, 2  ;;  %v3175_v26 = vmul.f32 %v3172_v5, %v7218_v27  ;;  %v1029_v14 = vrot.slane %v1021_v59, 2  ;;  %v3198_v19 = vstv %s7648_s4  ;;  %s8608_s4 = sld [smem:[#allocation3 + $0x83]] }
 0x2b2   :  { %11608 = vst [vmem:[#allocation243_spill] sm:$0xff] %v7703_v62  ;;  %3183 = vrot.lane.b32.xlu1 %v3174_v31, %s5863_s20  ;;  %3181 = vrot.lane.b32.xlu0 %v3173_v10, %s5863_s20  ;;  %v3176_v62 = vmul.f32 %v3172_v5, %v7216_v46  ;;  %v1053_v10 = vrot.slane %v1045_v48, 2  ;;  %v11617_v5 = vld [vmem:[#allocation249_spill] sm:$0xff]  ;;  %v11619_v25 = vrot.slane %v7670_v58, 2  ;;  %v1056_v56 = vrot.slane %v1047_v8, 2  ;;  %v11624_v8 = vld [vmem:[#allocation23_spill] sm:$0xff] }
 0x2b3   :  { %v7715_v60 = vsel %vm956_vm1, %v1005_v9, %v11611_v38  ;;  %v284_v9 = vadd.f32 %v11613_v2, %v7569_v44  ;;  %v11614_v38 = vld [vmem:[#allocation25_spill] sm:$0xff]  ;;  %v7736_v59 = vadd.f32 %v11618_v20, %v11617_v5  ;;  %v3200_v48 = vmul.f32 %v3198_v19, %v7204_v40 }
 0x2b4   :  { %11612 = vst [vmem:[#allocation17_spill] sm:$0xff] %v7715_v60  ;;  %v283_v31 = vadd.f32 %v11614_v38, %v7561_v50  ;;  %v1032_v60 = vrot.slane %v1023_v52, 2  ;;  %v7730_v23 = vpop.permute.xlu1 %2729  ;;  %v7732_v3 = vpop.permute.xlu0 %2727  ;;  %v7741_v15 = vsel %vm956_vm1, %v1008_v28, %v11619_v25  ;;  %v11620_v44 = vld [vmem:[#allocation121_spill] sm:$0xff]  ;;  %v11621_v50 = vld [vmem:[#allocation26_spill] sm:$0xff]  ;;  %v3199_v20 = vmul.f32 %v3198_v19, %v7206_v6 }
 0x2b5   :  { %11615 = vst [vmem:[#allocation244_spill] sm:$0xff] %v7730_v23  ;;  %11616 = vst [vmem:[#allocation18_spill] sm:$0xff] %v7732_v3  ;;  %v1069_v2 = vmul.f32 %v7289_v42, %v11620_v44  ;;  %v286_v52 = vadd.f32 %v11621_v50, %v7565_v57  ;;  %v11622_v38 = vld [vmem:[#allocation250_spill] sm:$0xff]  ;;  %v7759_v42 = vadd.f32 %v11624_v8, %v7466_v30  ;;  %v11625_v57 = vrot.slane %v7683_v41, 2 }
 0x2b6   :  { %3187 = vrot.lane.b32.xlu1 %v3176_v62, %s5863_s20  ;;  %3185 = vrot.lane.b32.xlu0 %v3175_v26, %s5863_s20  ;;  %v11623_v28 = vld [vmem:[#allocation22_spill] sm:$0xff]  ;;  %v1071_v62 = vmul.f32 %v7278_v36, %v11620_v44  ;;  %v11626_v26 = vrot.slane %v7353_v32, 1  ;;  %v7773_v3 = vadd.f32 %v7471_v29, %v283_v31  ;;  %v11632_v32 = vld [vmem:[#allocation27_spill] sm:$0xff]  ;;  %v11633_v29 = vld [vmem:[#allocation28_spill] sm:$0xff] }
 0x2b7   :  { %v7755_v25 = vadd.f32 %v11623_v28, %v11622_v38  ;;  %v7764_v5 = vsel %vm956_vm1, %v1029_v14, %v11625_v57  ;;  %v11627_v38 = vrot.slane %v7687_v7, 2  ;;  %v11628_v28 = vld [vmem:[#allocation115_spill] sm:$0xff]  ;;  %v310_v31 = vadd.f32 %v11633_v29, %v7573_v37  ;;  %v11634_v44 = vld [vmem:[#allocation118_spill] sm:$0xff] }
 0x2b8   :  { %v7770_v50 = vadd.f32 %v11626_v26, %v284_v9  ;;  %v11629_v8 = vrot.slane %v11628_v28, 2  ;;  %v7785_v57 = vpop.permute.xlu1 %2733  ;;  %v7787_v36 = vpop.permute.xlu0 %2731  ;;  %v285_v9 = vadd.f32 %v11632_v32, %v7550_v35  ;;  %v11635_v26 = vrot.slane %v11634_v44, 2  ;;  %v11686_v23 = vld [vmem:[#allocation178_spill] sm:$0xff] }
 0x2b9   :  { %v7778_v30 = vsel %vm956_vm1, %v1032_v60, %v11627_v38  ;;  %11630 = vst [vmem:[#allocation247_spill] sm:$0xff] %v7785_v57  ;;  %11631 = vst [vmem:[#allocation19_spill] sm:$0xff] %v7787_v36  ;;  %v1077_v38 = vrot.slane %v1069_v2, 2  ;;  %v3202_v35 = vmul.f32 %v3198_v19, %v7216_v46  ;;  %v3201_v37 = vmul.f32 %v3198_v19, %v7218_v27  ;;  %v11685_v36 = vld [vmem:[#allocation158_spill] sm:$0xff] }
 0x2ba   :  { %v7783_v14 = vsel %vm956_vm1, %v1053_v10, %v11629_v8  ;;  %v7796_v60 = vsel %vm956_vm1, %v1056_v56, %v11635_v26  ;;  %v11636_v10 = vrot.slane %v7359_v39, 1  ;;  %3209 = vrot.lane.b32.xlu1 %v3200_v48, %s5863_s20  ;;  %3207 = vrot.lane.b32.xlu0 %v3199_v20, %s5863_s20  ;;  %v11637_v8 = vld [vmem:[#allocation29_spill] sm:$0xff]  ;;  %v11638_v56 = vld [vmem:[#allocation30_spill] sm:$0xff]  ;;  %v1080_v29 = vrot.slane %v1071_v62, 2  ;;  %v11639_v39 = vld [vmem:[#allocation31_spill] sm:$0xff] }
 0x2bb   :  { %v309_v32 = vadd.f32 %v11637_v8, %v7588_v53  ;;  %v312_v2 = vadd.f32 %v11638_v56, %v7597_v34  ;;  %v3224_v44 = vstv %s7724_s5  ;;  %v11640_v48 = vld [vmem:[#allocation32_spill] sm:$0xff]  ;;  %v11641_v26 = vld [vmem:[#allocation33_spill] sm:$0xff]  ;;  %v11645_v8 = vld [vmem:[#allocation35_spill] sm:$0xff]  ;;  %v7834_v56 = vadd.f32 %v7483_v63, %v285_v9  ;;  %s8668_s5 = sld [smem:[#allocation3 + $0x9e]] }
 0x2bc   :  { %v7802_v28 = vadd.f32 %v11636_v10, %v286_v52  ;;  %v311_v52 = vadd.f32 %v11639_v39, %v7601_v55  ;;  %v336_v20 = vadd.f32 %v11640_v48, %v7606_v21  ;;  %v335_v19 = vadd.f32 %v11641_v26, %v7610_v33  ;;  %v11642_v10 = vld [vmem:[#allocation34_spill] sm:$0xff]  ;;  %v7825_v34 = vpop.permute.xlu1 %2761  ;;  %v7827_v62 = vpop.permute.xlu0 %2759  ;;  %v11650_v26 = vld [vmem:[#allocation36_spill] sm:$0xff] }
 0x2bd   :  { %v338_v53 = vadd.f32 %v11642_v10, %v7636_v24  ;;  %11643 = vst [vmem:[#allocation114_spill] sm:$0xff] %v7825_v34  ;;  %11644 = vst [vmem:[#allocation248_spill] sm:$0xff] %v7827_v62  ;;  %v337_v55 = vadd.f32 %v11645_v8, %v7640_v11  ;;  %v11646_v21 = vrot.slane %v7376_v12, 1  ;;  %v11647_v39 = vld [vmem:[#allocation122_spill] sm:$0xff]  ;;  %v362_v10 = vadd.f32 %v11650_v26, %v7652_v51  ;;  %v11652_v11 = vld [vmem:[#allocation37_spill] sm:$0xff] }
 0x2be   :  { %v11648_v24 = vrot.slane %v11647_v39, 2  ;;  %v7848_v62 = vstv %s7747_s6  ;;  %3213 = vrot.lane.b32.xlu1 %v3202_v35, %s5863_s20  ;;  %3211 = vrot.lane.b32.xlu0 %v3201_v37, %s5863_s20  ;;  %v3226_v63 = vmul.f32 %v3224_v44, %v7204_v40  ;;  %v3225_v12 = vmul.f32 %v3224_v44, %v7206_v6  ;;  %v11654_v8 = vld [vmem:[#allocation126_spill] sm:$0xff]  ;;  %v11666_v26 = vld [vmem:[#allocation152_spill] sm:$0xff]  ;;  %v11684_v34 = vld [vmem:[#allocation135_spill] sm:$0xff]  ;;  %s8762_s6 = sld [smem:[#allocation3 + $0x19]] }
 0x2bf   :  { %v7838_v33 = vadd.f32 %v11646_v21, %v310_v31  ;;  %11651 = vst [vmem:[#allocation24_spill] sm:$0xff] %v7848_v62  ;;  %v361_v9 = vadd.f32 %v11652_v11, %v7662_v18  ;;  %v7857_v31 = vadd.f32 %v7488_v49, %v309_v32  ;;  %v11655_v21 = vrot.slane %v11654_v8, 2 }
 0x2c0   :  { %v7843_v48 = vsel %vm956_vm1, %v1077_v38, %v11648_v24  ;;  %v11653_v38 = vrot.slane %v7395_v43, 1  ;;  %v7869_v37 = vadd.f32 %v7493_v16, %v311_v52  ;;  %v11657_v39 = vrot.slane %v7412_v0, 1  ;;  %v7882_v32 = vpop.permute.xlu1 %2765  ;;  %v7891_v0 = vld [vmem:[#allocation5 + $0x18] sm:$0xff] }
 0x2c1   :  { %11649 = vst [vmem:[#allocation20_spill] sm:$0xff] %v7843_v48  ;;  %v7866_v35 = vsel %vm956_vm1, %v1080_v29, %v11655_v21  ;;  %v7876_v18 = vadd.f32 %v7498_v1, %v335_v19  ;;  %v11658_v49 = vrot.slane %v7424_v54, 1  ;;  %11659 = vst [vmem:[#allocation249_spill] sm:$0xff] %v7882_v32  ;;  %v11661_v29 = vld [vmem:[#allocation38_spill] sm:$0xff]  ;;  %v7889_v52 = vadd.f32 %v7503_v4, %v337_v55  ;;  %v11665_v55 = vld [vmem:[#allocation128_spill] sm:$0xff] }
 0x2c2   :  { %v7861_v51 = vadd.f32 %v11653_v38, %v312_v2  ;;  %11656 = vst [vmem:[#allocation25_spill] sm:$0xff] %v7866_v35  ;;  %v7873_v24 = vadd.f32 %v11657_v39, %v336_v20  ;;  %v7884_v2 = vpop.permute.xlu0 %2763  ;;  %v364_v16 = vadd.f32 %v11661_v29, %v7680_v45  ;;  %v7895_v1 = vmul.f32 %v7891_v0, %v7848_v62  ;;  %v11673_v21 = vld [vmem:[#allocation39_spill] sm:$0xff] }
 0x2c3   :  { %v7880_v43 = vadd.f32 %v11658_v49, %v338_v53  ;;  %11660 = vst [vmem:[#allocation21_spill] sm:$0xff] %v7884_v2  ;;  %v7898_v54 = vstv %s7798_s7  ;;  %v11664_v20 = vrot.slane %v7428_v47, 1  ;;  %3235 = vrot.lane.b32.xlu1 %v3226_v63, %s5863_s20  ;;  %3233 = vrot.lane.b32.xlu0 %v3225_v12, %s5863_s20  ;;  %v3228_v4 = vmul.f32 %v3224_v44, %v7216_v46  ;;  %v7915_v47 = vld [vmem:[#allocation5 + $0x48] sm:$0xff]  ;;  %v11676_v2 = vld [vmem:[#allocation40_spill] sm:$0xff]  ;;  %s8819_s7 = sld [smem:[#allocation3 + $0x34]] }
 0x2c4   :  { %11662 = vst [vmem:[#allocation121_spill] sm:$0xff] %v7895_v1  ;;  %11663 = vst [vmem:[#allocation26_spill] sm:$0xff] %v7898_v54  ;;  %v3227_v45 = vmul.f32 %v3224_v44, %v7218_v27  ;;  %v7911_v53 = vadd.f32 %v7508_v61, %v361_v9  ;;  %v1662_v11 = vadd.f32 %v11666_v26, %v11665_v55  ;;  %v3250_v63 = vstv %s7813_s8  ;;  %v7935_v9 = vpop.permute.xlu1 %2793  ;;  %s8847_s8 = sld [smem:[#allocation3 + $0xf]] }
 0x2c5   :  { %v7902_v19 = vadd.f32 %v11664_v20, %v362_v10  ;;  %v7919_v10 = vmul.f32 %v7915_v47, %v7848_v62  ;;  %v7924_v12 = vmul.f32 %v7891_v0, %v7898_v54  ;;  %v7928_v44 = vmul.f32 %v7915_v47, %v7898_v54  ;;  %11671 = vst [vmem:[#allocation27_spill] sm:$0xff] %v7935_v9  ;;  %v11675_v20 = vld [vmem:[#allocation176_spill] sm:$0xff] }
 0x2c6   :  { %v7931_v61 = vstv %s7823_s10  ;;  %v7937_v38 = vpop.permute.xlu0 %2791  ;;  %v3420_v8 = vstv %s7829_s11  ;;  %v363_v39 = vadd.f32 %v11673_v21, %v7691_v17  ;;  %v11674_v49 = vrot.slane %v7432_v13, 1  ;;  %v11677_v17 = vld [vmem:[#allocation131_spill] sm:$0xff]  ;;  %v11678_v21 = vld [vmem:[#allocation154_spill] sm:$0xff]  ;;  %s8857_s10 = sld [smem:[#allocation3 + $0x2a]]  ;;  %s8894_s11 = sld [smem:[#allocation3 + $0x4f]] }
 0x2c7   :  { %11667 = vst [vmem:[#allocation250_spill] sm:$0xff] %v7919_v10  ;;  %11668 = vst [vmem:[#allocation22_spill] sm:$0xff] %v7924_v12  ;;  %v1818_v55 = vadd.f32 %v11675_v20, %v1662_v11  ;;  %v387_v32 = vadd.f32 %v11676_v2, %v7707_v22  ;;  %3239 = vrot.lane.b32.xlu1 %v3228_v4, %s5863_s20  ;;  %3237 = vrot.lane.b32.xlu0 %v3227_v45, %s5863_s20  ;;  %v11680_v22 = vld [vmem:[#allocation133_spill] sm:$0xff]  ;;  %v11681_v2 = vld [vmem:[#allocation156_spill] sm:$0xff]  ;;  %v11687_v62 = vrot.slane %v7895_v1, 1 }
 0x2c8   :  { %11669 = vst [vmem:[#allocation23_spill] sm:$0xff] %v7928_v44  ;;  %11670 = vst [vmem:[#allocation115_spill] sm:$0xff] %v7931_v61  ;;  %v7944_v29 = vadd.f32 %v11674_v49, %v364_v16  ;;  %v3251_v9 = vmul.f32 %v3250_v63, %v7206_v6  ;;  %v1664_v13 = vadd.f32 %v11678_v21, %v11677_v17  ;;  %v7969_v21 = vpop.permute.xlu1 %2797  ;;  %v3452_v45 = vstv %s7908_s12  ;;  %s8972_s12 = sld [smem:[#allocation3 + $0x45]] }
 0x2c9   :  { %11672 = vst [vmem:[#allocation28_spill] sm:$0xff] %v7937_v38  ;;  %v3252_v38 = vmul.f32 %v3250_v63, %v7204_v40  ;;  %v7958_v16 = vmul.f32 %v7891_v0, %v7931_v61  ;;  %v3422_v11 = vmul.f32 %v3420_v8, %v7204_v40  ;;  %v3421_v49 = vmul.f32 %v3420_v8, %v7206_v6 }
 0x2ca   :  { %v1688_v4 = vadd.f32 %v11681_v2, %v11680_v22  ;;  %11682 = vst [vmem:[#allocation29_spill] sm:$0xff] %v7969_v21  ;;  %v7971_v26 = vpop.permute.xlu0 %2795  ;;  %v1690_v57 = vadd.f32 %v11685_v36, %v11684_v34  ;;  %v1820_v54 = vadd.f32 %v11686_v23, %v1664_v13  ;;  %v1964_v35 = vadd.f32 %v11687_v62, %v1818_v55  ;;  %v11688_v36 = vld [vmem:[#allocation200_spill] sm:$0xff] }
 0x2cb   :  { %11679 = vst [vmem:[#allocation118_spill] sm:$0xff] %v7958_v16  ;;  %11683 = vst [vmem:[#allocation30_spill] sm:$0xff] %v7971_v26  ;;  %v3254_v22 = vmul.f32 %v3250_v63, %v7216_v46  ;;  %3261 = vrot.lane.b32.xlu1 %v3252_v38, %s5863_s20  ;;  %3259 = vrot.lane.b32.xlu0 %v3251_v9, %s5863_s20  ;;  %v3253_v2 = vmul.f32 %v3250_v63, %v7218_v27  ;;  %v3430_v13 = vrot.slane %v3422_v11, 1  ;;  %v11689_v55 = vld [vmem:[#allocation180_spill] sm:$0xff]  ;;  %v11690_v38 = vld [vmem:[#allocation182_spill] sm:$0xff] }
 0x2cc   :  { %v3424_v17 = vmul.f32 %v3420_v8, %v7216_v46  ;;  %v3423_v20 = vmul.f32 %v3420_v8, %v7218_v27  ;;  %v2148_v34 = vadd.f32 %v11688_v36, %v1964_v35  ;;  %v3429_v62 = vrot.slane %v3421_v49, 1  ;;  %v7998_v8 = vpop.permute.xlu1 %2825  ;;  %v11696_v36 = vld [vmem:[#allocation224_spill] sm:$0xff] }
 0x2cd   :  { %v1844_v26 = vadd.f32 %v11689_v55, %v1688_v4  ;;  %v1846_v21 = vadd.f32 %v11690_v38, %v1690_v57  ;;  %v7993_v63 = vmul.f32 %v7915_v47, %v7931_v61  ;;  %v7996_v9 = vstv %s7933_s13  ;;  %11693 = vst [vmem:[#allocation33_spill] sm:$0xff] %v7998_v8  ;;  %v11697_v55 = vld [vmem:[#allocation257_spill] sm:$0xff]  ;;  %v11698_v61 = vld [vmem:[#allocation258_spill] sm:$0xff]  ;;  %s8982_s13 = sld [smem:[#allocation3 + $0x60]] }
 0x2ce   :  { %11692 = vst [vmem:[#allocation32_spill] sm:$0xff] %v7996_v9  ;;  %v8000_v35 = vpop.permute.xlu0 %2823  ;;  %v11695_v11 = vrot.slane %v7919_v10, 1  ;;  %v2340_v23 = vadd.f32 %v11696_v36, %v2148_v34  ;;  %v8006_v4 = vmul.f32 %v3452_v45, %v7204_v40  ;;  %v3453_v57 = vmul.f32 %v3452_v45, %v7206_v6 }
 0x2cf   :  { %11691 = vst [vmem:[#allocation31_spill] sm:$0xff] %v7993_v63  ;;  %11694 = vst [vmem:[#allocation34_spill] sm:$0xff] %v8000_v35  ;;  %v8010_v38 = vadd.f32 %v11697_v55, %v363_v39  ;;  %v8013_v1 = vadd.f32 %v11698_v61, %v387_v32  ;;  %3265 = vrot.lane.b32.xlu1 %v3254_v22, %s5863_s20  ;;  %3263 = vrot.lane.b32.xlu0 %v3253_v2, %s5863_s20  ;;  %v3433_v35 = vrot.slane %v3424_v17, 1  ;;  %v11707_v2 = vld [vmem:[#allocation226_spill] sm:$0xff] }
 0x2d0   :  { %v1966_v49 = vadd.f32 %v11695_v11, %v1820_v54  ;;  %v3432_v8 = vrot.slane %v3423_v20, 1  ;;  %v11699_v54 = vld [vmem:[#allocation41_spill] sm:$0xff]  ;;  %v11700_v11 = vld [vmem:[#allocation202_spill] sm:$0xff]  ;;  %v3431_v10 = vsel %vm427_vm0, %v3429_v62, %v3430_v13  ;;  %v8022_v48 = vstv %s7962_s2  ;;  %s8993_s2 = sld [smem:[#allocation3 + $0x6a]] }
 0x2d1   :  { %v389_v34 = vadd.f32 %v11699_v54, %v7736_v59  ;;  %11701 = vst [vmem:[#allocation35_spill] sm:$0xff] %v8022_v48  ;;  %v11702_v39 = vrot.slane %v7924_v12, 1  ;;  %v11703_v32 = vrot.slane %v7928_v44, 1  ;;  %v8031_v20 = vmul.f32 %v7891_v0, %v7996_v9  ;;  %v8033_v59 = vpop.permute.xlu1 %2829 }
 0x2d2   :  { %v2150_v36 = vadd.f32 %v11700_v11, %v1966_v49  ;;  %11705 = vst [vmem:[#allocation36_spill] sm:$0xff] %v8033_v59  ;;  %v8035_v17 = vpop.permute.xlu0 %2827  ;;  %v3461_v54 = vrot.slane %v3453_v57, 1  ;;  %v11709_v11 = vld [vmem:[#allocation204_spill] sm:$0xff]  ;;  %v2946_v22 = vmul.f32 %v8022_v48, %v7204_v40  ;;  %v8089_v12 = vstv %s8037_s16  ;;  %s9122_s16 = sld [smem:[#allocation3 + $0xa0]] }
 0x2d3   :  { %v1988_v55 = vadd.f32 %v11702_v39, %v1844_v26  ;;  %v1990_v61 = vadd.f32 %v11703_v32, %v1846_v21  ;;  %11704 = vst [vmem:[#allocation122_spill] sm:$0xff] %v8031_v20  ;;  %11706 = vst [vmem:[#allocation37_spill] sm:$0xff] %v8035_v17  ;;  %v11708_v26 = vrot.slane %v7958_v16, 2  ;;  %v3462_v21 = vrot.slane %v8006_v4, 1  ;;  %3437 = vrot.lane.b32.xlu1 %v3430_v13, %s5862_s14  ;;  %v11710_v17 = vld [vmem:[#allocation266_spill] sm:$0xff]  ;;  %v11717_v13 = vld [vmem:[#allocation12_spill] sm:$0xff] }
 0x2d4   :  { %v2342_v62 = vadd.f32 %v11707_v2, %v2150_v36  ;;  %3435 = vrot.lane.b32.xlu0 %v3431_v10, %s5862_s14  ;;  %v3434_v32 = vsel %vm427_vm0, %v3432_v8, %v3433_v35  ;;  %v3456_v36 = vmul.f32 %v3452_v45, %v7216_v46  ;;  %v3484_v2 = vstv %s7987_s15  ;;  %v11711_v4 = vld [vmem:[#allocation42_spill] sm:$0xff]  ;;  %11723 = vst [vmem:[#allocation39_spill] sm:$0xff] %v8089_v12  ;;  %s9060_s15 = sld [smem:[#allocation3 + $0x85]] }
 0x2d5   :  { %v2492_v49 = vadd.f32 %v11708_v26, %v2340_v23  ;;  %v2180_v39 = vadd.f32 %v11709_v11, %v1988_v55  ;;  %v3455_v23 = vmul.f32 %v3452_v45, %v7218_v27  ;;  %v413_v57 = vadd.f32 %v11711_v4, %v7755_v25  ;;  %v11712_v55 = vld [vmem:[#allocation206_spill] sm:$0xff]  ;;  %v2858_v8 = vpop.permute.xlu1 %2857 }
 0x2d6   :  { %v2182_v26 = vadd.f32 %v11712_v55, %v1990_v61  ;;  %v8059_v10 = vmul.f32 %v7915_v47, %v7996_v9  ;;  %v8061_v11 = vpop.permute.xlu0 %2855  ;;  %v11716_v45 = vrot.slane %v7993_v63, 2  ;;  %v3463_v25 = vsel %vm427_vm0, %v3461_v54, %v3462_v21 }
 0x2d7   :  { %v2676_v59 = vadd.f32 %v11710_v17, %v2492_v49  ;;  %11714 = vst [vmem:[#allocation38_spill] sm:$0xff] %v8061_v11  ;;  %v11715_v17 = vld [vmem:[#allocation228_spill] sm:$0xff]  ;;  %3441 = vrot.lane.b32.xlu1 %v3433_v35, %s5862_s14  ;;  %v3486_v61 = vmul.f32 %v3484_v2, %v7204_v40  ;;  %v3485_v4 = vmul.f32 %v3484_v2, %v7206_v6  ;;  %v3464_v11 = vrot.slane %v3455_v23, 1 }
 0x2d8   :  { %11713 = vst [vmem:[#allocation126_spill] sm:$0xff] %v8059_v10  ;;  %v2372_v49 = vadd.f32 %v11715_v17, %v2180_v39  ;;  %v2494_v16 = vadd.f32 %v11716_v45, %v2342_v62  ;;  %3439 = vrot.lane.b32.xlu0 %v3434_v32, %s5862_s14  ;;  %v2948_v55 = vmul.f32 %v8022_v48, %v7216_v46  ;;  %v3465_v17 = vrot.slane %v3456_v36, 1  ;;  %v11721_v32 = vld [vmem:[#allocation262_spill] sm:$0xff] }
 0x2d9   :  { %v2868_v44 = vadd.f32 %v2858_v8, %v2676_v59  ;;  %v11719_v59 = vld [vmem:[#allocation43_spill] sm:$0xff]  ;;  %v11720_v8 = vld [vmem:[#allocation261_spill] sm:$0xff]  ;;  %v8084_v45 = vadd.f32 %v11721_v32, %v413_v57  ;;  %v2862_v63 = vpop.permute.xlu1 %2861  ;;  %v3493_v57 = vrot.slane %v3485_v4, 1 }
 0x2da   :  { %v2678_v39 = vadd.f32 %v11717_v13, %v2494_v16  ;;  %v415_v54 = vadd.f32 %v11719_v59, %v7759_v42  ;;  %v8081_v35 = vadd.f32 %v11720_v8, %v389_v34  ;;  %v8086_v9 = vpop.permute.xlu0 %2859  ;;  %v11724_v16 = vld [vmem:[#allocation230_spill] sm:$0xff]  ;;  %v11267_v42 = vrot.slane %v8059_v10, 2 }
 0x2db   :  { %v8076_v62 = vadd.f32 %v2946_v22, %v2868_v44  ;;  %11722 = vst [vmem:[#allocation152_spill] sm:$0xff] %v8086_v9  ;;  %v2374_v36 = vadd.f32 %v11724_v16, %v2182_v26  ;;  %v11725_v44 = vrot.slane %v8031_v20, 2  ;;  %3469 = vrot.lane.b32.xlu1 %v3462_v21, %s5862_s14  ;;  %v3494_v34 = vrot.slane %v3486_v61, 1  ;;  %v11726_v8 = vld [vmem:[#allocation14_spill] sm:$0xff]  ;;  %v11728_v21 = vld [vmem:[#allocation44_spill] sm:$0xff]  ;;  %v11729_v61 = vld [vmem:[#allocation45_spill] sm:$0xff] }
 0x2dc   :  { %v2870_v23 = vadd.f32 %v2862_v63, %v2678_v39  ;;  %3467 = vrot.lane.b32.xlu0 %v3463_v25, %s5862_s14  ;;  %v8100_v13 = vmul.f32 %v3484_v2, %v7216_v46  ;;  %v3487_v59 = vmul.f32 %v3484_v2, %v7218_v27  ;;  %v3466_v32 = vsel %vm427_vm0, %v3464_v11, %v3465_v17  ;;  %v11730_v27 = vld [vmem:[#allocation264_spill] sm:$0xff]  ;;  %v11732_v16 = vld [vmem:[#allocation46_spill] sm:$0xff] }
 0x2dd   :  { %11718 = vst [vmem:[#allocation128_spill] sm:$0xff] %v8076_v62  ;;  %v2516_v22 = vadd.f32 %v11725_v44, %v2372_v49  ;;  %v2956_v63 = vmul.f32 %v8089_v12, %v7204_v40  ;;  %v8113_v25 = vadd.f32 %v11728_v21, %v7770_v50  ;;  %v8117_v4 = vadd.f32 %v11729_v61, %v7773_v3  ;;  %v2890_v11 = vpop.permute.xlu1 %2889  ;;  %v11733_v50 = vld [vmem:[#allocation47_spill] sm:$0xff]  ;;  %v11734_v21 = vld [vmem:[#allocation16_spill] sm:$0xff]  ;;  %v11760_v20 = vld [vmem:[#allocation62_spill] sm:$0xff] }
 0x2de   :  { %v8107_v49 = vadd.f32 %v2948_v55, %v2870_v23  ;;  %v8120_v2 = vadd.f32 %v11730_v27, %v415_v54  ;;  %v8124_v39 = vpop.permute.xlu0 %2887  ;;  %v3516_v55 = vstv %s8063_s17  ;;  %v8129_v44 = vadd.f32 %v11732_v16, %v7802_v28  ;;  %s9221_s17 = sld [smem:[#allocation3 + $0x1a]] }
 0x2df   :  { %v2708_v26 = vadd.f32 %v11726_v8, %v2516_v22  ;;  %11731 = vst [vmem:[#allocation40_spill] sm:$0xff] %v8124_v39  ;;  %v8133_v22 = vadd.f32 %v11733_v50, %v7834_v56  ;;  %v2518_v3 = vadd.f32 %v11267_v42, %v2374_v36  ;;  %3473 = vrot.lane.b32.xlu1 %v3465_v17, %s5862_s14  ;;  %v3497_v28 = vrot.slane %v8100_v13, 1  ;;  %v11736_v17 = vld [vmem:[#allocation48_spill] sm:$0xff]  ;;  %v11738_v13 = vld [vmem:[#allocation50_spill] sm:$0xff]  ;;  %v11742_v50 = vld [vmem:[#allocation53_spill] sm:$0xff] }
 0x2e0   :  { %11727 = vst [vmem:[#allocation176_spill] sm:$0xff] %v8107_v49  ;;  %3471 = vrot.lane.b32.xlu0 %v3466_v32, %s5862_s14  ;;  %v3495_v54 = vsel %vm427_vm0, %v3493_v57, %v3494_v34  ;;  %v3496_v8 = vrot.slane %v3487_v59, 1  ;;  %v2958_v56 = vmul.f32 %v8089_v12, %v7216_v46  ;;  %v3518_v36 = vmul.f32 %v3516_v55, %v7204_v40  ;;  %v11737_v57 = vld [vmem:[#allocation49_spill] sm:$0xff]  ;;  %v11739_v46 = vld [vmem:[#allocation51_spill] sm:$0xff]  ;;  %v11755_v39 = vld [vmem:[#allocation60_spill] sm:$0xff] }
 0x2e1   :  { %v2900_v23 = vadd.f32 %v2890_v11, %v2708_v26  ;;  %v2710_v61 = vadd.f32 %v11734_v21, %v2518_v3  ;;  %v3517_v26 = vmul.f32 %v3516_v55, %v7206_v6  ;;  %v8152_v32 = vadd.f32 %v11736_v17, %v7838_v33  ;;  %v2894_v40 = vpop.permute.xlu1 %2893  ;;  %v8187_v21 = vld [vmem:[#allocation5 + $0x50] sm:$0xff] }
 0x2e2   :  { %v8156_v11 = vadd.f32 %v11737_v57, %v7857_v31  ;;  %v8160_v59 = vadd.f32 %v11738_v13, %v7861_v51  ;;  %v8164_v16 = vadd.f32 %v11739_v46, %v7869_v37  ;;  %v8166_v6 = vpop.permute.xlu0 %2891  ;;  %v8174_v31 = vadd.f32 %v11742_v50, %v7876_v18  ;;  %v8182_v37 = vld [vmem:[#allocation5 + $0x58] sm:$0xff]  ;;  %v8202_v46 = vld [vmem:[#allocation5 + $0x10] sm:$0xff] }
 0x2e3   :  { %v8148_v27 = vadd.f32 %v2956_v63, %v2900_v23  ;;  %11740 = vst [vmem:[#allocation154_spill] sm:$0xff] %v8166_v6  ;;  %v11741_v63 = vld [vmem:[#allocation52_spill] sm:$0xff]  ;;  %v1476_v3 = vstv %s8091_s18  ;;  %v2902_v23 = vadd.f32 %v2894_v40, %v2710_v61  ;;  %3501 = vrot.lane.b32.xlu1 %v3494_v34, %s5862_s14  ;;  %v3498_v51 = vsel %vm427_vm0, %v3496_v8, %v3497_v28  ;;  %s9289_s18 = sld [smem:[#allocation3 + $0x35]] }
 0x2e4   :  { %v8170_v33 = vadd.f32 %v11741_v63, %v7873_v24  ;;  %3499 = vrot.lane.b32.xlu0 %v3495_v54, %s5862_s14  ;;  %v8185_v24 = vmul.f32 %v8182_v37, %v3516_v55  ;;  %v3519_v18 = vmul.f32 %v8187_v21, %v3516_v55  ;;  %v3526_v17 = vrot.slane %v3518_v36, 1  ;;  %v11744_v54 = vld [vmem:[#allocation54_spill] sm:$0xff] }
 0x2e5   :  { %11735 = vst [vmem:[#allocation131_spill] sm:$0xff] %v8148_v27  ;;  %v3525_v61 = vrot.slane %v3517_v26, 1  ;;  %v3548_v57 = vstv %s8105_s19  ;;  %v8193_v34 = vadd.f32 %v2958_v56, %v2902_v23  ;;  %v8197_v8 = vadd.f32 %v11744_v54, %v7880_v43  ;;  %v8208_v36 = vpop.permute.xlu1 %2975  ;;  %v11747_v56 = vld [vmem:[#allocation55_spill] sm:$0xff]  ;;  %v11748_v43 = vld [vmem:[#allocation56_spill] sm:$0xff]  ;;  %v8223_v54 = vld [vmem:[#allocation5 + $0x40] sm:$0xff]  ;;  %s9315_s19 = sld [smem:[#allocation3 + $0x12]] }
 0x2e6   :  { %v8200_v13 = vmul.f32 %v7891_v0, %v1476_v3  ;;  %v8205_v40 = vmul.f32 %v8202_v46, %v1476_v3  ;;  %v1486_v55 = vstv %s8122_s21  ;;  %11745 = vst [vmem:[#allocation156_spill] sm:$0xff] %v8208_v36  ;;  %v8210_v26 = vpop.permute.xlu0 %2973  ;;  %v8214_v63 = vadd.f32 %v11747_v56, %v7889_v52  ;;  %v8232_v27 = vld [vmem:[#allocation5 + $0x28] sm:$0xff]  ;;  %s9344_s21 = sld [smem:[#allocation3 + $0x50]] }
 0x2e7   :  { %11743 = vst [vmem:[#allocation133_spill] sm:$0xff] %v8193_v34  ;;  %11746 = vst [vmem:[#allocation135_spill] sm:$0xff] %v8210_v26  ;;  %v8218_v50 = vadd.f32 %v11748_v43, %v7902_v19  ;;  %v8221_v23 = vmul.f32 %v7915_v47, %v1476_v3  ;;  %v8226_v42 = vmul.f32 %v8223_v54, %v1476_v3  ;;  %v1496_v34 = vstv %s8137_s22  ;;  %v11749_v43 = vld [vmem:[#allocation57_spill] sm:$0xff]  ;;  %v11751_v26 = vld [vmem:[#allocation59_spill] sm:$0xff]  ;;  %s9356_s22 = sld [smem:[#allocation3 + $0x6b]] }
 0x2e8   :  { %3505 = vrot.lane.b32.xlu1 %v3497_v28, %s5862_s14  ;;  %3503 = vrot.lane.b32.xlu0 %v3498_v51, %s5862_s14  ;;  %v3529_v52 = vrot.slane %v8185_v24, 1  ;;  %v3528_v56 = vrot.slane %v3519_v18, 1  ;;  %v3550_v19 = vmul.f32 %v8232_v27, %v3548_v57  ;;  %v8237_v49 = vadd.f32 %v11749_v43, %v7911_v53  ;;  %v8243_v28 = vld [vmem:[#allocation5 + $0x20] sm:$0xff] }
 0x2e9   :  { %v8240_v3 = vmul.f32 %v7891_v0, %v1486_v55  ;;  %v3527_v62 = vsel %vm427_vm0, %v3525_v61, %v3526_v17  ;;  %v3549_v51 = vmul.f32 %v8243_v28, %v3548_v57  ;;  %v11750_v24 = vld [vmem:[#allocation58_spill] sm:$0xff]  ;;  %v8252_v36 = vadd.f32 %v11751_v26, %v8010_v38  ;;  %v8260_v61 = vpop.permute.xlu1 %2979 }
 0x2ea   :  { %v8248_v18 = vadd.f32 %v11750_v24, %v7944_v29  ;;  %v8255_v53 = vmul.f32 %v8202_v46, %v1486_v55  ;;  %v8258_v43 = vmul.f32 %v7915_v47, %v1486_v55  ;;  %11753 = vst [vmem:[#allocation178_spill] sm:$0xff] %v8260_v61  ;;  %v8262_v6 = vpop.permute.xlu0 %2977  ;;  %v8266_v9 = vadd.f32 %v11755_v39, %v8013_v1  ;;  %v11759_v24 = vld [vmem:[#allocation61_spill] sm:$0xff] }
 0x2eb   :  { %11754 = vst [vmem:[#allocation200_spill] sm:$0xff] %v8262_v6  ;;  %v8269_v29 = vmul.f32 %v8223_v54, %v1486_v55  ;;  %v8272_v38 = vmul.f32 %v7891_v0, %v1496_v34  ;;  %v8275_v26 = vmul.f32 %v8202_v46, %v1496_v34  ;;  %v8279_v12 = vadd.f32 %v11759_v24, %v8081_v35  ;;  %v11761_v35 = vld [vmem:[#allocation64_spill] sm:$0xff] }
 0x2ec   :  { %11752 = vst [vmem:[#allocation158_spill] sm:$0xff] %v8258_v43  ;;  %v1506_v61 = vstv %s8177_s23  ;;  %3533 = vrot.lane.b32.xlu1 %v3526_v17, %s5862_s14  ;;  %3531 = vrot.lane.b32.xlu0 %v3527_v62, %s5862_s14  ;;  %v3530_v1 = vsel %vm427_vm0, %v3528_v56, %v3529_v52  ;;  %v3558_v39 = vrot.slane %v3550_v19, 1  ;;  %v3557_v55 = vrot.slane %v3549_v51, 1  ;;  %s9396_s23 = sld [smem:[#allocation3 + $0x2d]] }
 0x2ed   :  { %11756 = vst [vmem:[#allocation180_spill] sm:$0xff] %v8269_v29  ;;  %11757 = vst [vmem:[#allocation182_spill] sm:$0xff] %v8272_v38  ;;  %v3552_v6 = vmul.f32 %v8182_v37, %v3548_v57  ;;  %v3551_v48 = vmul.f32 %v8187_v21, %v3548_v57  ;;  %v3580_v10 = vstv %s8191_s24  ;;  %v783_v24 = vadd.f32 %v11761_v35, %v8113_v25  ;;  %v8300_v56 = vpop.permute.xlu1 %3001  ;;  %v11766_v57 = vld [vmem:[#allocation63_spill] sm:$0xff]  ;;  %s9409_s24 = sld [smem:[#allocation3 + $0x86]] }
 0x2ee   :  { %11758 = vst [vmem:[#allocation224_spill] sm:$0xff] %v8275_v26  ;;  %v8290_v26 = vadd.f32 %v11760_v20, %v8084_v45  ;;  %v8295_v17 = vmul.f32 %v7915_v47, %v1496_v34  ;;  %v8298_v62 = vmul.f32 %v8223_v54, %v1496_v34  ;;  %11764 = vst [vmem:[#allocation41_spill] sm:$0xff] %v8300_v56  ;;  %v8302_v19 = vpop.permute.xlu0 %2999  ;;  %v11767_v20 = vld [vmem:[#allocation65_spill] sm:$0xff] }
 0x2ef   :  { %11765 = vst [vmem:[#allocation202_spill] sm:$0xff] %v8302_v19  ;;  %v8308_v51 = vadd.f32 %v11766_v57, %v8120_v2  ;;  %v782_v45 = vadd.f32 %v11767_v20, %v8117_v4  ;;  %v8313_v25 = vmul.f32 %v7891_v0, %v1506_v61  ;;  %v8316_v35 = vmul.f32 %v8202_v46, %v1506_v61  ;;  %v11771_v57 = vld [vmem:[#allocation66_spill] sm:$0xff] }
 0x2f0   :  { %11762 = vst [vmem:[#allocation257_spill] sm:$0xff] %v8295_v17  ;;  %11763 = vst [vmem:[#allocation258_spill] sm:$0xff] %v8298_v62  ;;  %v8319_v34 = vmul.f32 %v7915_v47, %v1506_v61  ;;  %3537 = vrot.lane.b32.xlu1 %v3529_v52, %s5862_s14  ;;  %3535 = vrot.lane.b32.xlu0 %v3530_v1, %s5862_s14  ;;  %v3582_v19 = vmul.f32 %v8232_v27, %v3580_v10  ;;  %v3561_v56 = vrot.slane %v3552_v6, 1  ;;  %v11773_v17 = vld [vmem:[#allocation263_spill] sm:$0xff]  ;;  %v11775_v1 = vld [vmem:[#allocation125_spill] sm:$0xff] }
 0x2f1   :  { %11768 = vst [vmem:[#allocation226_spill] sm:$0xff] %v8313_v25  ;;  %11769 = vst [vmem:[#allocation204_spill] sm:$0xff] %v8316_v35  ;;  %v3581_v2 = vmul.f32 %v8243_v28, %v3580_v10  ;;  %v785_v4 = vadd.f32 %v11771_v57, %v8129_v44  ;;  %v3559_v20 = vsel %vm427_vm0, %v3557_v55, %v3558_v39  ;;  %v3560_v25 = vrot.slane %v3551_v48, 1  ;;  %v11772_v35 = vld [vmem:[#allocation67_spill] sm:$0xff]  ;;  %v8341_v43 = vpop.permute.xlu1 %3005  ;;  %v11779_v48 = vld [vmem:[#allocation68_spill] sm:$0xff] }
 0x2f2   :  { %11770 = vst [vmem:[#allocation266_spill] sm:$0xff] %v8319_v34  ;;  %v784_v62 = vadd.f32 %v11772_v35, %v8133_v22  ;;  %v11774_v34 = vrot.slane %v11773_v17, 2  ;;  %v8335_v52 = vmul.f32 %v8223_v54, %v1506_v61  ;;  %v8339_v29 = vmul.f32 %v8202_v46, %v11775_v1  ;;  %11777 = vst [vmem:[#allocation206_spill] sm:$0xff] %v8341_v43  ;;  %v8343_v44 = vpop.permute.xlu0 %3003  ;;  %v11780_v22 = vld [vmem:[#allocation69_spill] sm:$0xff]  ;;  %v11783_v35 = vld [vmem:[#allocation70_spill] sm:$0xff] }
 0x2f3   :  { %11778 = vst [vmem:[#allocation228_spill] sm:$0xff] %v8343_v44  ;;  %v815_v6 = vadd.f32 %v11779_v48, %v8152_v32  ;;  %v814_v55 = vadd.f32 %v11780_v22, %v8156_v11  ;;  %v11781_v17 = vld [vmem:[#allocation13_spill] sm:$0xff]  ;;  %v8354_v61 = vmul.f32 %v8223_v54, %v11775_v1  ;;  %v11784_v57 = vld [vmem:[#allocation71_spill] sm:$0xff]  ;;  %v3590_v32 = vrot.slane %v3582_v19, 1  ;;  %v11789_v19 = vld [vmem:[#allocation240_spill] sm:$0xff] }
 0x2f4   :  { %v8332_v38 = vadd.f32 %v11774_v34, %v783_v24  ;;  %11776 = vst [vmem:[#allocation42_spill] sm:$0xff] %v8339_v29  ;;  %v8350_v24 = vadd.f32 %v11781_v17, %v782_v45  ;;  %v817_v34 = vadd.f32 %v11783_v35, %v8160_v59  ;;  %v816_v44 = vadd.f32 %v11784_v57, %v8164_v16  ;;  %v11785_v48 = vld [vmem:[#allocation265_spill] sm:$0xff]  ;;  %v11787_v16 = vld [vmem:[#allocation72_spill] sm:$0xff] }
 0x2f5   :  { %11782 = vst [vmem:[#allocation12_spill] sm:$0xff] %v8354_v61  ;;  %3565 = vrot.lane.b32.xlu1 %v3558_v39, %s5862_s14  ;;  %3563 = vrot.lane.b32.xlu0 %v3559_v20, %s5862_s14  ;;  %v3589_v11 = vrot.slane %v3581_v2, 1  ;;  %v11786_v45 = vrot.slane %v11785_v48, 2  ;;  %v3562_v1 = vsel %vm427_vm0, %v3560_v25, %v3561_v56  ;;  %v3584_v17 = vmul.f32 %v8182_v37, %v3580_v10  ;;  %v11788_v39 = vld [vmem:[#allocation73_spill] sm:$0xff]  ;;  %v8378_v57 = vpop.permute.xlu1 %3027  ;;  %v11792_v48 = vld [vmem:[#allocation268_spill] sm:$0xff] }
 0x2f6   :  { %v3583_v59 = vmul.f32 %v8187_v21, %v3580_v10  ;;  %v847_v35 = vadd.f32 %v11787_v16, %v8170_v33  ;;  %v846_v20 = vadd.f32 %v11788_v39, %v8174_v31  ;;  %v8376_v2 = vadd.f32 %v11789_v19, %v784_v62  ;;  %11790 = vst [vmem:[#allocation43_spill] sm:$0xff] %v8378_v57  ;;  %v11794_v10 = vld [vmem:[#allocation15_spill] sm:$0xff]  ;;  %v11795_v29 = vld [vmem:[#allocation129_spill] sm:$0xff]  ;;  %v11797_v62 = vld [vmem:[#allocation238_spill] sm:$0xff] }
 0x2f7   :  { %v8364_v22 = vadd.f32 %v11786_v45, %v785_v4  ;;  %v8380_v4 = vpop.permute.xlu0 %3025  ;;  %v3612_v25 = vstv %s8304_s25  ;;  %v11793_v45 = vrot.slane %v11792_v48, 2  ;;  %v8388_v61 = vadd.f32 %v11794_v10, %v814_v55  ;;  %v11799_v19 = vld [vmem:[#allocation242_spill] sm:$0xff]  ;;  %s9477_s25 = sld [smem:[#allocation3 + $0xa1]] }
 0x2f8   :  { %11791 = vst [vmem:[#allocation261_spill] sm:$0xff] %v8380_v4  ;;  %v8392_v33 = vmul.f32 %v8202_v46, %v11795_v29  ;;  %v8396_v31 = vmul.f32 %v8223_v54, %v11795_v29  ;;  %v11798_v16 = vrot.slane %v11797_v62, 2  ;;  %v3591_v55 = vsel %vm427_vm0, %v3589_v11, %v3590_v32  ;;  %v11800_v4 = vld [vmem:[#allocation74_spill] sm:$0xff] }
 0x2f9   :  { %v8385_v43 = vadd.f32 %v11793_v45, %v815_v6  ;;  %v8405_v6 = vadd.f32 %v11799_v19, %v816_v44  ;;  %3569 = vrot.lane.b32.xlu1 %v3561_v56, %s5862_s14  ;;  %3567 = vrot.lane.b32.xlu0 %v3562_v1, %s5862_s14  ;;  %v3593_v48 = vrot.slane %v3584_v17, 1  ;;  %v3592_v45 = vrot.slane %v3583_v59, 1  ;;  %v11802_v44 = vld [vmem:[#allocation269_spill] sm:$0xff]  ;;  %v8423_v11 = vpop.permute.xlu1 %3031  ;;  %v11807_v59 = vld [vmem:[#allocation76_spill] sm:$0xff] }
 0x2fa   :  { %11796 = vst [vmem:[#allocation262_spill] sm:$0xff] %v8396_v31  ;;  %v8402_v39 = vadd.f32 %v11798_v16, %v817_v34  ;;  %v3614_v29 = vmul.f32 %v8232_v27, %v3612_v25  ;;  %v3613_v10 = vmul.f32 %v8243_v28, %v3612_v25  ;;  %v849_v62 = vadd.f32 %v11800_v4, %v8197_v8  ;;  %v11801_v34 = vld [vmem:[#allocation75_spill] sm:$0xff]  ;;  %v11804_v56 = vld [vmem:[#allocation17_spill] sm:$0xff] }
 0x2fb   :  { %v848_v16 = vadd.f32 %v11801_v34, %v8214_v63  ;;  %v11803_v19 = vrot.slane %v11802_v44, 2  ;;  %v8421_v1 = vadd.f32 %v11804_v56, %v846_v20  ;;  %11805 = vst [vmem:[#allocation230_spill] sm:$0xff] %v8423_v11  ;;  %v8425_v17 = vpop.permute.xlu0 %3029  ;;  %v879_v31 = vadd.f32 %v11807_v59, %v8218_v50  ;;  %v11808_v8 = vld [vmem:[#allocation77_spill] sm:$0xff]  ;;  %v11809_v63 = vld [vmem:[#allocation78_spill] sm:$0xff]  ;;  %v11811_v20 = vld [vmem:[#allocation80_spill] sm:$0xff] }
 0x2fc   :  { %11806 = vst [vmem:[#allocation14_spill] sm:$0xff] %v8425_v17  ;;  %v878_v4 = vadd.f32 %v11808_v8, %v8237_v49  ;;  %v881_v34 = vadd.f32 %v11809_v63, %v8248_v18  ;;  %v3616_v50 = vmul.f32 %v8182_v37, %v3612_v25  ;;  %v3615_v49 = vmul.f32 %v8187_v21, %v3612_v25  ;;  %v11813_v63 = vld [vmem:[#allocation82_spill] sm:$0xff] }
 0x2fd   :  { %v8418_v57 = vadd.f32 %v11803_v19, %v847_v35  ;;  %v11810_v35 = vld [vmem:[#allocation79_spill] sm:$0xff]  ;;  %v910_v19 = vadd.f32 %v11811_v20, %v8266_v9  ;;  %3597 = vrot.lane.b32.xlu1 %v3590_v32, %s5862_s14  ;;  %3595 = vrot.lane.b32.xlu0 %v3591_v55, %s5862_s14  ;;  %v3594_v56 = vsel %vm427_vm0, %v3592_v45, %v3593_v48  ;;  %v3622_v18 = vrot.slane %v3614_v29, 1  ;;  %v11812_v9 = vld [vmem:[#allocation81_spill] sm:$0xff]  ;;  %v8458_v25 = vpop.permute.xlu1 %3053 }
 0x2fe   :  { %v880_v44 = vadd.f32 %v11810_v35, %v8252_v36  ;;  %v3621_v59 = vrot.slane %v3613_v10, 1  ;;  %v3644_v8 = vstv %s8369_s26  ;;  %v912_v36 = vadd.f32 %v11812_v9, %v8279_v12  ;;  %11815 = vst [vmem:[#allocation44_spill] sm:$0xff] %v8458_v25  ;;  %v11817_v29 = vld [vmem:[#allocation83_spill] sm:$0xff]  ;;  %s9512_s26 = sld [smem:[#allocation3 + $0x63]] }
 0x2ff   :  { %v942_v32 = vadd.f32 %v11813_v63, %v8290_v26  ;;  %v11814_v55 = vrot.slane %v7670_v58, 2  ;;  %v8456_v20 = vadd.f32 %v7741_v15, %v848_v16  ;;  %v8460_v45 = vpop.permute.xlu0 %3051  ;;  %v944_v10 = vadd.f32 %v11817_v29, %v8308_v51 }
 0x300   :  { %11816 = vst [vmem:[#allocation45_spill] sm:$0xff] %v8460_v45  ;;  %v11818_v17 = vrot.slane %v7683_v41, 2  ;;  %v8469_v26 = vadd.f32 %v7764_v5, %v878_v4  ;;  %v1848_v58 = vstv %s8398_s0  ;;  %v3625_v15 = vrot.slane %v3616_v50, 1  ;;  %s9643_s0 = sld [smem:[#allocation3 + $0x15]] }
 0x301   :  { %v8453_v35 = vadd.f32 %v11814_v55, %v849_v62  ;;  %v11819_v62 = vrot.slane %v7687_v7, 2  ;;  %3601 = vrot.lane.b32.xlu1 %v3593_v48, %s5862_s14  ;;  %3599 = vrot.lane.b32.xlu0 %v3594_v56, %s5862_s14  ;;  %v3624_v16 = vrot.slane %v3615_v49, 1  ;;  %v3646_v51 = vmul.f32 %v8232_v27, %v3644_v8  ;;  %v11820_v48 = vld [vmem:[#allocation20_spill] sm:$0xff]  ;;  %v11825_v56 = vld [vmem:[#allocation25_spill] sm:$0xff] }
 0x302   :  { %v8466_v12 = vadd.f32 %v11818_v17, %v879_v31  ;;  %v8480_v41 = vadd.f32 %v7778_v30, %v880_v44  ;;  %v8483_v5 = vadd.f32 %v7783_v14, %v910_v19  ;;  %v3623_v31 = vsel %vm427_vm0, %v3621_v59, %v3622_v18  ;;  %v8497_v30 = vpop.permute.xlu1 %3057  ;;  %v11823_v44 = vld [vmem:[#allocation84_spill] sm:$0xff] }
 0x303   :  { %v8474_v9 = vadd.f32 %v11819_v62, %v881_v34  ;;  %v3645_v7 = vmul.f32 %v8243_v28, %v3644_v8  ;;  %v8488_v17 = vadd.f32 %v7796_v60, %v912_v36  ;;  %v8491_v4 = vadd.f32 %v11820_v48, %v942_v32  ;;  %11821 = vst [vmem:[#allocation264_spill] sm:$0xff] %v8497_v30  ;;  %v8499_v14 = vpop.permute.xlu0 %3055  ;;  %v11824_v60 = vld [vmem:[#allocation85_spill] sm:$0xff]  ;;  %v11827_v48 = vld [vmem:[#allocation86_spill] sm:$0xff] }
 0x304   :  { %v8494_v34 = vmul.f32 %v7891_v0, %v1848_v58  ;;  %v1849_v50 = vmul.f32 %v8202_v46, %v1848_v58  ;;  %11822 = vst [vmem:[#allocation46_spill] sm:$0xff] %v8499_v14  ;;  %v8503_v19 = vadd.f32 %v11823_v44, %v8332_v38  ;;  %v8507_v49 = vadd.f32 %v11824_v60, %v8350_v24  ;;  %v11835_v14 = vld [vmem:[#allocation91_spill] sm:$0xff] }
 0x305   :  { %v8510_v59 = vadd.f32 %v11825_v56, %v944_v10  ;;  %v8513_v36 = vmul.f32 %v7915_v47, %v1848_v58  ;;  %v1851_v63 = vmul.f32 %v8223_v54, %v1848_v58  ;;  %v1872_v32 = vstv %s8437_s27  ;;  %3629 = vrot.lane.b32.xlu1 %v3622_v18, %s5863_s20  ;;  %3627 = vrot.lane.b32.xlu0 %v3623_v31, %s5863_s20  ;;  %v11828_v58 = vld [vmem:[#allocation87_spill] sm:$0xff]  ;;  %s9673_s27 = sld [smem:[#allocation3 + $0x30]] }
 0x306   :  { %v3626_v38 = vsel %vm427_vm0, %v3624_v16, %v3625_v15  ;;  %v3654_v55 = vrot.slane %v3646_v51, 1  ;;  %v3653_v24 = vrot.slane %v3645_v7, 1  ;;  %v3648_v29 = vmul.f32 %v8182_v37, %v3644_v8  ;;  %v8534_v56 = vpop.permute.xlu1 %3079 }
 0x307   :  { %11826 = vst [vmem:[#allocation47_spill] sm:$0xff] %v8513_v36  ;;  %v3647_v10 = vmul.f32 %v8187_v21, %v3644_v8  ;;  %v3676_v62 = vstv %s8445_s28  ;;  %v8527_v44 = vadd.f32 %v11827_v48, %v8364_v22  ;;  %v8531_v60 = vadd.f32 %v11828_v58, %v8376_v2  ;;  %11829 = vst [vmem:[#allocation16_spill] sm:$0xff] %v8534_v56  ;;  %v8536_v16 = vpop.permute.xlu0 %3077  ;;  %v11831_v8 = vld [vmem:[#allocation88_spill] sm:$0xff]  ;;  %v11832_v22 = vld [vmem:[#allocation89_spill] sm:$0xff]  ;;  %s9704_s28 = sld [smem:[#allocation3 + $0x4b]] }
 0x308   :  { %v1857_v31 = vrot.slane %v1849_v50, 1  ;;  %11830 = vst [vmem:[#allocation48_spill] sm:$0xff] %v8536_v16  ;;  %v8542_v51 = vadd.f32 %v11831_v8, %v8385_v43  ;;  %v8546_v7 = vadd.f32 %v11832_v22, %v8388_v61  ;;  %v8549_v2 = vmul.f32 %v7891_v0, %v1872_v32  ;;  %v11834_v50 = vld [vmem:[#allocation90_spill] sm:$0xff] }
 0x309   :  { %v1873_v48 = vmul.f32 %v8202_v46, %v1872_v32  ;;  %v8556_v58 = vadd.f32 %v11834_v50, %v8402_v39  ;;  %3633 = vrot.lane.b32.xlu1 %v3625_v15, %s5863_s20  ;;  %3631 = vrot.lane.b32.xlu0 %v3626_v38, %s5863_s20  ;;  %v3678_v43 = vmul.f32 %v8232_v27, %v3676_v62  ;;  %v1860_v8 = vrot.slane %v1851_v63, 1  ;;  %v11836_v50 = vld [vmem:[#allocation92_spill] sm:$0xff]  ;;  %v11837_v15 = vld [vmem:[#allocation93_spill] sm:$0xff] }
 0x30a   :  { %11833 = vst [vmem:[#allocation49_spill] sm:$0xff] %v8549_v2  ;;  %v3677_v61 = vmul.f32 %v8243_v28, %v3676_v62  ;;  %v3655_v22 = vsel %vm427_vm0, %v3653_v24, %v3654_v55  ;;  %v3657_v16 = vrot.slane %v3648_v29, 1  ;;  %v3656_v56 = vrot.slane %v3647_v10, 1  ;;  %v8581_v24 = vpop.permute.xlu1 %3083 }
 0x30b   :  { %v8566_v39 = vadd.f32 %v11835_v14, %v8405_v6  ;;  %v8570_v18 = vadd.f32 %v11836_v50, %v8418_v57  ;;  %v8574_v38 = vadd.f32 %v11837_v15, %v8421_v1  ;;  %v11838_v30 = vrot.slane %v8494_v34, 1  ;;  %11839 = vst [vmem:[#allocation50_spill] sm:$0xff] %v8581_v24  ;;  %v8583_v29 = vpop.permute.xlu0 %3081  ;;  %v11841_v6 = vld [vmem:[#allocation94_spill] sm:$0xff]  ;;  %v11842_v57 = vld [vmem:[#allocation95_spill] sm:$0xff] }
 0x30c   :  { %11840 = vst [vmem:[#allocation51_spill] sm:$0xff] %v8583_v29  ;;  %v8587_v14 = vadd.f32 %v11841_v6, %v8453_v35  ;;  %v8591_v10 = vadd.f32 %v11842_v57, %v8456_v20  ;;  %v1881_v50 = vrot.slane %v1873_v48, 1  ;;  %v8595_v15 = vmul.f32 %v7915_v47, %v1872_v32 }
 0x30d   :  { %v8579_v63 = vsel %vm427_vm0, %v1857_v31, %v11838_v30  ;;  %v1896_v30 = vstv %s8517_s1  ;;  %3661 = vrot.lane.b32.xlu1 %v3654_v55, %s5863_s20  ;;  %3659 = vrot.lane.b32.xlu0 %v3655_v22, %s5863_s20  ;;  %v3686_v31 = vrot.slane %v3678_v43, 1  ;;  %v3685_v35 = vrot.slane %v3677_v61, 1  ;;  %v11845_v55 = vld [vmem:[#allocation96_spill] sm:$0xff]  ;;  %v11846_v43 = vld [vmem:[#allocation97_spill] sm:$0xff]  ;;  %s9773_s1 = sld [smem:[#allocation3 + $0x66]] }
 0x30e   :  { %v11843_v6 = vrot.slane %v8513_v36, 1  ;;  %v3658_v57 = vsel %vm427_vm0, %v3656_v56, %v3657_v16  ;;  %v3680_v48 = vmul.f32 %v8182_v37, %v3676_v62  ;;  %v3679_v1 = vmul.f32 %v8187_v21, %v3676_v62 }
 0x30f   :  { %v8612_v29 = vadd.f32 %v11845_v55, %v8466_v12  ;;  %v8616_v61 = vadd.f32 %v11846_v43, %v8469_v26  ;;  %v1875_v22 = vmul.f32 %v8223_v54, %v1872_v32  ;;  %v3708_v56 = vstv %s8538_s29  ;;  %s9796_s29 = sld [smem:[#allocation3 + $0x81]] }
 0x310   :  { %v8603_v20 = vsel %vm427_vm0, %v1860_v8, %v11843_v6  ;;  %v8619_v8 = vpop.permute.xlu1 %3105  ;;  %v8621_v6 = vpop.permute.xlu0 %3103  ;;  %v8625_v24 = vmul.f32 %v7891_v0, %v1896_v30  ;;  %v1897_v62 = vmul.f32 %v8202_v46, %v1896_v30  ;;  %v8629_v45 = vmul.f32 %v7915_v47, %v1896_v30 }
 0x311   :  { %11844 = vst [vmem:[#allocation52_spill] sm:$0xff] %v8603_v20  ;;  %11847 = vst [vmem:[#allocation53_spill] sm:$0xff] %v8619_v8  ;;  %v1920_v12 = vstv %s8552_s30  ;;  %v11850_v55 = vrot.slane %v8549_v2, 1  ;;  %v1899_v43 = vmul.f32 %v8223_v54, %v1896_v30  ;;  %3665 = vrot.lane.b32.xlu1 %v3657_v16, %s5863_s20  ;;  %3663 = vrot.lane.b32.xlu0 %v3658_v57, %s5863_s20  ;;  %v3689_v8 = vrot.slane %v3680_v48, 1  ;;  %v11852_v2 = vld [vmem:[#allocation98_spill] sm:$0xff]  ;;  %s9827_s30 = sld [smem:[#allocation3 + $0x9c]] }
 0x312   :  { %11848 = vst [vmem:[#allocation54_spill] sm:$0xff] %v8621_v6  ;;  %11849 = vst [vmem:[#allocation55_spill] sm:$0xff] %v8629_v45  ;;  %v3687_v6 = vsel %vm427_vm0, %v3685_v35, %v3686_v31  ;;  %v3688_v25 = vrot.slane %v3679_v1, 1  ;;  %v3710_v11 = vmul.f32 %v8232_v27, %v3708_v56  ;;  %v3709_v20 = vmul.f32 %v8243_v28, %v3708_v56 }
 0x313   :  { %v8635_v26 = vsel %vm427_vm0, %v1881_v50, %v11850_v55  ;;  %v8646_v50 = vadd.f32 %v11852_v2, %v8474_v9  ;;  %v1884_v55 = vrot.slane %v1875_v22, 1  ;;  %v8649_v32 = vmul.f32 %v7891_v0, %v1920_v12 }
 0x314   :  { %11851 = vst [vmem:[#allocation56_spill] sm:$0xff] %v8635_v26  ;;  %v1921_v16 = vmul.f32 %v8202_v46, %v1920_v12  ;;  %v8652_v30 = vpop.permute.xlu1 %3109  ;;  %v8654_v35 = vpop.permute.xlu0 %3107  ;;  %v1905_v57 = vrot.slane %v1897_v62, 1  ;;  %v8659_v26 = vmul.f32 %v7915_v47, %v1920_v12  ;;  %v1908_v9 = vrot.slane %v1899_v43, 1  ;;  %v11855_v47 = vld [vmem:[#allocation99_spill] sm:$0xff] }
 0x315   :  { %11853 = vst [vmem:[#allocation57_spill] sm:$0xff] %v8652_v30  ;;  %11854 = vst [vmem:[#allocation58_spill] sm:$0xff] %v8654_v35  ;;  %v1923_v2 = vmul.f32 %v8223_v54, %v1920_v12  ;;  %3693 = vrot.lane.b32.xlu1 %v3686_v31, %s5863_s20  ;;  %3691 = vrot.lane.b32.xlu0 %v3687_v6, %s5863_s20  ;;  %v3712_v0 = vmul.f32 %v8182_v37, %v3708_v56  ;;  %v3718_v1 = vrot.slane %v3710_v11, 1  ;;  %v11859_v11 = vld [vmem:[#allocation100_spill] sm:$0xff] }
 0x316   :  { %v3711_v22 = vmul.f32 %v8187_v21, %v3708_v56  ;;  %v3690_v35 = vsel %vm427_vm0, %v3688_v25, %v3689_v8  ;;  %v3717_v62 = vrot.slane %v3709_v20, 1  ;;  %v3740_v30 = vstv %s8608_s4  ;;  %s9982_s4 = sld [smem:[#allocation3 + $0x18]] }
 0x317   :  { %v8672_v43 = vadd.f32 %v11855_v47, %v8480_v41  ;;  %v11856_v12 = vrot.slane %v8595_v15, 1  ;;  %v1929_v48 = vrot.slane %v1921_v16, 1  ;;  %v8686_v20 = vadd.f32 %v11859_v11, %v8483_v5  ;;  %v11863_v11 = vld [vmem:[#allocation101_spill] sm:$0xff] }
 0x318   :  { %v8680_v56 = vpop.permute.xlu1 %3131  ;;  %v8682_v25 = vpop.permute.xlu0 %3129  ;;  %v11860_v36 = vrot.slane %v8625_v24, 1  ;;  %v1932_v6 = vrot.slane %v1923_v2, 1  ;;  %v3721_v16 = vrot.slane %v3712_v0, 1  ;;  %v3742_v5 = vmul.f32 %v8232_v27, %v3740_v30  ;;  %v11866_v0 = vld [vmem:[#allocation104_spill] sm:$0xff] }
 0x319   :  { %v8677_v31 = vsel %vm427_vm0, %v1884_v55, %v11856_v12  ;;  %11857 = vst [vmem:[#allocation59_spill] sm:$0xff] %v8680_v56  ;;  %11858 = vst [vmem:[#allocation60_spill] sm:$0xff] %v8682_v25  ;;  %v11862_v55 = vld [vmem:[#allocation24_spill] sm:$0xff]  ;;  %3697 = vrot.lane.b32.xlu1 %v3689_v8, %s5863_s20  ;;  %3695 = vrot.lane.b32.xlu0 %v3690_v35, %s5863_s20  ;;  %v3720_v25 = vrot.slane %v3711_v22, 1  ;;  %v8701_v56 = vadd.f32 %v11863_v11, %v8488_v17  ;;  %v11865_v8 = vld [vmem:[#allocation102_spill] sm:$0xff] }
 0x31a   :  { %v8691_v41 = vsel %vm427_vm0, %v1905_v57, %v11860_v36  ;;  %v1945_v12 = vmul.f32 %v8202_v46, %v11862_v55  ;;  %v11864_v36 = vrot.slane %v8629_v45, 1  ;;  %v3719_v47 = vsel %vm427_vm0, %v3717_v62, %v3718_v1 }
 0x31b   :  { %11861 = vst [vmem:[#allocation61_spill] sm:$0xff] %v8691_v41  ;;  %v3741_v2 = vmul.f32 %v8243_v28, %v3740_v30  ;;  %v8712_v35 = vadd.f32 %v11865_v8, %v8491_v4  ;;  %v1312_v22 = vadd.f32 %v11866_v0, %v8503_v19  ;;  %v11867_v41 = vld [vmem:[#allocation105_spill] sm:$0xff]  ;;  %v11868_v11 = vrot.slane %v8649_v32, 1  ;;  %v11872_v8 = vld [vmem:[#allocation106_spill] sm:$0xff] }
 0x31c   :  { %v8706_v57 = vsel %vm427_vm0, %v1908_v9, %v11864_v36  ;;  %v1311_v17 = vadd.f32 %v11867_v41, %v8507_v49  ;;  %v8723_v9 = vpop.permute.xlu1 %3135  ;;  %v8725_v62 = vpop.permute.xlu0 %3133  ;;  %v11871_v36 = vld [vmem:[#allocation103_spill] sm:$0xff]  ;;  %v1314_v19 = vadd.f32 %v11872_v8, %v8527_v44  ;;  %v1953_v0 = vrot.slane %v1945_v12, 1 }
 0x31d   :  { %v8721_v45 = vsel %vm427_vm0, %v1929_v48, %v11868_v11  ;;  %11869 = vst [vmem:[#allocation62_spill] sm:$0xff] %v8723_v9  ;;  %11870 = vst [vmem:[#allocation64_spill] sm:$0xff] %v8725_v62  ;;  %v8729_v4 = vadd.f32 %v11871_v36, %v8510_v59  ;;  %v1947_v49 = vmul.f32 %v8223_v54, %v11862_v55  ;;  %v11873_v41 = vrot.slane %v8659_v26, 1  ;;  %v11875_v11 = vld [vmem:[#allocation26_spill] sm:$0xff]  ;;  %v11876_v62 = vld [vmem:[#allocation107_spill] sm:$0xff] }
 0x31e   :  { %v1969_v9 = vmul.f32 %v8202_v46, %v11875_v11  ;;  %3725 = vrot.lane.b32.xlu1 %v3718_v1, %s5863_s20  ;;  %3723 = vrot.lane.b32.xlu0 %v3719_v47, %s5863_s20  ;;  %v3722_v59 = vsel %vm427_vm0, %v3720_v25, %v3721_v16  ;;  %v3750_v36 = vrot.slane %v3742_v5, 1  ;;  %v3749_v44 = vrot.slane %v3741_v2, 1 }
 0x31f   :  { %v8738_v48 = vsel %vm427_vm0, %v1932_v6, %v11873_v41  ;;  %v3744_v12 = vmul.f32 %v8182_v37, %v3740_v30  ;;  %v3743_v55 = vmul.f32 %v8187_v21, %v3740_v30  ;;  %v3772_v8 = vstv %s8668_s5  ;;  %v11879_v30 = vld [vmem:[#allocation108_spill] sm:$0xff]  ;;  %s10005_s5 = sld [smem:[#allocation3 + $0x33]] }
 0x320   :  { %11874 = vst [vmem:[#allocation63_spill] sm:$0xff] %v8738_v48  ;;  %v1313_v6 = vadd.f32 %v11876_v62, %v8531_v60  ;;  %v8751_v41 = vadd.f32 %v8200_v13, %v1312_v22  ;;  %v8754_v48 = vadd.f32 %v8205_v40, %v1311_v17  ;;  %v1971_v1 = vmul.f32 %v8223_v54, %v11875_v11  ;;  %v8758_v25 = vpop.permute.xlu1 %3157  ;;  %v8760_v47 = vpop.permute.xlu0 %3155  ;;  %v11880_v13 = vld [vmem:[#allocation121_spill] sm:$0xff] }
 0x321   :  { %11877 = vst [vmem:[#allocation65_spill] sm:$0xff] %v8758_v25  ;;  %11878 = vst [vmem:[#allocation66_spill] sm:$0xff] %v8760_v47  ;;  %v1344_v5 = vadd.f32 %v11879_v30, %v8542_v51  ;;  %v8767_v60 = vadd.f32 %v8221_v23, %v1314_v19  ;;  %v11881_v2 = vrot.slane %v11880_v13, 1  ;;  %v1956_v22 = vrot.slane %v1947_v49, 1  ;;  %v11882_v17 = vld [vmem:[#allocation109_spill] sm:$0xff]  ;;  %v11884_v49 = vld [vmem:[#allocation111_spill] sm:$0xff] }
 0x322   :  { %v1343_v62 = vadd.f32 %v11882_v17, %v8546_v7  ;;  %3729 = vrot.lane.b32.xlu1 %v3721_v16, %s5863_s20  ;;  %3727 = vrot.lane.b32.xlu0 %v3722_v59, %s5863_s20  ;;  %v3774_v11 = vmul.f32 %v8232_v27, %v3772_v8  ;;  %v3773_v51 = vmul.f32 %v8243_v28, %v3772_v8  ;;  %v1977_v30 = vrot.slane %v1969_v9, 1  ;;  %v11887_v9 = vld [vmem:[#allocation112_spill] sm:$0xff] }
 0x323   :  { %v8772_v40 = vsel %vm427_vm0, %v1953_v0, %v11881_v2  ;;  %v3751_v23 = vsel %vm427_vm0, %v3749_v44, %v3750_v36  ;;  %v3753_v19 = vrot.slane %v3744_v12, 1  ;;  %v3752_v13 = vrot.slane %v3743_v55, 1  ;;  %v11883_v0 = vld [vmem:[#allocation110_spill] sm:$0xff]  ;;  %v11888_v44 = vld [vmem:[#allocation113_spill] sm:$0xff] }
 0x324   :  { %v1346_v2 = vadd.f32 %v11883_v0, %v8556_v58  ;;  %v1345_v47 = vadd.f32 %v11884_v49, %v8566_v39  ;;  %v8786_v7 = vadd.f32 %v8226_v42, %v1313_v6  ;;  %v1980_v16 = vrot.slane %v1971_v1, 1  ;;  %v8788_v59 = vpop.permute.xlu1 %3161  ;;  %v8790_v17 = vpop.permute.xlu0 %3159  ;;  %v11889_v58 = vld [vmem:[#allocation250_spill] sm:$0xff]  ;;  %v11892_v42 = vld [vmem:[#allocation116_spill] sm:$0xff] }
 0x325   :  { %11885 = vst [vmem:[#allocation67_spill] sm:$0xff] %v8788_v59  ;;  %11886 = vst [vmem:[#allocation263_spill] sm:$0xff] %v8790_v17  ;;  %v1376_v25 = vadd.f32 %v11887_v9, %v8570_v18  ;;  %v1375_v12 = vadd.f32 %v11888_v44, %v8574_v38  ;;  %v8797_v55 = vadd.f32 %v8240_v3, %v1344_v5  ;;  %v11890_v0 = vrot.slane %v11889_v58, 1  ;;  %v11893_v3 = vld [vmem:[#allocation22_spill] sm:$0xff] }
 0x326   :  { %v1378_v6 = vadd.f32 %v11892_v42, %v8587_v14  ;;  %v8807_v1 = vadd.f32 %v8255_v53, %v1343_v62  ;;  %3757 = vrot.lane.b32.xlu1 %v3750_v36, %s5863_s20  ;;  %3755 = vrot.lane.b32.xlu0 %v3751_v23, %s5863_s20  ;;  %v3782_v18 = vrot.slane %v3774_v11, 1  ;;  %v3781_v38 = vrot.slane %v3773_v51, 1  ;;  %v11896_v53 = vld [vmem:[#allocation158_spill] sm:$0xff]  ;;  %v11897_v36 = vld [vmem:[#allocation180_spill] sm:$0xff]  ;;  %v11898_v11 = vld [vmem:[#allocation23_spill] sm:$0xff] }
 0x327   :  { %v8802_v39 = vsel %vm427_vm0, %v1956_v22, %v11890_v0  ;;  %v11894_v5 = vrot.slane %v11893_v3, 1  ;;  %v3754_v22 = vsel %vm427_vm0, %v3752_v13, %v3753_v19  ;;  %v3776_v9 = vmul.f32 %v8182_v37, %v3772_v8  ;;  %v11904_v42 = vld [vmem:[#allocation119_spill] sm:$0xff]  ;;  %v11905_v3 = vld [vmem:[#allocation182_spill] sm:$0xff] }
 0x328   :  { %11891 = vst [vmem:[#allocation125_spill] sm:$0xff] %v8802_v39  ;;  %v3775_v14 = vmul.f32 %v8187_v21, %v3772_v8  ;;  %v8822_v62 = vadd.f32 %v11896_v53, %v1346_v2  ;;  %v8825_v23 = vadd.f32 %v11897_v36, %v1345_v47  ;;  %v11899_v51 = vrot.slane %v11898_v11, 1  ;;  %v8834_v13 = vpop.permute.xlu0 %3181  ;;  %v11903_v8 = vld [vmem:[#allocation117_spill] sm:$0xff]  ;;  %v11906_v47 = vld [vmem:[#allocation224_spill] sm:$0xff]  ;;  %v11935_v17 = vld [vmem:[#allocation142_spill] sm:$0xff] }
 0x329   :  { %v8814_v49 = vsel %vm427_vm0, %v1977_v30, %v11894_v5  ;;  %v8832_v30 = vpop.permute.xlu1 %3183  ;;  %11902 = vst [vmem:[#allocation70_spill] sm:$0xff] %v8834_v13  ;;  %v3948_v58 = vstv %s8762_s6  ;;  %v1377_v0 = vadd.f32 %v11903_v8, %v8591_v10  ;;  %v1408_v2 = vadd.f32 %v11904_v42, %v8612_v29  ;;  %v11908_v11 = vld [vmem:[#allocation257_spill] sm:$0xff]  ;;  %v11909_v42 = vld [vmem:[#allocation123_spill] sm:$0xff]  ;;  %v11916_v13 = vld [vmem:[#allocation134_spill] sm:$0xff]  ;;  %s10040_s6 = sld [smem:[#allocation3 + $0x4e]] }
 0x32a   :  { %11895 = vst [vmem:[#allocation68_spill] sm:$0xff] %v8814_v49  ;;  %v8830_v44 = vsel %vm427_vm0, %v1980_v16, %v11899_v51  ;;  %11901 = vst [vmem:[#allocation13_spill] sm:$0xff] %v8832_v30  ;;  %v8842_v5 = vadd.f32 %v11905_v3, %v1376_v25  ;;  %v8845_v53 = vadd.f32 %v11906_v47, %v1375_v12  ;;  %v11907_v16 = vld [vmem:[#allocation120_spill] sm:$0xff]  ;;  %3761 = vrot.lane.b32.xlu1 %v3753_v19, %s5863_s20  ;;  %v11911_v19 = vld [vmem:[#allocation127_spill] sm:$0xff] }
 0x32b   :  { %11900 = vst [vmem:[#allocation69_spill] sm:$0xff] %v8830_v44  ;;  %v1407_v36 = vadd.f32 %v11907_v16, %v8616_v61  ;;  %v8852_v51 = vadd.f32 %v11908_v11, %v1378_v6  ;;  %3759 = vrot.lane.b32.xlu0 %v3754_v22, %s5863_s20  ;;  %v3783_v29 = vsel %vm427_vm0, %v3781_v38, %v3782_v18  ;;  %v3785_v10 = vrot.slane %v3776_v9, 1  ;;  %v11910_v6 = vld [vmem:[#allocation124_spill] sm:$0xff]  ;;  %v11912_v22 = vld [vmem:[#allocation130_spill] sm:$0xff] }
 0x32c   :  { %v3784_v25 = vrot.slane %v3775_v14, 1  ;;  %v3950_v12 = vmul.f32 %v8232_v27, %v3948_v58  ;;  %v3949_v8 = vmul.f32 %v8243_v28, %v3948_v58  ;;  %v1410_v61 = vadd.f32 %v11909_v42, %v8646_v50  ;;  %v8871_v9 = vpop.permute.xlu0 %3185  ;;  %v11915_v14 = vld [vmem:[#allocation132_spill] sm:$0xff]  ;;  %v11917_v42 = vld [vmem:[#allocation258_spill] sm:$0xff] }
 0x32d   :  { %v1409_v3 = vadd.f32 %v11910_v6, %v8672_v43  ;;  %v1439_v47 = vadd.f32 %v11911_v19, %v8686_v20  ;;  %v1441_v38 = vadd.f32 %v11912_v22, %v8701_v56  ;;  %v8869_v16 = vpop.permute.xlu1 %3187  ;;  %11914 = vst [vmem:[#allocation265_spill] sm:$0xff] %v8871_v9  ;;  %v1471_v11 = vadd.f32 %v11915_v14, %v8712_v35  ;;  %v11918_v43 = vld [vmem:[#allocation226_spill] sm:$0xff]  ;;  %v11919_v20 = vld [vmem:[#allocation204_spill] sm:$0xff]  ;;  %v11934_v9 = vld [vmem:[#allocation141_spill] sm:$0xff] }
 0x32e   :  { %11913 = vst [vmem:[#allocation71_spill] sm:$0xff] %v8869_v16  ;;  %v1473_v50 = vadd.f32 %v11916_v13, %v8729_v4  ;;  %v8878_v30 = vadd.f32 %v11917_v42, %v1377_v0  ;;  %v8881_v6 = vadd.f32 %v11918_v43, %v1408_v2  ;;  %v8884_v19 = vadd.f32 %v11919_v20, %v1407_v36  ;;  %v11920_v2 = vld [vmem:[#allocation266_spill] sm:$0xff]  ;;  %v11922_v42 = vld [vmem:[#allocation12_spill] sm:$0xff] }
 0x32f   :  { %3789 = vrot.lane.b32.xlu1 %v3782_v18, %s5863_s20  ;;  %3787 = vrot.lane.b32.xlu0 %v3783_v29, %s5863_s20  ;;  %v8889_v56 = vmul.f32 %v8182_v37, %v3948_v58  ;;  %v3951_v35 = vmul.f32 %v8187_v21, %v3948_v58  ;;  %v3786_v4 = vsel %vm427_vm0, %v3784_v25, %v3785_v10  ;;  %v3958_v13 = vrot.slane %v3950_v12, 2  ;;  %v11921_v29 = vld [vmem:[#allocation42_spill] sm:$0xff]  ;;  %v11925_v12 = vld [vmem:[#allocation136_spill] sm:$0xff] }
 0x330   :  { %v3957_v0 = vrot.slane %v3949_v8, 2  ;;  %v3980_v22 = vstv %s8819_s7  ;;  %v8897_v36 = vadd.f32 %v11920_v2, %v1410_v61  ;;  %v8900_v18 = vadd.f32 %v8335_v52, %v1409_v3  ;;  %v8910_v25 = vpop.permute.xlu0 %3207  ;;  %v11926_v52 = vld [vmem:[#allocation262_spill] sm:$0xff]  ;;  %s10054_s7 = sld [smem:[#allocation3 + $0x69]] }
 0x331   :  { %v8903_v14 = vadd.f32 %v11921_v29, %v1439_v47  ;;  %v8906_v43 = vadd.f32 %v11922_v42, %v1441_v38  ;;  %v8908_v58 = vpop.permute.xlu1 %3209  ;;  %11924 = vst [vmem:[#allocation73_spill] sm:$0xff] %v8910_v25  ;;  %v8914_v8 = vadd.f32 %v11925_v12, %v8751_v41  ;;  %v8917_v61 = vadd.f32 %v8392_v33, %v1471_v11  ;;  %v11927_v47 = vld [vmem:[#allocation137_spill] sm:$0xff]  ;;  %v11928_v33 = vld [vmem:[#allocation138_spill] sm:$0xff]  ;;  %v11933_v25 = vld [vmem:[#allocation140_spill] sm:$0xff] }
 0x332   :  { %11923 = vst [vmem:[#allocation72_spill] sm:$0xff] %v8908_v58  ;;  %v8920_v3 = vadd.f32 %v11926_v52, %v1473_v50  ;;  %v2376_v20 = vstv %s8847_s8  ;;  %v8925_v2 = vadd.f32 %v11927_v47, %v8754_v48  ;;  %v3961_v38 = vrot.slane %v8889_v56, 2  ;;  %v8940_v12 = vld [vmem:[#allocation5 + $0x18] sm:$0xff]  ;;  %s10126_s8 = sld [smem:[#allocation3 + $0x84]] }
 0x333   :  { %3793 = vrot.lane.b32.xlu1 %v3785_v10, %s5863_s20  ;;  %3791 = vrot.lane.b32.xlu0 %v3786_v4, %s5863_s20  ;;  %v3960_v29 = vrot.slane %v3951_v35, 2  ;;  %v8931_v41 = vmul.f32 %v8232_v27, %v3980_v22  ;;  %v8935_v11 = vadd.f32 %v11928_v33, %v8767_v60  ;;  %v2400_v50 = vstv %s8857_s10  ;;  %v8946_v35 = vld [vmem:[#allocation5 + $0x48] sm:$0xff]  ;;  %s10135_s10 = sld [smem:[#allocation3 + $0x9f]] }
 0x334   :  { %v3959_v42 = vsel %vm956_vm1, %v3957_v0, %v3958_v13  ;;  %v3981_v48 = vmul.f32 %v8243_v28, %v3980_v22  ;;  %v8943_v10 = vmul.f32 %v8940_v12, %v2376_v20  ;;  %v2377_v56 = vmul.f32 %v8202_v46, %v2376_v20  ;;  %v8954_v47 = vpop.permute.xlu0 %3211  ;;  %v11932_v0 = vld [vmem:[#allocation139_spill] sm:$0xff] }
 0x335   :  { %v8949_v4 = vmul.f32 %v8946_v35, %v2376_v20  ;;  %v2379_v60 = vmul.f32 %v8223_v54, %v2376_v20  ;;  %v8952_v52 = vpop.permute.xlu1 %3213  ;;  %11931 = vst [vmem:[#allocation15_spill] sm:$0xff] %v8954_v47  ;;  %v8958_v33 = vadd.f32 %v11932_v0, %v8786_v7  ;;  %v8962_v58 = vadd.f32 %v11933_v25, %v8797_v55 }
 0x336   :  { %11930 = vst [vmem:[#allocation268_spill] sm:$0xff] %v8952_v52  ;;  %v8966_v16 = vadd.f32 %v11934_v9, %v8807_v1  ;;  %v8970_v20 = vadd.f32 %v11935_v17, %v8822_v62  ;;  %v8975_v47 = vmul.f32 %v8940_v12, %v2400_v50  ;;  %v2401_v7 = vmul.f32 %v8202_v46, %v2400_v50 }
 0x337   :  { %11929 = vst [vmem:[#allocation240_spill] sm:$0xff] %v8949_v4  ;;  %3965 = vrot.lane.b32.xlu1 %v3958_v13, %s5862_s14  ;;  %3963 = vrot.lane.b32.xlu0 %v3959_v42, %s5862_s14  ;;  %v3962_v55 = vsel %vm956_vm1, %v3960_v29, %v3961_v38  ;;  %v3990_v1 = vrot.slane %v8931_v41, 2  ;;  %v3989_v9 = vrot.slane %v3981_v48, 2  ;;  %v3984_v17 = vmul.f32 %v8182_v37, %v3980_v22  ;;  %v11939_v29 = vld [vmem:[#allocation143_spill] sm:$0xff]  ;;  %v11940_v48 = vld [vmem:[#allocation144_spill] sm:$0xff] }
 0x338   :  { %11936 = vst [vmem:[#allocation129_spill] sm:$0xff] %v8975_v47  ;;  %v3983_v62 = vmul.f32 %v8187_v21, %v3980_v22  ;;  %v4012_v25 = vstv %s8894_s11  ;;  %v2385_v52 = vrot.slane %v2377_v56, 2  ;;  %v2388_v13 = vrot.slane %v2379_v60, 2  ;;  %v8991_v42 = vpop.permute.xlu0 %3233  ;;  %v11943_v60 = vld [vmem:[#allocation146_spill] sm:$0xff]  ;;  %s10368_s11 = sld [smem:[#allocation4]] }
 0x339   :  { %v8989_v44 = vpop.permute.xlu1 %3235  ;;  %11938 = vst [vmem:[#allocation242_spill] sm:$0xff] %v8991_v42  ;;  %v8997_v41 = vadd.f32 %v11939_v29, %v8825_v23  ;;  %v9001_v22 = vadd.f32 %v11940_v48, %v8842_v5  ;;  %v9004_v0 = vmul.f32 %v8946_v35, %v2400_v50  ;;  %v2403_v56 = vmul.f32 %v8223_v54, %v2400_v50  ;;  %v11942_v5 = vld [vmem:[#allocation145_spill] sm:$0xff] }
 0x33a   :  { %11937 = vst [vmem:[#allocation238_spill] sm:$0xff] %v8989_v44  ;;  %v2409_v59 = vrot.slane %v2401_v7, 2  ;;  %v4014_v23 = vmul.f32 %v8232_v27, %v4012_v25  ;;  %v4013_v29 = vmul.f32 %v8243_v28, %v4012_v25  ;;  %v9014_v48 = vadd.f32 %v11942_v5, %v8845_v53 }
 0x33b   :  { %11941 = vst [vmem:[#allocation74_spill] sm:$0xff] %v9004_v0  ;;  %3969 = vrot.lane.b32.xlu1 %v3961_v38, %s5862_s14  ;;  %3967 = vrot.lane.b32.xlu0 %v3962_v55, %s5862_s14  ;;  %v3991_v42 = vsel %vm956_vm1, %v3989_v9, %v3990_v1  ;;  %v3993_v44 = vrot.slane %v3984_v17, 2  ;;  %v3992_v50 = vrot.slane %v3983_v62, 2  ;;  %v9019_v7 = vadd.f32 %v11943_v60, %v8852_v51  ;;  %v11944_v38 = vld [vmem:[#allocation147_spill] sm:$0xff]  ;;  %v11950_v51 = vld [vmem:[#allocation148_spill] sm:$0xff] }
 0x33c   :  { %v9023_v55 = vadd.f32 %v11944_v38, %v8878_v30  ;;  %v11945_v49 = vrot.slane %v8943_v10, 2  ;;  %v11946_v53 = vrot.slane %v8949_v4, 2  ;;  %v9037_v62 = vpop.permute.xlu0 %3237  ;;  %v9041_v60 = vadd.f32 %v11950_v51, %v8881_v6 }
 0x33d   :  { %v9035_v17 = vpop.permute.xlu1 %3239  ;;  %11949 = vst [vmem:[#allocation17_spill] sm:$0xff] %v9037_v62  ;;  %v2412_v5 = vrot.slane %v2403_v56, 2  ;;  %v2424_v38 = vstv %s8972_s12  ;;  %v11952_v4 = vrot.slane %v8975_v47, 2  ;;  %v4022_v6 = vrot.slane %v4014_v23, 2  ;;  %s10380_s12 = sld [smem:[#allocation4 + $0x1]] }
 0x33e   :  { %v9028_v39 = vsel %vm956_vm1, %v2385_v52, %v11945_v49  ;;  %v9033_v9 = vsel %vm956_vm1, %v2388_v13, %v11946_v53  ;;  %11948 = vst [vmem:[#allocation269_spill] sm:$0xff] %v9035_v17  ;;  %v11951_v49 = vld [vmem:[#allocation149_spill] sm:$0xff]  ;;  %v4021_v53 = vrot.slane %v4013_v29, 2  ;;  %v2448_v51 = vstv %s8982_s13  ;;  %v11957_v29 = vld [vmem:[#allocation151_spill] sm:$0xff]  ;;  %s10388_s13 = sld [smem:[#allocation4 + $0x2]] }
 0x33f   :  { %11947 = vst [vmem:[#allocation75_spill] sm:$0xff] %v9033_v9  ;;  %v9047_v52 = vadd.f32 %v11951_v49, %v8884_v19  ;;  %v9052_v13 = vsel %vm956_vm1, %v2409_v59, %v11952_v4  ;;  %3997 = vrot.lane.b32.xlu1 %v3990_v1, %s5862_s14  ;;  %3995 = vrot.lane.b32.xlu0 %v3991_v42, %s5862_s14  ;;  %v11954_v49 = vld [vmem:[#allocation150_spill] sm:$0xff]  ;;  %v4044_v23 = vstv %s8993_s2  ;;  %v11964_v9 = vld [vmem:[#allocation115_spill] sm:$0xff]  ;;  %s10396_s2 = sld [smem:[#allocation4 + $0x3]] }
 0x340   :  { %11953 = vst [vmem:[#allocation76_spill] sm:$0xff] %v9052_v13  ;;  %v3994_v56 = vsel %vm956_vm1, %v3992_v50, %v3993_v44  ;;  %v4016_v30 = vmul.f32 %v8182_v37, %v4012_v25  ;;  %v4015_v19 = vmul.f32 %v8187_v21, %v4012_v25  ;;  %v9064_v62 = vadd.f32 %v11954_v49, %v8897_v36  ;;  %v9072_v42 = vpop.permute.xlu0 %3259 }
 0x341   :  { %v9067_v59 = vmul.f32 %v8940_v12, %v2424_v38  ;;  %v2425_v4 = vmul.f32 %v8202_v46, %v2424_v38  ;;  %v9070_v1 = vpop.permute.xlu1 %3261  ;;  %11956 = vst [vmem:[#allocation78_spill] sm:$0xff] %v9072_v42  ;;  %v9077_v50 = vadd.f32 %v11957_v29, %v8900_v18  ;;  %v11958_v25 = vrot.slane %v9004_v0, 2 }
 0x342   :  { %11955 = vst [vmem:[#allocation77_spill] sm:$0xff] %v9070_v1  ;;  %v9085_v36 = vmul.f32 %v8946_v35, %v2424_v38  ;;  %v2427_v49 = vmul.f32 %v8223_v54, %v2424_v38  ;;  %v9089_v13 = vmul.f32 %v8940_v12, %v2448_v51  ;;  %v2449_v42 = vmul.f32 %v8202_v46, %v2448_v51 }
 0x343   :  { %v9082_v17 = vsel %vm956_vm1, %v2412_v5, %v11958_v25  ;;  %4001 = vrot.lane.b32.xlu1 %v3993_v44, %s5862_s14  ;;  %3999 = vrot.lane.b32.xlu0 %v3994_v56, %s5862_s14  ;;  %v4023_v18 = vsel %vm956_vm1, %v4021_v53, %v4022_v6  ;;  %v4025_v29 = vrot.slane %v4016_v30, 2  ;;  %v4024_v1 = vrot.slane %v4015_v19, 2  ;;  %v11963_v30 = vld [vmem:[#allocation153_spill] sm:$0xff] }
 0x344   :  { %11959 = vst [vmem:[#allocation79_spill] sm:$0xff] %v9082_v17  ;;  %v4046_v5 = vmul.f32 %v8232_v27, %v4044_v23  ;;  %v4045_v25 = vmul.f32 %v8243_v28, %v4044_v23  ;;  %v2433_v38 = vrot.slane %v2425_v4, 2  ;;  %v9099_v12 = vmul.f32 %v8946_v35, %v2448_v51  ;;  %v9104_v56 = vpop.permute.xlu0 %3263 }
 0x345   :  { %v2451_v0 = vmul.f32 %v8223_v54, %v2448_v51  ;;  %v9102_v44 = vpop.permute.xlu1 %3265  ;;  %11962 = vst [vmem:[#allocation82_spill] sm:$0xff] %v9104_v56  ;;  %v9108_v53 = vadd.f32 %v11963_v30, %v8903_v14  ;;  %v2436_v47 = vrot.slane %v2427_v49, 2  ;;  %v2473_v4 = vmul.f32 %v8202_v46, %v11964_v9 }
 0x346   :  { %11960 = vst [vmem:[#allocation80_spill] sm:$0xff] %v9099_v12  ;;  %11961 = vst [vmem:[#allocation81_spill] sm:$0xff] %v9102_v44  ;;  %v2457_v17 = vrot.slane %v2449_v42, 2  ;;  %v9117_v51 = vmul.f32 %v8182_v37, %v4044_v23  ;;  %v4047_v56 = vmul.f32 %v8187_v21, %v4044_v23  ;;  %v4026_v14 = vsel %vm956_vm1, %v4024_v1, %v4025_v29  ;;  %v11968_v1 = vld [vmem:[#allocation155_spill] sm:$0xff] }
 0x347   :  { %4029 = vrot.lane.b32.xlu1 %v4022_v6, %s5862_s14  ;;  %4027 = vrot.lane.b32.xlu0 %v4023_v18, %s5862_s14  ;;  %v4054_v30 = vrot.slane %v4046_v5, 2  ;;  %v4053_v19 = vrot.slane %v4045_v25, 2  ;;  %v4076_v49 = vstv %s9060_s15  ;;  %v11965_v46 = vrot.slane %v9067_v59, 2  ;;  %v11969_v5 = vld [vmem:[#allocation160_spill] sm:$0xff]  ;;  %s10418_s15 = sld [smem:[#allocation4 + $0x4]] }
 0x348   :  { %v2460_v18 = vrot.slane %v2451_v0, 2  ;;  %v2475_v37 = vmul.f32 %v8223_v54, %v11964_v9  ;;  %v9134_v21 = vpop.permute.xlu0 %3435  ;;  %v9138_v23 = vadd.f32 %v11968_v1, %v8906_v43  ;;  %v1714_v25 = vadd.f32 %v11969_v5, %v8914_v8  ;;  %v11972_v8 = vld [vmem:[#allocation157_spill] sm:$0xff]  ;;  %v5777_v5 = vld [vmem:[#allocation5 + $0x10] sm:$0xff] }
 0x349   :  { %v9127_v42 = vsel %vm956_vm1, %v2433_v38, %v11965_v46  ;;  %v9132_v35 = vpop.permute.xlu1 %3437  ;;  %11967 = vst [vmem:[#allocation20_spill] sm:$0xff] %v9134_v21  ;;  %v11970_v38 = vld [vmem:[#allocation161_spill] sm:$0xff]  ;;  %v2481_v44 = vrot.slane %v2473_v4, 2  ;;  %v11971_v0 = vrot.slane %v9085_v36, 2  ;;  %v4057_v54 = vrot.slane %v9117_v51, 2 }
 0x34a   :  { %11966 = vst [vmem:[#allocation83_spill] sm:$0xff] %v9132_v35  ;;  %v1713_v46 = vadd.f32 %v11970_v38, %v8925_v2  ;;  %v4056_v43 = vrot.slane %v4047_v56, 2  ;;  %v9153_v9 = vmul.f32 %v8232_v27, %v4076_v49  ;;  %v9157_v1 = vadd.f32 %v11972_v8, %v8917_v61  ;;  %v11977_v38 = vld [vmem:[#allocation32_spill] sm:$0xff] }
 0x34b   :  { %v9147_v6 = vsel %vm956_vm1, %v2436_v47, %v11971_v0  ;;  %4033 = vrot.lane.b32.xlu1 %v4025_v29, %s5862_s14  ;;  %4031 = vrot.lane.b32.xlu0 %v4026_v14, %s5862_s14  ;;  %v11973_v2 = vrot.slane %v9089_v13, 2  ;;  %v4055_v47 = vsel %vm956_vm1, %v4053_v19, %v4054_v30  ;;  %v4077_v29 = vmul.f32 %v8243_v28, %v4076_v49  ;;  %v11974_v14 = vld [vmem:[#allocation159_spill] sm:$0xff] }
 0x34c   :  { %v9168_v51 = vadd.f32 %v11974_v14, %v8920_v3  ;;  %v11975_v27 = vrot.slane %v9099_v12, 2  ;;  %v2484_v61 = vrot.slane %v2475_v37, 2  ;;  %v2497_v0 = vmul.f32 %v5777_v5, %v11977_v38  ;;  %v5778_v37 = vld [vmem:[#allocation5 + $0x40] sm:$0xff] }
 0x34d   :  { %v9162_v4 = vsel %vm956_vm1, %v2457_v17, %v11973_v2  ;;  %v9176_v8 = vpop.permute.xlu1 %3441  ;;  %v9178_v17 = vpop.permute.xlu0 %3439  ;;  %v11980_v19 = vrot.slane %v8494_v34, 1  ;;  %v9185_v3 = vadd.f32 %v8579_v63, %v1713_v46  ;;  %v11981_v2 = vld [vmem:[#allocation118_spill] sm:$0xff]  ;;  %v4058_v63 = vsel %vm956_vm1, %v4056_v43, %v4057_v54 }
 0x34e   :  { %v9173_v56 = vsel %vm956_vm1, %v2460_v18, %v11975_v27  ;;  %11978 = vst [vmem:[#allocation85_spill] sm:$0xff] %v9176_v8  ;;  %11979 = vst [vmem:[#allocation25_spill] sm:$0xff] %v9178_v17  ;;  %v11982_v14 = vrot.slane %v11981_v2, 2  ;;  %v2499_v27 = vmul.f32 %v5778_v37, %v11977_v38  ;;  %v11984_v5 = vld [vmem:[#allocation162_spill] sm:$0xff]  ;;  %v11985_v17 = vld [vmem:[#allocation163_spill] sm:$0xff]  ;;  %v4085_v46 = vrot.slane %v4077_v29, 2 }
 0x34f   :  { %11976 = vst [vmem:[#allocation84_spill] sm:$0xff] %v9173_v56  ;;  %v9182_v28 = vadd.f32 %v11980_v19, %v1714_v25  ;;  %v1716_v8 = vadd.f32 %v11984_v5, %v8935_v11  ;;  %v1715_v34 = vadd.f32 %v11985_v17, %v8958_v33  ;;  %4061 = vrot.lane.b32.xlu1 %v4054_v30, %s5862_s14  ;;  %v4086_v25 = vrot.slane %v9153_v9, 2  ;;  %v9204_v38 = vld [vmem:[#allocation5 + $0x50] sm:$0xff]  ;;  %v11987_v30 = vld [vmem:[#allocation165_spill] sm:$0xff]  ;;  %v12003_v56 = vld [vmem:[#allocation122_spill] sm:$0xff] }
 0x350   :  { %v9190_v18 = vsel %vm956_vm1, %v2481_v44, %v11982_v14  ;;  %4059 = vrot.lane.b32.xlu0 %v4055_v47, %s5862_s14  ;;  %v9201_v44 = vld [vmem:[#allocation5 + $0x58] sm:$0xff]  ;;  %v4079_v11 = vmul.f32 %v9204_v38, %v4076_v49  ;;  %v4108_v2 = vstv %s9122_s16  ;;  %v1739_v47 = vadd.f32 %v11987_v30, %v8966_v16  ;;  %v11988_v14 = vld [vmem:[#allocation31_spill] sm:$0xff]  ;;  %s10420_s16 = sld [smem:[#allocation4 + $0x5]] }
 0x351   :  { %11983 = vst [vmem:[#allocation86_spill] sm:$0xff] %v9190_v18  ;;  %v4080_v19 = vmul.f32 %v9201_v44, %v4076_v49  ;;  %v11986_v33 = vld [vmem:[#allocation164_spill] sm:$0xff]  ;;  %v11989_v43 = vrot.slane %v11988_v14, 2  ;;  %v2505_v29 = vrot.slane %v2497_v0, 2  ;;  %v9217_v37 = vpop.permute.xlu1 %3469  ;;  %v9219_v5 = vpop.permute.xlu0 %3467  ;;  %v11993_v49 = vld [vmem:[#allocation166_spill] sm:$0xff]  ;;  %v2508_v14 = vrot.slane %v2499_v27, 2 }
 0x352   :  { %v1740_v17 = vadd.f32 %v11986_v33, %v8962_v58  ;;  %11991 = vst [vmem:[#allocation88_spill] sm:$0xff] %v9217_v37  ;;  %11992 = vst [vmem:[#allocation89_spill] sm:$0xff] %v9219_v5  ;;  %v1742_v21 = vadd.f32 %v11993_v49, %v8970_v20  ;;  %v11994_v58 = vld [vmem:[#allocation167_spill] sm:$0xff]  ;;  %v11995_v16 = vld [vmem:[#allocation168_spill] sm:$0xff]  ;;  %v4087_v27 = vsel %vm956_vm1, %v4085_v46, %v4086_v25  ;;  %v12004_v12 = vrot.slane %v12003_v56, 2 }
 0x353   :  { %v9215_v9 = vsel %vm956_vm1, %v2484_v61, %v11989_v43  ;;  %v1741_v33 = vadd.f32 %v11994_v58, %v8997_v41  ;;  %v1766_v30 = vadd.f32 %v11995_v16, %v9001_v22  ;;  %v11996_v61 = vld [vmem:[#allocation169_spill] sm:$0xff]  ;;  %4065 = vrot.lane.b32.xlu1 %v4057_v54, %s5862_s14  ;;  %v9233_v0 = vld [vmem:[#allocation5 + $0x28] sm:$0xff]  ;;  %v4088_v16 = vrot.slane %v4079_v11, 2  ;;  %v11999_v54 = vld [vmem:[#allocation52_spill] sm:$0xff] }
 0x354   :  { %11990 = vst [vmem:[#allocation87_spill] sm:$0xff] %v9215_v9  ;;  %v1765_v43 = vadd.f32 %v11996_v61, %v9014_v48  ;;  %4063 = vrot.lane.b32.xlu0 %v4058_v63, %s5862_s14  ;;  %v9236_v5 = vmul.f32 %v9233_v0, %v4108_v2  ;;  %v9238_v20 = vld [vmem:[#allocation5 + $0x20] sm:$0xff]  ;;  %v11997_v49 = vld [vmem:[#allocation47_spill] sm:$0xff]  ;;  %v4089_v48 = vrot.slane %v4080_v19, 2  ;;  %v9247_v61 = vadd.f32 %v11999_v54, %v1715_v34  ;;  %v12002_v9 = vld [vmem:[#allocation56_spill] sm:$0xff] }
 0x355   :  { %v4109_v41 = vmul.f32 %v9238_v20, %v4108_v2  ;;  %v11998_v58 = vrot.slane %v11997_v49, 1  ;;  %v12000_v63 = vld [vmem:[#allocation49_spill] sm:$0xff]  ;;  %v9254_v18 = vadd.f32 %v12002_v9, %v1739_v47  ;;  %v9259_v49 = vsel %vm956_vm1, %v2505_v29, %v12004_v12  ;;  %v9263_v46 = vpop.permute.xlu0 %3471  ;;  %v12007_v19 = vld [vmem:[#allocation170_spill] sm:$0xff] }
 0x356   :  { %v12001_v37 = vrot.slane %v12000_v63, 1  ;;  %12006 = vst [vmem:[#allocation91_spill] sm:$0xff] %v9263_v46  ;;  %v1768_v34 = vadd.f32 %v12007_v19, %v9019_v7  ;;  %v12008_v11 = vrot.slane %v8595_v15, 1  ;;  %v12009_v47 = vld [vmem:[#allocation126_spill] sm:$0xff]  ;;  %v12011_v12 = vrot.slane %v8625_v24, 1  ;;  %v12013_v7 = vld [vmem:[#allocation171_spill] sm:$0xff] }
 0x357   :  { %v9243_v22 = vadd.f32 %v11998_v58, %v1716_v8  ;;  %v9261_v8 = vpop.permute.xlu1 %3473  ;;  %v12010_v9 = vrot.slane %v12009_v47, 2  ;;  %4093 = vrot.lane.b32.xlu1 %v4086_v25, %s5862_s14  ;;  %v4118_v15 = vrot.slane %v9236_v5, 2  ;;  %v4090_v24 = vsel %vm956_vm1, %v4088_v16, %v4089_v48  ;;  %v12015_v25 = vld [vmem:[#allocation173_spill] sm:$0xff]  ;;  %v12016_v5 = vld [vmem:[#allocation174_spill] sm:$0xff]  ;;  %v12019_v16 = vld [vmem:[#allocation175_spill] sm:$0xff] }
 0x358   :  { %v9251_v35 = vadd.f32 %v12001_v37, %v1740_v17  ;;  %12005 = vst [vmem:[#allocation90_spill] sm:$0xff] %v9261_v8  ;;  %v9269_v58 = vadd.f32 %v12008_v11, %v1742_v21  ;;  %v9272_v17 = vadd.f32 %v8677_v31, %v1741_v33  ;;  %v9281_v29 = vadd.f32 %v12011_v12, %v1766_v30  ;;  %v12012_v37 = vld [vmem:[#allocation61_spill] sm:$0xff]  ;;  %v12022_v12 = vld [vmem:[#allocation55_spill] sm:$0xff] }
 0x359   :  { %v9277_v56 = vsel %vm956_vm1, %v2508_v14, %v12010_v9  ;;  %v9284_v54 = vadd.f32 %v12012_v37, %v1765_v43  ;;  %4091 = vrot.lane.b32.xlu0 %v4087_v27, %s5862_s14  ;;  %v4117_v31 = vrot.slane %v4109_v41, 2  ;;  %v1767_v21 = vadd.f32 %v12013_v7, %v9023_v55  ;;  %v12014_v14 = vld [vmem:[#allocation172_spill] sm:$0xff]  ;;  %v9304_v19 = vpop.permute.xlu0 %3499  ;;  %v12020_v47 = vld [vmem:[#allocation177_spill] sm:$0xff]  ;;  %v12021_v9 = vld [vmem:[#allocation179_spill] sm:$0xff] }
 0x35a   :  { %v4112_v33 = vmul.f32 %v9201_v44, %v4108_v2  ;;  %v4111_v30 = vmul.f32 %v9204_v38, %v4108_v2  ;;  %v1792_v43 = vadd.f32 %v12014_v14, %v9041_v60  ;;  %v1791_v27 = vadd.f32 %v12015_v25, %v9047_v52  ;;  %12018 = vst [vmem:[#allocation93_spill] sm:$0xff] %v9304_v19  ;;  %v12025_v14 = vld [vmem:[#allocation183_spill] sm:$0xff] }
 0x35b   :  { %v1794_v41 = vadd.f32 %v12016_v5, %v9064_v62  ;;  %v9302_v63 = vpop.permute.xlu1 %3501  ;;  %v4140_v55 = vstv %s9221_s17  ;;  %v1793_v11 = vadd.f32 %v12019_v16, %v9077_v50  ;;  %v1817_v2 = vadd.f32 %v12020_v47, %v9108_v53  ;;  %v12024_v62 = vld [vmem:[#allocation181_spill] sm:$0xff]  ;;  %4097 = vrot.lane.b32.xlu1 %v4089_v48, %s5862_s14  ;;  %s5867_s17 = smov 28  }
 0x35c   :  { %12017 = vst [vmem:[#allocation92_spill] sm:$0xff] %v9302_v63  ;;  %v1819_v60 = vadd.f32 %v12021_v9, %v9138_v23  ;;  %v12023_v37 = vrot.slane %v12022_v12, 1  ;;  %v1843_v7 = vadd.f32 %v12024_v62, %v9157_v1  ;;  %v1845_v25 = vadd.f32 %v12025_v14, %v9168_v51  ;;  %v12033_v9 = vld [vmem:[#allocation69_spill] sm:$0xff]  ;;  %v12036_v14 = vld [vmem:[#allocation186_spill] sm:$0xff] }
 0x35d   :  { %4095 = vrot.lane.b32.xlu0 %v4090_v24, %s5862_s14  ;;  %v4119_v50 = vsel %vm956_vm1, %v4117_v31, %v4118_v15  ;;  %v4121_v53 = vrot.slane %v4112_v33, 2  ;;  %v4120_v5 = vrot.slane %v4111_v30, 2  ;;  %v4142_v23 = vmul.f32 %v9233_v0, %v4140_v55  ;;  %v9342_v33 = vpop.permute.xlu0 %3503  ;;  %v12035_v62 = vld [vmem:[#allocation185_spill] sm:$0xff] }
 0x35e   :  { %v1918_v52 = vadd.f32 %v12023_v37, %v1768_v34  ;;  %v4141_v34 = vmul.f32 %v9238_v20, %v4140_v55  ;;  %v9327_v16 = vadd.f32 %v8706_v57, %v1767_v21  ;;  %v12026_v1 = vrot.slane %v8649_v32, 1  ;;  %12029 = vst [vmem:[#allocation95_spill] sm:$0xff] %v9342_v33  ;;  %v12030_v57 = vld [vmem:[#allocation63_spill] sm:$0xff] }
 0x35f   :  { %v9334_v51 = vadd.f32 %v8721_v45, %v1791_v27  ;;  %v12027_v48 = vrot.slane %v8659_v26, 1  ;;  %v9340_v24 = vpop.permute.xlu1 %3505  ;;  %v9347_v21 = vadd.f32 %v12030_v57, %v1793_v11  ;;  %v9350_v32 = vadd.f32 %v8772_v40, %v1817_v2  ;;  %v12031_v26 = vld [vmem:[#allocation125_spill] sm:$0xff]  ;;  %v12032_v27 = vld [vmem:[#allocation68_spill] sm:$0xff]  ;;  %4125 = vrot.lane.b32.xlu1 %v4118_v15, %s5862_s14  ;;  %v12037_v15 = vld [vmem:[#allocation187_spill] sm:$0xff] }
 0x360   :  { %v9331_v47 = vadd.f32 %v12026_v1, %v1792_v43  ;;  %12028 = vst [vmem:[#allocation94_spill] sm:$0xff] %v9340_v24  ;;  %v9353_v30 = vmul.f32 %v9201_v44, %v4140_v55  ;;  %v4143_v45 = vmul.f32 %v9204_v38, %v4140_v55  ;;  %v9359_v43 = vadd.f32 %v12031_v26, %v1819_v60  ;;  %v12034_v2 = vld [vmem:[#allocation184_spill] sm:$0xff]  ;;  %v12042_v26 = vld [vmem:[#allocation190_spill] sm:$0xff] }
 0x361   :  { %v9338_v31 = vadd.f32 %v12027_v48, %v1794_v41  ;;  %v9362_v41 = vadd.f32 %v12032_v27, %v1843_v7  ;;  %v9365_v11 = vadd.f32 %v12033_v9, %v1845_v25  ;;  %4123 = vrot.lane.b32.xlu0 %v4119_v50, %s5862_s14  ;;  %v4172_v40 = vstv %s9289_s18  ;;  %v12038_v1 = vld [vmem:[#allocation188_spill] sm:$0xff]  ;;  %v12043_v27 = vld [vmem:[#allocation191_spill] sm:$0xff]  ;;  %s5868_s18 = smov 14  }
 0x362   :  { %v9372_v55 = vadd.f32 %v12034_v2, %v9182_v28  ;;  %v4122_v12 = vsel %vm956_vm1, %v4120_v5, %v4121_v53  ;;  %v4150_v60 = vrot.slane %v4142_v23, 2  ;;  %v4149_v37 = vrot.slane %v4141_v34, 2  ;;  %v9393_v5 = vpop.permute.xlu0 %3531 }
 0x363   :  { %v9377_v7 = vadd.f32 %v12035_v62, %v9185_v3  ;;  %v9381_v25 = vadd.f32 %v12036_v14, %v9243_v22  ;;  %v9385_v50 = vadd.f32 %v12037_v15, %v9247_v61  ;;  %v9389_v28 = vadd.f32 %v12038_v1, %v9251_v35  ;;  %v9391_v48 = vpop.permute.xlu1 %3533  ;;  %12040 = vst [vmem:[#allocation97_spill] sm:$0xff] %v9393_v5  ;;  %v12045_v62 = vld [vmem:[#allocation193_spill] sm:$0xff] }
 0x364   :  { %12039 = vst [vmem:[#allocation96_spill] sm:$0xff] %v9391_v48  ;;  %v2904_v23 = vstv %s9315_s19  ;;  %v4153_v3 = vrot.slane %v9353_v30, 2  ;;  %v4152_v34 = vrot.slane %v4143_v45, 2  ;;  %v4175_v22 = vmul.f32 %v9204_v38, %v4172_v40  ;;  %4129 = vrot.lane.b32.xlu1 %v4121_v53, %s5862_s14  ;;  %v12041_v30 = vld [vmem:[#allocation189_spill] sm:$0xff]  ;;  %s5869_s19 = smov 56  }
 0x365   :  { %4127 = vrot.lane.b32.xlu0 %v4122_v12, %s5862_s14  ;;  %v9403_v35 = vmul.f32 %v9201_v44, %v4172_v40  ;;  %v4173_v61 = vmul.f32 %v9238_v20, %v4172_v40  ;;  %v9407_v57 = vmul.f32 %v9233_v0, %v4172_v40  ;;  %v9413_v45 = vadd.f32 %v12041_v30, %v9254_v18  ;;  %v12044_v12 = vld [vmem:[#allocation192_spill] sm:$0xff]  ;;  %s9448_s14 = sld [smem:[#allocation3 + $0x48]] }
 0x366   :  { %v9417_v53 = vadd.f32 %v12042_v26, %v9269_v58  ;;  %v9421_v9 = vadd.f32 %v12043_v27, %v9272_v17  ;;  %v4151_v2 = vsel %vm956_vm1, %v4149_v37, %v4150_v60  ;;  %v9426_v40 = vadd.f32 %v12044_v12, %v9281_v29  ;;  %v9437_v58 = vpop.permute.xlu0 %3535  ;;  %v12048_v17 = vld [vmem:[#allocation194_spill] sm:$0xff] }
 0x367   :  { %v9430_v14 = vadd.f32 %v12045_v62, %v9284_v54  ;;  %v9433_v18 = vmul.f32 %v9233_v0, %v2904_v23  ;;  %v9435_v15 = vpop.permute.xlu1 %3537  ;;  %12047 = vst [vmem:[#allocation99_spill] sm:$0xff] %v9437_v58  ;;  %v4204_v1 = vstv %s9344_s21  ;;  %v9441_v30 = vadd.f32 %v12048_v17, %v1918_v52  ;;  %s5870_s21 = smov 42  }
 0x368   :  { %12046 = vst [vmem:[#allocation98_spill] sm:$0xff] %v9435_v15  ;;  %v9444_v37 = vmul.f32 %v9238_v20, %v2904_v23  ;;  %v4154_v29 = vsel %vm956_vm1, %v4152_v34, %v4153_v3  ;;  %v4236_v26 = vstv %s9356_s22  ;;  %4157 = vrot.lane.b32.xlu1 %v4150_v60, %s5863_s20  ;;  %v4184_v54 = vrot.slane %v4175_v22, 2  ;;  %v12050_v60 = vld [vmem:[#allocation195_spill] sm:$0xff]  ;;  %s5871_s22 = smov 84  }
 0x369   :  { %4155 = vrot.lane.b32.xlu0 %v4151_v2, %s5863_s20  ;;  %v4181_v12 = vrot.slane %v4173_v61, 2  ;;  %v4207_v62 = vmul.f32 %v9204_v38, %v4204_v1  ;;  %v9456_v17 = vmul.f32 %v9201_v44, %v4204_v1  ;;  %v4205_v34 = vmul.f32 %v9238_v20, %v4204_v1 }
 0x36a   :  { %12049 = vst [vmem:[#allocation100_spill] sm:$0xff] %v9444_v37  ;;  %v9460_v58 = vmul.f32 %v9233_v0, %v4204_v1  ;;  %v9464_v2 = vadd.f32 %v12050_v60, %v9327_v16  ;;  %v9467_v22 = vmul.f32 %v9201_v44, %v2904_v23  ;;  %v9470_v61 = vmul.f32 %v9204_v38, %v2904_v23  ;;  %v9474_v27 = vpop.permute.xlu0 %3563  ;;  %v12055_v23 = vld [vmem:[#allocation196_spill] sm:$0xff]  ;;  %v12083_v37 = vld [vmem:[#allocation209_spill] sm:$0xff] }
 0x36b   :  { %v9472_v52 = vpop.permute.xlu1 %3565  ;;  %12054 = vst [vmem:[#allocation104_spill] sm:$0xff] %v9474_v27  ;;  %v4239_v15 = vmul.f32 %v9204_v38, %v4236_v26  ;;  %v2914_v1 = vstv %s9396_s23  ;;  %v9481_v5 = vmul.f32 %v9201_v44, %v4236_v26  ;;  %v4237_v16 = vmul.f32 %v9238_v20, %v4236_v26  ;;  %s5872_s23 = smov 70  }
 0x36c   :  { %12051 = vst [vmem:[#allocation24_spill] sm:$0xff] %v9467_v22  ;;  %12052 = vst [vmem:[#allocation101_spill] sm:$0xff] %v9470_v61  ;;  %v9485_v60 = vmul.f32 %v9233_v0, %v4236_v26  ;;  %v9489_v48 = vadd.f32 %v12055_v23, %v9331_v47  ;;  %4161 = vrot.lane.b32.xlu1 %v4153_v3, %s5863_s20  ;;  %v12056_v27 = vrot.slane %v9403_v35, 2  ;;  %v12057_v33 = vrot.slane %v9407_v57, 2  ;;  %v12058_v3 = vld [vmem:[#allocation197_spill] sm:$0xff]  ;;  %v12064_v47 = vld [vmem:[#allocation199_spill] sm:$0xff] }
 0x36d   :  { %12053 = vst [vmem:[#allocation102_spill] sm:$0xff] %v9472_v52  ;;  %4159 = vrot.lane.b32.xlu0 %v4154_v29, %s5863_s20  ;;  %v4268_v19 = vstv %s9409_s24  ;;  %v4216_v26 = vrot.slane %v4207_v62, 2  ;;  %v4213_v46 = vrot.slane %v4205_v34, 2  ;;  %v9504_v23 = vadd.f32 %v12058_v3, %v9334_v51  ;;  %s5873_s24 = smov 112  }
 0x36e   :  { %v4186_v52 = vsel %vm956_vm1, %v4184_v54, %v12056_v27  ;;  %v4183_v24 = vsel %vm956_vm1, %v4181_v12, %v12057_v33  ;;  %v9507_v29 = vmul.f32 %v9233_v0, %v2914_v1  ;;  %v9510_v54 = vmul.f32 %v9238_v20, %v2914_v1  ;;  %v9516_v27 = vpop.permute.xlu0 %3567 }
 0x36f   :  { %v9514_v33 = vpop.permute.xlu1 %3569  ;;  %12062 = vst [vmem:[#allocation26_spill] sm:$0xff] %v9516_v27  ;;  %v4248_v12 = vrot.slane %v4239_v15, 2  ;;  %v4245_v34 = vrot.slane %v4237_v16, 2  ;;  %v4271_v51 = vmul.f32 %v9204_v38, %v4268_v19  ;;  %v2924_v3 = vstv %s9448_s14  ;;  %v12063_v16 = vld [vmem:[#allocation198_spill] sm:$0xff]  ;;  %s5874_s14 = smov 98  }
 0x370   :  { %12059 = vst [vmem:[#allocation105_spill] sm:$0xff] %v9507_v29  ;;  %12060 = vst [vmem:[#allocation103_spill] sm:$0xff] %v9510_v54  ;;  %4191 = vrot.lane.b32.xlu1 %v4186_v52, %s5863_s20  ;;  %v9525_v63 = vmul.f32 %v9201_v44, %v4268_v19  ;;  %v9529_v15 = vmul.f32 %v9233_v0, %v4268_v19  ;;  %v9533_v62 = vadd.f32 %v12063_v16, %v9338_v31  ;;  %v12067_v29 = vld [vmem:[#allocation201_spill] sm:$0xff] }
 0x371   :  { %12061 = vst [vmem:[#allocation106_spill] sm:$0xff] %v9514_v33  ;;  %4187 = vrot.lane.b32.xlu0 %v4183_v24, %s5863_s20  ;;  %v4269_v33 = vmul.f32 %v9238_v20, %v4268_v19  ;;  %v9537_v27 = vadd.f32 %v12064_v47, %v9347_v21  ;;  %v12065_v52 = vrot.slane %v9456_v17, 2  ;;  %v12066_v8 = vrot.slane %v9460_v58, 2 }
 0x372   :  { %v9547_v19 = vadd.f32 %v12067_v29, %v9350_v32  ;;  %v9550_v61 = vmul.f32 %v9201_v44, %v2914_v1  ;;  %v9553_v31 = vmul.f32 %v9204_v38, %v2914_v1  ;;  %v9557_v47 = vpop.permute.xlu0 %3595  ;;  %v4300_v16 = vstv %s9477_s25  ;;  %s5875_s25 = smov 12  }
 0x373   :  { %v4218_v24 = vsel %vm956_vm1, %v4216_v26, %v12065_v52  ;;  %v4215_v54 = vsel %vm956_vm1, %v4213_v46, %v12066_v8  ;;  %v9555_v21 = vpop.permute.xlu1 %3597  ;;  %12071 = vst [vmem:[#allocation109_spill] sm:$0xff] %v9557_v47  ;;  %v9561_v26 = vmul.f32 %v9233_v0, %v2924_v3  ;;  %v9564_v8 = vmul.f32 %v9238_v20, %v2924_v3  ;;  %v12081_v47 = vld [vmem:[#allocation205_spill] sm:$0xff] }
 0x374   :  { %12068 = vst [vmem:[#allocation107_spill] sm:$0xff] %v9550_v61  ;;  %12069 = vst [vmem:[#allocation108_spill] sm:$0xff] %v9553_v31  ;;  %v12074_v46 = vrot.slane %v9481_v5, 2  ;;  %v12075_v29 = vrot.slane %v9485_v60, 2  ;;  %4223 = vrot.lane.b32.xlu1 %v4218_v24, %s5863_s20  ;;  %v4280_v52 = vrot.slane %v4271_v51, 2  ;;  %v9578_v31 = vmul.f32 %v9201_v44, %v4300_v16 }
 0x375   :  { %12070 = vst [vmem:[#allocation121_spill] sm:$0xff] %v9555_v21  ;;  %12072 = vst [vmem:[#allocation110_spill] sm:$0xff] %v9561_v26  ;;  %4219 = vrot.lane.b32.xlu0 %v4215_v54, %s5863_s20  ;;  %v4277_v21 = vrot.slane %v4269_v33, 2  ;;  %v9587_v54 = vmul.f32 %v9201_v44, %v2924_v3  ;;  %v9590_v33 = vmul.f32 %v9204_v38, %v2924_v3  ;;  %v2934_v51 = vstv %s9512_s26  ;;  %v12085_v3 = vld [vmem:[#allocation211_spill] sm:$0xff]  ;;  %s5876_s26 = smov 40  }
 0x376   :  { %12073 = vst [vmem:[#allocation111_spill] sm:$0xff] %v9564_v8  ;;  %v4250_v32 = vsel %vm956_vm1, %v4248_v12, %v12074_v46  ;;  %v4247_v1 = vsel %vm956_vm1, %v4245_v34, %v12075_v29  ;;  %v4303_v8 = vmul.f32 %v9204_v38, %v4300_v16  ;;  %v4301_v12 = vmul.f32 %v9238_v20, %v4300_v16  ;;  %v12076_v34 = vld [vmem:[#allocation203_spill] sm:$0xff]  ;;  %v9595_v26 = vpop.permute.xlu0 %3599 }
 0x377   :  { %v9582_v46 = vmul.f32 %v9233_v0, %v4300_v16  ;;  %v2149_v24 = vadd.f32 %v12076_v34, %v9359_v43  ;;  %12077 = vst [vmem:[#allocation112_spill] sm:$0xff] %v9587_v54  ;;  %12078 = vst [vmem:[#allocation113_spill] sm:$0xff] %v9590_v33  ;;  %v9593_v29 = vpop.permute.xlu1 %3601  ;;  %v2179_v61 = vadd.f32 %v12081_v47, %v9362_v41  ;;  %v12082_v16 = vld [vmem:[#allocation208_spill] sm:$0xff]  ;;  %v12084_v34 = vld [vmem:[#allocation210_spill] sm:$0xff]  ;;  %v12087_v47 = vrot.slane %v9529_v15, 2 }
 0x378   :  { %12079 = vst [vmem:[#allocation250_spill] sm:$0xff] %v9593_v29  ;;  %12080 = vst [vmem:[#allocation116_spill] sm:$0xff] %v9595_v26  ;;  %v2212_v22 = vadd.f32 %v12082_v16, %v9372_v55  ;;  %v2211_v43 = vadd.f32 %v12083_v37, %v9377_v7  ;;  %v2214_v54 = vadd.f32 %v12084_v34, %v9381_v25  ;;  %4255 = vrot.lane.b32.xlu1 %v4250_v32, %s5863_s20 }
 0x379   :  { %v2213_v33 = vadd.f32 %v12085_v3, %v9385_v50  ;;  %4251 = vrot.lane.b32.xlu0 %v4247_v1, %s5863_s20  ;;  %v12086_v26 = vrot.slane %v9525_v63, 2  ;;  %v4279_v55 = vsel %vm956_vm1, %v4277_v21, %v12087_v47  ;;  %v4312_v16 = vrot.slane %v4303_v8, 2  ;;  %v12088_v50 = vld [vmem:[#allocation207_spill] sm:$0xff]  ;;  %v12091_v8 = vld [vmem:[#allocation212_spill] sm:$0xff]  ;;  %v12092_v3 = vld [vmem:[#allocation213_spill] sm:$0xff] }
 0x37a   :  { %v4309_v37 = vrot.slane %v4301_v12, 2  ;;  %v2181_v34 = vadd.f32 %v12088_v50, %v9365_v11  ;;  %v9620_v32 = vmul.f32 %v9233_v0, %v2934_v51  ;;  %v9623_v1 = vmul.f32 %v9238_v20, %v2934_v51  ;;  %v9630_v21 = vpop.permute.xlu0 %3627  ;;  %v12093_v50 = vld [vmem:[#allocation35_spill] sm:$0xff] }
 0x37b   :  { %v4282_v41 = vsel %vm956_vm1, %v4280_v52, %v12086_v26  ;;  %v9626_v26 = vmul.f32 %v9201_v44, %v2934_v51  ;;  %v9628_v52 = vpop.permute.xlu1 %3629  ;;  %12090 = vst [vmem:[#allocation158_spill] sm:$0xff] %v9630_v21  ;;  %v2244_v12 = vadd.f32 %v12091_v8, %v9389_v28  ;;  %v2243_v47 = vadd.f32 %v12092_v3, %v9413_v45  ;;  %v12097_v45 = vld [vmem:[#allocation240_spill] sm:$0xff]  ;;  %v12099_v3 = vld [vmem:[#allocation75_spill] sm:$0xff] }
 0x37c   :  { %12089 = vst [vmem:[#allocation22_spill] sm:$0xff] %v9628_v52  ;;  %v9637_v11 = vmul.f32 %v9204_v38, %v2934_v51  ;;  %v9641_v25 = vmul.f32 %v9238_v20, %v12093_v50  ;;  %v12095_v7 = vrot.slane %v8943_v10, 2  ;;  %v2395_v21 = vadd.f32 %v9028_v39, %v2211_v43  ;;  %4287 = vrot.lane.b32.xlu1 %v4282_v41, %s5863_s20  ;;  %v12102_v43 = vld [vmem:[#allocation214_spill] sm:$0xff]  ;;  %v12103_v41 = vld [vmem:[#allocation215_spill] sm:$0xff] }
 0x37d   :  { %v9650_v28 = vmul.f32 %v9204_v38, %v12093_v50  ;;  %4283 = vrot.lane.b32.xlu0 %v4279_v55, %s5863_s20  ;;  %v12098_v51 = vrot.slane %v12097_v45, 2  ;;  %v2397_v52 = vadd.f32 %v12099_v3, %v2213_v33  ;;  %v2245_v50 = vadd.f32 %v12103_v41, %v9421_v9  ;;  %v12104_v55 = vld [vmem:[#allocation216_spill] sm:$0xff]  ;;  %v12113_v41 = vld [vmem:[#allocation218_spill] sm:$0xff] }
 0x37e   :  { %12094 = vst [vmem:[#allocation180_spill] sm:$0xff] %v9641_v25  ;;  %v2396_v29 = vadd.f32 %v12095_v7, %v2212_v22  ;;  %v12100_v25 = vrot.slane %v9578_v31, 2  ;;  %v12101_v22 = vrot.slane %v9582_v46, 2  ;;  %v2246_v7 = vadd.f32 %v12102_v43, %v9417_v53  ;;  %v12110_v53 = vld [vmem:[#allocation129_spill] sm:$0xff]  ;;  %v12112_v9 = vld [vmem:[#allocation76_spill] sm:$0xff] }
 0x37f   :  { %12096 = vst [vmem:[#allocation23_spill] sm:$0xff] %v9650_v28  ;;  %v2398_v8 = vadd.f32 %v12098_v51, %v2214_v54  ;;  %v2276_v45 = vadd.f32 %v12104_v55, %v9426_v40  ;;  %v12105_v54 = vld [vmem:[#allocation39_spill] sm:$0xff]  ;;  %v12111_v3 = vrot.slane %v12110_v53, 2  ;;  %v2419_v43 = vadd.f32 %v12112_v9, %v2243_v47  ;;  %v12117_v47 = vld [vmem:[#allocation222_spill] sm:$0xff]  ;;  %v12119_v53 = vld [vmem:[#allocation225_spill] sm:$0xff] }
 0x380   :  { %v4314_v10 = vsel %vm956_vm1, %v4312_v16, %v12100_v25  ;;  %v4311_v39 = vsel %vm956_vm1, %v4309_v37, %v12101_v22  ;;  %v9671_v33 = vmul.f32 %v9238_v20, %v12105_v54  ;;  %v9675_v16 = vpop.permute.xlu1 %3633  ;;  %v9677_v25 = vpop.permute.xlu0 %3631  ;;  %v12109_v37 = vld [vmem:[#allocation217_spill] sm:$0xff]  ;;  %v9686_v40 = vmul.f32 %v9204_v38, %v12105_v54 }
 0x381   :  { %12107 = vst [vmem:[#allocation119_spill] sm:$0xff] %v9675_v16  ;;  %12108 = vst [vmem:[#allocation182_spill] sm:$0xff] %v9677_v25  ;;  %v2275_v51 = vadd.f32 %v12109_v37, %v9430_v14  ;;  %v2420_v22 = vadd.f32 %v12111_v3, %v2244_v12  ;;  %v2278_v55 = vadd.f32 %v12113_v41, %v9441_v30  ;;  %v12115_v25 = vld [vmem:[#allocation220_spill] sm:$0xff]  ;;  %4319 = vrot.lane.b32.xlu1 %v4314_v10, %s5863_s20  ;;  %v12116_v14 = vld [vmem:[#allocation221_spill] sm:$0xff] }
 0x382   :  { %12106 = vst [vmem:[#allocation117_spill] sm:$0xff] %v9671_v33  ;;  %v12114_v33 = vld [vmem:[#allocation219_spill] sm:$0xff]  ;;  %v2308_v28 = vadd.f32 %v12115_v25, %v9489_v48  ;;  %4315 = vrot.lane.b32.xlu0 %v4311_v39, %s5863_s20  ;;  %v2307_v12 = vadd.f32 %v12116_v14, %v9504_v23  ;;  %v2310_v54 = vadd.f32 %v12117_v47, %v9533_v62  ;;  %v12121_v10 = vld [vmem:[#allocation74_spill] sm:$0xff]  ;;  %v12124_v23 = vrot.slane %v9067_v59, 2 }
 0x383   :  { %v2277_v16 = vadd.f32 %v12114_v33, %v9464_v2  ;;  %v12118_v37 = vld [vmem:[#allocation223_spill] sm:$0xff]  ;;  %v2339_v2 = vadd.f32 %v12119_v53, %v9547_v19  ;;  %v12122_v25 = vrot.slane %v12121_v10, 2  ;;  %v2443_v53 = vadd.f32 %v9127_v42, %v2275_v51 }
 0x384   :  { %v2309_v30 = vadd.f32 %v12118_v37, %v9537_v27  ;;  %v12120_v48 = vld [vmem:[#allocation227_spill] sm:$0xff]  ;;  %v2444_v41 = vadd.f32 %v12124_v23, %v2276_v45  ;;  %v9712_v14 = vpop.permute.xlu1 %3661  ;;  %v9714_v62 = vpop.permute.xlu0 %3659  ;;  %v12127_v27 = vld [vmem:[#allocation229_spill] sm:$0xff]  ;;  %v12130_v59 = vrot.slane %v9089_v13, 2  ;;  %v12131_v10 = vrot.slane %v9403_v35, 2  ;;  %v12140_v23 = vld [vmem:[#allocation232_spill] sm:$0xff] }
 0x385   :  { %v2341_v33 = vadd.f32 %v12120_v48, %v2149_v24  ;;  %v2422_v3 = vadd.f32 %v12122_v25, %v2246_v7  ;;  %v12123_v39 = vld [vmem:[#allocation79_spill] sm:$0xff]  ;;  %12125 = vst [vmem:[#allocation224_spill] sm:$0xff] %v9712_v14  ;;  %12126 = vst [vmem:[#allocation120_spill] sm:$0xff] %v9714_v62  ;;  %v2371_v47 = vadd.f32 %v12127_v27, %v2179_v61  ;;  %v3276_v24 = vstv %s9643_s0  ;;  %v12189_v14 = vld [vmem:[#allocation114_spill] sm:$0xff]  ;;  %s5877_s0 = smov 26  }
 0x386   :  { %v2421_v9 = vadd.f32 %v12123_v39, %v2245_v50  ;;  %v12128_v37 = vld [vmem:[#allocation231_spill] sm:$0xff]  ;;  %v12129_v48 = vrot.slane %v9085_v36, 2  ;;  %v2445_v50 = vadd.f32 %v9147_v6, %v2277_v16  ;;  %v9725_v45 = vadd.f32 %v12130_v59, %v2308_v28  ;;  %4193 = vrot.lane.b32.xlu1 %v12131_v10, %s5863_s20  ;;  %v12136_v6 = vld [vmem:[#allocation86_spill] sm:$0xff] }
 0x387   :  { %v2373_v19 = vadd.f32 %v12128_v37, %v2181_v34  ;;  %v12132_v61 = vrot.slane %v9407_v57, 2  ;;  %v2467_v42 = vadd.f32 %v9162_v4, %v2307_v12  ;;  %v12133_v34 = vld [vmem:[#allocation80_spill] sm:$0xff]  ;;  %v9740_v13 = vadd.f32 %v12136_v6, %v2339_v2  ;;  %v12137_v28 = vld [vmem:[#allocation87_spill] sm:$0xff]  ;;  %v12141_v37 = vld [vmem:[#allocation233_spill] sm:$0xff] }
 0x388   :  { %v2446_v7 = vadd.f32 %v12129_v48, %v2278_v55  ;;  %v12134_v51 = vrot.slane %v12133_v34, 2  ;;  %v12135_v55 = vld [vmem:[#allocation84_spill] sm:$0xff]  ;;  %v9743_v16 = vadd.f32 %v12137_v28, %v2341_v33  ;;  %v9746_v35 = vmul.f32 %v9233_v0, %v3276_v24  ;;  %v9750_v4 = vpop.permute.xlu1 %3665  ;;  %v9752_v12 = vpop.permute.xlu0 %3663  ;;  %v12142_v59 = vld [vmem:[#allocation234_spill] sm:$0xff]  ;;  %v12147_v34 = vld [vmem:[#allocation237_spill] sm:$0xff] }
 0x389   :  { %4189 = vrot.lane.b32.xlu0 %v12132_v61, %s5863_s20  ;;  %v9737_v25 = vadd.f32 %v12135_v55, %v2309_v30  ;;  %v3277_v57 = vmul.f32 %v9238_v20, %v3276_v24  ;;  %v3300_v39 = vstv %s9673_s27  ;;  %12138 = vst [vmem:[#allocation257_spill] sm:$0xff] %v9750_v4  ;;  %12139 = vst [vmem:[#allocation123_spill] sm:$0xff] %v9752_v12  ;;  %v12150_v6 = vld [vmem:[#allocation245_spill] sm:$0xff]  ;;  %s5878_s27 = smov 54  }
 0x38a   :  { %v2470_v36 = vadd.f32 %v12134_v51, %v2310_v54  ;;  %v9755_v54 = vadd.f32 %v9259_v49, %v2371_v47  ;;  %v9758_v30 = vadd.f32 %v9277_v56, %v2373_v19  ;;  %v9761_v2 = vmul.f32 %v9201_v44, %v3276_v24  ;;  %v12145_v47 = vld [vmem:[#allocation235_spill] sm:$0xff]  ;;  %v12200_v12 = vld [vmem:[#allocation101_spill] sm:$0xff] }
 0x38b   :  { %v3279_v33 = vmul.f32 %v9204_v38, %v3276_v24  ;;  %v9765_v27 = vadd.f32 %v12140_v23, %v2396_v29  ;;  %v9768_v48 = vadd.f32 %v12141_v37, %v2395_v21  ;;  %v9771_v10 = vadd.f32 %v12142_v59, %v2398_v8  ;;  %v12146_v24 = vld [vmem:[#allocation236_spill] sm:$0xff] }
 0x38c   :  { %v12143_v49 = vrot.slane %v9456_v17, 2  ;;  %v12144_v56 = vrot.slane %v9460_v58, 2  ;;  %v9782_v19 = vadd.f32 %v12145_v47, %v2397_v52  ;;  %v9785_v29 = vmul.f32 %v9233_v0, %v3300_v39  ;;  %v9798_v58 = vpop.permute.xlu1 %3693  ;;  %v9800_v52 = vpop.permute.xlu0 %3691  ;;  %v12154_v47 = vld [vmem:[#allocation251_spill] sm:$0xff] }
 0x38d   :  { %v3301_v21 = vmul.f32 %v9238_v20, %v3300_v39  ;;  %v3324_v8 = vstv %s9704_s28  ;;  %v9790_v61 = vadd.f32 %v12146_v24, %v2420_v22  ;;  %v9793_v51 = vadd.f32 %v12147_v34, %v2419_v43  ;;  %12148 = vst [vmem:[#allocation124_spill] sm:$0xff] %v9798_v58  ;;  %12149 = vst [vmem:[#allocation127_spill] sm:$0xff] %v9800_v52  ;;  %s5881_s28 = smov 16  }
 0x38e   :  { %4225 = vrot.lane.b32.xlu1 %v12143_v49, %s5863_s20  ;;  %4221 = vrot.lane.b32.xlu0 %v12144_v56, %s5863_s20  ;;  %v11281_v17 = vrot.slane %v9746_v35, 1  ;;  %v3285_v55 = vrot.slane %v3277_v57, 1  ;;  %v9803_v28 = vadd.f32 %v12150_v6, %v2422_v3  ;;  %v3288_v37 = vrot.slane %v3279_v33, 1  ;;  %v12153_v56 = vld [vmem:[#allocation246_spill] sm:$0xff]  ;;  %v12155_v6 = vld [vmem:[#allocation252_spill] sm:$0xff] }
 0x38f   :  { %v9807_v22 = vmul.f32 %v9201_v44, %v3300_v39  ;;  %v3303_v43 = vmul.f32 %v9204_v38, %v3300_v39  ;;  %v9811_v59 = vmul.f32 %v9233_v0, %v3324_v8  ;;  %v3325_v57 = vmul.f32 %v9238_v20, %v3324_v8 }
 0x390   :  { %v12151_v49 = vrot.slane %v9481_v5, 2  ;;  %v12152_v3 = vrot.slane %v9485_v60, 2  ;;  %v9821_v33 = vadd.f32 %v12153_v56, %v2421_v9  ;;  %v9824_v24 = vadd.f32 %v12154_v47, %v2444_v41  ;;  %v9841_v41 = vpop.permute.xlu1 %3697  ;;  %v12160_v56 = vld [vmem:[#allocation254_spill] sm:$0xff] }
 0x391   :  { %v3309_v34 = vrot.slane %v3301_v21, 1  ;;  %v9830_v23 = vadd.f32 %v12155_v6, %v2443_v53  ;;  %v9835_v5 = vsel %vm427_vm0, %v3285_v55, %v11281_v17  ;;  %v9838_v60 = vmul.f32 %v9201_v44, %v3324_v8  ;;  %12157 = vst [vmem:[#allocation132_spill] sm:$0xff] %v9841_v41  ;;  %v12159_v21 = vld [vmem:[#allocation253_spill] sm:$0xff] }
 0x392   :  { %4257 = vrot.lane.b32.xlu1 %v12151_v49, %s5863_s20  ;;  %4253 = vrot.lane.b32.xlu0 %v12152_v3, %s5863_s20  ;;  %v3327_v9 = vmul.f32 %v9204_v38, %v3324_v8  ;;  %v9843_v49 = vpop.permute.xlu0 %3695  ;;  %v9846_v3 = vadd.f32 %v12159_v21, %v2446_v7  ;;  %v9849_v53 = vadd.f32 %v12160_v56, %v2445_v50  ;;  %v12161_v47 = vrot.slane %v9761_v2, 1  ;;  %v12164_v21 = vld [vmem:[#allocation255_spill] sm:$0xff] }
 0x393   :  { %12156 = vst [vmem:[#allocation130_spill] sm:$0xff] %v9838_v60  ;;  %12158 = vst [vmem:[#allocation134_spill] sm:$0xff] %v9843_v49  ;;  %v3312_v17 = vrot.slane %v3303_v43, 1  ;;  %v3333_v39 = vrot.slane %v3325_v57, 1  ;;  %v3348_v41 = vstv %s9773_s1  ;;  %v12162_v7 = vrot.slane %v9525_v63, 2  ;;  %v12166_v43 = vld [vmem:[#allocation259_spill] sm:$0xff] }
 0x394   :  { %v9854_v55 = vsel %vm427_vm0, %v3288_v37, %v12161_v47  ;;  %v12163_v50 = vrot.slane %v9529_v15, 2  ;;  %v9867_v56 = vadd.f32 %v12164_v21, %v9725_v45  ;;  %v12165_v37 = vld [vmem:[#allocation256_spill] sm:$0xff]  ;;  %v9873_v6 = vadd.f32 %v12166_v43, %v2470_v36  ;;  %v9886_v21 = vpop.permute.xlu1 %3725  ;;  %v12171_v43 = vld [vmem:[#allocation267_spill] sm:$0xff]  ;;  %s5882_s1 = smov [#allocation8]  }
 0x395   :  { %v9870_v47 = vadd.f32 %v12165_v37, %v2467_v42  ;;  %v12167_v57 = vrot.slane %v9785_v29, 1  ;;  %v12168_v63 = vld [vmem:[#allocation260_spill] sm:$0xff]  ;;  %v3372_v45 = vstv %s9796_s29  ;;  %12169 = vst [vmem:[#allocation258_spill] sm:$0xff] %v9886_v21  ;;  %v9891_v36 = vmul.f32 %v9233_v0, %v3348_v41  ;;  %s5548_s29 = sshll.u32 %s5882_s1, 4  ;;  %s5549_s29 = int_to_ptr.vmem [resolvable:$true] %s5548_s29 }
 0x396   :  { %4289 = vrot.lane.b32.xlu1 %v12162_v7, %s5863_s20  ;;  %4285 = vrot.lane.b32.xlu0 %v12163_v50, %s5863_s20  ;;  %v9882_v7 = vadd.f32 %v12168_v63, %v9737_v25  ;;  %v3336_v50 = vrot.slane %v3327_v9, 1  ;;  %v9888_v42 = vpop.permute.xlu0 %3723  ;;  %v3349_v37 = vmul.f32 %v9238_v20, %v3348_v41  ;;  %v3351_v25 = vmul.f32 %v9204_v38, %v3348_v41  ;;  %p5834_p3 = scmp.lt.s32.totalorder %s5549_s29, %s5549_s29 }
 0x397   :  { %v9878_v8 = vsel %vm427_vm0, %v3309_v34, %v12167_v57  ;;  %12170 = vst [vmem:[#allocation226_spill] sm:$0xff] %v9888_v42  ;;  %v9895_v34 = vmul.f32 %v9201_v44, %v3348_v41  ;;  %v9900_v57 = vadd.f32 %v12171_v43, %v9740_v13  ;;  %v12172_v9 = vrot.slane %v9807_v22, 1  ;;  %v12177_v13 = vld [vmem:[#allocation239_spill] sm:$0xff] }
 0x398   :  { %v12173_v15 = vrot.slane %v9811_v59, 1  ;;  %v12175_v21 = vrot.slane %v9578_v31, 2  ;;  %v12176_v41 = vrot.slane %v9582_v46, 2  ;;  %v2677_v43 = vadd.f32 %v12177_v13, %v9743_v16  ;;  %v9936_v16 = vpop.permute.xlu1 %3729  ;;  %v12188_v13 = vld [vmem:[#allocation19_spill] sm:$0xff] }
 0x399   :  { %v9905_v63 = vsel %vm427_vm0, %v3312_v17, %v12172_v9  ;;  %v9921_v49 = vmul.f32 %v9233_v0, %v3372_v45  ;;  %v3373_v17 = vmul.f32 %v9238_v20, %v3372_v45  ;;  %v3396_v9 = vstv %s9827_s30  ;;  %12182 = vst [vmem:[#allocation12_spill] sm:$0xff] %v9936_v16  ;;  %v12187_v16 = vld [vmem:[#allocation247_spill] sm:$0xff]  ;;  %s5829_s30 = scalar_lea.vmem %s5549_s29, 320 }
 0x39a   :  { %v9910_v42 = vsel %vm427_vm0, %v3333_v39, %v12173_v15  ;;  %4321 = vrot.lane.b32.xlu1 %v12175_v21, %s5863_s20  ;;  %4317 = vrot.lane.b32.xlu0 %v12176_v41, %s5863_s20  ;;  %v12178_v39 = vld [vmem:[#allocation241_spill] sm:$0xff]  ;;  %v12179_v52 = vrot.slane %v9838_v60, 1  ;;  %v9933_v46 = vmul.f32 %v9201_v44, %v3372_v45  ;;  %v3375_v21 = vmul.f32 %v9204_v38, %v3372_v45  ;;  %v9938_v41 = vpop.permute.xlu0 %3727  ;;  %p5830_p2 = scmp.ne.s32.totalorder %s5549_s29, %s5829_s30  ;;  %p5835_p4 = scmp.lt.s32.totalorder %s5829_s30, %s5829_s30 }
 0x39b   :  { %12174 = vst [vmem:[#allocation204_spill] sm:$0xff] %v9910_v42  ;;  %v2707_v15 = vadd.f32 %v12178_v39, %v9755_v54  ;;  %12183 = vst [vmem:[#allocation136_spill] sm:$0xff] %v9938_v41  ;;  %v3357_v58 = vrot.slane %v3349_v37, 1  ;;  %v3360_v54 = vrot.slane %v3351_v25, 1  ;;  %v12184_v39 = vld [vmem:[#allocation244_spill] sm:$0xff]  ;;  %v9947_v62 = vmul.f32 %v9233_v0, %v3396_v9 }
 0x39c   :  { %v9930_v31 = vsel %vm427_vm0, %v3336_v50, %v12179_v52  ;;  %12181 = vst [vmem:[#allocation42_spill] sm:$0xff] %v9933_v46  ;;  %v2740_v4 = vadd.f32 %v12184_v39, %v9765_v27  ;;  %v12185_v52 = vld [vmem:[#allocation18_spill] sm:$0xff]  ;;  %v3397_v45 = vmul.f32 %v9238_v20, %v3396_v9  ;;  %v2742_v41 = vadd.f32 %v12187_v16, %v9771_v10  ;;  %v12190_v39 = vld [vmem:[#allocation248_spill] sm:$0xff]  ;;  %v9960_v60 = vpop.permute.xlu1 %3757  ;;  %v12193_v10 = vld [vmem:[#allocation243_spill] sm:$0xff]  ;;  %p5836_p5 = por %p5835_p4, %p5834_p3 }
 0x39d   :  { %12180 = vst [vmem:[#allocation266_spill] sm:$0xff] %v9930_v31  ;;  %v2739_v50 = vadd.f32 %v12185_v52, %v9768_v48  ;;  %12186 = vst [vmem:[#allocation262_spill] sm:$0xff] %v9947_v62  ;;  %v2741_v37 = vadd.f32 %v12188_v13, %v9782_v19  ;;  %v3381_v25 = vrot.slane %v3373_v17, 1  ;;  %v2772_v27 = vadd.f32 %v12189_v14, %v9790_v61 }
 0x39e   :  { %v2771_v48 = vadd.f32 %v12190_v39, %v9793_v51  ;;  %v3384_v31 = vrot.slane %v3375_v21, 1  ;;  %12191 = vst [vmem:[#allocation137_spill] sm:$0xff] %v9960_v60  ;;  %v9962_v42 = vpop.permute.xlu0 %3755  ;;  %v2709_v16 = vadd.f32 %v12193_v10, %v9758_v30  ;;  %v12194_v19 = vrot.slane %v9891_v36, 1  ;;  %v12198_v10 = vld [vmem:[#allocation100_spill] sm:$0xff]  ;;  %v12204_v39 = vld [vmem:[#allocation103_spill] sm:$0xff]  ;;  %p5837_p6 = pnand %p5836_p5, %p5830_p2 }
 0x39f   :  { %12192 = vst [vmem:[#allocation138_spill] sm:$0xff] %v9962_v42  ;;  %v9972_v14 = vmul.f32 %v9201_v44, %v3396_v9  ;;  %v3399_v61 = vmul.f32 %v9204_v38, %v3396_v9  ;;  %v2910_v51 = vadd.f32 %v9433_v18, %v2740_v4  ;;  %v12196_v21 = vrot.slane %v9895_v34, 1  ;;  %v12202_v4 = vld [vmem:[#allocation249_spill] sm:$0xff] }
 0x3a0   :  { %v9969_v17 = vsel %vm427_vm0, %v3357_v58, %v12194_v19  ;;  %v3405_v30 = vrot.slane %v3397_v45, 1  ;;  %v2909_v58 = vadd.f32 %v12198_v10, %v2739_v50  ;;  %v12199_v19 = vld [vmem:[#allocation24_spill] sm:$0xff]  ;;  %v2911_v42 = vadd.f32 %v12200_v12, %v2741_v37  ;;  %v12209_v37 = vld [vmem:[#allocation21_spill] sm:$0xff] }
 0x3a1   :  { %12195 = vst [vmem:[#allocation139_spill] sm:$0xff] %v9972_v14  ;;  %v9979_v13 = vsel %vm427_vm0, %v3360_v54, %v12196_v21  ;;  %v2912_v52 = vadd.f32 %v12199_v19, %v2742_v41  ;;  %v12201_v9 = vrot.slane %v9921_v49, 1  ;;  %v2774_v54 = vadd.f32 %v12202_v4, %v9803_v28  ;;  %v12203_v21 = vld [vmem:[#allocation105_spill] sm:$0xff]  ;;  %v10001_v41 = vpop.permute.xlu1 %3761  ;;  %v12210_v28 = vld [vmem:[#allocation27_spill] sm:$0xff] }
 0x3a2   :  { %12197 = vst [vmem:[#allocation140_spill] sm:$0xff] %v9979_v13  ;;  %v2920_v60 = vadd.f32 %v12203_v21, %v2772_v27  ;;  %v2919_v45 = vadd.f32 %v12204_v39, %v2771_v48  ;;  %v12205_v13 = vrot.slane %v9933_v46, 1  ;;  %12207 = vst [vmem:[#allocation142_spill] sm:$0xff] %v10001_v41  ;;  %v10003_v12 = vpop.permute.xlu0 %3759  ;;  %v2804_v10 = vadd.f32 %v12210_v28, %v9824_v24  ;;  %v12211_v39 = vld [vmem:[#allocation28_spill] sm:$0xff]  ;;  %v12223_v41 = vld [vmem:[#allocation107_spill] sm:$0xff] }
 0x3a3   :  { %v9990_v18 = vsel %vm427_vm0, %v3381_v25, %v12201_v9  ;;  %12208 = vst [vmem:[#allocation143_spill] sm:$0xff] %v10003_v12  ;;  %v2773_v25 = vadd.f32 %v12209_v37, %v9821_v33  ;;  %v3408_v48 = vrot.slane %v3399_v61, 1  ;;  %v2803_v19 = vadd.f32 %v12211_v39, %v9830_v23  ;;  %v12213_v9 = vld [vmem:[#allocation30_spill] sm:$0xff]  ;;  %v12216_v33 = vld [vmem:[#allocation33_spill] sm:$0xff]  ;;  %v12218_v28 = vld [vmem:[#allocation36_spill] sm:$0xff] }
 0x3a4   :  { %v9999_v50 = vsel %vm427_vm0, %v3384_v31, %v12205_v13  ;;  %v12212_v31 = vld [vmem:[#allocation29_spill] sm:$0xff]  ;;  %v2805_v4 = vadd.f32 %v12213_v9, %v9849_v53  ;;  %v12214_v21 = vrot.slane %v9947_v62, 1  ;;  %v2836_v24 = vadd.f32 %v12216_v33, %v9867_v56  ;;  %v12217_v37 = vld [vmem:[#allocation34_spill] sm:$0xff]  ;;  %v12221_v9 = vld [vmem:[#allocation152_spill] sm:$0xff] }
 0x3a5   :  { %12206 = vst [vmem:[#allocation141_spill] sm:$0xff] %v9999_v50  ;;  %v2806_v13 = vadd.f32 %v12212_v31, %v9846_v3  ;;  %v2835_v61 = vadd.f32 %v12217_v37, %v9870_v47  ;;  %v2838_v23 = vadd.f32 %v12218_v28, %v9873_v6  ;;  %v12219_v39 = vld [vmem:[#allocation37_spill] sm:$0xff]  ;;  %v12220_v53 = vld [vmem:[#allocation38_spill] sm:$0xff]  ;;  %v2869_v27 = vadd.f32 %v12221_v9, %v2677_v43  ;;  %v10036_v56 = vpop.permute.xlu1 %3789  ;;  %v12227_v37 = vld [vmem:[#allocation108_spill] sm:$0xff] }
 0x3a6   :  { %v10021_v12 = vsel %vm427_vm0, %v3405_v30, %v12214_v21  ;;  %v2837_v3 = vadd.f32 %v12219_v39, %v9882_v7  ;;  %v2867_v31 = vadd.f32 %v12220_v53, %v9900_v57  ;;  %v12222_v30 = vld [vmem:[#allocation40_spill] sm:$0xff]  ;;  %12224 = vst [vmem:[#allocation145_spill] sm:$0xff] %v10036_v56  ;;  %v10038_v33 = vpop.permute.xlu0 %3787  ;;  %v12226_v6 = vld [vmem:[#allocation154_spill] sm:$0xff]  ;;  %v2921_v28 = vadd.f32 %v12227_v37, %v2773_v25  ;;  %v12233_v9 = vld [vmem:[#allocation113_spill] sm:$0xff] }
 0x3a7   :  { %12215 = vst [vmem:[#allocation144_spill] sm:$0xff] %v10021_v12  ;;  %v2899_v21 = vadd.f32 %v12222_v30, %v2707_v15  ;;  %v2922_v12 = vadd.f32 %v12223_v41, %v2774_v54  ;;  %12225 = vst [vmem:[#allocation146_spill] sm:$0xff] %v10038_v33  ;;  %v2901_v47 = vadd.f32 %v12226_v6, %v2709_v16  ;;  %v12228_v7 = vld [vmem:[#allocation110_spill] sm:$0xff]  ;;  %v12229_v57 = vrot.slane %v9972_v14, 1  ;;  %v12231_v15 = vld [vmem:[#allocation111_spill] sm:$0xff] }
 0x3a8   :  { %v2930_v39 = vadd.f32 %v12228_v7, %v2804_v10  ;;  %v2929_v54 = vadd.f32 %v12231_v15, %v2803_v19  ;;  %v12232_v41 = vld [vmem:[#allocation112_spill] sm:$0xff]  ;;  %v2931_v30 = vadd.f32 %v12233_v9, %v2805_v4  ;;  %v3804_v33 = vstv %s9982_s4  ;;  %v12235_v7 = vld [vmem:[#allocation23_spill] sm:$0xff]  ;;  %v12244_v9 = vld [vmem:[#allocation41_spill] sm:$0xff] }
 0x3a9   :  { %v10048_v43 = vsel %vm427_vm0, %v3408_v48, %v12229_v57  ;;  %v2932_v53 = vadd.f32 %v12232_v41, %v2806_v13  ;;  %v2940_v16 = vadd.f32 %v9620_v32, %v2836_v24  ;;  %v2939_v25 = vadd.f32 %v9623_v1, %v2835_v61  ;;  %v12234_v37 = vld [vmem:[#allocation180_spill] sm:$0xff]  ;;  %v12236_v13 = vld [vmem:[#allocation117_spill] sm:$0xff]  ;;  %v10069_v4 = vpop.permute.xlu1 %3793 }
 0x3aa   :  { %12230 = vst [vmem:[#allocation147_spill] sm:$0xff] %v10048_v43  ;;  %v2942_v10 = vadd.f32 %v9626_v26, %v2838_v23  ;;  %v2941_v6 = vadd.f32 %v9637_v11, %v2837_v3  ;;  %v10061_v48 = vadd.f32 %v12234_v37, %v2867_v31  ;;  %v10064_v19 = vadd.f32 %v12235_v7, %v2869_v27  ;;  %v10071_v15 = vpop.permute.xlu0 %3791  ;;  %v12239_v24 = vld [vmem:[#allocation156_spill] sm:$0xff]  ;;  %v12240_v26 = vld [vmem:[#allocation135_spill] sm:$0xff]  ;;  %v12242_v23 = vld [vmem:[#allocation178_spill] sm:$0xff] }
 0x3ab   :  { %v10067_v57 = vadd.f32 %v12236_v13, %v2899_v21  ;;  %12237 = vst [vmem:[#allocation148_spill] sm:$0xff] %v10069_v4  ;;  %12238 = vst [vmem:[#allocation149_spill] sm:$0xff] %v10071_v15  ;;  %v3828_v32 = vstv %s10005_s5  ;;  %v10075_v1 = vadd.f32 %v12239_v24, %v2910_v51  ;;  %v10078_v61 = vadd.f32 %v12240_v26, %v2909_v58  ;;  %v12243_v41 = vld [vmem:[#allocation200_spill] sm:$0xff]  ;;  %v12247_v13 = vld [vmem:[#allocation206_spill] sm:$0xff] }
 0x3ac   :  { %v10081_v11 = vadd.f32 %v9686_v40, %v2901_v47  ;;  %v10084_v27 = vmul.f32 %v9233_v0, %v3804_v33  ;;  %v10087_v3 = vadd.f32 %v12242_v23, %v2912_v52  ;;  %v3805_v31 = vmul.f32 %v9238_v20, %v3804_v33  ;;  %v12246_v47 = vld [vmem:[#allocation202_spill] sm:$0xff]  ;;  %v12248_v26 = vld [vmem:[#allocation228_spill] sm:$0xff]  ;;  %v12254_v15 = vld [vmem:[#allocation261_spill] sm:$0xff] }
 0x3ad   :  { %v10091_v21 = vmul.f32 %v9201_v44, %v3804_v33  ;;  %v3807_v51 = vmul.f32 %v9204_v38, %v3804_v33  ;;  %v10095_v58 = vadd.f32 %v12243_v41, %v2911_v42  ;;  %v10098_v37 = vadd.f32 %v12244_v9, %v2920_v60  ;;  %v10113_v42 = vpop.permute.xlu1 %3965  ;;  %v12251_v41 = vld [vmem:[#allocation43_spill] sm:$0xff] }
 0x3ae   :  { %12241 = vst [vmem:[#allocation150_spill] sm:$0xff] %v10084_v27  ;;  %v10101_v40 = vmul.f32 %v9233_v0, %v3828_v32  ;;  %v3829_v52 = vmul.f32 %v9238_v20, %v3828_v32  ;;  %v10105_v7 = vadd.f32 %v12246_v47, %v2919_v45  ;;  %v10108_v24 = vadd.f32 %v12247_v13, %v2922_v12  ;;  %v10115_v23 = vpop.permute.xlu0 %3963 }
 0x3af   :  { %v10111_v33 = vadd.f32 %v12248_v26, %v2921_v28  ;;  %12249 = vst [vmem:[#allocation153_spill] sm:$0xff] %v10113_v42  ;;  %12250 = vst [vmem:[#allocation115_spill] sm:$0xff] %v10115_v23  ;;  %v3852_v60 = vstv %s10040_s6  ;;  %v10119_v9 = vadd.f32 %v12251_v41, %v2930_v39  ;;  %v10123_v4 = vmul.f32 %v9201_v44, %v3828_v32  ;;  %v12265_v28 = vld [vmem:[#allocation45_spill] sm:$0xff] }
 0x3b0   :  { %12245 = vst [vmem:[#allocation151_spill] sm:$0xff] %v10101_v40  ;;  %v3831_v45 = vmul.f32 %v9204_v38, %v3828_v32  ;;  %v3813_v12 = vrot.slane %v3805_v31, 2  ;;  %v3816_v47 = vrot.slane %v3807_v51, 2  ;;  %v3876_v13 = vstv %s10054_s7  ;;  %v12255_v32 = vld [vmem:[#allocation230_spill] sm:$0xff] }
 0x3b1   :  { %12252 = vst [vmem:[#allocation155_spill] sm:$0xff] %v10123_v4  ;;  %v3837_v42 = vrot.slane %v3829_v52, 2  ;;  %v10132_v39 = vmul.f32 %v9233_v0, %v3852_v60  ;;  %v3853_v41 = vmul.f32 %v9238_v20, %v3852_v60  ;;  %v10138_v56 = vadd.f32 %v12254_v15, %v2929_v54  ;;  %v10143_v31 = vpop.permute.xlu1 %3969  ;;  %v12260_v15 = vld [vmem:[#allocation14_spill] sm:$0xff] }
 0x3b2   :  { %v10141_v23 = vadd.f32 %v12255_v32, %v2932_v53  ;;  %12256 = vst [vmem:[#allocation161_spill] sm:$0xff] %v10143_v31  ;;  %v10145_v51 = vpop.permute.xlu0 %3967  ;;  %v10148_v26 = vmul.f32 %v9201_v44, %v3852_v60  ;;  %v3855_v52 = vmul.f32 %v9204_v38, %v3852_v60  ;;  %v3840_v43 = vrot.slane %v3831_v45, 2  ;;  %v12261_v32 = vld [vmem:[#allocation44_spill] sm:$0xff] }
 0x3b3   :  { %12253 = vst [vmem:[#allocation160_spill] sm:$0xff] %v10132_v39  ;;  %12257 = vst [vmem:[#allocation157_spill] sm:$0xff] %v10145_v51  ;;  %v10153_v14 = vmul.f32 %v9233_v0, %v3876_v13  ;;  %v3877_v54 = vmul.f32 %v9238_v20, %v3876_v13  ;;  %v10157_v53 = vadd.f32 %v12260_v15, %v2931_v30  ;;  %v12262_v51 = vrot.slane %v10084_v27, 2  ;;  %v12268_v27 = vld [vmem:[#allocation264_spill] sm:$0xff] }
 0x3b4   :  { %12258 = vst [vmem:[#allocation159_spill] sm:$0xff] %v10148_v26  ;;  %v10160_v31 = vadd.f32 %v12261_v32, %v2940_v16  ;;  %v12263_v60 = vrot.slane %v10091_v21, 2  ;;  %v10173_v50 = vadd.f32 %v12265_v28, %v2939_v25  ;;  %v12266_v30 = vrot.slane %v10101_v40, 2  ;;  %v12274_v16 = vld [vmem:[#allocation128_spill] sm:$0xff] }
 0x3b5   :  { %12259 = vst [vmem:[#allocation32_spill] sm:$0xff] %v10153_v14  ;;  %v10165_v62 = vsel %vm956_vm1, %v3813_v12, %v12262_v51  ;;  %v3861_v32 = vrot.slane %v3853_v41, 2  ;;  %v10182_v46 = vadd.f32 %v12268_v27, %v2942_v10  ;;  %v12269_v12 = vld [vmem:[#allocation46_spill] sm:$0xff]  ;;  %v3864_v28 = vrot.slane %v3855_v52, 2 }
 0x3b6   :  { %v10170_v45 = vsel %vm956_vm1, %v3816_v47, %v12263_v60  ;;  %v10178_v15 = vsel %vm956_vm1, %v3837_v42, %v12266_v30  ;;  %v10185_v51 = vadd.f32 %v12269_v12, %v2941_v6  ;;  %v10187_v47 = vpop.permute.xlu1 %3997  ;;  %v10189_v60 = vpop.permute.xlu0 %3995  ;;  %v12272_v42 = vrot.slane %v10123_v4, 2  ;;  %v12275_v6 = vld [vmem:[#allocation16_spill] sm:$0xff] }
 0x3b7   :  { %12264 = vst [vmem:[#allocation118_spill] sm:$0xff] %v10170_v45  ;;  %12267 = vst [vmem:[#allocation162_spill] sm:$0xff] %v10178_v15  ;;  %v3885_v10 = vrot.slane %v3877_v54, 2  ;;  %v3900_v27 = vstv %s10126_s8  ;;  %v10201_v12 = vadd.f32 %v12275_v6, %v12274_v16  ;;  %v10208_v25 = vmul.f32 %v9201_v44, %v3876_v13  ;;  %v12279_v54 = vld [vmem:[#allocation51_spill] sm:$0xff] }
 0x3b8   :  { %12270 = vst [vmem:[#allocation163_spill] sm:$0xff] %v10187_v47  ;;  %12271 = vst [vmem:[#allocation164_spill] sm:$0xff] %v10189_v60  ;;  %v10195_v30 = vsel %vm956_vm1, %v3840_v43, %v12272_v42  ;;  %v12276_v47 = vld [vmem:[#allocation48_spill] sm:$0xff]  ;;  %v3879_v52 = vmul.f32 %v9204_v38, %v3876_v13  ;;  %v12278_v43 = vld [vmem:[#allocation50_spill] sm:$0xff]  ;;  %v10217_v41 = vadd.f32 %v12279_v54, %v10064_v19  ;;  %v12280_v16 = vrot.slane %v10132_v39, 2 }
 0x3b9   :  { %12273 = vst [vmem:[#allocation165_spill] sm:$0xff] %v10195_v30  ;;  %v10205_v15 = vadd.f32 %v12276_v47, %v10061_v48  ;;  %v12277_v60 = vld [vmem:[#allocation176_spill] sm:$0xff]  ;;  %v3924_v48 = vstv %s10135_s10  ;;  %v12282_v47 = vld [vmem:[#allocation131_spill] sm:$0xff]  ;;  %v12283_v30 = vld [vmem:[#allocation53_spill] sm:$0xff]  ;;  %v10239_v19 = vmul.f32 %v9233_v0, %v3900_v27  ;;  %vm4536_vm0 = vcmask 551938  }
 0x3ba   :  { %v10213_v42 = vadd.f32 %v12278_v43, %v12277_v60  ;;  %v10222_v6 = vsel %vm956_vm1, %v3861_v32, %v12280_v16  ;;  %v10227_v4 = vadd.f32 %v12283_v30, %v12282_v47  ;;  %v10229_v40 = vpop.permute.xlu1 %4001  ;;  %v10231_v13 = vpop.permute.xlu0 %3999  ;;  %v12286_v60 = vrot.slane %v10148_v26, 2  ;;  %v12288_v54 = vld [vmem:[#allocation54_spill] sm:$0xff] }
 0x3bb   :  { %12281 = vst [vmem:[#allocation31_spill] sm:$0xff] %v10222_v6  ;;  %12284 = vst [vmem:[#allocation166_spill] sm:$0xff] %v10229_v40  ;;  %v3901_v32 = vmul.f32 %v9238_v20, %v3900_v27  ;;  %v10244_v16 = vadd.f32 %v12288_v54, %v10067_v57  ;;  %v12289_v30 = vrot.slane %v10153_v14, 2  ;;  %v3888_v40 = vrot.slane %v3879_v52, 2  ;;  %v12291_v57 = vld [vmem:[#allocation133_spill] sm:$0xff]  ;;  %v12293_v14 = vld [vmem:[#allocation58_spill] sm:$0xff] }
 0x3bc   :  { %12285 = vst [vmem:[#allocation167_spill] sm:$0xff] %v10231_v13  ;;  %v10236_v43 = vsel %vm956_vm1, %v3864_v28, %v12286_v60  ;;  %v10252_v13 = vmul.f32 %v9201_v44, %v3900_v27  ;;  %v3903_v28 = vmul.f32 %v9204_v38, %v3900_v27  ;;  %v3925_v26 = vmul.f32 %v9238_v20, %v3924_v48  ;;  %v12292_v54 = vld [vmem:[#allocation57_spill] sm:$0xff]  ;;  %v5784_v44 = vld [vmem:[#allocation5 + $0x50] sm:$0xff] }
 0x3bd   :  { %12287 = vst [vmem:[#allocation168_spill] sm:$0xff] %v10236_v43  ;;  %v10249_v47 = vsel %vm956_vm1, %v3885_v10, %v12289_v30  ;;  %v10257_v43 = vmul.f32 %v9233_v0, %v3924_v48  ;;  %v3118_v6 = vadd.f32 %v12292_v54, %v12291_v57  ;;  %v3117_v10 = vadd.f32 %v12293_v14, %v10081_v11  ;;  %v5783_v30 = vld [vmem:[#allocation5 + $0x58] sm:$0xff]  ;;  %v12294_v38 = vld [vmem:[#allocation59_spill] sm:$0xff]  ;;  %v12298_v14 = vld [vmem:[#allocation62_spill] sm:$0xff] }
 0x3be   :  { %12290 = vst [vmem:[#allocation169_spill] sm:$0xff] %v10249_v47  ;;  %v10264_v47 = vmul.f32 %v5783_v30, %v3924_v48  ;;  %v3927_v39 = vmul.f32 %v5784_v44, %v3924_v48  ;;  %v3142_v27 = vadd.f32 %v12294_v38, %v10075_v1  ;;  %v12295_v52 = vld [vmem:[#allocation60_spill] sm:$0xff]  ;;  %v10270_v60 = vpop.permute.xlu1 %4029  ;;  %v10272_v20 = vpop.permute.xlu0 %4027  ;;  %v3909_v54 = vrot.slane %v3901_v32, 2  ;;  %v12300_v1 = vld [vmem:[#allocation65_spill] sm:$0xff]  ;;  %v12302_v32 = vld [vmem:[#allocation67_spill] sm:$0xff] }
 0x3bf   :  { %v3141_v0 = vadd.f32 %v12295_v52, %v10078_v61  ;;  %12296 = vst [vmem:[#allocation47_spill] sm:$0xff] %v10270_v60  ;;  %12297 = vst [vmem:[#allocation52_spill] sm:$0xff] %v10272_v20  ;;  %v3144_v11 = vadd.f32 %v12298_v14, %v10087_v3  ;;  %v12299_v30 = vld [vmem:[#allocation64_spill] sm:$0xff]  ;;  %v3912_v44 = vrot.slane %v3903_v28, 2  ;;  %v3168_v38 = vadd.f32 %v12300_v1, %v10098_v37  ;;  %v12301_v61 = vld [vmem:[#allocation66_spill] sm:$0xff] }
 0x3c0   :  { %v3143_v45 = vadd.f32 %v12299_v30, %v10095_v58  ;;  %v3167_v52 = vadd.f32 %v12301_v61, %v10105_v7  ;;  %v3933_v60 = vrot.slane %v3925_v26, 2  ;;  %v3170_v57 = vadd.f32 %v12302_v32, %v10108_v24  ;;  %v12303_v3 = vld [vmem:[#allocation263_spill] sm:$0xff]  ;;  %v12304_v28 = vld [vmem:[#allocation13_spill] sm:$0xff]  ;;  %v12305_v37 = vld [vmem:[#allocation70_spill] sm:$0xff] }
 0x3c1   :  { %v3169_v14 = vadd.f32 %v12303_v3, %v10111_v33  ;;  %v11292_v58 = vrot.slane %v10264_v47, 2  ;;  %v3936_v30 = vrot.slane %v3927_v39, 2  ;;  %v3194_v48 = vadd.f32 %v12304_v28, %v10119_v9  ;;  %v12306_v7 = vld [vmem:[#allocation71_spill] sm:$0xff] }
 0x3c2   :  { %v3193_v1 = vadd.f32 %v12305_v37, %v10138_v56  ;;  %v3196_v61 = vadd.f32 %v12306_v7, %v10141_v23  ;;  %v10296_v20 = vpop.permute.xlu1 %4033  ;;  %v10298_v26 = vpop.permute.xlu0 %4031  ;;  %v12307_v24 = vrot.slane %v10208_v25, 2  ;;  %v12308_v39 = vrot.slane %v9746_v35, 1 }
 0x3c3   :  { %v3295_v9 = vadd.f32 %v9835_v5, %v3141_v0  ;;  %v12309_v3 = vrot.slane %v10239_v19, 2  ;;  %v12310_v23 = vrot.slane %v10252_v13, 2  ;;  %v12311_v37 = vrot.slane %v9761_v2, 1 }
 0x3c4   :  { %v10303_v33 = vsel %vm956_vm1, %v3888_v40, %v12307_v24  ;;  %v3296_v32 = vadd.f32 %v12308_v39, %v3142_v27  ;;  %v3297_v40 = vadd.f32 %v9854_v55, %v3143_v45  ;;  %v12312_v35 = vrot.slane %v9785_v29, 1  ;;  %v12315_v29 = vld [vmem:[#allocation265_spill] sm:$0xff] }
 0x3c5   :  { %v10311_v56 = vsel %vm956_vm1, %v3909_v54, %v12309_v3  ;;  %v10316_v28 = vsel %vm956_vm1, %v3912_v44, %v12310_v23  ;;  %v3298_v7 = vadd.f32 %v12311_v37, %v3144_v11  ;;  %v12313_v5 = vrot.slane %v10257_v43, 2  ;;  %v12318_v3 = vld [vmem:[#allocation130_spill] sm:$0xff] }
 0x3c6   :  { %v3320_v27 = vadd.f32 %v12312_v35, %v3168_v38  ;;  %v3319_v54 = vadd.f32 %v9878_v8, %v3167_v52  ;;  %v12314_v24 = vrot.slane %v9807_v22, 1  ;;  %v3321_v44 = vadd.f32 %v9905_v63, %v3169_v14  ;;  %v10344_v22 = vpop.permute.xlu1 %4061  ;;  %v12320_v63 = vld [vmem:[#allocation72_spill] sm:$0xff] }
 0x3c7   :  { %v10326_v0 = vsel %vm956_vm1, %v3933_v60, %v12313_v5  ;;  %v10335_v2 = vsel %vm956_vm1, %v3936_v30, %v11292_v58  ;;  %v3195_v55 = vadd.f32 %v12315_v29, %v10157_v53  ;;  %v12316_v45 = vrot.slane %v9811_v59, 1  ;;  %v12317_v60 = vld [vmem:[#allocation204_spill] sm:$0xff]  ;;  %v12321_v30 = vld [vmem:[#allocation73_spill] sm:$0xff]  ;;  %v12323_v59 = vld [vmem:[#allocation15_spill] sm:$0xff] }
 0x3c8   :  { %v3322_v39 = vadd.f32 %v12314_v24, %v3170_v57  ;;  %v3343_v38 = vadd.f32 %v12317_v60, %v3193_v1  ;;  %v12319_v8 = vrot.slane %v12318_v3, 1  ;;  %v10346_v57 = vpop.permute.xlu0 %4059  ;;  %v3220_v14 = vadd.f32 %v12320_v63, %v10160_v31  ;;  %v12322_v53 = vld [vmem:[#allocation268_spill] sm:$0xff]  ;;  %v12324_v1 = vld [vmem:[#allocation238_spill] sm:$0xff]  ;;  %v12326_v24 = vld [vmem:[#allocation269_spill] sm:$0xff] }
 0x3c9   :  { %v3344_v11 = vadd.f32 %v12316_v45, %v3194_v48  ;;  %v3219_v23 = vadd.f32 %v12321_v30, %v10173_v50  ;;  %v3222_v37 = vadd.f32 %v12322_v53, %v10182_v46  ;;  %v3221_v48 = vadd.f32 %v12323_v59, %v10185_v51  ;;  %v12327_v31 = vld [vmem:[#allocation17_spill] sm:$0xff]  ;;  %v12329_v46 = vld [vmem:[#allocation78_spill] sm:$0xff]  ;;  %v12343_v58 = vld [vmem:[#allocation144_spill] sm:$0xff] }
 0x3ca   :  { %v3346_v52 = vadd.f32 %v12319_v8, %v3196_v61  ;;  %v3246_v35 = vadd.f32 %v12324_v1, %v10201_v12  ;;  %v12325_v61 = vld [vmem:[#allocation242_spill] sm:$0xff]  ;;  %v3248_v29 = vadd.f32 %v12326_v24, %v10213_v42  ;;  %v3247_v45 = vadd.f32 %v12327_v31, %v10217_v41  ;;  %v12328_v50 = vld [vmem:[#allocation77_spill] sm:$0xff]  ;;  %v10372_v30 = vpop.permute.xlu1 %4065  ;;  %vm4537_vm1 = vmor %vm4536_vm0, %vm4535_vm15 }
 0x3cb   :  { %v3245_v5 = vadd.f32 %v12325_v61, %v10205_v15  ;;  %v3272_v60 = vadd.f32 %v12328_v50, %v10227_v4  ;;  %v3271_v3 = vadd.f32 %v12329_v46, %v10244_v16  ;;  %v12330_v51 = vld [vmem:[#allocation81_spill] sm:$0xff]  ;;  %v12331_v12 = vld [vmem:[#allocation82_spill] sm:$0xff]  ;;  %v5864_v42 = vmov 1983009808   ;;  %v12336_v50 = vld [vmem:[#allocation140_spill] sm:$0xff] }
 0x3cc   :  { %v3274_v8 = vadd.f32 %v12330_v51, %v3118_v6  ;;  %v3273_v63 = vadd.f32 %v12331_v12, %v3117_v10  ;;  %v10374_v15 = vpop.permute.xlu0 %4063  ;;  %v4339_v53 = vunpack.c.l.s4 %v5864_v42  ;;  %v4341_v59 = vlaneseq  ;;  %v12333_v41 = vld [vmem:[#allocation266_spill] sm:$0xff] }
 0x3cd   :  { %12332 = vst [vmem:[#allocation49_spill] sm:$0xff] %v10374_v15  ;;  %v3345_v1 = vadd.f32 %v12333_v41, %v3195_v55  ;;  %v12334_v4 = vrot.slane %v9891_v36, 1  ;;  %v3367_v16 = vadd.f32 %v9969_v17, %v3219_v23  ;;  %v5865_v24 = vmov 1934713408   ;;  %v12338_v36 = vld [vmem:[#allocation42_spill] sm:$0xff]  ;;  %v12340_v17 = vld [vmem:[#allocation141_spill] sm:$0xff] }
 0x3ce   :  { %v4370_v6 = vunpack.c.l.s4 %v5865_v24  ;;  %v12335_v10 = vrot.slane %v9895_v34, 1  ;;  %v3369_v46 = vadd.f32 %v12336_v50, %v3221_v48  ;;  %v12337_v51 = vrot.slane %v9921_v49, 1  ;;  %v12341_v41 = vld [vmem:[#allocation262_spill] sm:$0xff]  ;;  %v12358_v15 = vld [vmem:[#allocation93_spill] sm:$0xff] }
 0x3cf   :  { %v3368_v61 = vadd.f32 %v12334_v4, %v3220_v14  ;;  %v3391_v42 = vadd.f32 %v9990_v18, %v3245_v5  ;;  %v12339_v55 = vrot.slane %v12338_v36, 1  ;;  %v3393_v23 = vadd.f32 %v12340_v17, %v3247_v45  ;;  %v10401_v18 = vpop.permute.xlu1 %4093  ;;  %v12349_v45 = vld [vmem:[#allocation83_spill] sm:$0xff]  ;;  %v12350_v36 = vld [vmem:[#allocation20_spill] sm:$0xff]  ;;  %v12352_v17 = vld [vmem:[#allocation25_spill] sm:$0xff] }
 0x3d0   :  { %v3370_v31 = vadd.f32 %v12335_v10, %v3222_v37  ;;  %v3392_v12 = vadd.f32 %v12337_v51, %v3246_v35  ;;  %v12342_v4 = vrot.slane %v12341_v41, 1  ;;  %v3415_v34 = vadd.f32 %v12343_v58, %v3271_v3  ;;  %v12344_v37 = vld [vmem:[#allocation139_spill] sm:$0xff]  ;;  %12347 = vst [vmem:[#allocation56_spill] sm:$0xff] %v10401_v18  ;;  %v10403_v5 = vpop.permute.xlu0 %4091 }
 0x3d1   :  { %v3394_v14 = vadd.f32 %v12339_v55, %v3248_v29  ;;  %v12345_v48 = vrot.slane %v12344_v37, 1  ;;  %v12346_v35 = vld [vmem:[#allocation147_spill] sm:$0xff]  ;;  %12348 = vst [vmem:[#allocation122_spill] sm:$0xff] %v10403_v5  ;;  %v4340_v29 = vunpack.c.0.s8 %v4339_v53  ;;  %v4342_v50 = vshrl.u32 %v4341_v59, 7  ;;  %v12351_v55 = vld [vmem:[#allocation85_spill] sm:$0xff]  ;;  %v12357_v53 = vld [vmem:[#allocation92_spill] sm:$0xff] }
 0x3d2   :  { %v3416_v24 = vadd.f32 %v12342_v4, %v3272_v60  ;;  %v3417_v10 = vadd.f32 %v12346_v35, %v3273_v63  ;;  %v3448_v51 = vadd.f32 %v12349_v45, %v3296_v32  ;;  %v3447_v60 = vadd.f32 %v12350_v36, %v3295_v9  ;;  %v12353_v4 = vld [vmem:[#allocation88_spill] sm:$0xff]  ;;  %v12354_v37 = vld [vmem:[#allocation89_spill] sm:$0xff]  ;;  %v12356_v18 = vld [vmem:[#allocation91_spill] sm:$0xff] }
 0x3d3   :  { %v3418_v49 = vadd.f32 %v12345_v48, %v3274_v8  ;;  %v3450_v58 = vadd.f32 %v12351_v55, %v3298_v7  ;;  %v4371_v3 = vunpack.c.0.s8 %v4370_v6  ;;  %v3449_v41 = vadd.f32 %v12352_v17, %v3297_v40  ;;  %v12355_v48 = vld [vmem:[#allocation90_spill] sm:$0xff]  ;;  %v10424_v6 = vpop.permute.xlu1 %4097 }
 0x3d4   :  { %v3480_v8 = vadd.f32 %v12353_v4, %v3320_v27  ;;  %v3479_v63 = vadd.f32 %v12354_v37, %v3319_v54  ;;  %v3482_v35 = vadd.f32 %v12355_v48, %v3322_v39  ;;  %v3481_v5 = vadd.f32 %v12356_v18, %v3321_v44  ;;  %v12359_v7 = vld [vmem:[#allocation94_spill] sm:$0xff]  ;;  %v12360_v27 = vld [vmem:[#allocation95_spill] sm:$0xff]  ;;  %12361 = vst [vmem:[#allocation170_spill] sm:$0xff] %v10424_v6  ;;  %v10426_v39 = vpop.permute.xlu0 %4095  ;;  %v12390_v6 = vld [vmem:[#allocation116_spill] sm:$0xff] }
 0x3d5   :  { %v3512_v59 = vadd.f32 %v12357_v53, %v3344_v11  ;;  %v3511_v32 = vadd.f32 %v12358_v15, %v3343_v38  ;;  %v10416_v9 = vstv %s10368_s11  ;;  %v3514_v40 = vadd.f32 %v12359_v7, %v3346_v52  ;;  %12362 = vst [vmem:[#allocation126_spill] sm:$0xff] %v10426_v39  ;;  %v12363_v11 = vld [vmem:[#allocation96_spill] sm:$0xff]  ;;  %v12364_v15 = vld [vmem:[#allocation97_spill] sm:$0xff]  ;;  %v12367_v55 = vld [vmem:[#allocation98_spill] sm:$0xff] }
 0x3d6   :  { %v3513_v54 = vadd.f32 %v12360_v27, %v3345_v1  ;;  %v10428_v44 = vsub.s32 %v4340_v29, %v4342_v50  ;;  %v3544_v38 = vadd.f32 %v12363_v11, %v3368_v61  ;;  %v3543_v18 = vadd.f32 %v12364_v15, %v3367_v16  ;;  %v12368_v52 = vld [vmem:[#allocation99_spill] sm:$0xff]  ;;  %v12369_v37 = vld [vmem:[#allocation102_spill] sm:$0xff]  ;;  %v12371_v53 = vld [vmem:[#allocation104_spill] sm:$0xff] }
 0x3d7   :  { %v10433_v45 = vstv %s10380_s12  ;;  %v10435_v36 = vsub.s32 %v4371_v3, %v4342_v50  ;;  %v3546_v17 = vadd.f32 %v12367_v55, %v3370_v31  ;;  %v3545_v4 = vadd.f32 %v12368_v52, %v3369_v46  ;;  %v12372_v29 = vld [vmem:[#allocation106_spill] sm:$0xff]  ;;  %v12377_v31 = vld [vmem:[#allocation119_spill] sm:$0xff]  ;;  %v10453_v52 = vpop.permute.xlu1 %4125 }
 0x3d8   :  { %12365 = vst [vmem:[#allocation61_spill] sm:$0xff] %v10433_v45  ;;  %v3576_v1 = vadd.f32 %v12369_v37, %v3392_v12  ;;  %v10441_v48 = vstv %s10388_s13  ;;  %v3575_v7 = vadd.f32 %v12371_v53, %v3391_v42  ;;  %v3578_v27 = vadd.f32 %v12372_v29, %v3394_v14  ;;  %v12373_v39 = vld [vmem:[#allocation26_spill] sm:$0xff]  ;;  %12379 = vst [vmem:[#allocation174_spill] sm:$0xff] %v10453_v52  ;;  %v10455_v37 = vpop.permute.xlu0 %4123  ;;  %v12381_v42 = vld [vmem:[#allocation121_spill] sm:$0xff] }
 0x3d9   :  { %12366 = vst [vmem:[#allocation171_spill] sm:$0xff] %v10435_v36  ;;  %12370 = vst [vmem:[#allocation172_spill] sm:$0xff] %v10441_v48  ;;  %v3577_v61 = vadd.f32 %v12373_v39, %v3393_v23  ;;  %v10447_v11 = vstv %s10396_s2  ;;  %v12375_v16 = vld [vmem:[#allocation22_spill] sm:$0xff]  ;;  %v3642_v46 = vadd.f32 %v12377_v31, %v3450_v58  ;;  %v3608_v14 = vadd.f32 %v12381_v42, %v3416_v24  ;;  %v12382_v53 = vld [vmem:[#allocation224_spill] sm:$0xff] }
 0x3da   :  { %12374 = vst [vmem:[#allocation173_spill] sm:$0xff] %v10447_v11  ;;  %v3640_v15 = vadd.f32 %v12375_v16, %v3448_v51  ;;  %v12376_v50 = vld [vmem:[#allocation158_spill] sm:$0xff]  ;;  %12380 = vst [vmem:[#allocation175_spill] sm:$0xff] %v10455_v37  ;;  %v3672_v23 = vadd.f32 %v12382_v53, %v3480_v8  ;;  %v12383_v39 = vld [vmem:[#allocation120_spill] sm:$0xff]  ;;  %v3609_v37 = vadd.f32 %v12390_v6, %v3417_v10  ;;  %v10468_v36 = vstv %s10418_s15 }
 0x3db   :  { %v3639_v3 = vadd.f32 %v12376_v50, %v3447_v60  ;;  %v12378_v55 = vld [vmem:[#allocation182_spill] sm:$0xff]  ;;  %v3671_v29 = vadd.f32 %v12383_v39, %v3479_v63  ;;  %v12384_v11 = vld [vmem:[#allocation257_spill] sm:$0xff]  ;;  %v12386_v60 = vld [vmem:[#allocation123_spill] sm:$0xff]  ;;  %12391 = vst [vmem:[#allocation177_spill] sm:$0xff] %v10468_v36  ;;  %v10471_v24 = vstv %s10420_s16  ;;  %vm5139_vm15 = vcmask 128004  }
 0x3dc   :  { %v3641_v12 = vadd.f32 %v12378_v55, %v3449_v41  ;;  %v3674_v51 = vadd.f32 %v12384_v11, %v3482_v35  ;;  %v12385_v16 = vld [vmem:[#allocation109_spill] sm:$0xff]  ;;  %v3673_v50 = vadd.f32 %v12386_v60, %v3481_v5  ;;  %v12387_v45 = vld [vmem:[#allocation124_spill] sm:$0xff]  ;;  %v12388_v31 = vld [vmem:[#allocation127_spill] sm:$0xff]  ;;  %12392 = vst [vmem:[#allocation179_spill] sm:$0xff] %v10471_v24  ;;  %vm5134_vm0 = vcmask 621568  }
 0x3dd   :  { %v3607_v48 = vadd.f32 %v12385_v16, %v3415_v34  ;;  %v3704_v58 = vadd.f32 %v12387_v45, %v3512_v59  ;;  %v3703_v41 = vadd.f32 %v12388_v31, %v3511_v32  ;;  %v12389_v55 = vld [vmem:[#allocation250_spill] sm:$0xff]  ;;  %v3823_v35 = vadd.f32 %v10165_v62, %v3639_v3  ;;  %v10479_v45 = vpop.permute.xlu1 %4129  ;;  %v10481_v32 = vpop.permute.xlu0 %4127  ;;  %v12400_v6 = vld [vmem:[#allocation151_spill] sm:$0xff] }
 0x3de   :  { %v3610_v52 = vadd.f32 %v12389_v55, %v3418_v49  ;;  %v12393_v8 = vld [vmem:[#allocation150_spill] sm:$0xff]  ;;  %v12395_v34 = vrot.slane %v10091_v21, 2  ;;  %12397 = vst [vmem:[#allocation55_spill] sm:$0xff] %v10479_v45  ;;  %12398 = vst [vmem:[#allocation181_spill] sm:$0xff] %v10481_v32  ;;  %v12399_v49 = vld [vmem:[#allocation132_spill] sm:$0xff]  ;;  %v12401_v53 = vrot.slane %v12400_v6, 2 }
 0x3df   :  { %v12394_v63 = vrot.slane %v12393_v8, 2  ;;  %v12396_v11 = vld [vmem:[#allocation118_spill] sm:$0xff]  ;;  %v3706_v10 = vadd.f32 %v12399_v49, %v3514_v40  ;;  %v12403_v31 = vld [vmem:[#allocation155_spill] sm:$0xff]  ;;  %v12406_v21 = vld [vmem:[#allocation165_spill] sm:$0xff] }
 0x3e0   :  { %v3826_v5 = vadd.f32 %v12395_v34, %v3642_v46  ;;  %v3825_v59 = vadd.f32 %v12396_v11, %v3641_v12  ;;  %v3848_v39 = vadd.f32 %v12401_v53, %v3672_v23  ;;  %v12402_v16 = vld [vmem:[#allocation162_spill] sm:$0xff]  ;;  %v3849_v46 = vadd.f32 %v12406_v21, %v3673_v50  ;;  %v12407_v8 = vld [vmem:[#allocation160_spill] sm:$0xff]  ;;  %v12409_v34 = vld [vmem:[#allocation31_spill] sm:$0xff] }
 0x3e1   :  { %v3824_v42 = vadd.f32 %v12394_v63, %v3640_v15  ;;  %v3847_v60 = vadd.f32 %v12402_v16, %v3671_v29  ;;  %v12404_v15 = vrot.slane %v12403_v31, 2  ;;  %v12405_v62 = vld [vmem:[#allocation134_spill] sm:$0xff]  ;;  %v12408_v12 = vrot.slane %v12407_v8, 2  ;;  %v12412_v6 = vld [vmem:[#allocation12_spill] sm:$0xff]  ;;  %v12414_v16 = vld [vmem:[#allocation137_spill] sm:$0xff]  ;;  %v4158_v8 = vpop.permute.xlu1 %4157 }
 0x3e2   :  { %v3705_v3 = vadd.f32 %v12405_v62, %v3513_v54  ;;  %v3871_v11 = vadd.f32 %v12409_v34, %v3703_v41  ;;  %v12410_v24 = vld [vmem:[#allocation258_spill] sm:$0xff]  ;;  %v3738_v23 = vadd.f32 %v12412_v6, %v3546_v17  ;;  %v12413_v53 = vld [vmem:[#allocation136_spill] sm:$0xff]  ;;  %v3768_v31 = vadd.f32 %v12414_v16, %v3576_v1  ;;  %v12417_v50 = vld [vmem:[#allocation115_spill] sm:$0xff] }
 0x3e3   :  { %v3850_v55 = vadd.f32 %v12404_v15, %v3674_v51  ;;  %v3872_v63 = vadd.f32 %v12408_v12, %v3704_v58  ;;  %v3736_v36 = vadd.f32 %v12410_v24, %v3544_v38  ;;  %v12411_v40 = vld [vmem:[#allocation226_spill] sm:$0xff]  ;;  %v3737_v29 = vadd.f32 %v12413_v53, %v3545_v4  ;;  %v4156_v58 = vpop.permute.xlu0 %4155  ;;  %v12418_v12 = vld [vmem:[#allocation143_spill] sm:$0xff]  ;;  %v12419_v34 = vld [vmem:[#allocation145_spill] sm:$0xff] }
 0x3e4   :  { %v3735_v49 = vadd.f32 %v12411_v40, %v3543_v18  ;;  %v12415_v51 = vld [vmem:[#allocation138_spill] sm:$0xff]  ;;  %v3975_v21 = vadd.f32 %v12417_v50, %v3823_v35  ;;  %v3769_v41 = vadd.f32 %v12418_v12, %v3577_v61  ;;  %v3800_v38 = vadd.f32 %v12419_v34, %v3608_v14  ;;  %v12421_v40 = vld [vmem:[#allocation159_spill] sm:$0xff]  ;;  %v12423_v4 = vld [vmem:[#allocation148_spill] sm:$0xff] }
 0x3e5   :  { %v3767_v15 = vadd.f32 %v12415_v51, %v3575_v7  ;;  %v12416_v54 = vld [vmem:[#allocation142_spill] sm:$0xff]  ;;  %v12422_v17 = vrot.slane %v12421_v40, 2  ;;  %v3802_v53 = vadd.f32 %v12423_v4, %v3610_v52  ;;  %v12424_v1 = vld [vmem:[#allocation149_spill] sm:$0xff]  ;;  %v12425_v7 = vld [vmem:[#allocation168_spill] sm:$0xff]  ;;  %v12429_v61 = vrot.slane %v10208_v25, 2 }
 0x3e6   :  { %v3770_v62 = vadd.f32 %v12416_v54, %v3578_v27  ;;  %v12420_v24 = vld [vmem:[#allocation146_spill] sm:$0xff]  ;;  %v3801_v16 = vadd.f32 %v12424_v1, %v3609_v37  ;;  %v3873_v51 = vadd.f32 %v12425_v7, %v3705_v3  ;;  %v4167_v27 = vadd.f32 %v4156_v58, %v3975_v21  ;;  %v12426_v54 = vld [vmem:[#allocation32_spill] sm:$0xff]  ;;  %v12428_v32 = vld [vmem:[#allocation169_spill] sm:$0xff]  ;;  %v4162_v58 = vpop.permute.xlu1 %4161 }
 0x3e7   :  { %v3799_v18 = vadd.f32 %v12420_v24, %v3607_v48  ;;  %v3874_v6 = vadd.f32 %v12422_v17, %v3706_v10  ;;  %v12427_v35 = vrot.slane %v12426_v54, 2  ;;  %v3895_v45 = vadd.f32 %v12428_v32, %v3735_v49  ;;  %v12430_v12 = vld [vmem:[#allocation157_spill] sm:$0xff]  ;;  %v4160_v24 = vpop.permute.xlu0 %4159  ;;  %v12442_v1 = vld [vmem:[#allocation52_spill] sm:$0xff] }
 0x3e8   :  { %v3898_v14 = vadd.f32 %v12429_v61, %v3738_v23  ;;  %v3897_v48 = vadd.f32 %v10303_v33, %v3737_v29  ;;  %v3977_v34 = vadd.f32 %v12430_v12, %v3825_v59  ;;  %v12431_v10 = vrot.slane %v10239_v19, 2  ;;  %v12436_v29 = vld [vmem:[#allocation153_spill] sm:$0xff] }
 0x3e9   :  { %v3896_v50 = vadd.f32 %v12427_v35, %v3736_v36  ;;  %v3919_v37 = vadd.f32 %v10311_v56, %v3767_v15  ;;  %v12432_v3 = vrot.slane %v10252_v13, 2  ;;  %v12433_v36 = vld [vmem:[#allocation161_spill] sm:$0xff]  ;;  %v3921_v32 = vadd.f32 %v10316_v28, %v3769_v41  ;;  %v12437_v15 = vld [vmem:[#allocation163_spill] sm:$0xff]  ;;  %v12438_v28 = vld [vmem:[#allocation164_spill] sm:$0xff] }
 0x3ea   :  { %v3920_v52 = vadd.f32 %v12431_v10, %v3768_v31  ;;  %v3978_v40 = vadd.f32 %v12433_v36, %v3826_v5  ;;  %v12434_v25 = vrot.slane %v10257_v43, 2  ;;  %v3943_v33 = vadd.f32 %v10326_v0, %v3799_v18  ;;  %v12439_v41 = vld [vmem:[#allocation166_spill] sm:$0xff]  ;;  %v12440_v0 = vld [vmem:[#allocation167_spill] sm:$0xff]  ;;  %v4192_v4 = vpop.permute.xlu1 %4191 }
 0x3eb   :  { %v3922_v21 = vadd.f32 %v12432_v3, %v3770_v62  ;;  %v12435_v59 = vrot.slane %v10264_v47, 2  ;;  %v10530_v23 = vadd.f32 %v10335_v2, %v3801_v16  ;;  %v4333_v13 = vadd.f32 %v10416_v9, %v4167_v27  ;;  %v12441_v18 = vld [vmem:[#allocation47_spill] sm:$0xff]  ;;  %v12444_v3 = vld [vmem:[#allocation56_spill] sm:$0xff]  ;;  %v12446_v36 = vld [vmem:[#allocation122_spill] sm:$0xff] }
 0x3ec   :  { %v3944_v49 = vadd.f32 %v12434_v25, %v3800_v38  ;;  %v4169_v56 = vadd.f32 %v4160_v24, %v3977_v34  ;;  %v3976_v31 = vadd.f32 %v12436_v29, %v3824_v42  ;;  %v10535_v5 = vadd.f32 %v12437_v15, %v3848_v39  ;;  %v12443_v34 = vld [vmem:[#allocation49_spill] sm:$0xff]  ;;  %v12447_v25 = vld [vmem:[#allocation170_spill] sm:$0xff] }
 0x3ed   :  { %v3946_v19 = vadd.f32 %v12435_v59, %v3802_v53  ;;  %v4007_v62 = vadd.f32 %v12438_v28, %v3847_v60  ;;  %v4170_v43 = vadd.f32 %v4162_v58, %v3978_v40  ;;  %v10539_v38 = vadd.f32 %v12439_v41, %v3850_v55  ;;  %v4188_v53 = vpop.permute.xlu0 %4187 }
 0x3ee   :  { %v4009_v47 = vadd.f32 %v12440_v0, %v3849_v46  ;;  %v10543_v17 = vadd.f32 %v12441_v18, %v3872_v63  ;;  %v4335_v2 = vadd.f32 %v10416_v9, %v4169_v56  ;;  %v4039_v42 = vadd.f32 %v12442_v1, %v3871_v11  ;;  %v4224_v61 = vpop.permute.xlu1 %4223 }
 0x3ef   :  { %v10548_v39 = vadd.f32 %v10296_v20, %v3874_v6  ;;  %v4041_v60 = vadd.f32 %v10298_v26, %v3873_v51  ;;  %v4168_v16 = vadd.f32 %v4158_v8, %v3976_v31  ;;  %v5866_v7 = vmov 0.0  }
 0x3f0   :  { %v4337_v55 = vcombine.high %v4333_v13, %v5866_v7  ;;  %v4344_v46 = vrot.slane %v4333_v13, %v10428_v44  ;;  %v4352_v63 = vcombine.high %v4335_v2, %v5866_v7  ;;  %v4359_v27 = vrot.slane %v4335_v2, %v10428_v44 }
 0x3f1   :  { %v10556_v54 = vadd.f32 %v10344_v22, %v3896_v50  ;;  %v4071_v11 = vadd.f32 %v10346_v57, %v3895_v45  ;;  %v10560_v20 = vadd.f32 %v10372_v30, %v3898_v14  ;;  %v4336_v26 = vadd.f32 %v10416_v9, %v4170_v43  ;;  %v4220_v12 = vpop.permute.xlu0 %4219  ;;  %v12445_v50 = vld [vmem:[#allocation171_spill] sm:$0xff] }
 0x3f2   :  { %v4366_v8 = vrot.slane %v4352_v63, %v10428_v44  ;;  %v4367_v6 = vcombine.low %v4344_v46, %v4359_v27  ;;  %v4368_v51 = vcombine.high %v4344_v46, %v4359_v27  ;;  %v4201_v35 = vadd.f32 %v4192_v4, %v4009_v47  ;;  %v4256_v31 = vpop.permute.xlu1 %4255  ;;  %v12451_v43 = vld [vmem:[#allocation175_spill] sm:$0xff]  ;;  %v12453_v4 = vld [vmem:[#allocation172_spill] sm:$0xff] }
 0x3f3   :  { %v4073_v10 = vadd.f32 %v12443_v34, %v3897_v48  ;;  %v10566_v58 = vadd.f32 %v12444_v3, %v3920_v52  ;;  %v4334_v22 = vadd.f32 %v10416_v9, %v4168_v16  ;;  %v4199_v57 = vadd.f32 %v4188_v53, %v4007_v62  ;;  %v12448_v48 = vld [vmem:[#allocation126_spill] sm:$0xff]  ;;  %v12449_v9 = vld [vmem:[#allocation61_spill] sm:$0xff]  ;;  %v12452_v47 = vld [vmem:[#allocation55_spill] sm:$0xff] }
 0x3f4   :  { %v4351_v30 = vrot.slane %v4337_v55, %v10428_v44  ;;  %v4233_v45 = vadd.f32 %v4224_v61, %v4041_v60  ;;  %v4382_v14 = vrot.slane %v4368_v51, %v12445_v50  ;;  %v10572_v24 = vrot.slane %v4367_v6, %v12445_v50  ;;  %v12450_v62 = vld [vmem:[#allocation174_spill] sm:$0xff]  ;;  %v12454_v16 = vld [vmem:[#allocation181_spill] sm:$0xff] }
 0x3f5   :  { %v4103_v40 = vadd.f32 %v12446_v36, %v3919_v37  ;;  %v10576_v59 = vadd.f32 %v12447_v25, %v3922_v21  ;;  %v4105_v13 = vadd.f32 %v12448_v48, %v3921_v32  ;;  %v4231_v52 = vadd.f32 %v4220_v12, %v4039_v42  ;;  %v4252_v15 = vpop.permute.xlu0 %4251  ;;  %v12456_v48 = vld [vmem:[#allocation177_spill] sm:$0xff] }
 0x3f6   :  { %v10580_v56 = vrot.slane %v4336_v26, %v10428_v44  ;;  %v4543_v29 = vadd.f32 %v12449_v9, %v4201_v35  ;;  %4451 = vrot.lane.b32.xlu1 %v4382_v14, %s5867_s17  ;;  %v4399_v28 = vcombine.high %v10572_v24, %v5866_v7  ;;  %v4383_v37 = vcombine.low %v4351_v30, %v4366_v8  ;;  %v4288_v63 = vpop.permute.xlu1 %4287  ;;  %v12455_v35 = vld [vmem:[#allocation173_spill] sm:$0xff] }
 0x3f7   :  { %v10587_v21 = vadd.f32 %v12450_v62, %v3944_v49  ;;  %v4135_v32 = vadd.f32 %v12451_v43, %v3943_v33  ;;  %v5718_v41 = vcombine.high %v4334_v22, %v4336_v26  ;;  %v4541_v0 = vadd.f32 %v12449_v9, %v4199_v57 }
 0x3f8   :  { %v10592_v18 = vadd.f32 %v12452_v47, %v3946_v19  ;;  %v10595_v2 = vrot.slane %v4334_v22, %v10428_v44  ;;  %v4745_v53 = vadd.f32 %v12453_v4, %v4233_v45  ;;  %v4265_v1 = vadd.f32 %v4256_v31, %v4073_v10  ;;  %4447 = vrot.lane.b32.xlu0 %v4399_v28, %s5868_s18  ;;  %v12457_v47 = vld [vmem:[#allocation179_spill] sm:$0xff] }
 0x3f9   :  { %v4743_v49 = vadd.f32 %v12453_v4, %v4231_v52  ;;  %v4263_v42 = vadd.f32 %v4252_v15, %v4071_v11  ;;  %v4391_v33 = vrot.slane %v4383_v37, %v12445_v50  ;;  %v4384_v60 = vcombine.high %v4351_v30, %v4366_v8  ;;  %v4284_v27 = vpop.permute.xlu0 %4283 }
 0x3fa   :  { %v4137_v55 = vadd.f32 %v12454_v16, %v10530_v23  ;;  %v4419_v19 = vcombine.low %v10595_v2, %v10580_v56  ;;  %v4560_v46 = vcombine.high %v4543_v29, %v5866_v7  ;;  %v4400_v26 = vcombine.high %v4382_v14, %v5866_v7  ;;  %v4320_v36 = vpop.permute.xlu1 %4319 }
 0x3fb   :  { %v4420_v6 = vcombine.high %v10595_v2, %v10580_v56  ;;  %v10610_v11 = vrot.slane %v4543_v29, %v10428_v44  ;;  %v4545_v8 = vcombine.high %v4541_v0, %v5866_v7  ;;  %4459 = vrot.lane.b32.xlu1 %v4391_v33, %s5869_s19  ;;  %v10615_v23 = vrot.slane %v5718_v41, %v12445_v50 }
 0x3fc   :  { %v10618_v51 = vrot.slane %v4541_v0, %v10428_v44  ;;  %v4945_v61 = vadd.f32 %v12455_v35, %v4265_v1  ;;  %v4297_v12 = vadd.f32 %v4288_v63, %v4105_v13  ;;  %v4295_v34 = vadd.f32 %v4284_v27, %v4103_v40  ;;  %4455 = vrot.lane.b32.xlu0 %v4400_v26, %s5870_s21 }
 0x3fd   :  { %v4762_v10 = vcombine.high %v4745_v53, %v5866_v7  ;;  %v4747_v3 = vcombine.high %v4743_v49, %v5866_v7  ;;  %v4943_v22 = vadd.f32 %v12455_v35, %v4263_v42  ;;  %v4398_v57 = vrot.slane %v4384_v60, %v12445_v50  ;;  %v4316_v40 = vpop.permute.xlu0 %4315 }
 0x3fe   :  { %v10627_v30 = vrot.slane %v4560_v46, %v10428_v44  ;;  %v10630_v45 = vrot.slane %v4745_v53, %v10428_v44  ;;  %v10633_v14 = vrot.slane %v4743_v49, %v10428_v44  ;;  %v4401_v25 = vcombine.high %v4391_v33, %v5866_v7  ;;  %v4194_v1 = vpop.permute.xlu1 %4193 }
 0x3ff   :  { %v5146_v13 = vadd.f32 %v12456_v48, %v4297_v12  ;;  %v5144_v52 = vadd.f32 %v12456_v48, %v4295_v34  ;;  %4467 = vrot.lane.b32.xlu1 %v4398_v57, %s5871_s22  ;;  %v4329_v56 = vadd.f32 %v4320_v36, %v4137_v55  ;;  %v4327_v29 = vadd.f32 %v4316_v40, %v4135_v32 }
 0x400   :  { %v10640_v31 = vrot.slane %v4545_v8, %v10428_v44  ;;  %v4575_v15 = vcombine.low %v10618_v51, %v10610_v11  ;;  %v4576_v28 = vcombine.high %v10618_v51, %v10610_v11  ;;  %v4962_v37 = vcombine.high %v4945_v61, %v5866_v7  ;;  %4463 = vrot.lane.b32.xlu0 %v4401_v25, %s5872_s23 }
 0x401   :  { %v10649_v62 = vrot.slane %v4762_v10, %v10428_v44  ;;  %v10652_v43 = vrot.slane %v4747_v3, %v10428_v44  ;;  %v4947_v32 = vcombine.high %v4943_v22, %v5866_v7  ;;  %v4427_v41 = vrot.slane %v4419_v19, %v12445_v50  ;;  %v4190_v49 = vpop.permute.xlu0 %4189 }
 0x402   :  { %v4777_v0 = vcombine.low %v10633_v14, %v10630_v45  ;;  %v5346_v2 = vadd.f32 %v12457_v47, %v4329_v56  ;;  %v5344_v53 = vadd.f32 %v12457_v47, %v4327_v29  ;;  %v4402_v42 = vcombine.high %v4398_v57, %v5866_v7 }
 0x403   :  { %v10662_v33 = vrot.slane %v4945_v61, %v10428_v44  ;;  %v10665_v60 = vrot.slane %v4943_v22, %v10428_v44  ;;  %v5163_v16 = vcombine.high %v5146_v13, %v5866_v7  ;;  %v5148_v55 = vcombine.high %v5144_v52, %v5866_v7  ;;  %4475 = vrot.lane.b32.xlu1 %v4427_v41, %s5873_s24  ;;  %v4226_v22 = vpop.permute.xlu1 %4225 }
 0x404   :  { %v4778_v19 = vcombine.high %v10633_v14, %v10630_v45  ;;  %v10673_v46 = vrot.slane %v4962_v37, %v10428_v44  ;;  %v10676_v63 = vrot.slane %v5146_v13, %v10428_v44  ;;  %v10679_v27 = vrot.slane %v5144_v52, %v10428_v44  ;;  %4471 = vrot.lane.b32.xlu0 %v4402_v42, %s5874_s14 }
 0x405   :  { %v10683_v26 = vrot.slane %v4947_v32, %v10428_v44  ;;  %v4202_v8 = vadd.f32 %v4194_v1, %v10539_v38  ;;  %v4434_v61 = vrot.slane %v4420_v6, %v12445_v50  ;;  %v4443_v12 = vcombine.high %v4427_v41, %v5866_v7  ;;  %v4222_v57 = vpop.permute.xlu0 %4221 }
 0x406   :  { %v5363_v34 = vcombine.high %v5346_v2, %v5866_v7  ;;  %v5348_v10 = vcombine.high %v5344_v53, %v5866_v7  ;;  %v4200_v3 = vadd.f32 %v4190_v49, %v10535_v5  ;;  %v10692_v36 = vrot.slane %v4575_v15, %v12445_v50 }
 0x407   :  { %v4977_v40 = vcombine.low %v10665_v60, %v10662_v33  ;;  %v10697_v38 = vrot.slane %v5163_v16, %v10428_v44  ;;  %v10700_v6 = vrot.slane %v5148_v55, %v10428_v44  ;;  %4483 = vrot.lane.b32.xlu1 %v4434_v61, %s5875_s25  ;;  %v4234_v25 = vadd.f32 %v4226_v22, %v10548_v39 }
 0x408   :  { %v5178_v5 = vcombine.low %v10679_v27, %v10676_v63  ;;  %v10707_v13 = vrot.slane %v5346_v2, %v10428_v44  ;;  %v10710_v52 = vrot.slane %v5344_v53, %v10428_v44  ;;  %v4232_v56 = vadd.f32 %v4222_v57, %v10543_v17  ;;  %4479 = vrot.lane.b32.xlu0 %v4443_v12, %s5863_s20  ;;  %v4258_v2 = vpop.permute.xlu1 %4257 }
 0x409   :  { %v4978_v29 = vcombine.high %v10665_v60, %v10662_v33  ;;  %v4544_v15 = vadd.f32 %v12449_v9, %v4202_v8  ;;  %v4542_v39 = vadd.f32 %v12449_v9, %v4200_v3  ;;  %v4444_v37 = vcombine.high %v4434_v61, %v5866_v7  ;;  %v4254_v53 = vpop.permute.xlu0 %4253 }
 0x40a   :  { %v10720_v32 = vrot.slane %v5363_v34, %v10428_v44  ;;  %v10723_v41 = vrot.slane %v5348_v10, %v10428_v44  ;;  %v4607_v17 = vcombine.high %v10692_v36, %v5866_v7  ;;  %v10728_v1 = vrot.slane %v4777_v0, %v12445_v50 }
 0x40b   :  { %v10731_v49 = vadd.f32 %v12453_v4, %v4234_v25  ;;  %v10734_v9 = vadd.f32 %v12453_v4, %v4232_v56  ;;  %4491 = vrot.lane.b32.xlu1 %v10615_v23, %s5876_s26  ;;  %v4266_v42 = vadd.f32 %v4258_v2, %v10560_v20  ;;  %v4264_v16 = vadd.f32 %v4254_v53, %v10556_v54 }
 0x40c   :  { %v10741_v55 = vrot.slane %v5178_v5, %v12445_v50  ;;  %v5194_v0 = vcombine.low %v10700_v6, %v10697_v38  ;;  %v5195_v8 = vcombine.high %v10700_v6, %v10697_v38  ;;  %4487 = vrot.lane.b32.xlu0 %v4444_v37, %s5877_s0  ;;  %v5379_v20 = vcombine.high %v10710_v52, %v10707_v13  ;;  %v4290_v57 = vpop.permute.xlu1 %4289 }
 0x40d   :  { %v5720_v61 = vcombine.high %v4542_v39, %v4544_v15  ;;  %v4445_v54 = vcombine.high %v10615_v23, %v5866_v7  ;;  %v4590_v12 = vrot.slane %v4576_v28, %v12445_v50  ;;  %v5394_v34 = vcombine.low %v10723_v41, %v10720_v32  ;;  %v4286_v25 = vpop.permute.xlu0 %4285 }
 0x40e   :  { %12458 = vst [vmem:[#allocation183_spill] sm:$0xff] %v10741_v55  ;;  %v5395_v10 = vcombine.high %v10723_v41, %v10720_v32  ;;  %v4946_v3 = vadd.f32 %v12455_v35, %v4266_v42  ;;  %v4944_v22 = vadd.f32 %v12455_v35, %v4264_v16  ;;  %v10765_v5 = vrot.slane %v4544_v15, %v10428_v44 }
 0x40f   :  { %v4827_v23 = vrot.slane %v10731_v49, %v10428_v44  ;;  %v4819_v11 = vrot.slane %v10734_v9, %v10428_v44  ;;  %4655 = vrot.lane.b32.xlu1 %v4607_v17, %s5868_s18  ;;  %v4809_v51 = vcombine.high %v10728_v1, %v5866_v7  ;;  %v4298_v28 = vadd.f32 %v4290_v57, %v10576_v59 }
 0x410   :  { %v4296_v35 = vadd.f32 %v4286_v25, %v10566_v58  ;;  %4495 = vrot.lane.b32.xlu0 %v4445_v54, %s5878_s27  ;;  %v4792_v56 = vrot.slane %v4778_v19, %v12445_v50  ;;  %v4591_v15 = vcombine.low %v10640_v31, %v10627_v30  ;;  %v10784_v37 = vrot.slane %v4542_v39, %v10428_v44  ;;  %v4322_v19 = vpop.permute.xlu1 %4321 }
 0x411   :  { %v10787_v2 = vrot.slane %v5720_v61, %v12445_v50  ;;  %v4608_v59 = vcombine.high %v4590_v12, %v5866_v7  ;;  %v10791_v58 = vrot.slane %v4977_v40, %v12445_v50  ;;  %v5027_v53 = vrot.slane %v4946_v3, %v10428_v44  ;;  %v4318_v42 = vpop.permute.xlu0 %4317 }
 0x412   :  { %v5019_v17 = vrot.slane %v4944_v22, %v10428_v44  ;;  %v5147_v45 = vadd.f32 %v12456_v48, %v4298_v28  ;;  %v5145_v14 = vadd.f32 %v12456_v48, %v4296_v35  ;;  %v4829_v39 = vcombine.low %v4819_v11, %v4827_v23 }
 0x413   :  { %v5722_v16 = vcombine.high %v10734_v9, %v10731_v49  ;;  %4857 = vrot.lane.b32.xlu1 %v4809_v51, %s5868_s18  ;;  %v4330_v61 = vadd.f32 %v4322_v19, %v10592_v18  ;;  %v4328_v40 = vadd.f32 %v4318_v42, %v10587_v21  ;;  %v4599_v48 = vrot.slane %v4591_v15, %v12445_v50 }
 0x414   :  { %v5228_v54 = vrot.slane %v5147_v45, %v10428_v44  ;;  %v5220_v57 = vrot.slane %v5145_v14, %v10428_v44  ;;  %v5726_v25 = vcombine.high %v5145_v14, %v5147_v45  ;;  %4659 = vrot.lane.b32.xlu0 %v4590_v12, %s5867_s17  ;;  %v4830_v28 = vcombine.high %v4819_v11, %v4827_v23 }
 0x415   :  { %v5724_v35 = vcombine.high %v4944_v22, %v4946_v3  ;;  %v5347_v4 = vadd.f32 %v12457_v47, %v4330_v61  ;;  %v5345_v49 = vadd.f32 %v12457_v47, %v4328_v40  ;;  %v5029_v9 = vcombine.low %v5019_v17, %v5027_v53 }
 0x416   :  { %v5230_v51 = vcombine.low %v5220_v57, %v5228_v54  ;;  %v5231_v18 = vcombine.high %v5220_v57, %v5228_v54  ;;  %v10809_v21 = vrot.slane %v5726_v25, %v12445_v50  ;;  %v10812_v19 = vrot.slane %v4829_v39, %v12445_v50 }
 0x417   :  { %v5428_v45 = vrot.slane %v5347_v4, %v10428_v44  ;;  %v5420_v12 = vrot.slane %v5345_v49, %v10428_v44  ;;  %v5728_v15 = vcombine.high %v5345_v49, %v5347_v4  ;;  %4861 = vrot.lane.b32.xlu1 %v4792_v56, %s5867_s17  ;;  %v10818_v3 = vrot.slane %v5722_v16, %v12445_v50 }
 0x418   :  { %v10821_v47 = vrot.slane %v5230_v51, %v12445_v50  ;;  %4663 = vrot.lane.b32.xlu0 %v4608_v59, %s5870_s21  ;;  %v5009_v22 = vcombine.high %v10791_v58, %v5866_v7  ;;  %v4992_v23 = vrot.slane %v4978_v29, %v12445_v50  ;;  %v5030_v11 = vcombine.high %v5019_v17, %v5027_v53 }
 0x419   :  { %v5430_v4 = vcombine.low %v5420_v12, %v5428_v45  ;;  %v5431_v14 = vcombine.high %v5420_v12, %v5428_v45  ;;  %v10831_v42 = vrot.slane %v5728_v15, %v12445_v50  ;;  %v10834_v39 = vrot.slane %v5029_v9, %v12445_v50 }
 0x41a   :  { %v4993_v59 = vcombine.low %v10683_v26, %v10673_v46  ;;  %v10842_v16 = vrot.slane %v5379_v20, %v12445_v50  ;;  %v4794_v33 = vcombine.high %v10652_v43, %v10649_v62  ;;  %v10847_v60 = vrot.slane %v5724_v35, %v12445_v50 }
 0x41b   :  { %v10850_v29 = vrot.slane %v5430_v4, %v12445_v50  ;;  %4667 = vrot.lane.b32.xlu1 %v4599_v48, %s5869_s19  ;;  %v10854_v53 = vrot.slane %v4830_v28, %v12445_v50  ;;  %v10858_v17 = vcombine.high %v10812_v19, %v5866_v7  ;;  %v4810_v20 = vcombine.high %v4792_v56, %v5866_v7 }
 0x41c   :  { %5057 = vrot.lane.b32.xlu0 %v5009_v22, %s5868_s18  ;;  %v5001_v61 = vrot.slane %v4993_v59, %v12445_v50  ;;  %v10864_v40 = vrot.slane %v4794_v33, %v12445_v50  ;;  %v10870_v54 = vrot.slane %v5194_v0, %v12445_v50  ;;  %v10874_v57 = vcombine.high %v10842_v16, %v5866_v7 }
 0x41d   :  { %v4994_v25 = vcombine.high %v10683_v26, %v10673_v46  ;;  %v10880_v56 = vcombine.high %v10854_v53, %v5866_v7  ;;  %v10883_v28 = vrot.slane %v5030_v11, %v12445_v50  ;;  %v10894_v49 = vcombine.high %v10834_v39, %v5866_v7 }
 0x41e   :  { %v10886_v35 = vcombine.high %v5001_v61, %v5866_v7  ;;  %v10890_v0 = vcombine.high %v10864_v40, %v5866_v7  ;;  %v10900_v46 = vrot.slane %v5394_v34, %v12445_v50  ;;  %v10908_v9 = vcombine.high %v10870_v54, %v5866_v7 }
 0x41f   :  { %5061 = vrot.lane.b32.xlu1 %v4992_v23, %s5867_s17  ;;  %v10904_v26 = vrot.slane %v4994_v25, %v12445_v50  ;;  %v10912_v51 = vcombine.high %v10787_v2, %v5866_v7  ;;  %v10918_v45 = vrot.slane %v5195_v8, %v12445_v50  ;;  %v10923_v34 = vcombine.high %v10883_v28, %v5866_v7 }
 0x420   :  { %4865 = vrot.lane.b32.xlu0 %v4810_v20, %s5870_s21  ;;  %v10926_v12 = vrot.slane %v5231_v18, %v12445_v50  ;;  %v10930_v15 = vcombine.high %v10821_v47, %v5866_v7  ;;  %v10934_v22 = vcombine.high %v10818_v3, %v5866_v7  ;;  %v4609_v38 = vcombine.high %v4599_v48, %v5866_v7 }
 0x421   :  { %v4793_v6 = vcombine.low %v10652_v43, %v10649_v62  ;;  %v5012_v8 = vcombine.high %v10904_v26, %v5866_v7  ;;  %v10943_v18 = vcombine.high %v10900_v46, %v5866_v7  ;;  %v5210_v11 = vcombine.high %v10741_v55, %v5866_v7 }
 0x422   :  { %v10949_v4 = vcombine.high %v10926_v12, %v5866_v7  ;;  %v10953_v48 = vcombine.high %v10918_v45, %v5866_v7  ;;  %v10958_v62 = vcombine.high %v10850_v29, %v5866_v7  ;;  %v5179_v43 = vcombine.high %v10679_v27, %v10676_v63 }
 0x423   :  { %4671 = vrot.lane.b32.xlu1 %v4609_v38, %s5872_s23  ;;  %v10967_v59 = vrot.slane %v5395_v10, %v12445_v50  ;;  %v10971_v33 = vcombine.high %v10847_v60, %v5866_v7  ;;  %v10974_v20 = vrot.slane %v5431_v14, %v12445_v50  ;;  %v12459_v25 = vcombine.low %v10710_v52, %v10707_v13 }
 0x424   :  { %5258 = vrot.lane.b32.xlu0 %v5210_v11, %s5868_s18  ;;  %v4627_v27 = vcombine.low %v10784_v37, %v10765_v5  ;;  %v5010_v32 = vcombine.high %v4992_v23, %v5866_v7  ;;  %v4801_v41 = vrot.slane %v4793_v6, %v12445_v50  ;;  %v10996_v13 = vcombine.high %v10809_v21, %v5866_v7 }
 0x425   :  { %v10980_v63 = vrot.slane %v12459_v25, %v12445_v50  ;;  %v10988_v10 = vcombine.high %v10974_v20, %v5866_v7  ;;  %v10992_v14 = vcombine.high %v10967_v59, %v5866_v7  ;;  %v11000_v52 = vcombine.high %v10831_v42, %v5866_v7 }
 0x426   :  { %v4635_v23 = vrot.slane %v4627_v27, %v12445_v50  ;;  %v5193_v6 = vrot.slane %v5179_v43, %v12445_v50  ;;  %v4592_v11 = vcombine.high %v10640_v31, %v10627_v30  ;;  %v4811_v43 = vcombine.high %v4801_v41, %v5866_v7 }
 0x427   :  { %5065 = vrot.lane.b32.xlu1 %v5010_v32, %s5870_s21  ;;  %v5410_v38 = vcombine.high %v10980_v63, %v5866_v7  ;;  %v4628_v32 = vcombine.high %v10784_v37, %v10765_v5 }
 0x428   :  { %4869 = vrot.lane.b32.xlu0 %v4801_v41, %s5869_s19  ;;  %v4651_v25 = vcombine.high %v4635_v23, %v5866_v7  ;;  %v4606_v55 = vrot.slane %v4592_v11, %v12445_v50  ;;  %v5211_v30 = vcombine.high %v5193_v6, %v5866_v7 }
 0x429   :  { %v4642_v27 = vrot.slane %v4628_v32, %v12445_v50 }
 0x42a   :  { %v4610_v31 = vcombine.high %v4606_v55, %v5866_v7 }
 0x42b   :  { %5458 = vrot.lane.b32.xlu1 %v5410_v38, %s5868_s18  ;;  %v4652_v5 = vcombine.high %v4642_v27, %v5866_v7 }
 0x42c   :  { %5262 = vrot.lane.b32.xlu0 %v5193_v6, %s5867_s17 }
 0x42f   :  { %4687 = vrot.lane.b32.xlu1 %v4651_v25, %s5863_s20 }
 0x430   :  { %4675 = vrot.lane.b32.xlu0 %v4606_v55, %s5871_s22 }
 0x433   :  { %4873 = vrot.lane.b32.xlu1 %v4811_v43, %s5872_s23 }
 0x434   :  { %4691 = vrot.lane.b32.xlu0 %v4642_v27, %s5875_s25 }
 0x437   :  { %5266 = vrot.lane.b32.xlu1 %v5211_v30, %s5870_s21 }
 0x438   :  { %5069 = vrot.lane.b32.xlu0 %v5001_v61, %s5869_s19 }
 0x43b   :  { %4679 = vrot.lane.b32.xlu1 %v4610_v31, %s5874_s14 }
 0x43c   :  { %5462 = vrot.lane.b32.xlu0 %v10842_v16, %s5867_s17 }
 0x43f   :  { %4877 = vrot.lane.b32.xlu1 %v10864_v40, %s5871_s22 }
 0x440   :  { %4695 = vrot.lane.b32.xlu0 %v4652_v5, %s5877_s0 }
 0x443   :  { %4893 = vrot.lane.b32.xlu1 %v10854_v53, %s5875_s25 }
 0x444   :  { %4889 = vrot.lane.b32.xlu0 %v10858_v17, %s5863_s20 }
 0x447   :  { %5270 = vrot.lane.b32.xlu1 %v10870_v54, %s5869_s19 }
 0x448   :  { %5073 = vrot.lane.b32.xlu0 %v10886_v35, %s5872_s23 }
 0x44b   :  { %4683 = vrot.lane.b32.xlu1 %v4635_v23, %s5873_s24  ;;  %v12460_v23 = vld [vmem:[#allocation183_spill] sm:$0xff] }
 0x44c   :  { %5466 = vrot.lane.b32.xlu0 %v10874_v57, %s5870_s21 }
 0x44f   :  { %4881 = vrot.lane.b32.xlu1 %v10890_v0, %s5874_s14 }
 0x450   :  { %4699 = vrot.lane.b32.xlu0 %v10787_v2, %s5876_s26 }
 0x453   :  { %5077 = vrot.lane.b32.xlu1 %v10904_v26, %s5871_s22 }
 0x454   :  { %4897 = vrot.lane.b32.xlu0 %v10880_v56, %s5877_s0 }
 0x457   :  { %5093 = vrot.lane.b32.xlu1 %v10883_v28, %s5875_s25 }
 0x458   :  { %5089 = vrot.lane.b32.xlu0 %v10894_v49, %s5863_s20 }
 0x45b   :  { %5470 = vrot.lane.b32.xlu1 %v10900_v46, %s5869_s19 }
 0x45c   :  { %5274 = vrot.lane.b32.xlu0 %v10908_v9, %s5872_s23 }
 0x45f   :  { %4885 = vrot.lane.b32.xlu1 %v10812_v19, %s5873_s24 }
 0x460   :  { %4703 = vrot.lane.b32.xlu0 %v10912_v51, %s5878_s27 }
 0x463   :  { %5081 = vrot.lane.b32.xlu1 %v5012_v8, %s5874_s14 }
 0x464   :  { %4901 = vrot.lane.b32.xlu0 %v10818_v3, %s5876_s26 }
 0x467   :  { %5278 = vrot.lane.b32.xlu1 %v10918_v45, %s5871_s22 }
 0x468   :  { %v4452_v7 = vpop.permute.xlu1 %4451  ;;  %5097 = vrot.lane.b32.xlu0 %v10923_v34, %s5877_s0 }
 0x46a   :  { %v4448_v50 = vpop.permute.xlu0 %4447 }
 0x46b   :  { %5294 = vrot.lane.b32.xlu1 %v10926_v12, %s5875_s25  ;;  %v4499_v3 = vsel %vm4498_vm2, %v10572_v24, %v4448_v50 }
 0x46c   :  { %5290 = vrot.lane.b32.xlu0 %v10930_v15, %s5863_s20  ;;  %v4501_v53 = vsel %vm4500_vm3, %v4499_v3, %v4452_v7 }
 0x46d   :  { %v4460_v55 = vpop.permute.xlu1 %4459 }
 0x46e   :  { %v4456_v37 = vpop.permute.xlu0 %4455 }
 0x46f   :  { %4905 = vrot.lane.b32.xlu1 %v10934_v22, %s5878_s27  ;;  %v4503_v61 = vsel %vm4502_vm4, %v4501_v53, %v4456_v37 }
 0x470   :  { %5474 = vrot.lane.b32.xlu0 %v10943_v18, %s5872_s23 }
 0x471   :  { %v4468_v2 = vpop.permute.xlu1 %4467 }
 0x472   :  { %v4464_v19 = vpop.permute.xlu0 %4463 }
 0x473   :  { %5101 = vrot.lane.b32.xlu1 %v10847_v60, %s5876_s26  ;;  %v4505_v60 = vsel %vm4504_vm5, %v4503_v61, %v4460_v55 }
 0x474   :  { %5085 = vrot.lane.b32.xlu0 %v10834_v39, %s5873_s24  ;;  %v4507_v39 = vsel %vm4506_vm6, %v4505_v60, %v4464_v19 }
 0x475   :  { %v4476_v16 = vpop.permute.xlu1 %4475  ;;  %v4509_v57 = vsel %vm4508_vm7, %v4507_v39, %v4468_v2 }
 0x476   :  { %v4472_v17 = vpop.permute.xlu0 %4471 }
 0x477   :  { %5298 = vrot.lane.b32.xlu1 %v10949_v4, %s5877_s0  ;;  %v4511_v35 = vsel %vm4510_vm9, %v4509_v57, %v4472_v17 }
 0x478   :  { %5282 = vrot.lane.b32.xlu0 %v10953_v48, %s5874_s14  ;;  %v4513_v46 = vsel %vm4512_vm11, %v4511_v35, %v4476_v16 }
 0x479   :  { %v4484_v24 = vpop.permute.xlu1 %4483 }
 0x47a   :  { %v4480_v40 = vpop.permute.xlu0 %4479 }
 0x47b   :  { %5490 = vrot.lane.b32.xlu1 %v10958_v62, %s5863_s20  ;;  %v4517_v56 = vsel %vm4516_vm8, %v4480_v40, %v4484_v24  ;;  %v4515_v45 = vsel %vm4514_vm13, %v4513_v46, %v4480_v40  ;;  %s5879_s20 = smov 68  }
 0x47c   :  { %5478 = vrot.lane.b32.xlu0 %v10967_v59, %s5871_s22 }
 0x47d   :  { %v4492_v54 = vpop.permute.xlu1 %4491 }
 0x47e   :  { %v4488_v28 = vpop.permute.xlu0 %4487 }
 0x47f   :  { %5105 = vrot.lane.b32.xlu1 %v10971_v33, %s5878_s27  ;;  %v4519_v0 = vsel %vm4518_vm10, %v4517_v56, %v4488_v28 }
 0x480   :  { %5494 = vrot.lane.b32.xlu0 %v10974_v20, %s5875_s25  ;;  %v4521_v9 = vsel %vm4520_vm12, %v4519_v0, %v4492_v54 }
 0x481   :  { %v4656_v49 = vpop.permute.xlu1 %4655 }
 0x482   :  { %v4706_v26 = vsel %vm4498_vm2, %v10692_v36, %v4656_v49  ;;  %v4496_v51 = vpop.permute.xlu0 %4495 }
 0x483   :  { %5302 = vrot.lane.b32.xlu1 %v10809_v21, %s5876_s26  ;;  %v4523_v34 = vsel %vm4522_vm14, %v4521_v9, %v4496_v51 }
 0x484   :  { %v4526_v12 = vcombine.low %v4515_v45, %v4523_v34  ;;  %5286 = vrot.lane.b32.xlu0 %v10821_v47, %s5873_s24 }
 0x485   :  { %v4858_v15 = vpop.permute.xlu1 %4857 }
 0x486   :  { %v4533_v22 = vrot.slane %v4526_v12, %v10428_v44  ;;  %v4908_v36 = vsel %vm4498_vm2, %v10728_v1, %v4858_v15  ;;  %v4660_v8 = vpop.permute.xlu0 %4659 }
 0x487   :  { %5498 = vrot.lane.b32.xlu1 %v10988_v10, %s5877_s0  ;;  %v4707_v18 = vsel %vm4500_vm3, %v4706_v26, %v4660_v8 }
 0x488   :  { %4538 = vst.msk [vmem:[#allocation8] sm:$0xf] %vm4537_vm1, %v4533_v22  ;;  %5482 = vrot.lane.b32.xlu0 %v10992_v14, %s5874_s14 }
 0x489   :  { %v4862_v21 = vpop.permute.xlu1 %4861 }
 0x48a   :  { %v4909_v47 = vsel %vm4500_vm3, %v4908_v36, %v4862_v21  ;;  %v4664_v4 = vpop.permute.xlu0 %4663 }
 0x48b   :  { %5486 = vrot.lane.b32.xlu1 %v10850_v29, %s5873_s24  ;;  %v4708_v48 = vsel %vm4502_vm4, %v4707_v18, %v4664_v4 }
 0x48c   :  { %5306 = vrot.lane.b32.xlu0 %v10996_v13, %s5878_s27 }
 0x48d   :  { %v4668_v1 = vpop.permute.xlu1 %4667 }
 0x48e   :  { %v4709_v62 = vsel %vm4504_vm5, %v4708_v48, %v4668_v1  ;;  %v5058_v59 = vpop.permute.xlu0 %5057 }
 0x48f   :  { %5506 = vrot.lane.b32.xlu1 %v11000_v52, %s5878_s27  ;;  %v5108_v33 = vsel %vm4498_vm2, %v10791_v58, %v5058_v59 }
 0x490   :  { %5502 = vrot.lane.b32.xlu0 %v10831_v42, %s5876_s26 }
 0x491   :  { %v5062_v20 = vpop.permute.xlu1 %5061 }
 0x492   :  { %v5109_v29 = vsel %vm4500_vm3, %v5108_v33, %v5062_v20  ;;  %v4866_v41 = vpop.permute.xlu0 %4865 }
 0x493   :  { %v4910_v10 = vsel %vm4502_vm4, %v4909_v47, %v4866_v41 }
 0x495   :  { %v4672_v14 = vpop.permute.xlu1 %4671 }
 0x496   :  { %v5259_v13 = vpop.permute.xlu0 %5258  ;;  %v4710_v49 = vsel %vm4506_vm6, %v4709_v62, %v4672_v14 }
 0x497   :  { %v5309_v38 = vsel %vm4498_vm2, %v12460_v23, %v5259_v13 }
 0x499   :  { %v5066_v6 = vpop.permute.xlu1 %5065 }
 0x49a   :  { %v5110_v52 = vsel %vm4502_vm4, %v5109_v29, %v5066_v6  ;;  %v4870_v11 = vpop.permute.xlu0 %4869 }
 0x49b   :  { %v4911_v58 = vsel %vm4504_vm5, %v4910_v10, %v4870_v11 }
 0x49d   :  { %v5459_v25 = vpop.permute.xlu1 %5458 }
 0x49e   :  { %v5509_v42 = vsel %vm4498_vm2, %v10980_v63, %v5459_v25  ;;  %v5263_v32 = vpop.permute.xlu0 %5262  ;;  %vm4735_vm2 = vcmask 1041952  }
 0x49f   :  { %v5310_v43 = vsel %vm4500_vm3, %v5309_v38, %v5263_v32 }
 0x4a1   :  { %v4688_v27 = vpop.permute.xlu1 %4687 }
 0x4a2   :  { %v4676_v30 = vpop.permute.xlu0 %4675 }
 0x4a3   :  { %v4711_v26 = vsel %vm4508_vm7, %v4710_v49, %v4676_v30 }
 0x4a5   :  { %v4874_v31 = vpop.permute.xlu1 %4873 }
 0x4a6   :  { %v4692_v5 = vpop.permute.xlu0 %4691  ;;  %v4912_v59 = vsel %vm4506_vm6, %v4911_v58, %v4874_v31 }
 0x4a7   :  { %v4715_v45 = vsel %vm4516_vm8, %v4688_v27, %v4692_v5 }
 0x4a9   :  { %v5267_v7 = vpop.permute.xlu1 %5266 }
 0x4aa   :  { %v5311_v50 = vsel %vm4502_vm4, %v5310_v43, %v5267_v7  ;;  %v5070_v55 = vpop.permute.xlu0 %5069 }
 0x4ab   :  { %v5111_v37 = vsel %vm4504_vm5, %v5110_v52, %v5070_v55 }
 0x4ad   :  { %v4680_v2 = vpop.permute.xlu1 %4679 }
 0x4ae   :  { %v5463_v19 = vpop.permute.xlu0 %5462  ;;  %v4712_v51 = vsel %vm4510_vm9, %v4711_v26, %v4680_v2 }
 0x4af   :  { %v11148_v3 = vsel %vm4500_vm3, %v5509_v42, %v5463_v19  ;;  %vm4736_vm3 = vcmask 1043458  }
 0x4b1   :  { %v4878_v16 = vpop.permute.xlu1 %4877 }
 0x4b2   :  { %v4696_v63 = vpop.permute.xlu0 %4695  ;;  %v4913_v33 = vsel %vm4508_vm7, %v4912_v59, %v4878_v16 }
 0x4b3   :  { %v4716_v12 = vsel %vm4518_vm10, %v4715_v45, %v4696_v63 }
 0x4b5   :  { %v4894_v53 = vpop.permute.xlu1 %4893 }
 0x4b6   :  { %v4890_v17 = vpop.permute.xlu0 %4889 }
 0x4b7   :  { %v4917_v10 = vsel %vm4516_vm8, %v4890_v17, %v4894_v53 }
 0x4b9   :  { %v5271_v61 = vpop.permute.xlu1 %5270 }
 0x4ba   :  { %v11151_v24 = vsel %vm4504_vm5, %v5311_v50, %v5271_v61  ;;  %v5074_v60 = vpop.permute.xlu0 %5073 }
 0x4bb   :  { %v5112_v30 = vsel %vm4506_vm6, %v5111_v37, %v5074_v60 }
 0x4bd   :  { %v4684_v40 = vpop.permute.xlu1 %4683 }
 0x4be   :  { %v11153_v39 = vpop.permute.xlu0 %5466  ;;  %v4713_v34 = vsel %vm4512_vm11, %v4712_v51, %v4684_v40 }
 0x4bf   :  { %v4714_v8 = vsel %vm4514_vm13, %v4713_v34, %v4688_v27 }
 0x4c1   :  { %v4882_v54 = vpop.permute.xlu1 %4881 }
 0x4c2   :  { %v4700_v57 = vpop.permute.xlu0 %4699  ;;  %v4914_v29 = vsel %vm4510_vm9, %v4913_v33, %v4882_v54 }
 0x4c3   :  { %v4717_v22 = vsel %vm4520_vm12, %v4716_v12, %v4700_v57 }
 0x4c5   :  { %v5078_v56 = vpop.permute.xlu1 %5077 }
 0x4c6   :  { %v4898_v28 = vpop.permute.xlu0 %4897  ;;  %v5113_v31 = vsel %vm4508_vm7, %v5112_v30, %v5078_v56 }
 0x4c7   :  { %v4918_v13 = vsel %vm4518_vm10, %v4917_v10, %v4898_v28  ;;  %v5511_v28 = vsel %vm4502_vm4, %v11148_v3, %v11153_v39  ;;  %vm4737_vm4 = vmor %vm4736_vm3, %vm4735_vm2  ;;  %vm5338_vm2 = vcmask 1041536  }
 0x4c9   :  { %v5094_v35 = vpop.permute.xlu1 %5093 }
 0x4ca   :  { %v5090_v0 = vpop.permute.xlu0 %5089 }
 0x4cb   :  { %v5117_v55 = vsel %vm4516_vm8, %v5090_v0, %v5094_v35 }
 0x4cd   :  { %v11156_v46 = vpop.permute.xlu1 %5470 }
 0x4ce   :  { %v5275_v9 = vpop.permute.xlu0 %5274  ;;  %v5512_v49 = vsel %vm4504_vm5, %v5511_v28, %v11156_v46  ;;  %vm4738_vm5 = vcmask 62468  }
 0x4cf   :  { %v5313_v57 = vsel %vm4506_vm6, %v11151_v24, %v5275_v9 }
 0x4d1   :  { %v4886_v15 = vpop.permute.xlu1 %4885 }
 0x4d2   :  { %v4704_v36 = vpop.permute.xlu0 %4703  ;;  %v4915_v14 = vsel %vm4512_vm11, %v4914_v29, %v4886_v15 }
 0x4d3   :  { %v4718_v18 = vsel %vm4522_vm14, %v4717_v22, %v4704_v36  ;;  %v4916_v6 = vsel %vm4514_vm13, %v4915_v14, %v4890_v17 }
 0x4d4   :  { %v4721_v21 = vcombine.low %v4714_v8, %v4718_v18 }
 0x4d5   :  { %v5082_v47 = vpop.permute.xlu1 %5081 }
 0x4d6   :  { %v4728_v4 = vrot.slane %v4721_v21, %v10428_v44  ;;  %v4902_v48 = vpop.permute.xlu0 %4901  ;;  %v5114_v7 = vsel %vm4510_vm9, %v5113_v31, %v5082_v47 }
 0x4d7   :  { %v4919_v23 = vsel %vm4520_vm12, %v4918_v13, %v4902_v48 }
 0x4d8   :  { %4729 = vrot.lane.b32.xlu0 %v4728_v4, %s5879_s20 }
 0x4d9   :  { %v5279_v1 = vpop.permute.xlu1 %5278 }
 0x4da   :  { %v5098_v62 = vpop.permute.xlu0 %5097  ;;  %v5314_v35 = vsel %vm4508_vm7, %v5313_v57, %v5279_v1 }
 0x4db   :  { %v5118_v19 = vsel %vm4518_vm10, %v5117_v55, %v5098_v62 }
 0x4dd   :  { %v5295_v20 = vpop.permute.xlu1 %5294 }
 0x4de   :  { %v5291_v41 = vpop.permute.xlu0 %5290 }
 0x4df   :  { %v5318_v51 = vsel %vm4516_vm8, %v5291_v41, %v5295_v20 }
 0x4e1   :  { %v4906_v38 = vpop.permute.xlu1 %4905 }
 0x4e2   :  { %v4920_v52 = vsel %vm4522_vm14, %v4919_v23, %v4906_v38  ;;  %v5475_v11 = vpop.permute.xlu0 %5474 }
 0x4e3   :  { %v4923_v58 = vcombine.low %v4916_v6, %v4920_v52  ;;  %v5513_v45 = vsel %vm4506_vm6, %v5512_v49, %v5475_v11  ;;  %vm4732_vm6 = vcmask 556032  }
 0x4e5   :  { %v5102_v25 = vpop.permute.xlu1 %5101  ;;  %v4930_v42 = vrot.slane %v4923_v58, %v10428_v44 }
 0x4e6   :  { %v5086_v32 = vpop.permute.xlu0 %5085  ;;  %v5119_v16 = vsel %vm4520_vm12, %v5118_v19, %v5102_v25 }
 0x4e7   :  { %4931 = vrot.lane.b32.xlu1 %v4930_v42, %s5861_s9  ;;  %v5115_v2 = vsel %vm4512_vm11, %v5114_v7, %v5086_v32  ;;  %s5880_s9 = smov 76  }
 0x4e8   :  { %v5116_v53 = vsel %vm4514_vm13, %v5115_v2, %v5090_v0 }
 0x4e9   :  { %v5299_v43 = vpop.permute.xlu1 %5298 }
 0x4ea   :  { %v5283_v27 = vpop.permute.xlu0 %5282  ;;  %v5319_v24 = vsel %vm4518_vm10, %v5318_v51, %v5299_v43 }
 0x4eb   :  { %v5315_v26 = vsel %vm4510_vm9, %v5314_v35, %v5283_v27 }
 0x4ed   :  { %v5491_v5 = vpop.permute.xlu1 %5490 }
 0x4ee   :  { %v5479_v50 = vpop.permute.xlu0 %5478 }
 0x4ef   :  { %v5514_v9 = vsel %vm4508_vm7, %v5513_v45, %v5479_v50 }
 0x4f1   :  { %v5106_v63 = vpop.permute.xlu1 %5105 }
 0x4f2   :  { %v5120_v17 = vsel %vm4522_vm14, %v5119_v16, %v5106_v63  ;;  %v5495_v37 = vpop.permute.xlu0 %5494 }
 0x4f3   :  { %v5123_v61 = vcombine.low %v5116_v53, %v5120_v17  ;;  %v5518_v8 = vsel %vm4516_vm8, %v5491_v5, %v5495_v37  ;;  %vm4739_vm8 = vmor %vm4738_vm5, %vm4737_vm4  ;;  %vm5339_vm4 = vcmask 683010   ;;  %vm5335_vm5 = vcmask 130048  }
 0x4f5   :  { %v5130_v60 = vrot.slane %v5123_v61, %v10428_v44  ;;  %v5303_v40 = vpop.permute.xlu1 %5302 }
 0x4f6   :  { %v5287_v54 = vpop.permute.xlu0 %5286  ;;  %v5320_v3 = vsel %vm4520_vm12, %v5319_v24, %v5303_v40 }
 0x4f7   :  { %5131 = vrot.lane.b32.xlu0 %v5130_v60, %s5880_s9  ;;  %v5316_v34 = vsel %vm4512_vm11, %v5315_v26, %v5287_v54 }
 0x4f8   :  { %v5317_v46 = vsel %vm4514_vm13, %v5316_v34, %v5291_v41 }
 0x4f9   :  { %v5499_v56 = vpop.permute.xlu1 %5498 }
 0x4fa   :  { %v5483_v0 = vpop.permute.xlu0 %5482  ;;  %v5519_v21 = vsel %vm4518_vm10, %v5518_v8, %v5499_v56  ;;  %vm4938_vm10 = vcmask 617474  }
 0x4fb   :  { %v5515_v39 = vsel %vm4510_vm9, %v5514_v9, %v5483_v0  ;;  %vm4937_vm9 = vcmask 1041472  }
 0x4fd   :  { %v5487_v12 = vpop.permute.xlu1 %5486 }
 0x4fe   :  { %v5307_v15 = vpop.permute.xlu0 %5306  ;;  %v5516_v18 = vsel %vm4512_vm11, %v5515_v39, %v5487_v12  ;;  %vm4934_vm11 = vcmask 64512  }
 0x4ff   :  { %v5321_v22 = vsel %vm4522_vm14, %v5320_v3, %v5307_v15  ;;  %v5517_v62 = vsel %vm4514_vm13, %v5516_v18, %v5491_v5  ;;  %vm5137_vm13 = vcmask 1042016  }
 0x500   :  { %v5324_v36 = vcombine.low %v5317_v46, %v5321_v22 }
 0x501   :  { %v5507_v48 = vpop.permute.xlu1 %5506 }
 0x502   :  { %v5331_v47 = vrot.slane %v5324_v36, %v10428_v44  ;;  %v5503_v4 = vpop.permute.xlu0 %5502 }
 0x503   :  { %v5520_v1 = vsel %vm4520_vm12, %v5519_v21, %v5503_v4  ;;  %vm4939_vm12 = vmor %vm4938_vm10, %vm4937_vm9  ;;  %vm5539_vm10 = vcmask 193540  }
 0x504   :  { %v5521_v59 = vsel %vm4522_vm14, %v5520_v1, %v5507_v48  ;;  %5332 = vrot.lane.b32.xlu1 %v5331_v47, %s5881_s28  ;;  %vm5138_vm14 = vmor %vm4736_vm3, %vm5137_vm13 }
 0x505   :  { %v5524_v33 = vcombine.low %v5517_v62, %v5521_v59  ;;  %vm5140_vm1 = vmor %vm5139_vm15, %vm5138_vm14 }
 0x507   :  { %v5531_v20 = vrot.slane %v5524_v33, %v10428_v44 }
 0x509   :  { %5532 = vrot.lane.b32.xlu0 %v5531_v20, %s5871_s22 }
 0x54a   :  { %v4730_v29 = vpop.permute.xlu0 %4729 }
 0x54b   :  { %v4731_v41 = vrot.slane %v4730_v29, 6 }
 0x54d   :  { %v4733_v10 = vsel %vm4732_vm6, %v4731_v41, %v4730_v29  ;;  %vm5537_vm6 = vcmask 1042080  }
 0x54e   :  { %4740 = vst.msk [vmem:[#allocation8 + $0x2] sm:$0x3f] %vm4739_vm8, %v4733_v10  ;;  %vm5340_vm8 = vmor %vm5339_vm4, %vm5338_vm2 }
 0x54f   :  { %vm5538_vm9 = vmor %vm4736_vm3, %vm5537_vm6 }
 0x559   :  { %v4932_v14 = vpop.permute.xlu1 %4931 }
 0x55a   :  { %v4933_v13 = vrot.slane %v4932_v14, 6 }
 0x55c   :  { %v4935_v44 = vsel %vm4934_vm11, %v4933_v13, %v4932_v14  ;;  %vm5540_vm11 = vmor %vm5539_vm10, %vm5538_vm9 }
 0x55d   :  { %4940 = vst.msk [vmem:[#allocation8 + $0x6] sm:$0xf] %vm4939_vm12, %v4935_v44 }
 0x569   :  { %v5132_v23 = vpop.permute.xlu0 %5131 }
 0x56a   :  { %v5133_v38 = vrot.slane %v5132_v23, 6 }
 0x56c   :  { %v5135_v6 = vsel %vm5134_vm0, %v5133_v38, %v5132_v23 }
 0x56d   :  { %5141 = vst.msk [vmem:[#allocation8 + $0x8] sm:$0x3f] %vm5140_vm1, %v5135_v6 }
 0x576   :  { %v5333_v52 = vpop.permute.xlu1 %5332 }
 0x577   :  { %v5334_v11 = vrot.slane %v5333_v52, 6 }
 0x579   :  { %v5336_v58 = vsel %vm5335_vm5, %v5334_v11, %v5333_v52 }
 0x57a   :  { %5341 = vst.msk [vmem:[#allocation8 + $0xc] sm:$0xf] %vm5340_vm8, %v5336_v58 }
 0x57b   :  { %v5533_v25 = vpop.permute.xlu0 %5532 }
 0x57c   :  { %v5534_v42 = vrot.slane %v5533_v25, 6 }
 0x57e   :  { %v5535_v32 = vsel %vm4508_vm7, %v5534_v42, %v5533_v25 }
 0x57f   :  { %5541 = vst.msk [vmem:[#allocation8 + $0xe] sm:$0x3f] %vm5540_vm11, %v5535_v32 }
 0x580   :  { %5840 = shalt.err (!%p5837_p6)
}
 0x581   :  { %s5841_s6 = scalar_lea.hbm %s11233_s3, 320 }
 0x582   :  { %p5842_p7 = scmp.ne.s32.totalorder %s11233_s3, %s5841_s6  ;;  %p5845_p8 = scmp.lt.u32.totalorder %s5841_s6, %s11233_s3 }
 0x584   :  { %p5847_p9 = pnand %p5845_p8, %p5842_p7 }
 0x586   :  { %5850 = shalt.err (!%p5847_p9)
}
 0x587   :  { %5551 = dma.vmem_to_hbm [thread:$0]  %s5549_s29, 320, %s11233_s3, [#allocation7]  }
 0x588   :  { %5855 = dma.done.wait [#allocation7], 320  }
 0x589   :  { %5856 = vsyncadd [#allocation7], 4294966976 }
 0x58a   :  { %5555 = vsyncpa [#allocation6], 1 }
 0x58b   :  { %5556 = vsyncpa [#allocation7], 1 }

</bundles_post_ra>
